<compile_context>
chip_gen: v7x
topology: tpu7x:2x2x1
jax: 0.10.0
libtpu: 0.0.40
codegen_flags: <defaults>
</compile_context>

<pallas_src>
import numpy as np

import jax
import jax.numpy as jnp
from jax.experimental import pallas as pl
from jax.experimental.pallas import tpu as pltpu


_BT = 8  # images per grid step (per-step working set ~10 MB, safe on v5e/v6e/v7x)


# ----------------------------------------------------------------------------
# Host-side weight repacking (PyTorch layout -> fused-kernel layout)
# ----------------------------------------------------------------------------
def prepare_params(params):
    w1 = np.asarray(params["conv1_w"], np.float32)      # (64, 1, 3, 3)
    b1 = np.asarray(params["conv1_b"], np.float32)      # (64,)
    w2 = np.asarray(params["conv2_w"], np.float32)      # (16, 64, 7, 7)
    b2 = np.asarray(params["conv2_b"], np.float32)      # (16,)
    f1w = np.asarray(params["fc1_w"], np.float32)       # (200, 256)
    f1b = np.asarray(params["fc1_b"], np.float32)       # (200,)
    f2w = np.asarray(params["fc2_w"], np.float32)       # (10, 200)
    f2b = np.asarray(params["fc2_b"], np.float32)       # (10,)

    # conv1 Toeplitz RHS, separate matrices for even / odd output columns.
    # w1e[dr*32 + j_in, j2*64 + c] = w1[c, 0, dr, j_in - 2*j2]   (j = 2*j2)
    # w1o[dr*32 + j_in, j2*64 + c] = w1[c, 0, dr, j_in - 2*j2-1] (j = 2*j2+1)
    w1e = np.zeros((96, 960), np.float32)
    w1o = np.zeros((96, 960), np.float32)
    for dr in range(3):
        for j2 in range(15):
            for dc in range(3):
                w1e[dr * 32 + 2 * j2 + dc, j2 * 64:(j2 + 1) * 64] = w1[:, 0, dr, dc]
                w1o[dr * 32 + 2 * j2 + 1 + dc, j2 * 64:(j2 + 1) * 64] = w1[:, 0, dr, dc]

    # conv2 Toeplitz RHS, one (960,128) matrix per kernel row di.
    # Columns: lanes 0..63  = even output cols j_out=2*bb  (bb*16 + c)
    #          lanes 64..127= odd  output cols j_out=2*bb+1 (64 + bb*16 + c)
    # t2[di, j2*64 + k, col] = w2[c, k, di, j2 - j_out]
    t2 = np.zeros((7, 960, 128), np.float32)
    for di in range(7):
        for bb in range(4):
            for par in range(2):
                j_out = 2 * bb + par
                col0 = par * 64 + bb * 16
                for dj in range(7):
                    j2 = j_out + dj
                    t2[di, j2 * 64:(j2 + 1) * 64, col0:col0 + 16] = w2[:, :, di, dj].T

    # fc1: PyTorch flatten order is (c, h, w).  Kernel feeds one pooled row h
    # at a time with lane index w*16 + c, so repack to (h, w*16 + c, n).
    fc1k = f1w.reshape(200, 16, 4, 4).transpose(2, 3, 1, 0).reshape(4, 64, 200)

    return dict(
        w1e=jnp.asarray(w1e, jnp.bfloat16),
        w1o=jnp.asarray(w1o, jnp.bfloat16),
        b1t=jnp.asarray(np.tile(b1, 15).reshape(1, 960), jnp.float32),
        t2=jnp.asarray(t2, jnp.bfloat16),
        b2t=jnp.asarray(np.tile(b2, 4).reshape(1, 64), jnp.float32),
        fc1w=jnp.asarray(fc1k, jnp.bfloat16),
        fc1b=jnp.asarray(f1b.reshape(1, 200), jnp.float32),
        fc2w=jnp.asarray(f2w.T, jnp.bfloat16),
        fc2b=jnp.asarray(f2b.reshape(1, 10), jnp.float32),
    )


# ----------------------------------------------------------------------------
# Fused kernel: conv1+tanh+pool1 -> conv2+relu+pool2 -> fc1+relu -> fc2
# ----------------------------------------------------------------------------
def _cnn_fused_kernel(xe_ref, xo_ref, w1e_ref, w1o_ref, b1_ref,
                      t2_ref, b2_ref, fc1w_ref, fc1b_ref, fc2w_ref, fc2b_ref,
                      out_ref):
    bt = out_ref.shape[0]                                   # images this step
    dot = lambda a, b: jnp.dot(a, b, preferred_element_type=jnp.float32)

    # --- conv1 (+ fused 2x2 max-pool, then tanh) --------------------------
    # 4 matmuls = {even,odd conv rows} x {even,odd conv cols}; pooling is an
    # elementwise max of the four results.  Shapes: (bt*16, 96) @ (96, 960).
    xe = xe_ref[...]
    xo = xo_ref[...]
    w1e = w1e_ref[...]
    w1o = w1o_ref[...]
    p1 = jnp.maximum(jnp.maximum(dot(xe, w1e), dot(xe, w1o)),
                     jnp.maximum(dot(xo, w1e), dot(xo, w1o)))
    y1 = jnp.tanh(p1 + b1_ref[...]).astype(jnp.bfloat16)    # (bt*16, 960)

    # --- conv2: 7 Toeplitz matmuls (one per kernel row), shift-add over di --
    acc2 = None
    for di in range(7):
        m2 = dot(y1, t2_ref[di]).reshape(bt, 16, 128)       # (bt, 16, 128)
        term = m2[:, di:di + 8, :]                          # output rows 0..7
        acc2 = term if acc2 is None else acc2 + term        # (bt, 8, 128)

    # --- pool2 rows (adjacent max; even rows consumed below) ---------------
    m1 = jnp.maximum(acc2[:, 0:7, :], acc2[:, 1:8, :])      # (bt, 7, 128)

    # --- pool2 cols + conv2 bias + relu, fc1 accumulated per pooled row ----
    h = jnp.broadcast_to(fc1b_ref[...], (bt, 200))
    for hi, a in enumerate((0, 2, 4, 6)):                   # pool2 row pairs
        row = m1[:, a, :]                                   # (bt, 128)
        v = jnp.maximum(row[:, 0:64], row[:, 64:128]) + b2_ref[...]
        v = jnp.maximum(v, 0.0)                             # relu(conv2)
        h = h + dot(v.astype(jnp.bfloat16), fc1w_ref[hi])   # (bt, 200)
    h = jnp.maximum(h, 0.0)                                 # relu(fc1)

    out = dot(h.astype(jnp.bfloat16), fc2w_ref[...]) + fc2b_ref[...]
    out_ref[...] = out.astype(out_ref.dtype)


# ----------------------------------------------------------------------------
# Forward wrapper
# ----------------------------------------------------------------------------
def cnn_net_32_forward_prepared(x, prep):
    x = x.reshape(-1, 32, 32).astype(jnp.float32)           # x.view(-1,1,32,32)
    b = x.shape[0]
    bt = _BT
    b_pad = ((b + bt - 1) // bt) * bt
    if b_pad != b:
        x = jnp.pad(x, ((0, b_pad - b), (0, 0), (0, 0)))

    # im2col over the 3 conv1 kernel rows, split into even / odd conv rows so
    # the 2x2 pool becomes an elementwise max inside the kernel.  Lane-dense.
    xe = jnp.concatenate([x[:, dr:dr + 29:2, :] for dr in range(3)], axis=-1)
    xo = jnp.concatenate([x[:, dr + 1:dr + 30:2, :] for dr in range(3)], axis=-1)
    xe = jnp.pad(xe, ((0, 0), (0, 1), (0, 0))).astype(jnp.bfloat16)  # (b_pad,16,96)
    xo = jnp.pad(xo, ((0, 0), (0, 1), (0, 0))).astype(jnp.bfloat16)
    xe = xe.reshape(b_pad * 16, 96)
    xo = xo.reshape(b_pad * 16, 96)

    const = lambda a: pl.BlockSpec(a.shape, lambda g, _n=a.ndim: (0,) * _n)

    flops = b_pad * (4 * 16 * 96 * 960 * 2 + 7 * 16 * 960 * 128 * 2
                     + 4 * 64 * 200 * 2 + 200 * 10 * 2)
    w_bytes = (2 * 96 * 960 + 7 * 960 * 128 + 4 * 64 * 200 + 200 * 10) * 2 \
              + (960 + 64 + 200 + 10) * 4

    out = pl.pallas_call(
        _cnn_fused_kernel,
        out_shape=jax.ShapeDtypeStruct((b_pad, 10), jnp.float32),
        grid=(b_pad // bt,),
        in_specs=[
            pl.BlockSpec((bt * 16, 96), lambda g: (g, 0)),   # xe
            pl.BlockSpec((bt * 16, 96), lambda g: (g, 0)),   # xo
            const(prep["w1e"]), const(prep["w1o"]), const(prep["b1t"]),
            const(prep["t2"]), const(prep["b2t"]),
            const(prep["fc1w"]), const(prep["fc1b"]),
            const(prep["fc2w"]), const(prep["fc2b"]),
        ],
        out_specs=pl.BlockSpec((bt, 10), lambda g: (g, 0)),
        compiler_params=pltpu.CompilerParams(
            dimension_semantics=("parallel",),
            vmem_limit_bytes=48 * 1024 * 1024),
        cost_estimate=pl.CostEstimate(
            flops=flops,
            transcendentals=b_pad * 16 * 960,
            bytes_accessed=b_pad * (2 * 16 * 96 * 2 + 10 * 4) + w_bytes),
    )(xe, xo, prep["w1e"], prep["w1o"], prep["b1t"], prep["t2"], prep["b2t"],
      prep["fc1w"], prep["fc1b"], prep["fc2w"], prep["fc2b"])
    return out[:b]


def cnn_net_32_forward(x, params):
    # Convenience wrapper (repacks weights every call); for repeated calls
    # hoist prepare_params() out of the jit-ed forward as in __main__.
    return cnn_net_32_forward_prepared(x, prepare_params(params))


# ----------------------------------------------------------------------------
# Parameters + pure-JAX reference (sanity check)
# ----------------------------------------------------------------------------
def init_params(key):
    ks = jax.random.split(key, 8)

    def u(k, shape, fan_in):
        bound = 1.0 / (fan_in ** 0.5)
        return jax.random.uniform(k, shape, jnp.float32, -bound, bound)

    return dict(
        conv1_w=u(ks[0], (64, 1, 3, 3), 1 * 3 * 3),
        conv1_b=u(ks[1], (64,), 1 * 3 * 3),
        conv2_w=u(ks[2], (16, 64, 7, 7), 64 * 7 * 7),
        conv2_b=u(ks[3], (16,), 64 * 7 * 7),
        fc1_w=u(ks[4], (200, 4 * 4 * 16), 4 * 4 * 16),     # PyTorch (out, in)
        fc1_b=u(ks[5], (200,), 4 * 4 * 16),
        fc2_w=u(ks[6], (10, 200), 200),
        fc2_b=u(ks[7], (10,), 200),
    )


def reference_forward(x, params):
    x = x.reshape(-1, 1, 32, 32).astype(jnp.float32)
    dn = ("NCHW", "OIHW", "NCHW")
    y = jax.lax.conv_general_dilated(x, params["conv1_w"], (1, 1), "VALID",
                                     dimension_numbers=dn)
    y = jnp.tanh(y + params["conv1_b"][None, :, None, None])
    y = jax.lax.reduce_window(y, -jnp.inf, jax.lax.max,
                              (1, 1, 2, 2), (1, 1, 2, 2), "VALID")
    y = jax.lax.conv_general_dilated(y, params["conv2_w"], (1, 1), "VALID",
                                     dimension_numbers=dn)
    y = jax.nn.relu(y + params["conv2_b"][None, :, None, None])
    y = jax.lax.reduce_window(y, -jnp.inf, jax.lax.max,
                              (1, 1, 2, 2), (1, 1, 2, 2), "VALID")
    y = y.reshape(y.shape[0], -1)
    y = jax.nn.relu(y @ params["fc1_w"].T + params["fc1_b"])
    return y @ params["fc2_w"].T + params["fc2_b"]


if __name__ == "__main__":
    key = jax.random.PRNGKey(0)
    pkey, xkey = jax.random.split(key)
    params = init_params(pkey)
    x = jax.random.normal(xkey, (2, 1, 32, 32), dtype=jnp.float32)

    prep = prepare_params(params)                      # hoisted weight repacking
    fwd = jax.jit(cnn_net_32_forward_prepared)
    out = jax.block_until_ready(fwd(x, prep))
    assert out.shape == (2, 10) and out.dtype == jnp.float32

    ref = reference_forward(x, params)
    max_err = float(jnp.max(jnp.abs(out - ref)))
    assert jnp.allclose(out, ref, atol=3e-2, rtol=3e-2), max_err

    print("KERNEL_OK")
</pallas_src>

<mosaic_0001>
module attributes {stable_mosaic.version = 11 : i64} {
  func.func @_cnn_fused_kernel(%arg0: i32, %arg1: memref<128x96xbf16, #tpu.memory_space<vmem>>, %arg2: memref<128x96xbf16, #tpu.memory_space<vmem>>, %arg3: memref<96x960xbf16, #tpu.memory_space<vmem>>, %arg4: memref<96x960xbf16, #tpu.memory_space<vmem>>, %arg5: memref<1x960xf32, #tpu.memory_space<vmem>>, %arg6: memref<7x960x128xbf16, #tpu.memory_space<vmem>>, %arg7: memref<1x64xf32, #tpu.memory_space<vmem>>, %arg8: memref<4x64x200xbf16, #tpu.memory_space<vmem>>, %arg9: memref<1x200xf32, #tpu.memory_space<vmem>>, %arg10: memref<200x10xbf16, #tpu.memory_space<vmem>>, %arg11: memref<1x10xf32, #tpu.memory_space<vmem>>, %arg12: memref<8x10xf32, #tpu.memory_space<vmem>>) attributes {dimension_semantics = [#tpu.dimension_semantics<parallel>], iteration_bounds = array<i64: 1>, scalar_prefetch = 0 : i64, scratch_operands = 0 : i64, tpu.core_type = #tpu.core_type<tc>, window_params = [{transform_indices = @transform_0, window_bounds = array<i64: 128, 96>}, {transform_indices = @transform_1, window_bounds = array<i64: 128, 96>}, {pipeline_mode = #tpu.pipeline_mode<synchronous>, transform_indices = @transform_2, window_bounds = array<i64: 96, 960>}, {pipeline_mode = #tpu.pipeline_mode<synchronous>, transform_indices = @transform_3, window_bounds = array<i64: 96, 960>}, {pipeline_mode = #tpu.pipeline_mode<synchronous>, transform_indices = @transform_4, window_bounds = array<i64: 1, 960>}, {pipeline_mode = #tpu.pipeline_mode<synchronous>, transform_indices = @transform_5, window_bounds = array<i64: 7, 960, 128>}, {pipeline_mode = #tpu.pipeline_mode<synchronous>, transform_indices = @transform_6, window_bounds = array<i64: 1, 64>}, {pipeline_mode = #tpu.pipeline_mode<synchronous>, transform_indices = @transform_7, window_bounds = array<i64: 4, 64, 200>}, {pipeline_mode = #tpu.pipeline_mode<synchronous>, transform_indices = @transform_8, window_bounds = array<i64: 1, 200>}, {pipeline_mode = #tpu.pipeline_mode<synchronous>, transform_indices = @transform_9, window_bounds = array<i64: 200, 10>}, {pipeline_mode = #tpu.pipeline_mode<synchronous>, transform_indices = @transform_10, window_bounds = array<i64: 1, 10>}, {transform_indices = @transform_11, window_bounds = array<i64: 8, 10>}]} {
    %c0 = arith.constant 0 : index
    %c0_0 = arith.constant 0 : index
    %0 = vector.load %arg1[%c0, %c0_0] : memref<128x96xbf16, #tpu.memory_space<vmem>>, vector<128x96xbf16>
    %c0_1 = arith.constant 0 : index
    %c0_2 = arith.constant 0 : index
    %1 = vector.load %arg2[%c0_1, %c0_2] : memref<128x96xbf16, #tpu.memory_space<vmem>>, vector<128x96xbf16>
    %c0_3 = arith.constant 0 : index
    %c0_4 = arith.constant 0 : index
    %2 = vector.load %arg3[%c0_3, %c0_4] : memref<96x960xbf16, #tpu.memory_space<vmem>>, vector<96x960xbf16>
    %c0_5 = arith.constant 0 : index
    %c0_6 = arith.constant 0 : index
    %3 = vector.load %arg4[%c0_5, %c0_6] : memref<96x960xbf16, #tpu.memory_space<vmem>>, vector<96x960xbf16>
    %cst = arith.constant dense<0.000000e+00> : vector<128x960xf32>
    %4 = tpu.matmul %0, %2, %cst {dimension_numbers = #tpu.dot_dimension_numbers<[1], [0], [0], [1], [0, 0, 1, 1], [], []>} : vector<128x96xbf16>, vector<96x960xbf16>, vector<128x960xf32> -> vector<128x960xf32>
    %cst_7 = arith.constant dense<0.000000e+00> : vector<128x960xf32>
    %5 = tpu.matmul %0, %3, %cst_7 {dimension_numbers = #tpu.dot_dimension_numbers<[1], [0], [0], [1], [0, 0, 1, 1], [], []>} : vector<128x96xbf16>, vector<96x960xbf16>, vector<128x960xf32> -> vector<128x960xf32>
    %6 = arith.maximumf %4, %5 : vector<128x960xf32>
    %cst_8 = arith.constant dense<0.000000e+00> : vector<128x960xf32>
    %7 = tpu.matmul %1, %2, %cst_8 {dimension_numbers = #tpu.dot_dimension_numbers<[1], [0], [0], [1], [0, 0, 1, 1], [], []>} : vector<128x96xbf16>, vector<96x960xbf16>, vector<128x960xf32> -> vector<128x960xf32>
    %cst_9 = arith.constant dense<0.000000e+00> : vector<128x960xf32>
    %8 = tpu.matmul %1, %3, %cst_9 {dimension_numbers = #tpu.dot_dimension_numbers<[1], [0], [0], [1], [0, 0, 1, 1], [], []>} : vector<128x96xbf16>, vector<96x960xbf16>, vector<128x960xf32> -> vector<128x960xf32>
    %9 = arith.maximumf %7, %8 : vector<128x960xf32>
    %10 = arith.maximumf %6, %9 : vector<128x960xf32>
    %c0_10 = arith.constant 0 : index
    %c0_11 = arith.constant 0 : index
    %11 = vector.load %arg5[%c0_10, %c0_11] : memref<1x960xf32, #tpu.memory_space<vmem>>, vector<1x960xf32>
    %12 = vector.broadcast %11 : vector<1x960xf32> to vector<128x960xf32>
    %13 = arith.addf %10, %12 : vector<128x960xf32>
    %14 = math.tanh %13 : vector<128x960xf32>
    %15 = arith.truncf %14 : vector<128x960xf32> to vector<128x960xbf16>
    %c0_12 = arith.constant 0 : index
    %c0_13 = arith.constant 0 : index
    %c0_14 = arith.constant 0 : index
    %16 = vector.load %arg6[%c0_12, %c0_13, %c0_14] : memref<7x960x128xbf16, #tpu.memory_space<vmem>>, vector<1x960x128xbf16>
    %17 = vector.shape_cast %16 : vector<1x960x128xbf16> to vector<960x128xbf16>
    %cst_15 = arith.constant dense<0.000000e+00> : vector<128x128xf32>
    %18 = tpu.matmul %15, %17, %cst_15 {dimension_numbers = #tpu.dot_dimension_numbers<[1], [0], [0], [1], [0, 0, 1, 1], [], []>} : vector<128x960xbf16>, vector<960x128xbf16>, vector<128x128xf32> -> vector<128x128xf32>
    %19 = vector.shape_cast %18 : vector<128x128xf32> to vector<8x16x128xf32>
    %20 = vector.extract_strided_slice %19 {offsets = [0, 0, 0], sizes = [8, 8, 128], strides = [1, 1, 1]} : vector<8x16x128xf32> to vector<8x8x128xf32>
    %c1 = arith.constant 1 : index
    %c0_16 = arith.constant 0 : index
    %c0_17 = arith.constant 0 : index
    %21 = vector.load %arg6[%c1, %c0_16, %c0_17] : memref<7x960x128xbf16, #tpu.memory_space<vmem>>, vector<1x960x128xbf16>
    %22 = vector.shape_cast %21 : vector<1x960x128xbf16> to vector<960x128xbf16>
    %cst_18 = arith.constant dense<0.000000e+00> : vector<128x128xf32>
    %23 = tpu.matmul %15, %22, %cst_18 {dimension_numbers = #tpu.dot_dimension_numbers<[1], [0], [0], [1], [0, 0, 1, 1], [], []>} : vector<128x960xbf16>, vector<960x128xbf16>, vector<128x128xf32> -> vector<128x128xf32>
    %24 = vector.shape_cast %23 : vector<128x128xf32> to vector<8x16x128xf32>
    %25 = vector.extract_strided_slice %24 {offsets = [0, 1, 0], sizes = [8, 8, 128], strides = [1, 1, 1]} : vector<8x16x128xf32> to vector<8x8x128xf32>
    %26 = arith.addf %20, %25 : vector<8x8x128xf32>
    %c2 = arith.constant 2 : index
    %c0_19 = arith.constant 0 : index
    %c0_20 = arith.constant 0 : index
    %27 = vector.load %arg6[%c2, %c0_19, %c0_20] : memref<7x960x128xbf16, #tpu.memory_space<vmem>>, vector<1x960x128xbf16>
    %28 = vector.shape_cast %27 : vector<1x960x128xbf16> to vector<960x128xbf16>
    %cst_21 = arith.constant dense<0.000000e+00> : vector<128x128xf32>
    %29 = tpu.matmul %15, %28, %cst_21 {dimension_numbers = #tpu.dot_dimension_numbers<[1], [0], [0], [1], [0, 0, 1, 1], [], []>} : vector<128x960xbf16>, vector<960x128xbf16>, vector<128x128xf32> -> vector<128x128xf32>
    %30 = vector.shape_cast %29 : vector<128x128xf32> to vector<8x16x128xf32>
    %31 = vector.extract_strided_slice %30 {offsets = [0, 2, 0], sizes = [8, 8, 128], strides = [1, 1, 1]} : vector<8x16x128xf32> to vector<8x8x128xf32>
    %32 = arith.addf %26, %31 : vector<8x8x128xf32>
    %c3 = arith.constant 3 : index
    %c0_22 = arith.constant 0 : index
    %c0_23 = arith.constant 0 : index
    %33 = vector.load %arg6[%c3, %c0_22, %c0_23] : memref<7x960x128xbf16, #tpu.memory_space<vmem>>, vector<1x960x128xbf16>
    %34 = vector.shape_cast %33 : vector<1x960x128xbf16> to vector<960x128xbf16>
    %cst_24 = arith.constant dense<0.000000e+00> : vector<128x128xf32>
    %35 = tpu.matmul %15, %34, %cst_24 {dimension_numbers = #tpu.dot_dimension_numbers<[1], [0], [0], [1], [0, 0, 1, 1], [], []>} : vector<128x960xbf16>, vector<960x128xbf16>, vector<128x128xf32> -> vector<128x128xf32>
    %36 = vector.shape_cast %35 : vector<128x128xf32> to vector<8x16x128xf32>
    %37 = vector.extract_strided_slice %36 {offsets = [0, 3, 0], sizes = [8, 8, 128], strides = [1, 1, 1]} : vector<8x16x128xf32> to vector<8x8x128xf32>
    %38 = arith.addf %32, %37 : vector<8x8x128xf32>
    %c4 = arith.constant 4 : index
    %c0_25 = arith.constant 0 : index
    %c0_26 = arith.constant 0 : index
    %39 = vector.load %arg6[%c4, %c0_25, %c0_26] : memref<7x960x128xbf16, #tpu.memory_space<vmem>>, vector<1x960x128xbf16>
    %40 = vector.shape_cast %39 : vector<1x960x128xbf16> to vector<960x128xbf16>
    %cst_27 = arith.constant dense<0.000000e+00> : vector<128x128xf32>
    %41 = tpu.matmul %15, %40, %cst_27 {dimension_numbers = #tpu.dot_dimension_numbers<[1], [0], [0], [1], [0, 0, 1, 1], [], []>} : vector<128x960xbf16>, vector<960x128xbf16>, vector<128x128xf32> -> vector<128x128xf32>
    %42 = vector.shape_cast %41 : vector<128x128xf32> to vector<8x16x128xf32>
    %43 = vector.extract_strided_slice %42 {offsets = [0, 4, 0], sizes = [8, 8, 128], strides = [1, 1, 1]} : vector<8x16x128xf32> to vector<8x8x128xf32>
    %44 = arith.addf %38, %43 : vector<8x8x128xf32>
    %c5 = arith.constant 5 : index
    %c0_28 = arith.constant 0 : index
    %c0_29 = arith.constant 0 : index
    %45 = vector.load %arg6[%c5, %c0_28, %c0_29] : memref<7x960x128xbf16, #tpu.memory_space<vmem>>, vector<1x960x128xbf16>
    %46 = vector.shape_cast %45 : vector<1x960x128xbf16> to vector<960x128xbf16>
    %cst_30 = arith.constant dense<0.000000e+00> : vector<128x128xf32>
    %47 = tpu.matmul %15, %46, %cst_30 {dimension_numbers = #tpu.dot_dimension_numbers<[1], [0], [0], [1], [0, 0, 1, 1], [], []>} : vector<128x960xbf16>, vector<960x128xbf16>, vector<128x128xf32> -> vector<128x128xf32>
    %48 = vector.shape_cast %47 : vector<128x128xf32> to vector<8x16x128xf32>
    %49 = vector.extract_strided_slice %48 {offsets = [0, 5, 0], sizes = [8, 8, 128], strides = [1, 1, 1]} : vector<8x16x128xf32> to vector<8x8x128xf32>
    %50 = arith.addf %44, %49 : vector<8x8x128xf32>
    %c6 = arith.constant 6 : index
    %c0_31 = arith.constant 0 : index
    %c0_32 = arith.constant 0 : index
    %51 = vector.load %arg6[%c6, %c0_31, %c0_32] : memref<7x960x128xbf16, #tpu.memory_space<vmem>>, vector<1x960x128xbf16>
    %52 = vector.shape_cast %51 : vector<1x960x128xbf16> to vector<960x128xbf16>
    %cst_33 = arith.constant dense<0.000000e+00> : vector<128x128xf32>
    %53 = tpu.matmul %15, %52, %cst_33 {dimension_numbers = #tpu.dot_dimension_numbers<[1], [0], [0], [1], [0, 0, 1, 1], [], []>} : vector<128x960xbf16>, vector<960x128xbf16>, vector<128x128xf32> -> vector<128x128xf32>
    %54 = vector.shape_cast %53 : vector<128x128xf32> to vector<8x16x128xf32>
    %55 = vector.extract_strided_slice %54 {offsets = [0, 6, 0], sizes = [8, 8, 128], strides = [1, 1, 1]} : vector<8x16x128xf32> to vector<8x8x128xf32>
    %56 = arith.addf %50, %55 : vector<8x8x128xf32>
    %57 = vector.extract_strided_slice %56 {offsets = [0, 0, 0], sizes = [8, 7, 128], strides = [1, 1, 1]} : vector<8x8x128xf32> to vector<8x7x128xf32>
    %58 = vector.extract_strided_slice %56 {offsets = [0, 1, 0], sizes = [8, 7, 128], strides = [1, 1, 1]} : vector<8x8x128xf32> to vector<8x7x128xf32>
    %59 = arith.maximumf %57, %58 : vector<8x7x128xf32>
    %c0_34 = arith.constant 0 : index
    %c0_35 = arith.constant 0 : index
    %60 = vector.load %arg9[%c0_34, %c0_35] : memref<1x200xf32, #tpu.memory_space<vmem>>, vector<1x200xf32>
    %61 = vector.shape_cast %60 : vector<1x200xf32> to vector<1x200xf32>
    %62 = vector.broadcast %61 : vector<1x200xf32> to vector<8x200xf32>
    %63 = vector.extract_strided_slice %59 {offsets = [0, 0, 0], sizes = [8, 1, 128], strides = [1, 1, 1]} : vector<8x7x128xf32> to vector<8x1x128xf32>
    %64 = vector.shape_cast %63 : vector<8x1x128xf32> to vector<8x128xf32>
    %65 = vector.extract_strided_slice %64 {offsets = [0, 0], sizes = [8, 64], strides = [1, 1]} : vector<8x128xf32> to vector<8x64xf32>
    %66 = vector.extract_strided_slice %64 {offsets = [0, 64], sizes = [8, 64], strides = [1, 1]} : vector<8x128xf32> to vector<8x64xf32>
    %67 = arith.maximumf %65, %66 : vector<8x64xf32>
    %c0_36 = arith.constant 0 : index
    %c0_37 = arith.constant 0 : index
    %68 = vector.load %arg7[%c0_36, %c0_37] : memref<1x64xf32, #tpu.memory_space<vmem>>, vector<1x64xf32>
    %69 = vector.broadcast %68 : vector<1x64xf32> to vector<8x64xf32>
    %70 = arith.addf %67, %69 : vector<8x64xf32>
    %cst_38 = arith.constant 0.000000e+00 : f32
    %71 = vector.broadcast %cst_38 : f32 to vector<8x64xf32>
    %72 = arith.maximumf %70, %71 : vector<8x64xf32>
    %73 = arith.truncf %72 : vector<8x64xf32> to vector<8x64xbf16>
    %c0_39 = arith.constant 0 : index
    %c0_40 = arith.constant 0 : index
    %c0_41 = arith.constant 0 : index
    %74 = vector.load %arg8[%c0_39, %c0_40, %c0_41] : memref<4x64x200xbf16, #tpu.memory_space<vmem>>, vector<1x64x200xbf16>
    %75 = vector.shape_cast %74 : vector<1x64x200xbf16> to vector<64x200xbf16>
    %cst_42 = arith.constant dense<0.000000e+00> : vector<8x200xf32>
    %76 = tpu.matmul %73, %75, %cst_42 {dimension_numbers = #tpu.dot_dimension_numbers<[1], [0], [0], [1], [0, 0, 1, 1], [], []>} : vector<8x64xbf16>, vector<64x200xbf16>, vector<8x200xf32> -> vector<8x200xf32>
    %77 = arith.addf %62, %76 : vector<8x200xf32>
    %78 = vector.extract_strided_slice %59 {offsets = [0, 2, 0], sizes = [8, 1, 128], strides = [1, 1, 1]} : vector<8x7x128xf32> to vector<8x1x128xf32>
    %79 = vector.shape_cast %78 : vector<8x1x128xf32> to vector<8x128xf32>
    %80 = vector.extract_strided_slice %79 {offsets = [0, 0], sizes = [8, 64], strides = [1, 1]} : vector<8x128xf32> to vector<8x64xf32>
    %81 = vector.extract_strided_slice %79 {offsets = [0, 64], sizes = [8, 64], strides = [1, 1]} : vector<8x128xf32> to vector<8x64xf32>
    %82 = arith.maximumf %80, %81 : vector<8x64xf32>
    %c0_43 = arith.constant 0 : index
    %c0_44 = arith.constant 0 : index
    %83 = vector.load %arg7[%c0_43, %c0_44] : memref<1x64xf32, #tpu.memory_space<vmem>>, vector<1x64xf32>
    %84 = vector.broadcast %83 : vector<1x64xf32> to vector<8x64xf32>
    %85 = arith.addf %82, %84 : vector<8x64xf32>
    %cst_45 = arith.constant 0.000000e+00 : f32
    %86 = vector.broadcast %cst_45 : f32 to vector<8x64xf32>
    %87 = arith.maximumf %85, %86 : vector<8x64xf32>
    %88 = arith.truncf %87 : vector<8x64xf32> to vector<8x64xbf16>
    %c1_46 = arith.constant 1 : index
    %c0_47 = arith.constant 0 : index
    %c0_48 = arith.constant 0 : index
    %89 = vector.load %arg8[%c1_46, %c0_47, %c0_48] : memref<4x64x200xbf16, #tpu.memory_space<vmem>>, vector<1x64x200xbf16>
    %90 = vector.shape_cast %89 : vector<1x64x200xbf16> to vector<64x200xbf16>
    %cst_49 = arith.constant dense<0.000000e+00> : vector<8x200xf32>
    %91 = tpu.matmul %88, %90, %cst_49 {dimension_numbers = #tpu.dot_dimension_numbers<[1], [0], [0], [1], [0, 0, 1, 1], [], []>} : vector<8x64xbf16>, vector<64x200xbf16>, vector<8x200xf32> -> vector<8x200xf32>
    %92 = arith.addf %77, %91 : vector<8x200xf32>
    %93 = vector.extract_strided_slice %59 {offsets = [0, 4, 0], sizes = [8, 1, 128], strides = [1, 1, 1]} : vector<8x7x128xf32> to vector<8x1x128xf32>
    %94 = vector.shape_cast %93 : vector<8x1x128xf32> to vector<8x128xf32>
    %95 = vector.extract_strided_slice %94 {offsets = [0, 0], sizes = [8, 64], strides = [1, 1]} : vector<8x128xf32> to vector<8x64xf32>
    %96 = vector.extract_strided_slice %94 {offsets = [0, 64], sizes = [8, 64], strides = [1, 1]} : vector<8x128xf32> to vector<8x64xf32>
    %97 = arith.maximumf %95, %96 : vector<8x64xf32>
    %c0_50 = arith.constant 0 : index
    %c0_51 = arith.constant 0 : index
    %98 = vector.load %arg7[%c0_50, %c0_51] : memref<1x64xf32, #tpu.memory_space<vmem>>, vector<1x64xf32>
    %99 = vector.broadcast %98 : vector<1x64xf32> to vector<8x64xf32>
    %100 = arith.addf %97, %99 : vector<8x64xf32>
    %cst_52 = arith.constant 0.000000e+00 : f32
    %101 = vector.broadcast %cst_52 : f32 to vector<8x64xf32>
    %102 = arith.maximumf %100, %101 : vector<8x64xf32>
    %103 = arith.truncf %102 : vector<8x64xf32> to vector<8x64xbf16>
    %c2_53 = arith.constant 2 : index
    %c0_54 = arith.constant 0 : index
    %c0_55 = arith.constant 0 : index
    %104 = vector.load %arg8[%c2_53, %c0_54, %c0_55] : memref<4x64x200xbf16, #tpu.memory_space<vmem>>, vector<1x64x200xbf16>
    %105 = vector.shape_cast %104 : vector<1x64x200xbf16> to vector<64x200xbf16>
    %cst_56 = arith.constant dense<0.000000e+00> : vector<8x200xf32>
    %106 = tpu.matmul %103, %105, %cst_56 {dimension_numbers = #tpu.dot_dimension_numbers<[1], [0], [0], [1], [0, 0, 1, 1], [], []>} : vector<8x64xbf16>, vector<64x200xbf16>, vector<8x200xf32> -> vector<8x200xf32>
    %107 = arith.addf %92, %106 : vector<8x200xf32>
    %108 = vector.extract_strided_slice %59 {offsets = [0, 6, 0], sizes = [8, 1, 128], strides = [1, 1, 1]} : vector<8x7x128xf32> to vector<8x1x128xf32>
    %109 = vector.shape_cast %108 : vector<8x1x128xf32> to vector<8x128xf32>
    %110 = vector.extract_strided_slice %109 {offsets = [0, 0], sizes = [8, 64], strides = [1, 1]} : vector<8x128xf32> to vector<8x64xf32>
    %111 = vector.extract_strided_slice %109 {offsets = [0, 64], sizes = [8, 64], strides = [1, 1]} : vector<8x128xf32> to vector<8x64xf32>
    %112 = arith.maximumf %110, %111 : vector<8x64xf32>
    %c0_57 = arith.constant 0 : index
    %c0_58 = arith.constant 0 : index
    %113 = vector.load %arg7[%c0_57, %c0_58] : memref<1x64xf32, #tpu.memory_space<vmem>>, vector<1x64xf32>
    %114 = vector.broadcast %113 : vector<1x64xf32> to vector<8x64xf32>
    %115 = arith.addf %112, %114 : vector<8x64xf32>
    %cst_59 = arith.constant 0.000000e+00 : f32
    %116 = vector.broadcast %cst_59 : f32 to vector<8x64xf32>
    %117 = arith.maximumf %115, %116 : vector<8x64xf32>
    %118 = arith.truncf %117 : vector<8x64xf32> to vector<8x64xbf16>
    %c3_60 = arith.constant 3 : index
    %c0_61 = arith.constant 0 : index
    %c0_62 = arith.constant 0 : index
    %119 = vector.load %arg8[%c3_60, %c0_61, %c0_62] : memref<4x64x200xbf16, #tpu.memory_space<vmem>>, vector<1x64x200xbf16>
    %120 = vector.shape_cast %119 : vector<1x64x200xbf16> to vector<64x200xbf16>
    %cst_63 = arith.constant dense<0.000000e+00> : vector<8x200xf32>
    %121 = tpu.matmul %118, %120, %cst_63 {dimension_numbers = #tpu.dot_dimension_numbers<[1], [0], [0], [1], [0, 0, 1, 1], [], []>} : vector<8x64xbf16>, vector<64x200xbf16>, vector<8x200xf32> -> vector<8x200xf32>
    %122 = arith.addf %107, %121 : vector<8x200xf32>
    %cst_64 = arith.constant 0.000000e+00 : f32
    %123 = vector.broadcast %cst_64 : f32 to vector<8x200xf32>
    %124 = arith.maximumf %122, %123 : vector<8x200xf32>
    %125 = arith.truncf %124 : vector<8x200xf32> to vector<8x200xbf16>
    %c0_65 = arith.constant 0 : index
    %c0_66 = arith.constant 0 : index
    %126 = vector.load %arg10[%c0_65, %c0_66] : memref<200x10xbf16, #tpu.memory_space<vmem>>, vector<200x10xbf16>
    %cst_67 = arith.constant dense<0.000000e+00> : vector<8x10xf32>
    %127 = tpu.matmul %125, %126, %cst_67 {dimension_numbers = #tpu.dot_dimension_numbers<[1], [0], [0], [1], [0, 0, 1, 1], [], []>} : vector<8x200xbf16>, vector<200x10xbf16>, vector<8x10xf32> -> vector<8x10xf32>
    %c0_68 = arith.constant 0 : index
    %c0_69 = arith.constant 0 : index
    %128 = vector.load %arg11[%c0_68, %c0_69] : memref<1x10xf32, #tpu.memory_space<vmem>>, vector<1x10xf32>
    %129 = vector.broadcast %128 : vector<1x10xf32> to vector<8x10xf32>
    %130 = arith.addf %127, %129 : vector<8x10xf32>
    %c0_70 = arith.constant 0 : index
    %c0_71 = arith.constant 0 : index
    %131 = vector.load %arg12[%c0_70, %c0_71] : memref<8x10xf32, #tpu.memory_space<vmem>>, vector<8x10xf32>
    tpu.vector_store %arg12[%c0_70, %c0_71], %130 {strides = array<i32>} : memref<8x10xf32, #tpu.memory_space<vmem>>, vector<8x10xf32>,
    return
  }
  func.func @transform_0(%arg0: i32) -> (i32, i32) {
    %c0_i32 = arith.constant 0 : i32
    %c0_i32_0 = arith.constant 0 : i32
    return %arg0, %c0_i32 : i32, i32
  }
  func.func @transform_1(%arg0: i32) -> (i32, i32) {
    %c0_i32 = arith.constant 0 : i32
    %c0_i32_0 = arith.constant 0 : i32
    return %arg0, %c0_i32 : i32, i32
  }
  func.func @transform_2(%arg0: i32) -> (i32, i32) {
    %c0_i32 = arith.constant 0 : i32
    %c0_i32_0 = arith.constant 0 : i32
    %c0_i32_1 = arith.constant 0 : i32
    return %c0_i32, %c0_i32_0 : i32, i32
  }
  func.func @transform_3(%arg0: i32) -> (i32, i32) {
    %c0_i32 = arith.constant 0 : i32
    %c0_i32_0 = arith.constant 0 : i32
    %c0_i32_1 = arith.constant 0 : i32
    return %c0_i32, %c0_i32_0 : i32, i32
  }
  func.func @transform_4(%arg0: i32) -> (i32, i32) {
    %c0_i32 = arith.constant 0 : i32
    %c0_i32_0 = arith.constant 0 : i32
    %c0_i32_1 = arith.constant 0 : i32
    return %c0_i32, %c0_i32_0 : i32, i32
  }
  func.func @transform_5(%arg0: i32) -> (i32, i32, i32) {
    %c0_i32 = arith.constant 0 : i32
    %c0_i32_0 = arith.constant 0 : i32
    %c0_i32_1 = arith.constant 0 : i32
    %c0_i32_2 = arith.constant 0 : i32
    return %c0_i32, %c0_i32_0, %c0_i32_1 : i32, i32, i32
  }
  func.func @transform_6(%arg0: i32) -> (i32, i32) {
    %c0_i32 = arith.constant 0 : i32
    %c0_i32_0 = arith.constant 0 : i32
    %c0_i32_1 = arith.constant 0 : i32
    return %c0_i32, %c0_i32_0 : i32, i32
  }
  func.func @transform_7(%arg0: i32) -> (i32, i32, i32) {
    %c0_i32 = arith.constant 0 : i32
    %c0_i32_0 = arith.constant 0 : i32
    %c0_i32_1 = arith.constant 0 : i32
    %c0_i32_2 = arith.constant 0 : i32
    return %c0_i32, %c0_i32_0, %c0_i32_1 : i32, i32, i32
  }
  func.func @transform_8(%arg0: i32) -> (i32, i32) {
    %c0_i32 = arith.constant 0 : i32
    %c0_i32_0 = arith.constant 0 : i32
    %c0_i32_1 = arith.constant 0 : i32
    return %c0_i32, %c0_i32_0 : i32, i32
  }
  func.func @transform_9(%arg0: i32) -> (i32, i32) {
    %c0_i32 = arith.constant 0 : i32
    %c0_i32_0 = arith.constant 0 : i32
    %c0_i32_1 = arith.constant 0 : i32
    return %c0_i32, %c0_i32_0 : i32, i32
  }
  func.func @transform_10(%arg0: i32) -> (i32, i32) {
    %c0_i32 = arith.constant 0 : i32
    %c0_i32_0 = arith.constant 0 : i32
    %c0_i32_1 = arith.constant 0 : i32
    return %c0_i32, %c0_i32_0 : i32, i32
  }
  func.func @transform_11(%arg0: i32) -> (i32, i32) {
    %c0_i32 = arith.constant 0 : i32
    %c0_i32_0 = arith.constant 0 : i32
    return %arg0, %c0_i32 : i32, i32
  }
}

</mosaic_0001>

<bundles_post_ra>
// kernel: cnn_net_32_forward_prepared.1
= control target key start
LH: loop header
LB: loop body
LE: loop exit
PB: predicated region body
PF: predicated region fallthrough
CT: control target
= control target key end

     0   :  { %16 = vsyncpa [#allocation3], 0  ;;  %s18406_s0 = inlined_call_operand.vmem [shape: bf16[128,96], index: 0, kind: input, shape index: {}]   ;;  %s18407_s1 = inlined_call_operand.vmem [shape: bf16[128,96], index: 1, kind: input, shape index: {}]   ;;  %s18408_s2 = inlined_call_operand.hbm [shape: bf16[96,960], index: 2, kind: input, shape index: {}]   ;;  %s18409_s3 = inlined_call_operand.hbm [shape: bf16[96,960], index: 3, kind: input, shape index: {}]   ;;  %s18410_s4 = inlined_call_operand.hbm [shape: f32[1,960], index: 4, kind: input, shape index: {}]   ;;  %s18411_s5 = inlined_call_operand.hbm [shape: bf16[7,960,128], index: 5, kind: input, shape index: {}]   ;;  %s18412_s6 = inlined_call_operand.hbm [shape: f32[1,64], index: 6, kind: input, shape index: {}]   ;;  %s18413_s7 = inlined_call_operand.hbm [shape: bf16[4,64,200], index: 7, kind: input, shape index: {}]   ;;  %s18414_s8 = inlined_call_operand.hbm [shape: f32[1,200], index: 8, kind: input, shape index: {}]   ;;  %s18415_s9 = inlined_call_operand.vmem [shape: bf16[200,10], index: 9, kind: input, shape index: {}]   ;;  %s18416_s10 = inlined_call_operand.hbm [shape: f32[1,10], index: 10, kind: input, shape index: {}]   ;;  %s18417_s11 = inlined_call_operand.vmem [shape: f32[8,10], index: 11, kind: output, shape index: {}]  }
   0x1   :  { %17 = vsyncpa [#allocation5], 0 }
   0x2   :  { %18 = vsyncpa [#allocation8], 0 }
   0x3   :  { %19 = vsyncpa [#allocation11], 0 }
   0x4   :  { %20 = vsyncpa [#allocation14], 0  ;;  %s13705_s17 = smov [#allocation4]   ;;  %s13706_s19 = smov [#allocation7]  }
   0x5   :  { %s42_s18 = sshll.u32 %s13705_s17, 4  ;;  %s64_s20 = sshll.u32 %s13706_s19, 4  ;;  %s43_s18 = int_to_ptr.vmem [resolvable:$true] %s42_s18  ;;  %s13780_s20 = int_to_ptr.vmem [resolvable:$true] %s64_s20 }
   0x6   :  { %s13519_s23 = scalar_lea.hbm %s18409_s3, 6144 }
   0x7   :  { %p13520_p0 = scmp.ne.s32.totalorder %s18409_s3, %s13519_s23  ;;  %p13523_p1 = scmp.lt.u32.totalorder %s13519_s23, %s18409_s3 }
   0x9   :  { %p13525_p2 = pnand %p13523_p1, %p13520_p0 }
   0xb   :  { %13528 = shalt.err (!%p13525_p2)
}
   0xc   :  { %s13529_s28 = scalar_lea.vmem %s43_s18, 6144  ;;  %p13534_p4 = scmp.lt.s32.totalorder %s43_s18, %s43_s18 }
   0xd   :  { %p13530_p3 = scmp.ne.s32.totalorder %s43_s18, %s13529_s28  ;;  %p13535_p5 = scmp.lt.s32.totalorder %s13529_s28, %s13529_s28 }
   0xf   :  { %p13536_p6 = por %p13535_p5, %p13534_p4 }
  0x11   :  { %p13537_p7 = pnand %p13536_p6, %p13530_p3 }
  0x13   :  { %13540 = shalt.err (!%p13537_p7)
}
  0x14   :  { %s13707_s29 = smov 512   ;;  %s13708_s30 = smov 32  }
  0x15   :  { %48 = dma.hbm_to_vmem [thread:$0]  %s18409_s3, 6144, %s43_s18, [#allocation5], %s13707_s29, %s13707_s29, %s13708_s30  }
  0x16   :  { %s13541_s16 = scalar_lea.hbm %s18411_s5, 53760 }
  0x17   :  { %p13542_p8 = scmp.ne.s32.totalorder %s18411_s5, %s13541_s16  ;;  %p13545_p9 = scmp.lt.u32.totalorder %s13541_s16, %s18411_s5 }
  0x19   :  { %p13547_p10 = pnand %p13545_p9, %p13542_p8 }
  0x1b   :  { %13550 = shalt.err (!%p13547_p10)
}
  0x1c   :  { %s13551_s23 = scalar_lea.vmem %s13780_s20, 53760  ;;  %p13556_p12 = scmp.lt.s32.totalorder %s13780_s20, %s13780_s20 }
  0x1d   :  { %p13552_p11 = scmp.ne.s32.totalorder %s13780_s20, %s13551_s23  ;;  %p13557_p13 = scmp.lt.s32.totalorder %s13551_s23, %s13551_s23 }
  0x1f   :  { %p13558_p0 = por %p13557_p13, %p13556_p12 }
  0x21   :  { %p13559_p1 = pnand %p13558_p0, %p13552_p11 }
  0x23   :  { %13562 = shalt.err (!%p13559_p1)
}
  0x24   :  { %s13709_s3 = smov 64   ;;  %s13710_s18 = smov 4  }
  0x25   :  { %70 = dma.hbm_to_vmem [thread:$0]  %s18411_s5, 53760, %s13780_s20, [#allocation8], %s13709_s3, %s13709_s3, %s13710_s18  }
  0x26   :  { %s13711_s26 = smov [#allocation10]   ;;  %s13563_s13 = scalar_lea.hbm %s18413_s7, 4096 }
  0x27   :  { %s86_s27 = sshll.u32 %s13711_s26, 4  ;;  %p13564_p2 = scmp.ne.s32.totalorder %s18413_s7, %s13563_s13  ;;  %s87_s27 = int_to_ptr.vmem [resolvable:$true] %s86_s27 }
  0x28   :  { %p13567_p3 = scmp.lt.u32.totalorder %s13563_s13, %s18413_s7 }
  0x2a   :  { %p13569_p4 = pnand %p13567_p3, %p13564_p2 }
  0x2c   :  { %13572 = shalt.err (!%p13569_p4)
}
  0x2d   :  { %s13573_s19 = scalar_lea.vmem %s87_s27, 4096  ;;  %p13578_p6 = scmp.lt.s32.totalorder %s87_s27, %s87_s27 }
  0x2e   :  { %p13574_p5 = scmp.ne.s32.totalorder %s87_s27, %s13573_s19  ;;  %p13579_p7 = scmp.lt.s32.totalorder %s13573_s19, %s13573_s19 }
  0x30   :  { %p13580_p8 = por %p13579_p7, %p13578_p6 }
  0x32   :  { %p13581_p9 = pnand %p13580_p8, %p13574_p5 }
  0x34   :  { %13584 = shalt.err (!%p13581_p9)
}
  0x35   :  { %s13712_s5 = smov 128   ;;  %s13713_s20 = smov 8  }
  0x36   :  { %92 = dma.hbm_to_vmem [thread:$0]  %s18413_s7, 4096, %s87_s27, [#allocation11], %s13712_s5, %s13712_s5, %s13713_s20  }
  0x37   :  { %s13714_s23 = smov [#allocation2]   ;;  %s13715_s24 = smov [#allocation6]  }
  0x38   :  { %s30_s18 = sshll.u32 %s13714_s23, 4  ;;  %s55_s25 = sshll.u32 %s13715_s24, 4  ;;  %s31_s18 = int_to_ptr.vmem [resolvable:$true] %s30_s18  ;;  %s56_s25 = int_to_ptr.vmem [resolvable:$true] %s55_s25 }
  0x39   :  { %s13585_s12 = scalar_lea.hbm %s18408_s2, 6144 }
  0x3a   :  { %p13586_p10 = scmp.ne.s32.totalorder %s18408_s2, %s13585_s12  ;;  %p13589_p11 = scmp.lt.u32.totalorder %s13585_s12, %s18408_s2 }
  0x3c   :  { %p13591_p12 = pnand %p13589_p11, %p13586_p10 }
  0x3e   :  { %13594 = shalt.err (!%p13591_p12)
}
  0x3f   :  { %s13595_s7 = scalar_lea.vmem %s31_s18, 6144  ;;  %p13600_p0 = scmp.lt.s32.totalorder %s31_s18, %s31_s18 }
  0x40   :  { %p13596_p13 = scmp.ne.s32.totalorder %s31_s18, %s13595_s7  ;;  %p13601_p1 = scmp.lt.s32.totalorder %s13595_s7, %s13595_s7 }
  0x42   :  { %p13602_p2 = por %p13601_p1, %p13600_p0 }
  0x44   :  { %p13603_p3 = pnand %p13602_p2, %p13596_p13 }
  0x46   :  { %13606 = shalt.err (!%p13603_p3)
}
  0x47   :  { %36 = dma.hbm_to_vmem [thread:$0]  %s18408_s2, 6144, %s31_s18, [#allocation3], %s13707_s29, %s13707_s29, %s13708_s30  }
  0x48   :  { %s13607_s20 = scalar_lea.hbm %s18410_s4, 128 }
  0x49   :  { %p13608_p4 = scmp.ne.s32.totalorder %s18410_s4, %s13607_s20  ;;  %p13611_p5 = scmp.lt.u32.totalorder %s13607_s20, %s18410_s4 }
  0x4b   :  { %p13613_p6 = pnand %p13611_p5, %p13608_p4 }
  0x4d   :  { %13616 = shalt.err (!%p13613_p6)
}
  0x4e   :  { %s13617_s26 = scalar_lea.vmem %s56_s25, 128  ;;  %p13622_p8 = scmp.lt.s32.totalorder %s56_s25, %s56_s25 }
  0x4f   :  { %p13618_p7 = scmp.ne.s32.totalorder %s56_s25, %s13617_s26  ;;  %p13623_p9 = scmp.lt.s32.totalorder %s13617_s26, %s13617_s26 }
  0x51   :  { %p13624_p10 = por %p13623_p9, %p13622_p8 }
  0x53   :  { %p13625_p11 = pnand %p13624_p10, %p13618_p7 }
  0x55   :  { %13628 = shalt.err (!%p13625_p11)
}
  0x56   :  { %58 = dma.hbm_to_vmem [thread:$0]  %s18410_s4, 128, %s56_s25, [#allocation5]  }
  0x57   :  { %s13716_s30 = smov [#allocation9]   ;;  %s13717_s28 = smov [#allocation12]  }
  0x58   :  { %s77_s18 = sshll.u32 %s13716_s30, 4  ;;  %s99_s12 = sshll.u32 %s13717_s28, 4  ;;  %s78_s18 = int_to_ptr.vmem [resolvable:$true] %s77_s18  ;;  %s100_s12 = int_to_ptr.vmem [resolvable:$true] %s99_s12 }
  0x59   :  { %s13629_s15 = scalar_lea.hbm %s18412_s6, 16 }
  0x5a   :  { %p13630_p12 = scmp.ne.s32.totalorder %s18412_s6, %s13629_s15  ;;  %p13633_p13 = scmp.lt.u32.totalorder %s13629_s15, %s18412_s6 }
  0x5c   :  { %p13635_p0 = pnand %p13633_p13, %p13630_p12 }
  0x5e   :  { %13638 = shalt.err (!%p13635_p0)
}
  0x5f   :  { %s13639_s4 = scalar_lea.vmem %s78_s18, 16  ;;  %s13643_s25 = scalar_lea.vmem %s78_s18, 32 }
  0x60   :  { %p13640_p1 = scmp.ne.s32.totalorder %s78_s18, %s13639_s4  ;;  %p13644_p2 = scmp.lt.s32.totalorder %s78_s18, %s78_s18 }
  0x61   :  { %p13645_p3 = scmp.lt.s32.totalorder %s13643_s25, %s13639_s4 }
  0x63   :  { %p13646_p4 = por %p13645_p3, %p13644_p2 }
  0x65   :  { %p13647_p5 = pnand %p13646_p4, %p13640_p1 }
  0x67   :  { %13650 = shalt.err (!%p13647_p5)
}
  0x68   :  { %80 = dma.hbm_to_vmem [thread:$0]  %s18412_s6, 16, %s78_s18, [#allocation8]  }
  0x69   :  { %s13651_s22 = scalar_lea.hbm %s18414_s8, 32 }
  0x6a   :  { %p13652_p6 = scmp.ne.s32.totalorder %s18414_s8, %s13651_s22  ;;  %p13655_p7 = scmp.lt.u32.totalorder %s13651_s22, %s18414_s8 }
  0x6c   :  { %p13657_p8 = pnand %p13655_p7, %p13652_p6 }
  0x6e   :  { %13660 = shalt.err (!%p13657_p8)
}
  0x6f   :  { %s13661_s29 = scalar_lea.vmem %s100_s12, 32  ;;  %p13666_p10 = scmp.lt.s32.totalorder %s100_s12, %s100_s12 }
  0x70   :  { %p13662_p9 = scmp.ne.s32.totalorder %s100_s12, %s13661_s29  ;;  %p13667_p11 = scmp.lt.s32.totalorder %s13661_s29, %s13661_s29 }
  0x72   :  { %p13668_p12 = por %p13667_p11, %p13666_p10 }
  0x74   :  { %p13669_p13 = pnand %p13668_p12, %p13662_p9 }
  0x76   :  { %13672 = shalt.err (!%p13669_p13)
}
  0x77   :  { %102 = dma.hbm_to_vmem [thread:$0]  %s18414_s8, 32, %s100_s12, [#allocation11]  }
  0x78   :  { %s13718_s18 = smov [#allocation13]   ;;  %s13673_s15 = scalar_lea.hbm %s18416_s10, 16 }
  0x79   :  { %s111_s28 = sshll.u32 %s13718_s18, 4  ;;  %p13674_p0 = scmp.ne.s32.totalorder %s18416_s10, %s13673_s15  ;;  %s112_s28 = int_to_ptr.vmem [resolvable:$true] %s111_s28 }
  0x7a   :  { %p13677_p1 = scmp.lt.u32.totalorder %s13673_s15, %s18416_s10 }
  0x7c   :  { %p13679_p2 = pnand %p13677_p1, %p13674_p0 }
  0x7e   :  { %13682 = shalt.err (!%p13679_p2)
}
  0x7f   :  { %s13683_s4 = scalar_lea.vmem %s112_s28, 16  ;;  %s13687_s8 = scalar_lea.vmem %s112_s28, 32 }
  0x80   :  { %p13684_p3 = scmp.ne.s32.totalorder %s112_s28, %s13683_s4  ;;  %p13688_p4 = scmp.lt.s32.totalorder %s112_s28, %s112_s28 }
  0x81   :  { %p13689_p5 = scmp.lt.s32.totalorder %s13687_s8, %s13683_s4 }
  0x83   :  { %p13690_p6 = por %p13689_p5, %p13688_p4 }
  0x85   :  { %p13691_p7 = pnand %p13690_p6, %p13684_p3 }
  0x87   :  { %13694 = shalt.err (!%p13691_p7)
}
  0x88   :  { %114 = dma.hbm_to_vmem [thread:$0]  %s18416_s10, 16, %s112_s28, [#allocation14]  }
  0x89   :  { %13695 = dma.done.wait [#allocation3], 6144  }
  0x8a   :  { %13696 = vsyncadd [#allocation3], 4294961152 }
  0x8b   :  { %13697 = dma.done.wait [#allocation5], 6272  }
  0x8c   :  { %13698 = vsyncadd [#allocation5], 4294961024 }
  0x8d   :  { %13699 = dma.done.wait [#allocation8], 53776  }
  0x8e   :  { %13700 = vsyncadd [#allocation8], 4294913520 }
  0x8f   :  { %13701 = dma.done.wait [#allocation11], 4128  }
  0x90   :  { %13702 = vsyncadd [#allocation11], 4294963168 }
  0x91   :  { %13703 = dma.done.wait [#allocation14], 16  }
  0x92   :  { %13704 = vsyncadd [#allocation14], 4294967280  ;;  %v18422_v0 = vmov 0   ;;  %v172_v1 = vld [vmem:[#allocation2] sm:$0xff]  ;;  %v173_v24 = vld [vmem:[#allocation2 + $0x8] sm:$0xff]  ;;  %vm548_vm0 = vcmask 785408  }
  0x93   :  { %605 = vmatprep.mubr.bf16.mxu0 %v18422_v0  ;;  %655 = vmatprep.mubr.bf16.mxu1 %v18422_v0  ;;  %v176_v2 = vld [vmem:[#allocation2 + $0x20] sm:$0xff]  ;;  %v177_v25 = vld [vmem:[#allocation2 + $0x28] sm:$0xff]  ;;  %v174_v26 = vld [vmem:[#allocation2 + $0x10] sm:$0xff]  ;;  %vm3911_vm1 = vcmask 523264   ;;  %vm5177_vm2 = vcmask 1046528   ;;  %vm6103_vm3 = vcmask 1045504  }
  0x94   :  { %v180_v3 = vld [vmem:[#allocation2 + $0x40] sm:$0xff]  ;;  %v13893_v4 = vcombine.high %v172_v1, %v176_v2  ;;  %v13895_v5 = vcombine.low %v172_v1, %v176_v2  ;;  %v178_v27 = vld [vmem:[#allocation2 + $0x30] sm:$0xff]  ;;  %v13939_v29 = vcombine.high %v173_v24, %v177_v25  ;;  %v181_v31 = vld [vmem:[#allocation2 + $0x48] sm:$0xff]  ;;  %v13955_v35 = vcombine.low %v173_v24, %v177_v25 }
  0x95   :  { %v184_v6 = vld [vmem:[#allocation2 + $0x60] sm:$0xff]  ;;  %v13941_v30 = vcombine.high %v174_v26, %v178_v27  ;;  %v185_v32 = vld [vmem:[#allocation2 + $0x68] sm:$0xff]  ;;  %v182_v36 = vld [vmem:[#allocation2 + $0x50] sm:$0xff]  ;;  %v13961_v41 = vcombine.low %v174_v26, %v178_v27  ;;  %vm7029_vm4 = vcmask 1044480   ;;  %vm7955_vm5 = vcmask 1043456  }
  0x96   :  { %v13897_v7 = vcombine.high %v180_v3, %v184_v6  ;;  %v188_v8 = vld [vmem:[#allocation2 + $0x80] sm:$0xff]  ;;  %573 = vmatprep.subr.bf16.mxu0 %v13893_v4  ;;  %12706 = vmatprep.subr.bf16.mxu1 %v13893_v4  ;;  %v13903_v10 = vcombine.low %v180_v3, %v184_v6  ;;  %v13951_v34 = vld [vmem:[%s18406_s0 + $0x28] sm:$0xff]   ;;  %v186_v37 = vld [vmem:[#allocation2 + $0x70] sm:$0xff]  ;;  %v13958_v38 = vcombine.high %v181_v31, %v185_v32  ;;  %vm8881_vm6 = vcmask 1042432  }
  0x97   :  { %v192_v9 = vld [vmem:[#allocation2 + $0xa0] sm:$0xff]  ;;  %574 = vmatpush1.bf16.msra.mxu0 %v13895_v5  ;;  %12712 = vmatpush1.bf16.msra.mxu1 %v13895_v5  ;;  %v189_v39 = vld [vmem:[#allocation2 + $0x88] sm:$0xff]  ;;  %v13967_v42 = vcombine.high %v182_v36, %v186_v37  ;;  %v13970_v43 = vcombine.low %v181_v31, %v185_v32  ;;  %v13983_v45 = vld [vmem:[%s18406_s0 + $0x30] sm:$0xff]   ;;  %v13988_v49 = vcombine.low %v182_v36, %v186_v37  ;;  %vm9807_vm7 = vcmask 1041408  }
  0x98   :  { %575 = vmatprep.subr.bf16.mxu0 %v13897_v7  ;;  %12707 = vmatprep.subr.bf16.mxu1 %v13897_v7  ;;  %v13907_v11 = vcombine.high %v188_v8, %v192_v9  ;;  %v196_v12 = vld [vmem:[#allocation2 + $0xc0] sm:$0xff]  ;;  %v13911_v14 = vcombine.low %v188_v8, %v192_v9  ;;  %v193_v40 = vld [vmem:[#allocation2 + $0xa8] sm:$0xff]  ;;  %v190_v50 = vld [vmem:[#allocation2 + $0x90] sm:$0xff]  ;;  %vm9988_vm8 = vcmask 1041409   ;;  %vm9994_vm9 = vcmask 1043459  }
  0x99   :  { %v200_v13 = vld [vmem:[#allocation2 + $0xe0] sm:$0xff]  ;;  %v13978_v44 = vld [vmem:[%s18406_s0 + $0x8] sm:$0xff]   ;;  %v13985_v46 = vcombine.high %v189_v39, %v193_v40  ;;  %v194_v51 = vld [vmem:[#allocation2 + $0xb0] sm:$0xff]  ;;  %v13992_v54 = vcombine.low %v189_v39, %v193_v40  ;;  %vm9991_vm10 = vcmask 1042434   ;;  %vm10000_vm11 = vcmask 1045509  }
  0x9a   :  { %v13915_v15 = vcombine.high %v196_v12, %v200_v13  ;;  %v204_v16 = vld [vmem:[#allocation2 + $0x100] sm:$0xff]  ;;  %v13919_v18 = vcombine.low %v196_v12, %v200_v13  ;;  %v197_v47 = vld [vmem:[#allocation2 + $0xc8] sm:$0xff]  ;;  %v198_v52 = vld [vmem:[#allocation2 + $0xd0] sm:$0xff]  ;;  %v13998_v58 = vcombine.high %v190_v50, %v194_v51  ;;  %v14004_v59 = vcombine.low %v190_v50, %v194_v51 }
  0x9b   :  { %576 = vmatpush1.bf16.msra.mxu0 %v13903_v10  ;;  %12713 = vmatpush1.bf16.msra.mxu1 %v13903_v10  ;;  %v208_v17 = vld [vmem:[#allocation2 + $0x120] sm:$0xff]  ;;  %v201_v48 = vld [vmem:[#allocation2 + $0xe8] sm:$0xff]  ;;  %v202_v53 = vld [vmem:[#allocation2 + $0xf0] sm:$0xff]  ;;  %vm9997_vm12 = vcmask 1044484   ;;  %vm10006_vm13 = vcmask 1047559   ;;  %vm10003_vm14 = vcmask 1046534  }
  0x9c   :  { %577 = vmatprep.subr.bf16.mxu0 %v13907_v11  ;;  %12708 = vmatprep.subr.bf16.mxu1 %v13907_v11  ;;  %v13923_v19 = vcombine.high %v204_v16, %v208_v17  ;;  %v212_v20 = vld [vmem:[#allocation2 + $0x140] sm:$0xff]  ;;  %v13927_v22 = vcombine.low %v204_v16, %v208_v17  ;;  %v205_v55 = vld [vmem:[#allocation2 + $0x108] sm:$0xff]  ;;  %v13995_v57 = vcombine.high %v197_v47, %v201_v48  ;;  %v14017_v1 = vld [vmem:[%s18406_s0 + $0x10] sm:$0xff]   ;;  %vm10536_vm15 = vcmask 588800  }
  0x9d   :  { %v216_v21 = vld [vmem:[#allocation2 + $0x160] sm:$0xff]  ;;  %v209_v56 = vld [vmem:[#allocation2 + $0x128] sm:$0xff]  ;;  %v14007_v60 = vcombine.low %v197_v47, %v201_v48  ;;  %v14010_v63 = vcombine.high %v198_v52, %v202_v53  ;;  %v14022_v2 = vld [vmem:[%s18406_s0 + $0x38] sm:$0xff]   ;;  %v14035_v17 = vcombine.low %v198_v52, %v202_v53 }
  0x9e   :  { %v13931_v23 = vcombine.high %v212_v20, %v216_v21  ;;  %v13935_v28 = vcombine.low %v212_v20, %v216_v21  ;;  %v13946_v33 = vld [vmem:[%s18406_s0] sm:$0xff]   ;;  %v213_v61 = vld [vmem:[#allocation2 + $0x148] sm:$0xff]  ;;  %v14024_v3 = vcombine.high %v205_v55, %v209_v56  ;;  %v14029_v6 = vcombine.low %v205_v55, %v209_v56  ;;  %v175_v8 = vld [vmem:[#allocation2 + $0x18] sm:$0xff] }
  0x9f   :  { %578 = vmatpush1.bf16.msra.mxu0 %v13911_v14  ;;  %12714 = vmatpush1.bf16.msra.mxu1 %v13911_v14  ;;  %v217_v62 = vld [vmem:[#allocation2 + $0x168] sm:$0xff]  ;;  %v179_v9 = vld [vmem:[#allocation2 + $0x38] sm:$0xff]  ;;  %v206_v12 = vld [vmem:[#allocation2 + $0x110] sm:$0xff] }
  0xa0   :  { %579 = vmatprep.subr.bf16.mxu0 %v13915_v15  ;;  %12709 = vmatprep.subr.bf16.mxu1 %v13915_v15  ;;  %v210_v13 = vld [vmem:[#allocation2 + $0x130] sm:$0xff]  ;;  %v14033_v16 = vcombine.high %v213_v61, %v217_v62  ;;  %v14044_v21 = vcombine.low %v213_v61, %v217_v62  ;;  %v183_v24 = vld [vmem:[#allocation2 + $0x58] sm:$0xff]  ;;  %v14054_v27 = vcombine.high %v175_v8, %v179_v9  ;;  %v220_v47 = vld [vmem:[#allocation4] sm:$0xff] }
  0xa1   :  { %v14041_v20 = vcombine.high %v206_v12, %v210_v13  ;;  %v187_v25 = vld [vmem:[#allocation2 + $0x78] sm:$0xff]  ;;  %v214_v31 = vld [vmem:[#allocation2 + $0x150] sm:$0xff]  ;;  %v14057_v36 = vcombine.low %v206_v12, %v210_v13  ;;  %v14061_v37 = vcombine.low %v175_v8, %v179_v9  ;;  %v224_v48 = vld [vmem:[#allocation4 + $0x20] sm:$0xff] }
  0xa2   :  { %v14052_v26 = vld [vmem:[%s18406_s0 + $0x18] sm:$0xff]   ;;  %v218_v32 = vld [vmem:[#allocation2 + $0x170] sm:$0xff]  ;;  %v14064_v50 = vcombine.high %v183_v24, %v187_v25  ;;  %v14077_v53 = vcombine.low %v183_v24, %v187_v25  ;;  %v14079_v55 = vcombine.high %v220_v47, %v224_v48  ;;  %v14085_v56 = vld [vmem:[%s18406_s0 + $0x20] sm:$0xff]  }
  0xa3   :  { %580 = vmatpush1.bf16.msra.mxu0 %v13919_v18  ;;  %12715 = vmatpush1.bf16.msra.mxu1 %v13919_v18  ;;  %18843 = vst [vmem:[#allocation20_spill] sm:$0xff] %v14061_v37  ;;  %v191_v39 = vld [vmem:[#allocation2 + $0x98] sm:$0xff]  ;;  %v14067_v51 = vcombine.high %v214_v31, %v218_v32  ;;  %v14073_v52 = vcombine.low %v214_v31, %v218_v32 }
  0xa4   :  { %581 = vmatprep.subr.bf16.mxu0 %v13923_v19  ;;  %12710 = vmatprep.subr.bf16.mxu1 %v13923_v19  ;;  %v195_v40 = vld [vmem:[#allocation2 + $0xb8] sm:$0xff]  ;;  %18844 = vst [vmem:[#allocation21_spill] sm:$0xff] %v14064_v50  ;;  %18845 = vst [vmem:[#allocation22_spill] sm:$0xff] %v14077_v53 }
  0xa5   :  { %18846 = vst [vmem:[#allocation23_spill] sm:$0xff] %v14079_v55  ;;  %v14088_v61 = vcombine.high %v191_v39, %v195_v40  ;;  %v199_v62 = vld [vmem:[#allocation2 + $0xd8] sm:$0xff]  ;;  %v14094_v9 = vcombine.low %v191_v39, %v195_v40  ;;  %v228_v39 = vld [vmem:[#allocation4 + $0x40] sm:$0xff] }
  0xa6   :  { %v203_v8 = vld [vmem:[#allocation2 + $0xf8] sm:$0xff]  ;;  %v232_v40 = vld [vmem:[#allocation4 + $0x60] sm:$0xff] }
  0xa7   :  { %582 = vmatpush1.bf16.msra.mxu0 %v13927_v22  ;;  %12716 = vmatpush1.bf16.msra.mxu1 %v13927_v22  ;;  %18847 = vst [vmem:[#allocation24_spill] sm:$0xff] %v14088_v61  ;;  %18848 = vst [vmem:[#allocation25_spill] sm:$0xff] %v14094_v9  ;;  %v14097_v12 = vcombine.high %v199_v62, %v203_v8  ;;  %v207_v13 = vld [vmem:[#allocation2 + $0x118] sm:$0xff]  ;;  %v14106_v25 = vcombine.low %v199_v62, %v203_v8 }
  0xa8   :  { %583 = vmatprep.subr.bf16.mxu0 %v13931_v23  ;;  %12711 = vmatprep.subr.bf16.mxu1 %v13931_v23  ;;  %v211_v24 = vld [vmem:[#allocation2 + $0x138] sm:$0xff]  ;;  %v14119_v8 = vcombine.high %v228_v39, %v232_v40 }
  0xa9   :  { %18849 = vst [vmem:[#allocation26_spill] sm:$0xff] %v14097_v12  ;;  %18850 = vst [vmem:[#allocation27_spill] sm:$0xff] %v14106_v25  ;;  %v215_v31 = vld [vmem:[#allocation2 + $0x158] sm:$0xff] }
  0xaa   :  { %v219_v32 = vld [vmem:[#allocation2 + $0x178] sm:$0xff] }
  0xab   :  { %584 = vmatpush1.bf16.msra.mxu0 %v13935_v28  ;;  %12717 = vmatpush1.bf16.msra.mxu1 %v13935_v28  ;;  %v14117_v62 = vcombine.high %v215_v31, %v219_v32 }
  0xac   :  { %686 = vmatprep.subr.bf16.mxu1 %v13939_v29  ;;  %799 = vmatprep.subr.bf16.mxu0 %v13941_v30 }
  0xae   :  { %10650 = vmatmul.mubr.msk.bf16.vlgmr.msra.gmra.mrb[0].mxu0 %vm548_vm0, %v13946_v33  ;;  %10655 = vmatmul.mubr.msk.bf16.vlgmr.msra.gmra.mrb[0].mxu1 %vm548_vm0, %v13951_v34 }
  0xaf   :  { %687 = vmatpush1.bf16.msra.mxu1 %v13955_v35  ;;  %615 = vmatprep.mubr.bf16.mxu0 %v18422_v0 }
  0xb0   :  { %688 = vmatprep.subr.bf16.mxu1 %v13958_v38  ;;  %665 = vmatprep.mubr.bf16.mxu1 %v18422_v0 }
  0xb1   :  { %800 = vmatpush1.bf16.msra.mxu0 %v13961_v41 }
  0xb2   :  { %801 = vmatprep.subr.bf16.mxu0 %v13967_v42 }
  0xb3   :  { %689 = vmatpush1.bf16.msra.mxu1 %v13970_v43 }
  0xb4   :  { %690 = vmatprep.subr.bf16.mxu1 %v13985_v46 }
  0xb5   :  { %802 = vmatpush1.bf16.msra.mxu0 %v13988_v49 }
  0xb6   :  { %10651 = vmatmul.mubr.msk.bf16.gmra.mrb[4].mxu0 %vm548_vm0, %v13978_v44  ;;  %10656 = vmatmul.mubr.msk.bf16.gmra.mrb[4].mxu1 %vm548_vm0, %v13983_v45 }
  0xb7   :  { %691 = vmatpush1.bf16.msra.mxu1 %v13992_v54  ;;  %625 = vmatprep.mubr.bf16.mxu0 %v18422_v0 }
  0xb8   :  { %692 = vmatprep.subr.bf16.mxu1 %v13995_v57  ;;  %675 = vmatprep.mubr.bf16.mxu1 %v18422_v0 }
  0xb9   :  { %803 = vmatprep.subr.bf16.mxu0 %v13998_v58 }
  0xba   :  { %804 = vmatpush1.bf16.msra.mxu0 %v14004_v59 }
  0xbb   :  { %693 = vmatpush1.bf16.msra.mxu1 %v14007_v60  ;;  %805 = vmatprep.subr.bf16.mxu0 %v14010_v63 }
  0xbc   :  { %694 = vmatprep.subr.bf16.mxu1 %v14024_v3 }
  0xbe   :  { %10652 = vmatmul.mubr.msk.bf16.gmra.mrb[8].mxu0 %vm548_vm0, %v14017_v1  ;;  %10657 = vmatmul.mubr.msk.bf16.gmra.mrb[8].mxu1 %vm548_vm0, %v14022_v2 }
  0xbf   :  { %695 = vmatpush1.bf16.msra.mxu1 %v14029_v6  ;;  %635 = vmatprep.mubr.bf16.mxu0 %v18422_v0 }
  0xc0   :  { %696 = vmatprep.subr.bf16.mxu1 %v14033_v16  ;;  %718 = vmatprep.mubr.bf16.mxu1 %v18422_v0 }
  0xc1   :  { %806 = vmatpush1.bf16.msra.mxu0 %v14035_v17 }
  0xc2   :  { %807 = vmatprep.subr.bf16.mxu0 %v14041_v20 }
  0xc3   :  { %697 = vmatpush1.bf16.msra.mxu1 %v14044_v21 }
  0xc4   :  { %912 = vmatprep.subr.bf16.mxu1 %v14054_v27 }
  0xc5   :  { %808 = vmatpush1.bf16.msra.mxu0 %v14057_v36 }
  0xc6   :  { %10653 = vmatmul.mubr.msk.bf16.gmra.mrb[12].mxu0 %vm548_vm0, %v14052_v26  ;;  %10658 = vmatmul.mubr.msk.bf16.vlgmr.msra.gmra.mrb[12].mxu1 %vm548_vm0, %v13946_v33 }
  0xc7   :  { %913 = vmatpush1.bf16.msra.mxu1 %v14061_v37  ;;  %645 = vmatprep.mubr.bf16.mxu0 %v18422_v0  ;;  %v236_v37 = vld [vmem:[#allocation4 + $0x80] sm:$0xff] }
  0xc8   :  { %728 = vmatprep.mubr.bf16.mxu1 %v18422_v0  ;;  %914 = vmatprep.subr.bf16.mxu1 %v14064_v50  ;;  %v14114_v50 = vcombine.low %v220_v47, %v224_v48  ;;  %v14128_v47 = vcombine.low %v215_v31, %v219_v32  ;;  %v14131_v48 = vcombine.low %v228_v39, %v232_v40  ;;  %v252_v32 = vld [vmem:[#allocation4 + $0x100] sm:$0xff] }
  0xc9   :  { %809 = vmatprep.subr.bf16.mxu0 %v14067_v51  ;;  %v264_v40 = vld [vmem:[#allocation4 + $0x160] sm:$0xff] }
  0xca   :  { %810 = vmatpush1.bf16.msra.mxu0 %v14073_v52  ;;  %18852 = vst [vmem:[#allocation29_spill] sm:$0xff] %v14114_v50  ;;  %18854 = vst [vmem:[#allocation30_spill] sm:$0xff] %v14131_v48 }
  0xcb   :  { %915 = vmatpush1.bf16.msra.mxu1 %v14077_v53  ;;  %1265 = vmatprep.subr.bf16.mxu0 %v14079_v55  ;;  %v14112_v53 = vcombine.low %v207_v13, %v211_v24 }
  0xcc   :  { %916 = vmatprep.subr.bf16.mxu1 %v14088_v61  ;;  %v14109_v61 = vcombine.high %v207_v13, %v211_v24  ;;  %v18853_v13 = vmov 0   ;;  %v244_v24 = vld [vmem:[#allocation4 + $0xc0] sm:$0xff] }
  0xce   :  { %10654 = vmatmul.mubr.msk.bf16.gmra.mrb[16].mxu0 %vm548_vm0, %v14085_v56  ;;  %10659 = vmatmul.mubr.msk.bf16.gmra.mrb[16].mxu1 %vm548_vm0, %v13978_v44  ;;  %18851 = vst [vmem:[#allocation28_spill] sm:$0xff] %v14109_v61 }
  0xcf   :  { %738 = vmatprep.mubr.bf16.mxu1 %v18422_v0  ;;  %831 = vmatprep.mubr.bf16.mxu0 %v18422_v0  ;;  %v240_v0 = vld [vmem:[#allocation4 + $0xa0] sm:$0xff] }
  0xd0   :  { %917 = vmatpush1.bf16.msra.mxu1 %v14094_v9  ;;  %v14135_v9 = vcombine.high %v236_v37, %v240_v0  ;;  %v14141_v31 = vcombine.low %v236_v37, %v240_v0  ;;  %v260_v37 = vld [vmem:[#allocation4 + $0x140] sm:$0xff] }
  0xd1   :  { %918 = vmatprep.subr.bf16.mxu1 %v14097_v12  ;;  %v221_v12 = vld [vmem:[#allocation4 + $0x8] sm:$0xff] }
  0xd2   :  { %18855 = vst [vmem:[#allocation31_spill] sm:$0xff] %v14135_v9  ;;  %18857 = vst [vmem:[#allocation33_spill] sm:$0xff] %v14141_v31 }
  0xd4   :  { %919 = vmatpush1.bf16.msra.mxu1 %v14106_v25  ;;  %v225_v25 = vld [vmem:[#allocation4 + $0x28] sm:$0xff] }
  0xd5   :  { %920 = vmatprep.subr.bf16.mxu1 %v14109_v61  ;;  %v248_v61 = vld [vmem:[#allocation4 + $0xe0] sm:$0xff]  ;;  %v14137_v55 = vcombine.high %v221_v12, %v225_v25 }
  0xd6   :  { %10660 = vmatmul.mubr.msk.bf16.gmra.mrb[20].mxu1 %vm548_vm0, %v14017_v1  ;;  %10666 = vmatmul.mubr.msk.bf16.vlgmr.msra.gmra.mrb[20].mxu0 %vm548_vm0, %v13946_v33  ;;  %v14145_v39 = vcombine.high %v244_v24, %v248_v61  ;;  %v14154_v0 = vcombine.low %v244_v24, %v248_v61  ;;  %v222_v61 = vld [vmem:[#allocation4 + $0x10] sm:$0xff] }
  0xd7   :  { %748 = vmatprep.mubr.bf16.mxu1 %v18853_v13  ;;  %841 = vmatprep.mubr.bf16.mxu0 %v18853_v13  ;;  %18856 = vst [vmem:[#allocation32_spill] sm:$0xff] %v14137_v55  ;;  %v226_v24 = vld [vmem:[#allocation4 + $0x30] sm:$0xff] }
  0xd8   :  { %921 = vmatpush1.bf16.msra.mxu1 %v14112_v53  ;;  %1266 = vmatpush1.bf16.msra.mxu0 %v14114_v50  ;;  %v256_v50 = vld [vmem:[#allocation4 + $0x120] sm:$0xff]  ;;  %18858 = vst [vmem:[#allocation34_spill] sm:$0xff] %v14145_v39  ;;  %18859 = vst [vmem:[#allocation35_spill] sm:$0xff] %v14154_v0 }
  0xd9   :  { %922 = vmatprep.subr.bf16.mxu1 %v14117_v62  ;;  %1267 = vmatprep.subr.bf16.mxu0 %v14119_v8 }
  0xdc   :  { %923 = vmatpush1.bf16.msra.mxu1 %v14128_v47  ;;  %1268 = vmatpush1.bf16.msra.mxu0 %v14131_v48  ;;  %v14163_v48 = vcombine.high %v260_v37, %v264_v40 }
  0xdd   :  { %1269 = vmatprep.subr.bf16.mxu0 %v14135_v9  ;;  %1378 = vmatprep.subr.bf16.mxu1 %v14137_v55  ;;  %v14157_v55 = vcombine.high %v252_v32, %v256_v50  ;;  %v14160_v9 = vcombine.low %v252_v32, %v256_v50  ;;  %v14172_v50 = vcombine.low %v260_v37, %v264_v40  ;;  %v229_v37 = vld [vmem:[#allocation4 + $0x48] sm:$0xff] }
  0xde   :  { %10661 = vmatmul.mubr.msk.bf16.gmra.mrb[24].mxu1 %vm548_vm0, %v14052_v26  ;;  %10667 = vmatmul.mubr.msk.bf16.gmra.mrb[24].mxu0 %vm548_vm0, %v13978_v44  ;;  %18862 = vst [vmem:[#allocation38_spill] sm:$0xff] %v14163_v48  ;;  %v14175_v32 = vcombine.high %v222_v61, %v226_v24  ;;  %v233_v40 = vld [vmem:[#allocation4 + $0x68] sm:$0xff] }
  0xdf   :  { %758 = vmatprep.mubr.bf16.mxu1 %v18853_v13  ;;  %851 = vmatprep.mubr.bf16.mxu0 %v18853_v13  ;;  %18860 = vst [vmem:[#allocation36_spill] sm:$0xff] %v14157_v55  ;;  %18861 = vst [vmem:[#allocation37_spill] sm:$0xff] %v14160_v9 }
  0xe0   :  { %1270 = vmatpush1.bf16.msra.mxu0 %v14141_v31  ;;  %18863 = vst [vmem:[#allocation39_spill] sm:$0xff] %v14172_v50  ;;  %18864 = vst [vmem:[#allocation40_spill] sm:$0xff] %v14175_v32  ;;  %v14236_v31 = vld [vmem:[#allocation4 + $0x18] sm:$0xff] }
  0xe1   :  { %1271 = vmatprep.subr.bf16.mxu0 %v14145_v39  ;;  %v242_v39 = vld [vmem:[#allocation4 + $0xb0] sm:$0xff] }
  0xe4   :  { %1272 = vmatpush1.bf16.msra.mxu0 %v14154_v0 }
  0xe5   :  { %1273 = vmatprep.subr.bf16.mxu0 %v14157_v55  ;;  %v249_v55 = vld [vmem:[#allocation4 + $0xe8] sm:$0xff] }
  0xe6   :  { %10662 = vmatmul.mubr.msk.bf16.gmra.mrb[28].mxu1 %vm548_vm0, %v14085_v56  ;;  %10668 = vmatmul.mubr.msk.bf16.gmra.mrb[28].mxu0 %vm548_vm0, %v14017_v1 }
  0xe7   :  { %768 = vmatprep.mubr.bf16.mxu1 %v18853_v13  ;;  %861 = vmatprep.mubr.bf16.mxu0 %v18853_v13 }
  0xe8   :  { %1274 = vmatpush1.bf16.msra.mxu0 %v14160_v9  ;;  %v14199_v9 = vcombine.high %v229_v37, %v233_v40 }
  0xe9   :  { %1275 = vmatprep.subr.bf16.mxu0 %v14163_v48  ;;  %v241_v48 = vld [vmem:[#allocation4 + $0xa8] sm:$0xff] }
  0xea   :  { %18866 = vst [vmem:[#allocation42_spill] sm:$0xff] %v14199_v9 }
  0xec   :  { %1276 = vmatpush1.bf16.msra.mxu0 %v14172_v50  ;;  %v237_v50 = vld [vmem:[#allocation4 + $0x88] sm:$0xff] }
  0xed   :  { %1491 = vmatprep.subr.bf16.mxu0 %v14175_v32  ;;  %v14197_v32 = vcombine.low %v221_v12, %v225_v25  ;;  %v14211_v12 = vcombine.high %v237_v50, %v241_v48  ;;  %v245_v25 = vld [vmem:[#allocation4 + $0xc8] sm:$0xff] }
  0xee   :  { %10663 = vmatmul.mubr.msk.bf16.gmra.mrb[32].mxu1 %vm548_vm0, %v13951_v34  ;;  %10669 = vmatmul.mubr.msk.bf16.gmra.mrb[32].mxu0 %vm548_vm0, %v14052_v26  ;;  %v14217_v0 = vcombine.high %v245_v25, %v249_v55 }
  0xef   :  { %778 = vmatprep.mubr.bf16.mxu1 %v18853_v13  ;;  %871 = vmatprep.mubr.bf16.mxu0 %v18853_v13  ;;  %18865 = vst [vmem:[#allocation41_spill] sm:$0xff] %v14197_v32  ;;  %18868 = vst [vmem:[#allocation44_spill] sm:$0xff] %v14211_v12 }
  0xf6   :  { %10664 = vmatmul.mubr.msk.bf16.gmra.mrb[36].mxu1 %vm548_vm0, %v13983_v45  ;;  %10670 = vmatmul.mubr.msk.bf16.gmra.mrb[36].mxu0 %vm548_vm0, %v14085_v56 }
  0xf7   :  { %788 = vmatprep.mubr.bf16.mxu1 %v18853_v13  ;;  %881 = vmatprep.mubr.bf16.mxu0 %v18853_v13 }
  0xfe   :  { %10665 = vmatmul.mubr.msk.bf16.gmra.mrb[40].mxu1 %vm548_vm0, %v14022_v2  ;;  %10671 = vmatmul.mubr.msk.bf16.gmra.mrb[40].mxu0 %vm548_vm0, %v13951_v34  ;;  %v14207_v34 = vcombine.low %v229_v37, %v233_v40  ;;  %v265_v37 = vld [vmem:[#allocation4 + $0x168] sm:$0xff]  ;;  %v230_v40 = vld [vmem:[#allocation4 + $0x50] sm:$0xff] }
  0xff   :  { %891 = vmatprep.mubr.bf16.mxu0 %v18853_v13  ;;  %944 = vmatprep.mubr.bf16.mxu1 %v18853_v13 }
 0x100   :  { %18867 = vst [vmem:[#allocation43_spill] sm:$0xff] %v14207_v34 }
 0x106   :  { %10672 = vmatmul.mubr.msk.bf16.gmra.mrb[44].mxu0 %vm548_vm0, %v13983_v45  ;;  %10674 = vmatmul.mubr.msk.bf16.vlgmr.msra.gmra.mrb[44].mxu1 %vm548_vm0, %v13946_v33  ;;  %v14214_v45 = vcombine.low %v237_v50, %v241_v48  ;;  %v253_v33 = vld [vmem:[#allocation4 + $0x108] sm:$0xff]  ;;  %v14226_v48 = vcombine.low %v245_v25, %v249_v55  ;;  %v14238_v55 = vld [vmem:[#allocation4 + $0x38] sm:$0xff] }
 0x107   :  { %1379 = vmatpush1.bf16.msra.mxu1 %v14197_v32  ;;  %901 = vmatprep.mubr.bf16.mxu0 %v18853_v13  ;;  %v257_v32 = vld [vmem:[#allocation4 + $0x128] sm:$0xff] }
 0x108   :  { %954 = vmatprep.mubr.bf16.mxu1 %v18853_v13  ;;  %1380 = vmatprep.subr.bf16.mxu1 %v14199_v9  ;;  %18869 = vst [vmem:[#allocation45_spill] sm:$0xff] %v14214_v45  ;;  %18870 = vst [vmem:[#allocation46_spill] sm:$0xff] %v14226_v48  ;;  %v261_v50 = vld [vmem:[#allocation4 + $0x148] sm:$0xff]  ;;  %v238_v9 = vld [vmem:[#allocation4 + $0x90] sm:$0xff] }
 0x109   :  { %v14241_v25 = vcombine.high %v261_v50, %v265_v37 }
 0x10b   :  { %1381 = vmatpush1.bf16.msra.mxu1 %v14207_v34  ;;  %v14229_v34 = vcombine.high %v253_v33, %v257_v32  ;;  %18872 = vst [vmem:[#allocation48_spill] sm:$0xff] %v14241_v25 }
 0x10c   :  { %1382 = vmatprep.subr.bf16.mxu1 %v14211_v12  ;;  %v234_v12 = vld [vmem:[#allocation4 + $0x70] sm:$0xff] }
 0x10d   :  { %18871 = vst [vmem:[#allocation47_spill] sm:$0xff] %v14229_v34 }
 0x10e   :  { %10673 = vmatmul.mubr.msk.bf16.gmra.mrb[48].mxu0 %vm548_vm0, %v14022_v2  ;;  %10675 = vmatmul.mubr.msk.bf16.gmra.mrb[48].mxu1 %vm548_vm0, %v13978_v44  ;;  %v14232_v2 = vcombine.low %v253_v33, %v257_v32  ;;  %v14234_v44 = vcombine.low %v222_v61, %v226_v24  ;;  %v14250_v61 = vld [vmem:[%s18406_s0] sm:$0xff]   ;;  %v14257_v24 = vcombine.low %v261_v50, %v265_v37  ;;  %v250_v33 = vld [vmem:[#allocation4 + $0xf0] sm:$0xff] }
 0x10f   :  { %964 = vmatprep.mubr.bf16.mxu1 %v18853_v13  ;;  %1297 = vmatprep.mubr.bf16.mxu0 %v18853_v13  ;;  %v14260_v32 = vcombine.low %v230_v40, %v234_v12  ;;  %v14272_v50 = vcombine.low %v238_v9, %v242_v39  ;;  %v258_v37 = vld [vmem:[#allocation4 + $0x130] sm:$0xff] }
 0x110   :  { %1383 = vmatpush1.bf16.msra.mxu1 %v14214_v45  ;;  %v14243_v45 = vcombine.high %v230_v40, %v234_v12  ;;  %18874 = vst [vmem:[#allocation50_spill] sm:$0xff] %v14257_v24  ;;  %v254_v12 = vld [vmem:[#allocation4 + $0x110] sm:$0xff] }
 0x111   :  { %1384 = vmatprep.subr.bf16.mxu1 %v14217_v0  ;;  %18875 = vst [vmem:[#allocation51_spill] sm:$0xff] %v14260_v32  ;;  %18878 = vst [vmem:[#allocation54_spill] sm:$0xff] %v14272_v50 }
 0x112   :  { %18873 = vst [vmem:[#allocation49_spill] sm:$0xff] %v14243_v45 }
 0x114   :  { %1385 = vmatpush1.bf16.msra.mxu1 %v14226_v48  ;;  %v14268_v48 = vcombine.high %v14236_v31, %v14238_v55 }
 0x115   :  { %1386 = vmatprep.subr.bf16.mxu1 %v14229_v34  ;;  %v14264_v34 = vcombine.high %v238_v9, %v242_v39  ;;  %v262_v39 = vld [vmem:[#allocation4 + $0x150] sm:$0xff] }
 0x116   :  { %10676 = vmatmul.mubr.msk.bf16.gmra.mrb[52].mxu1 %vm548_vm0, %v14017_v1  ;;  %10730 = vmatmul.mubr.msk.bf16.vlgmr.msra.gmra.mrb[52].mxu0 %vm548_vm0, %v14250_v61  ;;  %v246_v1 = vld [vmem:[#allocation4 + $0xd0] sm:$0xff]  ;;  %18877 = vst [vmem:[#allocation53_spill] sm:$0xff] %v14268_v48 }
 0x117   :  { %974 = vmatprep.mubr.bf16.mxu1 %v18853_v13  ;;  %1307 = vmatprep.mubr.bf16.mxu0 %v18853_v13  ;;  %18876 = vst [vmem:[#allocation52_spill] sm:$0xff] %v14264_v34  ;;  %v14276_v40 = vcombine.high %v246_v1, %v250_v33  ;;  %v14290_v9 = vcombine.low %v246_v1, %v250_v33  ;;  %v14306_v1 = vld [vmem:[%s18406_s0 + $0x10] sm:$0xff]  }
 0x118   :  { %1387 = vmatpush1.bf16.msra.mxu1 %v14232_v2  ;;  %1492 = vmatpush1.bf16.msra.mxu0 %v14234_v44 }
 0x119   :  { %1388 = vmatprep.subr.bf16.mxu1 %v14241_v25  ;;  %1493 = vmatprep.subr.bf16.mxu0 %v14243_v45  ;;  %18879 = vst [vmem:[#allocation55_spill] sm:$0xff] %v14276_v40  ;;  %v14283_v45 = vld [vmem:[%s18406_s0 + $0x8] sm:$0xff]   ;;  %18880 = vst [vmem:[#allocation56_spill] sm:$0xff] %v14290_v9 }
 0x11c   :  { %1389 = vmatpush1.bf16.msra.mxu1 %v14257_v24  ;;  %1494 = vmatpush1.bf16.msra.mxu0 %v14260_v32  ;;  %v255_v24 = vld [vmem:[#allocation4 + $0x118] sm:$0xff] }
 0x11d   :  { %1495 = vmatprep.subr.bf16.mxu0 %v14264_v34  ;;  %1604 = vmatprep.subr.bf16.mxu1 %v14268_v48  ;;  %v266_v48 = vld [vmem:[#allocation4 + $0x170] sm:$0xff]  ;;  %v14296_v34 = vcombine.low %v254_v12, %v258_v37 }
 0x11e   :  { %10677 = vmatmul.mubr.msk.bf16.gmra.mrb[56].mxu1 %vm548_vm0, %v14052_v26  ;;  %10731 = vmatmul.mubr.msk.bf16.gmra.mrb[56].mxu0 %vm548_vm0, %v14283_v45  ;;  %v14293_v26 = vcombine.high %v254_v12, %v258_v37  ;;  %v14299_v32 = vcombine.high %v262_v39, %v266_v48  ;;  %v14313_v33 = vcombine.low %v262_v39, %v266_v48  ;;  %v14321_v12 = vld [vmem:[%s18406_s0 + $0x28] sm:$0xff]   ;;  %v14328_v37 = vld [vmem:[%s18406_s0 + $0x18] sm:$0xff]  }
 0x11f   :  { %984 = vmatprep.mubr.bf16.mxu1 %v18853_v13  ;;  %1317 = vmatprep.mubr.bf16.mxu0 %v18853_v13  ;;  %18882 = vst [vmem:[#allocation58_spill] sm:$0xff] %v14296_v34  ;;  %v14348_v48 = vld [vmem:[%s18406_s0 + $0x38] sm:$0xff]  }
 0x120   :  { %1496 = vmatpush1.bf16.msra.mxu0 %v14272_v50  ;;  %18881 = vst [vmem:[#allocation57_spill] sm:$0xff] %v14293_v26  ;;  %18883 = vst [vmem:[#allocation59_spill] sm:$0xff] %v14299_v32  ;;  %v235_v39 = vld [vmem:[#allocation4 + $0x78] sm:$0xff] }
 0x121   :  { %1497 = vmatprep.subr.bf16.mxu0 %v14276_v40  ;;  %18884 = vst [vmem:[#allocation60_spill] sm:$0xff] %v14313_v33  ;;  %v251_v40 = vld [vmem:[#allocation4 + $0xf8] sm:$0xff] }
 0x124   :  { %1498 = vmatpush1.bf16.msra.mxu0 %v14290_v9 }
 0x125   :  { %1499 = vmatprep.subr.bf16.mxu0 %v14293_v26  ;;  %v243_v26 = vld [vmem:[#allocation4 + $0xb8] sm:$0xff] }
 0x126   :  { %10678 = vmatmul.mubr.msk.bf16.gmra.mrb[60].mxu1 %vm548_vm0, %v14085_v56  ;;  %10732 = vmatmul.mubr.msk.bf16.gmra.mrb[60].mxu0 %vm548_vm0, %v14306_v1 }
 0x127   :  { %994 = vmatprep.mubr.bf16.mxu1 %v18853_v13  ;;  %1327 = vmatprep.mubr.bf16.mxu0 %v18853_v13 }
 0x128   :  { %1500 = vmatpush1.bf16.msra.mxu0 %v14296_v34 }
 0x129   :  { %1501 = vmatprep.subr.bf16.mxu0 %v14299_v32  ;;  %v239_v32 = vld [vmem:[#allocation4 + $0x98] sm:$0xff] }
 0x12a   :  { %v14375_v50 = vcombine.low %v239_v32, %v243_v26 }
 0x12c   :  { %1502 = vmatpush1.bf16.msra.mxu0 %v14313_v33  ;;  %v14358_v33 = vcombine.low %v14236_v31, %v14238_v55  ;;  %v14372_v31 = vcombine.high %v239_v32, %v243_v26  ;;  %v247_v55 = vld [vmem:[#allocation4 + $0xd8] sm:$0xff]  ;;  %18889 = vst [vmem:[#allocation65_spill] sm:$0xff] %v14375_v50 }
 0x12d   :  { %1909 = vmatprep.subr.bf16.mxu0 %v13893_v4  ;;  %v14337_v4 = vld [vmem:[%s18406_s0 + $0x30] sm:$0xff]   ;;  %v14378_v25 = vcombine.high %v247_v55, %v251_v40  ;;  %v14387_v32 = vcombine.low %v247_v55, %v251_v40  ;;  %v263_v26 = vld [vmem:[#allocation4 + $0x158] sm:$0xff] }
 0x12e   :  { %10679 = vmatmul.mubr.msk.bf16.gmra.mrb[64].mxu1 %vm548_vm0, %v14321_v12  ;;  %10733 = vmatmul.mubr.msk.bf16.gmra.mrb[64].mxu0 %vm548_vm0, %v14328_v37  ;;  %18885 = vst [vmem:[#allocation61_spill] sm:$0xff] %v14358_v33  ;;  %18888 = vst [vmem:[#allocation64_spill] sm:$0xff] %v14372_v31 }
 0x12f   :  { %1004 = vmatprep.mubr.bf16.mxu1 %v18853_v13  ;;  %1337 = vmatprep.mubr.bf16.mxu0 %v18853_v13  ;;  %18890 = vst [vmem:[#allocation66_spill] sm:$0xff] %v14378_v25  ;;  %18891 = vst [vmem:[#allocation67_spill] sm:$0xff] %v14387_v32 }
 0x136   :  { %10680 = vmatmul.mubr.msk.bf16.gmra.mrb[68].mxu1 %vm548_vm0, %v14337_v4  ;;  %10734 = vmatmul.mubr.msk.bf16.gmra.mrb[68].mxu0 %vm548_vm0, %v14085_v56  ;;  %v231_v56 = vld [vmem:[#allocation4 + $0x58] sm:$0xff] }
 0x137   :  { %1014 = vmatprep.mubr.bf16.mxu1 %v18853_v13  ;;  %1347 = vmatprep.mubr.bf16.mxu0 %v18853_v13  ;;  %v14360_v34 = vcombine.high %v231_v56, %v235_v39  ;;  %v14368_v9 = vcombine.low %v231_v56, %v235_v39  ;;  %v267_v56 = vld [vmem:[#allocation4 + $0x178] sm:$0xff] }
 0x138   :  { %v14405_v40 = vcombine.low %v263_v26, %v267_v56 }
 0x139   :  { %18886 = vst [vmem:[#allocation62_spill] sm:$0xff] %v14360_v34  ;;  %18887 = vst [vmem:[#allocation63_spill] sm:$0xff] %v14368_v9 }
 0x13a   :  { %18895 = vst [vmem:[#allocation71_spill] sm:$0xff] %v14405_v40 }
 0x13e   :  { %10681 = vmatmul.mubr.msk.bf16.gmra.mrb[72].mxu1 %vm548_vm0, %v14348_v48  ;;  %10735 = vmatmul.mubr.msk.bf16.gmra.mrb[72].mxu0 %vm548_vm0, %v14321_v12 }
 0x13f   :  { %1357 = vmatprep.mubr.bf16.mxu0 %v18853_v13  ;;  %1410 = vmatprep.mubr.bf16.mxu1 %v18853_v13 }
 0x146   :  { %10736 = vmatmul.mubr.msk.bf16.gmra.mrb[76].mxu0 %vm548_vm0, %v14337_v4  ;;  %10738 = vmatmul.mubr.msk.bf16.vlgmr.msra.gmra.mrb[76].mxu1 %vm548_vm0, %v14250_v61 }
 0x147   :  { %1605 = vmatpush1.bf16.msra.mxu1 %v14358_v33  ;;  %1367 = vmatprep.mubr.bf16.mxu0 %v18853_v13  ;;  %v259_v33 = vld [vmem:[#allocation4 + $0x138] sm:$0xff] }
 0x148   :  { %1420 = vmatprep.mubr.bf16.mxu1 %v18853_v13  ;;  %1606 = vmatprep.subr.bf16.mxu1 %v14360_v34  ;;  %v14390_v39 = vcombine.high %v255_v24, %v259_v33  ;;  %v14638_v34 = vld [vmem:[%s18407_s1 + $0x20] sm:$0xff]  }
 0x14a   :  { %18892 = vst [vmem:[#allocation68_spill] sm:$0xff] %v14390_v39 }
 0x14b   :  { %1607 = vmatpush1.bf16.msra.mxu1 %v14368_v9  ;;  %v14396_v9 = vcombine.high %v263_v26, %v267_v56 }
 0x14c   :  { %1608 = vmatprep.subr.bf16.mxu1 %v14372_v31  ;;  %v14393_v31 = vcombine.low %v255_v24, %v259_v33 }
 0x14d   :  { %18894 = vst [vmem:[#allocation70_spill] sm:$0xff] %v14396_v9 }
 0x14e   :  { %10737 = vmatmul.mubr.msk.bf16.gmra.mrb[80].mxu0 %vm548_vm0, %v14348_v48  ;;  %10739 = vmatmul.mubr.msk.bf16.gmra.mrb[80].mxu1 %vm548_vm0, %v14283_v45  ;;  %18893 = vst [vmem:[#allocation69_spill] sm:$0xff] %v14393_v31 }
 0x14f   :  { %1430 = vmatprep.mubr.bf16.mxu1 %v18853_v13  ;;  %1523 = vmatprep.mubr.bf16.mxu0 %v18853_v13 }
 0x150   :  { %1609 = vmatpush1.bf16.msra.mxu1 %v14375_v50 }
 0x151   :  { %1610 = vmatprep.subr.bf16.mxu1 %v14378_v25 }
 0x154   :  { %1611 = vmatpush1.bf16.msra.mxu1 %v14387_v32 }
 0x155   :  { %1612 = vmatprep.subr.bf16.mxu1 %v14390_v39 }
 0x156   :  { %10740 = vmatmul.mubr.msk.bf16.gmra.mrb[84].mxu1 %vm548_vm0, %v14306_v1  ;;  %10746 = vmatmul.mubr.msk.bf16.vlgmr.msra.gmra.mrb[84].mxu0 %vm548_vm0, %v14250_v61 }
 0x157   :  { %1440 = vmatprep.mubr.bf16.mxu1 %v18853_v13  ;;  %1533 = vmatprep.mubr.bf16.mxu0 %v18853_v13 }
 0x158   :  { %1613 = vmatpush1.bf16.msra.mxu1 %v14393_v31  ;;  %1910 = vmatpush1.bf16.msra.mxu0 %v13895_v5  ;;  %v14427_v5 = vld [vmem:[%s18406_s0 + $0x20] sm:$0xff]  }
 0x159   :  { %1614 = vmatprep.subr.bf16.mxu1 %v14396_v9  ;;  %1911 = vmatprep.subr.bf16.mxu0 %v13897_v7 }
 0x15c   :  { %1615 = vmatpush1.bf16.msra.mxu1 %v14405_v40  ;;  %1912 = vmatpush1.bf16.msra.mxu0 %v13903_v10 }
 0x15d   :  { %1913 = vmatprep.subr.bf16.mxu0 %v13907_v11  ;;  %2022 = vmatprep.subr.bf16.mxu1 %v13939_v29 }
 0x15e   :  { %10741 = vmatmul.mubr.msk.bf16.gmra.mrb[88].mxu1 %vm548_vm0, %v14328_v37  ;;  %10747 = vmatmul.mubr.msk.bf16.gmra.mrb[88].mxu0 %vm548_vm0, %v14283_v45 }
 0x15f   :  { %1450 = vmatprep.mubr.bf16.mxu1 %v18853_v13  ;;  %1543 = vmatprep.mubr.bf16.mxu0 %v18853_v13 }
 0x160   :  { %1914 = vmatpush1.bf16.msra.mxu0 %v13911_v14 }
 0x161   :  { %1915 = vmatprep.subr.bf16.mxu0 %v13915_v15 }
 0x164   :  { %1916 = vmatpush1.bf16.msra.mxu0 %v13919_v18 }
 0x165   :  { %1917 = vmatprep.subr.bf16.mxu0 %v13923_v19 }
 0x166   :  { %10742 = vmatmul.mubr.msk.bf16.gmra.mrb[92].mxu1 %vm548_vm0, %v14427_v5  ;;  %10748 = vmatmul.mubr.msk.bf16.gmra.mrb[92].mxu0 %vm548_vm0, %v14306_v1 }
 0x167   :  { %1460 = vmatprep.mubr.bf16.mxu1 %v18853_v13  ;;  %1553 = vmatprep.mubr.bf16.mxu0 %v18853_v13 }
 0x168   :  { %1918 = vmatpush1.bf16.msra.mxu0 %v13927_v22 }
 0x169   :  { %1919 = vmatprep.subr.bf16.mxu0 %v13931_v23 }
 0x16c   :  { %1920 = vmatpush1.bf16.msra.mxu0 %v13935_v28 }
 0x16d   :  { %2135 = vmatprep.subr.bf16.mxu0 %v13941_v30 }
 0x16e   :  { %10743 = vmatmul.mubr.msk.bf16.gmra.mrb[96].mxu1 %vm548_vm0, %v14321_v12  ;;  %10749 = vmatmul.mubr.msk.bf16.gmra.mrb[96].mxu0 %vm548_vm0, %v14328_v37 }
 0x16f   :  { %1470 = vmatprep.mubr.bf16.mxu1 %v18853_v13  ;;  %1563 = vmatprep.mubr.bf16.mxu0 %v18853_v13 }
 0x176   :  { %10744 = vmatmul.mubr.msk.bf16.gmra.mrb[100].mxu1 %vm548_vm0, %v14337_v4  ;;  %10750 = vmatmul.mubr.msk.bf16.gmra.mrb[100].mxu0 %vm548_vm0, %v14427_v5 }
 0x177   :  { %1480 = vmatprep.mubr.bf16.mxu1 %v18853_v13  ;;  %1573 = vmatprep.mubr.bf16.mxu0 %v18853_v13 }
 0x17e   :  { %10745 = vmatmul.mubr.msk.bf16.gmra.mrb[104].mxu1 %vm548_vm0, %v14348_v48  ;;  %10751 = vmatmul.mubr.msk.bf16.gmra.mrb[104].mxu0 %vm548_vm0, %v14321_v12 }
 0x17f   :  { %1583 = vmatprep.mubr.bf16.mxu0 %v18853_v13  ;;  %1636 = vmatprep.mubr.bf16.mxu1 %v18853_v13 }
 0x181   :  { %v14457_v7 = vpop.f32.mrb[0].mxu1  ;;  %v14459_v10 = vpop.f32.mrb[0].mxu0 }
 0x182   :  { %18896 = vst [vmem:[#allocation72_spill] sm:$0xff] %v14459_v10  ;;  %v14461_v11 = vpop.f32.mrb[1].mxu1  ;;  %v14463_v14 = vpop.f32.mrb[1].mxu0 }
 0x183   :  { %18897 = vst [vmem:[#allocation73_spill] sm:$0xff] %v14463_v14  ;;  %v14465_v15 = vpop.f32.mrb[2].mxu1  ;;  %v14467_v18 = vpop.f32.mrb[2].mxu0 }
 0x184   :  { %18898 = vst [vmem:[#allocation74_spill] sm:$0xff] %v14467_v18  ;;  %v14469_v19 = vpop.f32.mrb[3].mxu1  ;;  %v14471_v22 = vpop.f32.mrb[3].mxu0 }
 0x185   :  { %18899 = vst [vmem:[#allocation75_spill] sm:$0xff] %v14469_v19  ;;  %18900 = vst [vmem:[#allocation76_spill] sm:$0xff] %v14471_v22 }
 0x186   :  { %10752 = vmatmul.mubr.msk.bf16.gmra.mrb[108].mxu0 %vm548_vm0, %v14337_v4  ;;  %10754 = vmatmul.mubr.msk.bf16.vlgmr.msra.gmra.mrb[108].mxu1 %vm548_vm0, %v14250_v61 }
 0x187   :  { %2023 = vmatpush1.bf16.msra.mxu1 %v13955_v35  ;;  %1593 = vmatprep.mubr.bf16.mxu0 %v18853_v13 }
 0x188   :  { %1646 = vmatprep.mubr.bf16.mxu1 %v18853_v13  ;;  %2024 = vmatprep.subr.bf16.mxu1 %v13958_v38  ;;  %v14508_v38 = vld [vmem:[%s18407_s1] sm:$0xff]  }
 0x189   :  { %v14481_v23 = vpop.f32.mrb[4].mxu1  ;;  %v14483_v28 = vpop.f32.mrb[4].mxu0 }
 0x18a   :  { %18901 = vst [vmem:[#allocation77_spill] sm:$0xff] %v14483_v28  ;;  %v14485_v29 = vpop.f32.mrb[5].mxu1  ;;  %v14487_v30 = vpop.f32.mrb[5].mxu0 }
 0x18b   :  { %18902 = vst [vmem:[#allocation78_spill] sm:$0xff] %v14487_v30  ;;  %v14489_v24 = vpop.f32.mrb[6].mxu1  ;;  %2025 = vmatpush1.bf16.msra.mxu1 %v13970_v43  ;;  %v14492_v61 = vpop.f32.mrb[6].mxu0 }
 0x18c   :  { %18903 = vst [vmem:[#allocation79_spill] sm:$0xff] %v14492_v61  ;;  %v14494_v35 = vpop.f32.mrb[7].mxu1  ;;  %2026 = vmatprep.subr.bf16.mxu1 %v13985_v46  ;;  %v14497_v33 = vpop.f32.mrb[7].mxu0 }
 0x18d   :  { %18904 = vst [vmem:[#allocation80_spill] sm:$0xff] %v14494_v35  ;;  %18905 = vst [vmem:[#allocation81_spill] sm:$0xff] %v14497_v33 }
 0x18e   :  { %10753 = vmatmul.mubr.msk.bf16.gmra.mrb[112].mxu0 %vm548_vm0, %v14348_v48  ;;  %10755 = vmatmul.mubr.msk.bf16.gmra.mrb[112].mxu1 %vm548_vm0, %v14283_v45 }
 0x18f   :  { %1656 = vmatprep.mubr.bf16.mxu1 %v18853_v13  ;;  %1941 = vmatprep.mubr.bf16.mxu0 %v18853_v13 }
 0x190   :  { %2027 = vmatpush1.bf16.msra.mxu1 %v13992_v54  ;;  %v14539_v54 = vld [vmem:[%s18407_s1 + $0x8] sm:$0xff]  }
 0x191   :  { %v14511_v43 = vpop.f32.mrb[8].mxu1  ;;  %2028 = vmatprep.subr.bf16.mxu1 %v13995_v57  ;;  %v14514_v46 = vpop.f32.mrb[8].mxu0 }
 0x192   :  { %18906 = vst [vmem:[#allocation82_spill] sm:$0xff] %v14511_v43  ;;  %18907 = vst [vmem:[#allocation83_spill] sm:$0xff] %v14514_v46  ;;  %v14516_v12 = vpop.f32.mrb[9].mxu1  ;;  %v14518_v45 = vpop.f32.mrb[9].mxu0 }
 0x193   :  { %18908 = vst [vmem:[#allocation84_spill] sm:$0xff] %v14516_v12  ;;  %18909 = vst [vmem:[#allocation85_spill] sm:$0xff] %v14518_v45  ;;  %v14520_v4 = vpop.f32.mrb[10].mxu1  ;;  %v14522_v48 = vpop.f32.mrb[10].mxu0  ;;  %v19047_v45 = vld [vmem:[#allocation42_spill] sm:$0xff] }
 0x194   :  { %18910 = vst [vmem:[#allocation86_spill] sm:$0xff] %v14520_v4  ;;  %18911 = vst [vmem:[#allocation87_spill] sm:$0xff] %v14522_v48  ;;  %v14524_v55 = vpop.f32.mrb[11].mxu1  ;;  %2029 = vmatpush1.bf16.msra.mxu1 %v14007_v60  ;;  %v14527_v26 = vpop.f32.mrb[11].mxu0 }
 0x195   :  { %18912 = vst [vmem:[#allocation88_spill] sm:$0xff] %v14524_v55  ;;  %18913 = vst [vmem:[#allocation89_spill] sm:$0xff] %v14527_v26  ;;  %2030 = vmatprep.subr.bf16.mxu1 %v14024_v3 }
 0x196   :  { %10756 = vmatmul.mubr.msk.bf16.gmra.mrb[116].mxu1 %vm548_vm0, %v14306_v1  ;;  %10770 = vmatmul.mubr.msk.bf16.vlgmr.msra.gmra.mrb[116].mxu0 %vm548_vm0, %v14508_v38 }
 0x197   :  { %1666 = vmatprep.mubr.bf16.mxu1 %v18853_v13  ;;  %1951 = vmatprep.mubr.bf16.mxu0 %v18853_v13 }
 0x198   :  { %2031 = vmatpush1.bf16.msra.mxu1 %v14029_v6  ;;  %2136 = vmatpush1.bf16.msra.mxu0 %v13961_v41 }
 0x199   :  { %v14543_v57 = vpop.f32.mrb[12].mxu1  ;;  %2032 = vmatprep.subr.bf16.mxu1 %v14033_v16  ;;  %v14546_v60 = vpop.f32.mrb[12].mxu0  ;;  %2137 = vmatprep.subr.bf16.mxu0 %v13967_v42  ;;  %v14574_v42 = vld [vmem:[%s18407_s1 + $0x10] sm:$0xff]  }
 0x19a   :  { %18914 = vst [vmem:[#allocation90_spill] sm:$0xff] %v14543_v57  ;;  %18915 = vst [vmem:[#allocation91_spill] sm:$0xff] %v14546_v60  ;;  %v14549_v3 = vpop.f32.mrb[13].mxu1  ;;  %v14551_v1 = vpop.f32.mrb[13].mxu0  ;;  %v19054_v60 = vld [vmem:[#allocation43_spill] sm:$0xff]  ;;  %v19075_v57 = vld [vmem:[#allocation50_spill] sm:$0xff] }
 0x19b   :  { %18916 = vst [vmem:[#allocation92_spill] sm:$0xff] %v14549_v3  ;;  %18917 = vst [vmem:[#allocation93_spill] sm:$0xff] %v14551_v1  ;;  %v14553_v56 = vpop.f32.mrb[14].mxu1  ;;  %v14555_v40 = vpop.f32.mrb[14].mxu0  ;;  %v19077_v3 = vld [vmem:[#allocation52_spill] sm:$0xff] }
 0x19c   :  { %18918 = vst [vmem:[#allocation94_spill] sm:$0xff] %v14555_v40  ;;  %v14557_v9 = vpop.f32.mrb[15].mxu1  ;;  %2033 = vmatpush1.bf16.msra.mxu1 %v14044_v21  ;;  %2138 = vmatpush1.bf16.msra.mxu0 %v13988_v49  ;;  %v14561_v41 = vpop.f32.mrb[15].mxu0 }
 0x19d   :  { %18919 = vst [vmem:[#allocation95_spill] sm:$0xff] %v14557_v9  ;;  %18920 = vst [vmem:[#allocation96_spill] sm:$0xff] %v14561_v41  ;;  %2139 = vmatprep.subr.bf16.mxu0 %v13998_v58  ;;  %2248 = vmatprep.subr.bf16.mxu1 %v14054_v27  ;;  %v19057_v41 = vld [vmem:[#allocation44_spill] sm:$0xff] }
 0x19e   :  { %10757 = vmatmul.mubr.msk.bf16.gmra.mrb[120].mxu1 %vm548_vm0, %v14328_v37  ;;  %10771 = vmatmul.mubr.msk.bf16.gmra.mrb[120].mxu0 %vm548_vm0, %v14539_v54 }
 0x19f   :  { %1676 = vmatprep.mubr.bf16.mxu1 %v18853_v13  ;;  %1961 = vmatprep.mubr.bf16.mxu0 %v18853_v13 }
 0x1a0   :  { %2140 = vmatpush1.bf16.msra.mxu0 %v14004_v59  ;;  %v14605_v59 = vld [vmem:[%s18407_s1 + $0x18] sm:$0xff]  }
 0x1a1   :  { %v14577_v49 = vpop.f32.mrb[16].mxu1  ;;  %v14579_v58 = vpop.f32.mrb[16].mxu0  ;;  %2141 = vmatprep.subr.bf16.mxu0 %v14010_v63 }
 0x1a2   :  { %18921 = vst [vmem:[#allocation97_spill] sm:$0xff] %v14577_v49  ;;  %18922 = vst [vmem:[#allocation98_spill] sm:$0xff] %v14579_v58  ;;  %v14582_v6 = vpop.f32.mrb[17].mxu1  ;;  %v14584_v16 = vpop.f32.mrb[17].mxu0  ;;  %v19066_v58 = vld [vmem:[#allocation46_spill] sm:$0xff] }
 0x1a3   :  { %18923 = vst [vmem:[#allocation99_spill] sm:$0xff] %v14582_v6  ;;  %18924 = vst [vmem:[#allocation100_spill] sm:$0xff] %v14584_v16  ;;  %v14586_v21 = vpop.f32.mrb[18].mxu1  ;;  %v14588_v27 = vpop.f32.mrb[18].mxu0  ;;  %v19093_v6 = vld [vmem:[#allocation57_spill] sm:$0xff] }
 0x1a4   :  { %18925 = vst [vmem:[#allocation101_spill] sm:$0xff] %v14586_v21  ;;  %18926 = vst [vmem:[#allocation102_spill] sm:$0xff] %v14588_v27  ;;  %v14590_v37 = vpop.f32.mrb[19].mxu1  ;;  %v14592_v31 = vpop.f32.mrb[19].mxu0  ;;  %2142 = vmatpush1.bf16.msra.mxu0 %v14035_v17  ;;  %v18973_v21 = vld [vmem:[#allocation24_spill] sm:$0xff] }
 0x1a5   :  { %18927 = vst [vmem:[#allocation103_spill] sm:$0xff] %v14590_v37  ;;  %18928 = vst [vmem:[#allocation104_spill] sm:$0xff] %v14592_v31  ;;  %2143 = vmatprep.subr.bf16.mxu0 %v14041_v20 }
 0x1a6   :  { %10758 = vmatmul.mubr.msk.bf16.gmra.mrb[124].mxu1 %vm548_vm0, %v14427_v5  ;;  %10772 = vmatmul.mubr.msk.bf16.gmra.mrb[124].mxu0 %vm548_vm0, %v14574_v42 }
 0x1a7   :  { %1686 = vmatprep.mubr.bf16.mxu1 %v18853_v13  ;;  %1971 = vmatprep.mubr.bf16.mxu0 %v18853_v13 }
 0x1a8   :  { %2144 = vmatpush1.bf16.msra.mxu0 %v14057_v36  ;;  %v18937_v36 = vld [vmem:[#allocation23_spill] sm:$0xff] }
 0x1a9   :  { %v14608_v63 = vpop.f32.mrb[20].mxu1  ;;  %v14610_v17 = vpop.f32.mrb[20].mxu0  ;;  %2145 = vmatprep.subr.bf16.mxu0 %v14067_v51  ;;  %v13508_v51 = vld [vmem:[%s18406_s0 + $0x28] sm:$0xff]  }
 0x1aa   :  { %18929 = vst [vmem:[#allocation105_spill] sm:$0xff] %v14608_v63  ;;  %18930 = vst [vmem:[#allocation106_spill] sm:$0xff] %v14610_v17  ;;  %v14613_v20 = vpop.f32.mrb[21].mxu1  ;;  %v14615_v5 = vpop.f32.mrb[21].mxu0  ;;  %v13510_v17 = vld [vmem:[%s18406_s0 + $0x38] sm:$0xff]  }
 0x1ab   :  { %18931 = vst [vmem:[#allocation107_spill] sm:$0xff] %v14613_v20  ;;  %18932 = vst [vmem:[#allocation108_spill] sm:$0xff] %v14615_v5  ;;  %v14617_v39 = vpop.f32.mrb[22].mxu1  ;;  %v14619_v32 = vpop.f32.mrb[22].mxu0  ;;  %v13509_v20 = vld [vmem:[%s18406_s0 + $0x30] sm:$0xff]  }
 0x1ac   :  { %18933 = vst [vmem:[#allocation109_spill] sm:$0xff] %v14617_v39  ;;  %18934 = vst [vmem:[#allocation110_spill] sm:$0xff] %v14619_v32  ;;  %v14621_v25 = vpop.f32.mrb[23].mxu1  ;;  %v14623_v50 = vpop.f32.mrb[23].mxu0  ;;  %2146 = vmatpush1.bf16.msra.mxu0 %v14073_v52 }
 0x1ad   :  { %18935 = vst [vmem:[#allocation111_spill] sm:$0xff] %v14621_v25  ;;  %18936 = vst [vmem:[#allocation112_spill] sm:$0xff] %v14623_v50  ;;  %2361 = vmatprep.subr.bf16.mxu0 %v18937_v36 }
 0x1ae   :  { %10759 = vmatmul.mubr.msk.bf16.gmra.mrb[128].mxu1 %vm548_vm0, %v13508_v51  ;;  %10773 = vmatmul.mubr.msk.bf16.gmra.mrb[128].mxu0 %vm548_vm0, %v14605_v59 }
 0x1af   :  { %1696 = vmatprep.mubr.bf16.mxu1 %v18853_v13  ;;  %1981 = vmatprep.mubr.bf16.mxu0 %v18853_v13 }
 0x1b1   :  { %v14640_v52 = vpop.f32.mrb[24].mxu1  ;;  %v14642_v36 = vpop.f32.mrb[24].mxu0 }
 0x1b2   :  { %18938 = vst [vmem:[#allocation23_spill] sm:$0xff] %v14640_v52  ;;  %18939 = vst [vmem:[#allocation113_spill] sm:$0xff] %v14642_v36  ;;  %v14644_v50 = vpop.f32.mrb[25].mxu1  ;;  %v14646_v25 = vpop.f32.mrb[25].mxu0 }
 0x1b3   :  { %18940 = vst [vmem:[#allocation114_spill] sm:$0xff] %v14644_v50  ;;  %18941 = vst [vmem:[#allocation115_spill] sm:$0xff] %v14646_v25  ;;  %v14648_v51 = vpop.f32.mrb[26].mxu1  ;;  %v14650_v32 = vpop.f32.mrb[26].mxu0 }
 0x1b4   :  { %18942 = vst [vmem:[#allocation116_spill] sm:$0xff] %v14648_v51  ;;  %18943 = vst [vmem:[#allocation117_spill] sm:$0xff] %v14650_v32  ;;  %v14652_v39 = vpop.f32.mrb[27].mxu1  ;;  %v14654_v5 = vpop.f32.mrb[27].mxu0  ;;  %v14667_v32 = vld [vmem:[%s18407_s1 + $0x28] sm:$0xff]  }
 0x1b5   :  { %18944 = vst [vmem:[#allocation118_spill] sm:$0xff] %v14652_v39  ;;  %18945 = vst [vmem:[#allocation119_spill] sm:$0xff] %v14654_v5 }
 0x1b6   :  { %10760 = vmatmul.mubr.msk.bf16.gmra.mrb[132].mxu1 %vm548_vm0, %v13509_v20  ;;  %10774 = vmatmul.mubr.msk.bf16.gmra.mrb[132].mxu0 %vm548_vm0, %v14638_v34 }
 0x1b7   :  { %1706 = vmatprep.mubr.bf16.mxu1 %v18853_v13  ;;  %1991 = vmatprep.mubr.bf16.mxu0 %v18853_v13 }
 0x1b9   :  { %v14669_v39 = vpop.f32.mrb[28].mxu1  ;;  %v14671_v5 = vpop.f32.mrb[28].mxu0 }
 0x1ba   :  { %18946 = vst [vmem:[#allocation120_spill] sm:$0xff] %v14669_v39  ;;  %18947 = vst [vmem:[#allocation121_spill] sm:$0xff] %v14671_v5  ;;  %v14673_v51 = vpop.f32.mrb[29].mxu1  ;;  %v14675_v25 = vpop.f32.mrb[29].mxu0 }
 0x1bb   :  { %18948 = vst [vmem:[#allocation122_spill] sm:$0xff] %v14673_v51  ;;  %18949 = vst [vmem:[#allocation123_spill] sm:$0xff] %v14675_v25  ;;  %v14677_v20 = vpop.f32.mrb[30].mxu1  ;;  %v14679_v50 = vpop.f32.mrb[30].mxu0 }
 0x1bc   :  { %18950 = vst [vmem:[#allocation124_spill] sm:$0xff] %v14677_v20  ;;  %18951 = vst [vmem:[#allocation125_spill] sm:$0xff] %v14679_v50  ;;  %v14681_v36 = vpop.f32.mrb[31].mxu1  ;;  %v14683_v52 = vpop.f32.mrb[31].mxu0  ;;  %v14696_v50 = vld [vmem:[%s18407_s1 + $0x30] sm:$0xff]  }
 0x1bd   :  { %18952 = vst [vmem:[#allocation126_spill] sm:$0xff] %v14681_v36  ;;  %18953 = vst [vmem:[#allocation127_spill] sm:$0xff] %v14683_v52 }
 0x1be   :  { %10761 = vmatmul.mubr.msk.bf16.gmra.mrb[136].mxu1 %vm548_vm0, %v13510_v17  ;;  %10775 = vmatmul.mubr.msk.bf16.gmra.mrb[136].mxu0 %vm548_vm0, %v14667_v32 }
 0x1bf   :  { %2001 = vmatprep.mubr.bf16.mxu0 %v18853_v13  ;;  %2054 = vmatprep.mubr.bf16.mxu1 %v18853_v13 }
 0x1c1   :  { %v14698_v36 = vpop.f32.mrb[32].mxu1  ;;  %v14700_v52 = vpop.f32.mrb[32].mxu0 }
 0x1c2   :  { %18954 = vst [vmem:[#allocation128_spill] sm:$0xff] %v14698_v36  ;;  %18955 = vst [vmem:[#allocation129_spill] sm:$0xff] %v14700_v52  ;;  %v14702_v20 = vpop.f32.mrb[33].mxu1  ;;  %v14704_v25 = vpop.f32.mrb[33].mxu0  ;;  %v18962_v36 = vld [vmem:[#allocation20_spill] sm:$0xff]  ;;  %v18969_v52 = vld [vmem:[#allocation22_spill] sm:$0xff] }
 0x1c3   :  { %18956 = vst [vmem:[#allocation130_spill] sm:$0xff] %v14702_v20  ;;  %18957 = vst [vmem:[#allocation131_spill] sm:$0xff] %v14704_v25  ;;  %v14706_v17 = vpop.f32.mrb[34].mxu1  ;;  %v14708_v51 = vpop.f32.mrb[34].mxu0 }
 0x1c4   :  { %18958 = vst [vmem:[#allocation132_spill] sm:$0xff] %v14706_v17  ;;  %18959 = vst [vmem:[#allocation133_spill] sm:$0xff] %v14708_v51  ;;  %v14710_v5 = vpop.f32.mrb[35].mxu1  ;;  %v14712_v39 = vpop.f32.mrb[35].mxu0  ;;  %v14724_v51 = vld [vmem:[%s18407_s1 + $0x38] sm:$0xff]  }
 0x1c5   :  { %18960 = vst [vmem:[#allocation134_spill] sm:$0xff] %v14710_v5  ;;  %18961 = vst [vmem:[#allocation135_spill] sm:$0xff] %v14712_v39  ;;  %v18963_v5 = vld [vmem:[#allocation21_spill] sm:$0xff] }
 0x1c6   :  { %10776 = vmatmul.mubr.msk.bf16.gmra.mrb[140].mxu0 %vm548_vm0, %v14696_v50  ;;  %10778 = vmatmul.mubr.msk.bf16.vlgmr.msra.gmra.mrb[140].mxu1 %vm548_vm0, %v14508_v38 }
 0x1c7   :  { %2249 = vmatpush1.bf16.msra.mxu1 %v18962_v36  ;;  %2011 = vmatprep.mubr.bf16.mxu0 %v18853_v13 }
 0x1c8   :  { %2064 = vmatprep.mubr.bf16.mxu1 %v18853_v13  ;;  %2250 = vmatprep.subr.bf16.mxu1 %v18963_v5  ;;  %v18974_v5 = vld [vmem:[#allocation25_spill] sm:$0xff] }
 0x1c9   :  { %v14727_v39 = vpop.f32.mrb[36].mxu1  ;;  %v14729_v17 = vpop.f32.mrb[36].mxu0 }
 0x1ca   :  { %18964 = vst [vmem:[#allocation20_spill] sm:$0xff] %v14727_v39  ;;  %18965 = vst [vmem:[#allocation21_spill] sm:$0xff] %v14729_v17  ;;  %v14731_v25 = vpop.f32.mrb[37].mxu1  ;;  %v14733_v20 = vpop.f32.mrb[37].mxu0  ;;  %v18984_v39 = vld [vmem:[#allocation27_spill] sm:$0xff] }
 0x1cb   :  { %18966 = vst [vmem:[#allocation136_spill] sm:$0xff] %v14731_v25  ;;  %18967 = vst [vmem:[#allocation137_spill] sm:$0xff] %v14733_v20  ;;  %v14735_v36 = vpop.f32.mrb[38].mxu1  ;;  %2251 = vmatpush1.bf16.msra.mxu1 %v18969_v52  ;;  %v14738_v63 = vpop.f32.mrb[38].mxu0 }
 0x1cc   :  { %18968 = vst [vmem:[#allocation138_spill] sm:$0xff] %v14735_v36  ;;  %18970 = vst [vmem:[#allocation22_spill] sm:$0xff] %v14738_v63  ;;  %v14740_v37 = vpop.f32.mrb[39].mxu1  ;;  %v14742_v55 = vpop.f32.mrb[39].mxu0  ;;  %2252 = vmatprep.subr.bf16.mxu1 %v18973_v21 }
 0x1cd   :  { %18971 = vst [vmem:[#allocation139_spill] sm:$0xff] %v14740_v37  ;;  %18972 = vst [vmem:[#allocation140_spill] sm:$0xff] %v14742_v55  ;;  %v18977_v37 = vld [vmem:[#allocation26_spill] sm:$0xff] }
 0x1ce   :  { %10777 = vmatmul.mubr.msk.bf16.gmra.mrb[144].mxu0 %vm548_vm0, %v14724_v51  ;;  %10779 = vmatmul.mubr.msk.bf16.gmra.mrb[144].mxu1 %vm548_vm0, %v14539_v54 }
 0x1cf   :  { %2074 = vmatprep.mubr.bf16.mxu1 %v18853_v13  ;;  %2167 = vmatprep.mubr.bf16.mxu0 %v18853_v13 }
 0x1d0   :  { %2253 = vmatpush1.bf16.msra.mxu1 %v18974_v5  ;;  %v18985_v5 = vld [vmem:[#allocation28_spill] sm:$0xff] }
 0x1d1   :  { %v14752_v52 = vpop.f32.mrb[40].mxu1  ;;  %v14754_v63 = vpop.f32.mrb[40].mxu0  ;;  %2254 = vmatprep.subr.bf16.mxu1 %v18977_v37  ;;  %v18986_v37 = vld [vmem:[#allocation29_spill] sm:$0xff] }
 0x1d2   :  { %18975 = vst [vmem:[#allocation24_spill] sm:$0xff] %v14752_v52  ;;  %18976 = vst [vmem:[#allocation25_spill] sm:$0xff] %v14754_v63  ;;  %v14757_v55 = vpop.f32.mrb[41].mxu1  ;;  %v14759_v21 = vpop.f32.mrb[41].mxu0  ;;  %v19193_v52 = vld [vmem:[#allocation67_spill] sm:$0xff] }
 0x1d3   :  { %18978 = vst [vmem:[#allocation26_spill] sm:$0xff] %v14757_v55  ;;  %18979 = vst [vmem:[#allocation141_spill] sm:$0xff] %v14759_v21  ;;  %v14761_v36 = vpop.f32.mrb[42].mxu1  ;;  %v14763_v20 = vpop.f32.mrb[42].mxu0  ;;  %v19196_v21 = vld [vmem:[#allocation68_spill] sm:$0xff] }
 0x1d4   :  { %18980 = vst [vmem:[#allocation142_spill] sm:$0xff] %v14761_v36  ;;  %18981 = vst [vmem:[#allocation143_spill] sm:$0xff] %v14763_v20  ;;  %v14765_v25 = vpop.f32.mrb[43].mxu1  ;;  %v14767_v17 = vpop.f32.mrb[43].mxu0  ;;  %2255 = vmatpush1.bf16.msra.mxu1 %v18984_v39 }
 0x1d5   :  { %18982 = vst [vmem:[#allocation144_spill] sm:$0xff] %v14765_v25  ;;  %18983 = vst [vmem:[#allocation145_spill] sm:$0xff] %v14767_v17  ;;  %2256 = vmatprep.subr.bf16.mxu1 %v18985_v5 }
 0x1d6   :  { %10780 = vmatmul.mubr.msk.bf16.gmra.mrb[148].mxu1 %vm548_vm0, %v14574_v42  ;;  %10786 = vmatmul.mubr.msk.bf16.vlgmr.msra.gmra.mrb[148].mxu0 %vm548_vm0, %v14508_v38 }
 0x1d7   :  { %2084 = vmatprep.mubr.bf16.mxu1 %v18853_v13  ;;  %2177 = vmatprep.mubr.bf16.mxu0 %v18853_v13 }
 0x1d8   :  { %2257 = vmatpush1.bf16.msra.mxu1 %v14112_v53  ;;  %2362 = vmatpush1.bf16.msra.mxu0 %v18986_v37  ;;  %v18995_v37 = vld [vmem:[#allocation30_spill] sm:$0xff] }
 0x1d9   :  { %v14779_v25 = vpop.f32.mrb[44].mxu1  ;;  %v14781_v17 = vpop.f32.mrb[44].mxu0  ;;  %2258 = vmatprep.subr.bf16.mxu1 %v14117_v62  ;;  %2363 = vmatprep.subr.bf16.mxu0 %v14119_v8  ;;  %v18997_v62 = vld [vmem:[#allocation32_spill] sm:$0xff]  ;;  %v18998_v8 = vld [vmem:[#allocation33_spill] sm:$0xff] }
 0x1da   :  { %18987 = vst [vmem:[#allocation27_spill] sm:$0xff] %v14779_v25  ;;  %18988 = vst [vmem:[#allocation28_spill] sm:$0xff] %v14781_v17  ;;  %v14785_v39 = vpop.f32.mrb[45].mxu1  ;;  %v14787_v5 = vpop.f32.mrb[45].mxu0  ;;  %v18996_v25 = vld [vmem:[#allocation31_spill] sm:$0xff] }
 0x1db   :  { %18989 = vst [vmem:[#allocation29_spill] sm:$0xff] %v14785_v39  ;;  %18990 = vst [vmem:[#allocation146_spill] sm:$0xff] %v14787_v5  ;;  %v14789_v38 = vpop.f32.mrb[46].mxu1  ;;  %v14791_v20 = vpop.f32.mrb[46].mxu0  ;;  %v19008_v39 = vld [vmem:[#allocation35_spill] sm:$0xff] }
 0x1dc   :  { %18991 = vst [vmem:[#allocation147_spill] sm:$0xff] %v14789_v38  ;;  %18992 = vst [vmem:[#allocation148_spill] sm:$0xff] %v14791_v20  ;;  %v14793_v36 = vpop.f32.mrb[47].mxu1  ;;  %v14795_v53 = vpop.f32.mrb[47].mxu0  ;;  %2259 = vmatpush1.bf16.msra.mxu1 %v14128_v47  ;;  %2364 = vmatpush1.bf16.msra.mxu0 %v18995_v37  ;;  %v19001_v37 = vld [vmem:[#allocation34_spill] sm:$0xff]  ;;  %v19211_v17 = vld [vmem:[#allocation71_spill] sm:$0xff] }
 0x1dd   :  { %18993 = vst [vmem:[#allocation149_spill] sm:$0xff] %v14793_v36  ;;  %18994 = vst [vmem:[#allocation150_spill] sm:$0xff] %v14795_v53  ;;  %2365 = vmatprep.subr.bf16.mxu0 %v18996_v25  ;;  %2474 = vmatprep.subr.bf16.mxu1 %v18997_v62 }
 0x1de   :  { %10781 = vmatmul.mubr.msk.bf16.gmra.mrb[152].mxu1 %vm548_vm0, %v14605_v59  ;;  %10787 = vmatmul.mubr.msk.bf16.gmra.mrb[152].mxu0 %vm548_vm0, %v14539_v54 }
 0x1df   :  { %2094 = vmatprep.mubr.bf16.mxu1 %v18853_v13  ;;  %2187 = vmatprep.mubr.bf16.mxu0 %v18853_v13 }
 0x1e0   :  { %2366 = vmatpush1.bf16.msra.mxu0 %v18998_v8  ;;  %v19009_v8 = vld [vmem:[#allocation36_spill] sm:$0xff] }
 0x1e1   :  { %v14808_v36 = vpop.f32.mrb[48].mxu1  ;;  %v14810_v47 = vpop.f32.mrb[48].mxu0  ;;  %2367 = vmatprep.subr.bf16.mxu0 %v19001_v37  ;;  %v19010_v37 = vld [vmem:[#allocation37_spill] sm:$0xff] }
 0x1e2   :  { %18999 = vst [vmem:[#allocation30_spill] sm:$0xff] %v14808_v36  ;;  %19000 = vst [vmem:[#allocation31_spill] sm:$0xff] %v14810_v47  ;;  %v14813_v25 = vpop.f32.mrb[49].mxu1  ;;  %v14815_v62 = vpop.f32.mrb[49].mxu0  ;;  %v19020_v47 = vld [vmem:[#allocation39_spill] sm:$0xff] }
 0x1e3   :  { %19002 = vst [vmem:[#allocation32_spill] sm:$0xff] %v14813_v25  ;;  %19003 = vst [vmem:[#allocation33_spill] sm:$0xff] %v14815_v62  ;;  %v14817_v53 = vpop.f32.mrb[50].mxu1  ;;  %v14819_v38 = vpop.f32.mrb[50].mxu0 }
 0x1e4   :  { %19004 = vst [vmem:[#allocation34_spill] sm:$0xff] %v14817_v53  ;;  %19005 = vst [vmem:[#allocation151_spill] sm:$0xff] %v14819_v38  ;;  %v14821_v54 = vpop.f32.mrb[51].mxu1  ;;  %v14823_v20 = vpop.f32.mrb[51].mxu0  ;;  %2368 = vmatpush1.bf16.msra.mxu0 %v19008_v39 }
 0x1e5   :  { %19006 = vst [vmem:[#allocation152_spill] sm:$0xff] %v14821_v54  ;;  %19007 = vst [vmem:[#allocation153_spill] sm:$0xff] %v14823_v20  ;;  %2369 = vmatprep.subr.bf16.mxu0 %v19009_v8  ;;  %v19013_v20 = vld [vmem:[#allocation38_spill] sm:$0xff] }
 0x1e6   :  { %10782 = vmatmul.mubr.msk.bf16.gmra.mrb[156].mxu1 %vm548_vm0, %v14638_v34  ;;  %10788 = vmatmul.mubr.msk.bf16.gmra.mrb[156].mxu0 %vm548_vm0, %v14574_v42 }
 0x1e7   :  { %2104 = vmatprep.mubr.bf16.mxu1 %v18853_v13  ;;  %2197 = vmatprep.mubr.bf16.mxu0 %v18853_v13 }
 0x1e8   :  { %2370 = vmatpush1.bf16.msra.mxu0 %v19010_v37 }
 0x1e9   :  { %v14834_v53 = vpop.f32.mrb[52].mxu1  ;;  %v14836_v54 = vpop.f32.mrb[52].mxu0  ;;  %2371 = vmatprep.subr.bf16.mxu0 %v19013_v20 }
 0x1ea   :  { %19011 = vst [vmem:[#allocation35_spill] sm:$0xff] %v14834_v53  ;;  %19012 = vst [vmem:[#allocation36_spill] sm:$0xff] %v14836_v54  ;;  %v14841_v8 = vpop.f32.mrb[53].mxu1  ;;  %v14843_v38 = vpop.f32.mrb[53].mxu0  ;;  %v19021_v54 = vld [vmem:[#allocation40_spill] sm:$0xff] }
 0x1eb   :  { %19014 = vst [vmem:[#allocation37_spill] sm:$0xff] %v14841_v8  ;;  %19015 = vst [vmem:[#allocation38_spill] sm:$0xff] %v14843_v38  ;;  %v14847_v62 = vpop.f32.mrb[54].mxu1  ;;  %v14849_v36 = vpop.f32.mrb[54].mxu0 }
 0x1ec   :  { %19016 = vst [vmem:[#allocation154_spill] sm:$0xff] %v14847_v62  ;;  %19017 = vst [vmem:[#allocation155_spill] sm:$0xff] %v14849_v36  ;;  %v14853_v53 = vpop.f32.mrb[55].mxu1  ;;  %v14855_v20 = vpop.f32.mrb[55].mxu0  ;;  %2372 = vmatpush1.bf16.msra.mxu0 %v19020_v47  ;;  %v15518_v62 = vld [vmem:[%s18407_s1 + $0x30] sm:$0xff]  }
 0x1ed   :  { %19018 = vst [vmem:[#allocation156_spill] sm:$0xff] %v14853_v53  ;;  %19019 = vst [vmem:[#allocation157_spill] sm:$0xff] %v14855_v20  ;;  %2587 = vmatprep.subr.bf16.mxu0 %v19021_v54 }
 0x1ee   :  { %10783 = vmatmul.mubr.msk.bf16.gmra.mrb[160].mxu1 %vm548_vm0, %v14667_v32  ;;  %10789 = vmatmul.mubr.msk.bf16.gmra.mrb[160].mxu0 %vm548_vm0, %v14605_v59 }
 0x1ef   :  { %2114 = vmatprep.mubr.bf16.mxu1 %v18853_v13  ;;  %2207 = vmatprep.mubr.bf16.mxu0 %v18853_v13 }
 0x1f1   :  { %v14867_v37 = vpop.f32.mrb[56].mxu1  ;;  %v14869_v25 = vpop.f32.mrb[56].mxu0 }
 0x1f2   :  { %19022 = vst [vmem:[#allocation39_spill] sm:$0xff] %v14867_v37  ;;  %19023 = vst [vmem:[#allocation40_spill] sm:$0xff] %v14869_v25  ;;  %v14873_v39 = vpop.f32.mrb[57].mxu1  ;;  %v14875_v54 = vpop.f32.mrb[57].mxu0  ;;  %v12772_v37 = vld [vmem:[#allocation7 + $0xc0] sm:$0xff]  }
 0x1f3   :  { %19024 = vst [vmem:[#allocation158_spill] sm:$0xff] %v14873_v39  ;;  %19025 = vst [vmem:[#allocation159_spill] sm:$0xff] %v14875_v54  ;;  %v14879_v22 = vpop.f32.mrb[58].mxu1  ;;  %v14881_v36 = vpop.f32.mrb[58].mxu0 }
 0x1f4   :  { %19026 = vst [vmem:[#allocation160_spill] sm:$0xff] %v14879_v22  ;;  %19027 = vst [vmem:[#allocation161_spill] sm:$0xff] %v14881_v36  ;;  %v14885_v38 = vpop.f32.mrb[59].mxu1  ;;  %v14887_v14 = vpop.f32.mrb[59].mxu0  ;;  %v15553_v22 = vld [vmem:[%s18407_s1 + $0x38] sm:$0xff]  }
 0x1f5   :  { %19028 = vst [vmem:[#allocation162_spill] sm:$0xff] %v14885_v38  ;;  %19029 = vst [vmem:[#allocation163_spill] sm:$0xff] %v14887_v14 }
 0x1f6   :  { %10784 = vmatmul.mubr.msk.bf16.gmra.mrb[164].mxu1 %vm548_vm0, %v14696_v50  ;;  %10790 = vmatmul.mubr.msk.bf16.gmra.mrb[164].mxu0 %vm548_vm0, %v14638_v34 }
 0x1f7   :  { %2124 = vmatprep.mubr.bf16.mxu1 %v18853_v13  ;;  %2217 = vmatprep.mubr.bf16.mxu0 %v18853_v13 }
 0x1f9   :  { %v14897_v20 = vpop.f32.mrb[60].mxu1  ;;  %v14899_v18 = vpop.f32.mrb[60].mxu0 }
 0x1fa   :  { %19030 = vst [vmem:[#allocation164_spill] sm:$0xff] %v14897_v20  ;;  %19031 = vst [vmem:[#allocation165_spill] sm:$0xff] %v14899_v18  ;;  %v14903_v61 = vpop.f32.mrb[61].mxu1  ;;  %v14905_v47 = vpop.f32.mrb[61].mxu0  ;;  %v12774_v20 = vld [vmem:[#allocation7 + $0x80] sm:$0xff]  }
 0x1fb   :  { %19032 = vst [vmem:[#allocation166_spill] sm:$0xff] %v14903_v61  ;;  %19033 = vst [vmem:[#allocation167_spill] sm:$0xff] %v14905_v47  ;;  %v14909_v33 = vpop.f32.mrb[62].mxu1  ;;  %v14911_v54 = vpop.f32.mrb[62].mxu0 }
 0x1fc   :  { %19034 = vst [vmem:[#allocation168_spill] sm:$0xff] %v14909_v33  ;;  %19035 = vst [vmem:[#allocation169_spill] sm:$0xff] %v14911_v54  ;;  %v14915_v25 = vpop.f32.mrb[63].mxu1  ;;  %v14917_v28 = vpop.f32.mrb[63].mxu0 }
 0x1fd   :  { %19036 = vst [vmem:[#allocation170_spill] sm:$0xff] %v14915_v25  ;;  %19037 = vst [vmem:[#allocation171_spill] sm:$0xff] %v14917_v28  ;;  %v14956_v28 = vld [vmem:[%s18407_s1] sm:$0xff]  }
 0x1fe   :  { %10785 = vmatmul.mubr.msk.bf16.gmra.mrb[168].mxu1 %vm548_vm0, %v14724_v51  ;;  %10791 = vmatmul.mubr.msk.bf16.gmra.mrb[168].mxu0 %vm548_vm0, %v14667_v32 }
 0x1ff   :  { %2227 = vmatprep.mubr.bf16.mxu0 %v18853_v13  ;;  %2280 = vmatprep.mubr.bf16.mxu1 %v18853_v13 }
 0x201   :  { %v14927_v14 = vpop.f32.mrb[64].mxu1  ;;  %v14929_v30 = vpop.f32.mrb[64].mxu0 }
 0x202   :  { %19038 = vst [vmem:[#allocation172_spill] sm:$0xff] %v14927_v14  ;;  %19039 = vst [vmem:[#allocation173_spill] sm:$0xff] %v14929_v30  ;;  %v14933_v48 = vpop.f32.mrb[65].mxu1  ;;  %v14935_v36 = vpop.f32.mrb[65].mxu0 }
 0x203   :  { %19040 = vst [vmem:[#allocation174_spill] sm:$0xff] %v14933_v48  ;;  %19041 = vst [vmem:[#allocation175_spill] sm:$0xff] %v14935_v36  ;;  %v14939_v26 = vpop.f32.mrb[66].mxu1  ;;  %v14941_v47 = vpop.f32.mrb[66].mxu0  ;;  %v19046_v36 = vld [vmem:[#allocation41_spill] sm:$0xff] }
 0x204   :  { %19042 = vst [vmem:[#allocation176_spill] sm:$0xff] %v14939_v26  ;;  %19043 = vst [vmem:[#allocation177_spill] sm:$0xff] %v14941_v47  ;;  %v14945_v18 = vpop.f32.mrb[67].mxu1  ;;  %v14947_v46 = vpop.f32.mrb[67].mxu0 }
 0x205   :  { %19044 = vst [vmem:[#allocation178_spill] sm:$0xff] %v14945_v18  ;;  %19045 = vst [vmem:[#allocation179_spill] sm:$0xff] %v14947_v46 }
 0x206   :  { %10792 = vmatmul.mubr.msk.bf16.gmra.mrb[172].mxu0 %vm548_vm0, %v14696_v50  ;;  %10794 = vmatmul.mubr.msk.bf16.vlgmr.msra.gmra.mrb[172].mxu1 %vm548_vm0, %v14956_v28 }
 0x207   :  { %2475 = vmatpush1.bf16.msra.mxu1 %v19046_v36  ;;  %2237 = vmatprep.mubr.bf16.mxu0 %v18853_v13  ;;  %v14995_v36 = vld [vmem:[%s18407_s1 + $0x8] sm:$0xff]  }
 0x208   :  { %2290 = vmatprep.mubr.bf16.mxu1 %v18853_v13  ;;  %2476 = vmatprep.subr.bf16.mxu1 %v19047_v45  ;;  %v19069_v45 = vld [vmem:[#allocation48_spill] sm:$0xff] }
 0x209   :  { %v14964_v54 = vpop.f32.mrb[68].mxu1  ;;  %v14966_v46 = vpop.f32.mrb[68].mxu0 }
 0x20a   :  { %19048 = vst [vmem:[#allocation41_spill] sm:$0xff] %v14964_v54  ;;  %19049 = vst [vmem:[#allocation42_spill] sm:$0xff] %v14966_v46  ;;  %v14970_v47 = vpop.f32.mrb[69].mxu1  ;;  %v14972_v40 = vpop.f32.mrb[69].mxu0 }
 0x20b   :  { %19050 = vst [vmem:[#allocation180_spill] sm:$0xff] %v14970_v47  ;;  %19051 = vst [vmem:[#allocation181_spill] sm:$0xff] %v14972_v40  ;;  %v14976_v1 = vpop.f32.mrb[70].mxu1  ;;  %v14978_v30 = vpop.f32.mrb[70].mxu0  ;;  %2477 = vmatpush1.bf16.msra.mxu1 %v19054_v60  ;;  %v19058_v60 = vld [vmem:[#allocation45_spill] sm:$0xff] }
 0x20c   :  { %19052 = vst [vmem:[#allocation182_spill] sm:$0xff] %v14976_v1  ;;  %19053 = vst [vmem:[#allocation183_spill] sm:$0xff] %v14978_v30  ;;  %v14983_v10 = vpop.f32.mrb[71].mxu1  ;;  %v14985_v54 = vpop.f32.mrb[71].mxu0  ;;  %2478 = vmatprep.subr.bf16.mxu1 %v19057_v41 }
 0x20d   :  { %19055 = vst [vmem:[#allocation43_spill] sm:$0xff] %v14983_v10  ;;  %19056 = vst [vmem:[#allocation184_spill] sm:$0xff] %v14985_v54 }
 0x20e   :  { %10793 = vmatmul.mubr.msk.bf16.gmra.mrb[176].mxu0 %vm548_vm0, %v14724_v51  ;;  %10795 = vmatmul.mubr.msk.bf16.gmra.mrb[176].mxu1 %vm548_vm0, %v14995_v36 }
 0x20f   :  { %2300 = vmatprep.mubr.bf16.mxu1 %v18853_v13  ;;  %2393 = vmatprep.mubr.bf16.mxu0 %v18853_v13 }
 0x210   :  { %2479 = vmatpush1.bf16.msra.mxu1 %v19058_v60 }
 0x211   :  { %v15002_v41 = vpop.f32.mrb[72].mxu1  ;;  %v15004_v46 = vpop.f32.mrb[72].mxu0  ;;  %2480 = vmatprep.subr.bf16.mxu1 %v14217_v0 }
 0x212   :  { %19059 = vst [vmem:[#allocation44_spill] sm:$0xff] %v15002_v41  ;;  %19060 = vst [vmem:[#allocation45_spill] sm:$0xff] %v15004_v46  ;;  %v15009_v54 = vpop.f32.mrb[73].mxu1  ;;  %v15011_v31 = vpop.f32.mrb[73].mxu0  ;;  %v19067_v46 = vld [vmem:[#allocation47_spill] sm:$0xff] }
 0x213   :  { %19061 = vst [vmem:[#allocation185_spill] sm:$0xff] %v15009_v54  ;;  %v15015_v27 = vpop.f32.mrb[74].mxu1  ;;  %v15017_v40 = vpop.f32.mrb[74].mxu0  ;;  %v12786_v41 = vld [vmem:[#allocation7 + $0x98] sm:$0xff]  }
 0x214   :  { %19062 = vst [vmem:[#allocation186_spill] sm:$0xff] %v15015_v27  ;;  %19063 = vst [vmem:[#allocation187_spill] sm:$0xff] %v15017_v40  ;;  %v15021_v16 = vpop.f32.mrb[75].mxu1  ;;  %v15023_v0 = vpop.f32.mrb[75].mxu0  ;;  %2481 = vmatpush1.bf16.msra.mxu1 %v19066_v58 }
 0x215   :  { %19064 = vst [vmem:[#allocation188_spill] sm:$0xff] %v15021_v16  ;;  %19065 = vst [vmem:[#allocation189_spill] sm:$0xff] %v15023_v0  ;;  %2482 = vmatprep.subr.bf16.mxu1 %v19067_v46  ;;  %v19070_v46 = vld [vmem:[#allocation49_spill] sm:$0xff]  ;;  %v12788_v16 = vld [vmem:[#allocation7 + $0xa0] sm:$0xff]  }
 0x216   :  { %10796 = vmatmul.mubr.msk.bf16.gmra.mrb[180].mxu1 %vm548_vm0, %v14574_v42  ;;  %10802 = vmatmul.mubr.msk.bf16.vlgmr.msra.gmra.mrb[180].mxu0 %vm548_vm0, %v14956_v28 }
 0x217   :  { %2310 = vmatprep.mubr.bf16.mxu1 %v18853_v13  ;;  %2403 = vmatprep.mubr.bf16.mxu0 %v18853_v13 }
 0x218   :  { %2483 = vmatpush1.bf16.msra.mxu1 %v14232_v2  ;;  %2588 = vmatpush1.bf16.msra.mxu0 %v14234_v44  ;;  %v19076_v2 = vld [vmem:[#allocation51_spill] sm:$0xff] }
 0x219   :  { %v15037_v58 = vpop.f32.mrb[76].mxu0  ;;  %v15039_v60 = vpop.f32.mrb[76].mxu1  ;;  %2484 = vmatprep.subr.bf16.mxu1 %v19069_v45  ;;  %2589 = vmatprep.subr.bf16.mxu0 %v19070_v46  ;;  %v19078_v46 = vld [vmem:[#allocation53_spill] sm:$0xff] }
 0x21a   :  { %19068 = vst [vmem:[#allocation46_spill] sm:$0xff] %v15039_v60  ;;  %v15047_v0 = vpop.f32.mrb[77].mxu0  ;;  %v15049_v19 = vpop.f32.mrb[77].mxu1 }
 0x21b   :  { %19071 = vst [vmem:[#allocation47_spill] sm:$0xff] %v15049_v19  ;;  %v15055_v40 = vpop.f32.mrb[78].mxu0  ;;  %v15057_v45 = vpop.f32.mrb[78].mxu1  ;;  %v19082_v19 = vld [vmem:[#allocation55_spill] sm:$0xff] }
 0x21c   :  { %19072 = vst [vmem:[#allocation48_spill] sm:$0xff] %v15057_v45  ;;  %v15063_v42 = vpop.f32.mrb[79].mxu0  ;;  %v15065_v60 = vpop.f32.mrb[79].mxu1  ;;  %2485 = vmatpush1.bf16.msra.mxu1 %v19075_v57  ;;  %2590 = vmatpush1.bf16.msra.mxu0 %v19076_v2  ;;  %v19079_v57 = vld [vmem:[#allocation54_spill] sm:$0xff] }
 0x21d   :  { %19073 = vst [vmem:[#allocation49_spill] sm:$0xff] %v15063_v42  ;;  %19074 = vst [vmem:[#allocation190_spill] sm:$0xff] %v15065_v60  ;;  %2591 = vmatprep.subr.bf16.mxu0 %v19077_v3  ;;  %2700 = vmatprep.subr.bf16.mxu1 %v19078_v46 }
 0x21e   :  { %10797 = vmatmul.mubr.msk.bf16.gmra.mrb[184].mxu1 %vm548_vm0, %v14605_v59  ;;  %10803 = vmatmul.mubr.msk.bf16.gmra.mrb[184].mxu0 %vm548_vm0, %v14995_v36  ;;  %v15122_v59 = vld [vmem:[%s18407_s1 + $0x10] sm:$0xff]  }
 0x21f   :  { %2320 = vmatprep.mubr.bf16.mxu1 %v18853_v13  ;;  %2413 = vmatprep.mubr.bf16.mxu0 %v18853_v13 }
 0x220   :  { %2592 = vmatpush1.bf16.msra.mxu0 %v19079_v57  ;;  %v15211_v57 = vld [vmem:[%s18407_s1 + $0x20] sm:$0xff]  }
 0x221   :  { %v15082_v2 = vpop.f32.mrb[80].mxu0  ;;  %v15084_v44 = vpop.f32.mrb[80].mxu1  ;;  %2593 = vmatprep.subr.bf16.mxu0 %v19082_v19  ;;  %v15168_v19 = vld [vmem:[%s18407_s1 + $0x18] sm:$0xff]  }
 0x222   :  { %19080 = vst [vmem:[#allocation50_spill] sm:$0xff] %v15082_v2  ;;  %19081 = vst [vmem:[#allocation51_spill] sm:$0xff] %v15084_v44  ;;  %v15091_v46 = vpop.f32.mrb[81].mxu0  ;;  %v15093_v30 = vpop.f32.mrb[81].mxu1  ;;  %v19090_v2 = vld [vmem:[#allocation56_spill] sm:$0xff] }
 0x223   :  { %19083 = vst [vmem:[#allocation52_spill] sm:$0xff] %v15091_v46  ;;  %19084 = vst [vmem:[#allocation53_spill] sm:$0xff] %v15093_v30  ;;  %v15099_v9 = vpop.f32.mrb[82].mxu0  ;;  %v15101_v42 = vpop.f32.mrb[82].mxu1  ;;  %v19097_v46 = vld [vmem:[#allocation59_spill] sm:$0xff] }
 0x224   :  { %19085 = vst [vmem:[#allocation54_spill] sm:$0xff] %v15099_v9  ;;  %19086 = vst [vmem:[#allocation55_spill] sm:$0xff] %v15101_v42  ;;  %v15107_v44 = vpop.f32.mrb[83].mxu0  ;;  %v15109_v49 = vpop.f32.mrb[83].mxu1  ;;  %2594 = vmatpush1.bf16.msra.mxu0 %v19090_v2  ;;  %v19094_v2 = vld [vmem:[#allocation58_spill] sm:$0xff] }
 0x225   :  { %19088 = vst [vmem:[#allocation191_spill] sm:$0xff] %v15107_v44  ;;  %19089 = vst [vmem:[#allocation192_spill] sm:$0xff] %v15109_v49  ;;  %2595 = vmatprep.subr.bf16.mxu0 %v19093_v6 }
 0x226   :  { %10798 = vmatmul.mubr.msk.bf16.gmra.mrb[188].mxu1 %vm548_vm0, %v14638_v34  ;;  %10804 = vmatmul.mubr.msk.bf16.gmra.mrb[188].mxu0 %vm548_vm0, %v15122_v59  ;;  %v19110_v34 = vld [vmem:[#allocation60_spill] sm:$0xff] }
 0x227   :  { %2330 = vmatprep.mubr.bf16.mxu1 %v18853_v13  ;;  %2423 = vmatprep.mubr.bf16.mxu0 %v18853_v13 }
 0x228   :  { %2596 = vmatpush1.bf16.msra.mxu0 %v19094_v2 }
 0x229   :  { %v15129_v30 = vpop.f32.mrb[84].mxu1  ;;  %v15131_v6 = vpop.f32.mrb[84].mxu0  ;;  %2597 = vmatprep.subr.bf16.mxu0 %v19097_v46 }
 0x22a   :  { %19095 = vst [vmem:[#allocation56_spill] sm:$0xff] %v15129_v30  ;;  %19096 = vst [vmem:[#allocation57_spill] sm:$0xff] %v15131_v6  ;;  %v15138_v44 = vpop.f32.mrb[85].mxu1  ;;  %v15140_v60 = vpop.f32.mrb[85].mxu0 }
 0x22b   :  { %19100 = vst [vmem:[#allocation58_spill] sm:$0xff] %v15138_v44  ;;  %19101 = vst [vmem:[#allocation59_spill] sm:$0xff] %v15140_v60  ;;  %v15146_v4 = vpop.f32.mrb[86].mxu1  ;;  %v15148_v12 = vpop.f32.mrb[86].mxu0 }
 0x22c   :  { %19104 = vst [vmem:[#allocation193_spill] sm:$0xff] %v15146_v4  ;;  %19105 = vst [vmem:[#allocation194_spill] sm:$0xff] %v15148_v12  ;;  %v15154_v6 = vpop.f32.mrb[87].mxu1  ;;  %v15156_v49 = vpop.f32.mrb[87].mxu0  ;;  %2598 = vmatpush1.bf16.msra.mxu0 %v19110_v34 }
 0x22d   :  { %19108 = vst [vmem:[#allocation195_spill] sm:$0xff] %v15154_v6  ;;  %19109 = vst [vmem:[#allocation196_spill] sm:$0xff] %v15156_v49 }
 0x22e   :  { %10799 = vmatmul.mubr.msk.bf16.gmra.mrb[192].mxu1 %vm548_vm0, %v14667_v32  ;;  %10805 = vmatmul.mubr.msk.bf16.gmra.mrb[192].mxu0 %vm548_vm0, %v15168_v19 }
 0x22f   :  { %2340 = vmatprep.mubr.bf16.mxu1 %v18853_v13  ;;  %2433 = vmatprep.mubr.bf16.mxu0 %v18853_v13 }
 0x231   :  { %v15174_v34 = vpop.f32.mrb[88].mxu1  ;;  %v15176_v44 = vpop.f32.mrb[88].mxu0 }
 0x232   :  { %19113 = vst [vmem:[#allocation60_spill] sm:$0xff] %v15174_v34  ;;  %19114 = vst [vmem:[#allocation197_spill] sm:$0xff] %v15176_v44  ;;  %v15182_v6 = vpop.f32.mrb[89].mxu1  ;;  %v15184_v3 = vpop.f32.mrb[89].mxu0 }
 0x233   :  { %19117 = vst [vmem:[#allocation198_spill] sm:$0xff] %v15182_v6  ;;  %19118 = vst [vmem:[#allocation199_spill] sm:$0xff] %v15184_v3  ;;  %v15190_v2 = vpop.f32.mrb[90].mxu1  ;;  %v15192_v42 = vpop.f32.mrb[90].mxu0  ;;  %v19162_v3 = vld [vmem:[#allocation62_spill] sm:$0xff] }
 0x234   :  { %19121 = vst [vmem:[#allocation200_spill] sm:$0xff] %v15190_v2  ;;  %19122 = vst [vmem:[#allocation201_spill] sm:$0xff] %v15192_v42  ;;  %v15198_v44 = vpop.f32.mrb[91].mxu1  ;;  %v15200_v49 = vpop.f32.mrb[91].mxu0  ;;  %v19161_v2 = vld [vmem:[#allocation61_spill] sm:$0xff] }
 0x235   :  { %19125 = vst [vmem:[#allocation202_spill] sm:$0xff] %v15198_v44  ;;  %19126 = vst [vmem:[#allocation203_spill] sm:$0xff] %v15200_v49 }
 0x236   :  { %10800 = vmatmul.mubr.msk.bf16.gmra.mrb[196].mxu1 %vm548_vm0, %v14696_v50  ;;  %10806 = vmatmul.mubr.msk.bf16.gmra.mrb[196].mxu0 %vm548_vm0, %v15211_v57 }
 0x237   :  { %2350 = vmatprep.mubr.bf16.mxu1 %v18853_v13  ;;  %2443 = vmatprep.mubr.bf16.mxu0 %v18853_v13 }
 0x239   :  { %v15217_v9 = vpop.f32.mrb[92].mxu1  ;;  %v15219_v30 = vpop.f32.mrb[92].mxu0 }
 0x23a   :  { %19129 = vst [vmem:[#allocation204_spill] sm:$0xff] %v15217_v9  ;;  %19130 = vst [vmem:[#allocation205_spill] sm:$0xff] %v15219_v30  ;;  %v15225_v60 = vpop.f32.mrb[93].mxu1  ;;  %v15227_v42 = vpop.f32.mrb[93].mxu0  ;;  %v19173_v9 = vld [vmem:[#allocation63_spill] sm:$0xff] }
 0x23b   :  { %19133 = vst [vmem:[#allocation206_spill] sm:$0xff] %v15225_v60  ;;  %19134 = vst [vmem:[#allocation207_spill] sm:$0xff] %v15227_v42  ;;  %v15233_v4 = vpop.f32.mrb[94].mxu1  ;;  %v15235_v12 = vpop.f32.mrb[94].mxu0 }
 0x23c   :  { %19137 = vst [vmem:[#allocation208_spill] sm:$0xff] %v15233_v4  ;;  %19138 = vst [vmem:[#allocation209_spill] sm:$0xff] %v15235_v12  ;;  %v15241_v30 = vpop.f32.mrb[95].mxu1  ;;  %v15243_v6 = vpop.f32.mrb[95].mxu0 }
 0x23d   :  { %19141 = vst [vmem:[#allocation210_spill] sm:$0xff] %v15241_v30  ;;  %19142 = vst [vmem:[#allocation211_spill] sm:$0xff] %v15243_v6 }
 0x23e   :  { %10801 = vmatmul.mubr.msk.bf16.gmra.mrb[200].mxu1 %vm548_vm0, %v14724_v51  ;;  %10807 = vmatmul.mubr.msk.bf16.gmra.mrb[200].mxu0 %vm548_vm0, %v14667_v32 }
 0x23f   :  { %2453 = vmatprep.mubr.bf16.mxu0 %v18853_v13  ;;  %2506 = vmatprep.mubr.bf16.mxu1 %v18853_v13 }
 0x241   :  { %v15255_v44 = vpop.f32.mrb[96].mxu1  ;;  %v15257_v49 = vpop.f32.mrb[96].mxu0 }
 0x242   :  { %19145 = vst [vmem:[#allocation212_spill] sm:$0xff] %v15255_v44  ;;  %19146 = vst [vmem:[#allocation213_spill] sm:$0xff] %v15257_v49  ;;  %v15263_v6 = vpop.f32.mrb[97].mxu1  ;;  %v15265_v60 = vpop.f32.mrb[97].mxu0  ;;  %v19178_v44 = vld [vmem:[#allocation64_spill] sm:$0xff] }
 0x243   :  { %19149 = vst [vmem:[#allocation214_spill] sm:$0xff] %v15263_v6  ;;  %19150 = vst [vmem:[#allocation215_spill] sm:$0xff] %v15265_v60  ;;  %v15271_v35 = vpop.f32.mrb[98].mxu1  ;;  %v15273_v42 = vpop.f32.mrb[98].mxu0  ;;  %v12792_v6 = vld [vmem:[#allocation7 + $0x140] sm:$0xff]  }
 0x244   :  { %19153 = vst [vmem:[#allocation216_spill] sm:$0xff] %v15271_v35  ;;  %19154 = vst [vmem:[#allocation217_spill] sm:$0xff] %v15273_v42  ;;  %v15279_v49 = vpop.f32.mrb[99].mxu1  ;;  %v15281_v30 = vpop.f32.mrb[99].mxu0 }
 0x245   :  { %19157 = vst [vmem:[#allocation218_spill] sm:$0xff] %v15279_v49  ;;  %19158 = vst [vmem:[#allocation219_spill] sm:$0xff] %v15281_v30  ;;  %v12789_v30 = vld [vmem:[#allocation7 + $0xe8] sm:$0xff]  }
 0x246   :  { %10808 = vmatmul.mubr.msk.bf16.gmra.mrb[204].mxu0 %vm548_vm0, %v14696_v50  ;;  %10810 = vmatmul.mubr.msk.bf16.vlgmr.msra.gmra.mrb[204].mxu1 %vm548_vm0, %v14956_v28 }
 0x247   :  { %2701 = vmatpush1.bf16.msra.mxu1 %v19161_v2  ;;  %2463 = vmatprep.mubr.bf16.mxu0 %v18853_v13 }
 0x248   :  { %2516 = vmatprep.mubr.bf16.mxu1 %v18853_v13  ;;  %2702 = vmatprep.subr.bf16.mxu1 %v19162_v3 }
 0x249   :  { %v15295_v42 = vpop.f32.mrb[100].mxu1  ;;  %v15297_v46 = vpop.f32.mrb[100].mxu0 }
 0x24a   :  { %19163 = vst [vmem:[#allocation61_spill] sm:$0xff] %v15295_v42  ;;  %19164 = vst [vmem:[#allocation62_spill] sm:$0xff] %v15297_v46  ;;  %v15303_v49 = vpop.f32.mrb[101].mxu1  ;;  %v15305_v12 = vpop.f32.mrb[101].mxu0 }
 0x24b   :  { %19167 = vst [vmem:[#allocation220_spill] sm:$0xff] %v15303_v49  ;;  %19168 = vst [vmem:[#allocation221_spill] sm:$0xff] %v15305_v12  ;;  %v15311_v43 = vpop.f32.mrb[102].mxu1  ;;  %v15313_v60 = vpop.f32.mrb[102].mxu0  ;;  %2703 = vmatpush1.bf16.msra.mxu1 %v19173_v9  ;;  %v19181_v9 = vld [vmem:[#allocation65_spill] sm:$0xff]  ;;  %v19184_v12 = vld [vmem:[#allocation66_spill] sm:$0xff] }
 0x24c   :  { %19171 = vst [vmem:[#allocation222_spill] sm:$0xff] %v15311_v43  ;;  %19172 = vst [vmem:[#allocation223_spill] sm:$0xff] %v15313_v60  ;;  %v15320_v50 = vpop.f32.mrb[103].mxu1  ;;  %v15322_v4 = vpop.f32.mrb[103].mxu0  ;;  %2704 = vmatprep.subr.bf16.mxu1 %v19178_v44  ;;  %v19200_v49 = vld [vmem:[#allocation70_spill] sm:$0xff] }
 0x24d   :  { %19176 = vst [vmem:[#allocation63_spill] sm:$0xff] %v15320_v50  ;;  %19177 = vst [vmem:[#allocation224_spill] sm:$0xff] %v15322_v4 }
 0x24e   :  { %10809 = vmatmul.mubr.msk.bf16.gmra.mrb[208].mxu0 %vm548_vm0, %v14724_v51  ;;  %10811 = vmatmul.mubr.msk.bf16.gmra.mrb[208].mxu1 %vm548_vm0, %v14995_v36  ;;  %v19197_v51 = vld [vmem:[#allocation69_spill] sm:$0xff] }
 0x24f   :  { %2526 = vmatprep.mubr.bf16.mxu1 %v18853_v13  ;;  %2619 = vmatprep.mubr.bf16.mxu0 %v18853_v13 }
 0x250   :  { %2705 = vmatpush1.bf16.msra.mxu1 %v19181_v9 }
 0x251   :  { %v15336_v46 = vpop.f32.mrb[104].mxu1  ;;  %v15338_v44 = vpop.f32.mrb[104].mxu0  ;;  %2706 = vmatprep.subr.bf16.mxu1 %v19184_v12  ;;  %v12765_v12 = vld [vmem:[#allocation7 + $0x48] sm:$0xff]  }
 0x252   :  { %19182 = vst [vmem:[#allocation64_spill] sm:$0xff] %v15336_v46  ;;  %19183 = vst [vmem:[#allocation65_spill] sm:$0xff] %v15338_v44  ;;  %v15345_v42 = vpop.f32.mrb[105].mxu1  ;;  %v15347_v4 = vpop.f32.mrb[105].mxu0 }
 0x253   :  { %19185 = vst [vmem:[#allocation66_spill] sm:$0xff] %v15345_v42  ;;  %19186 = vst [vmem:[#allocation225_spill] sm:$0xff] %v15347_v4  ;;  %v15353_v50 = vpop.f32.mrb[106].mxu1  ;;  %v15355_v3 = vpop.f32.mrb[106].mxu0 }
 0x254   :  { %19187 = vst [vmem:[#allocation226_spill] sm:$0xff] %v15353_v50  ;;  %19188 = vst [vmem:[#allocation227_spill] sm:$0xff] %v15355_v3  ;;  %v15361_v44 = vpop.f32.mrb[107].mxu1  ;;  %v15363_v63 = vpop.f32.mrb[107].mxu0  ;;  %2707 = vmatpush1.bf16.msra.mxu1 %v19193_v52 }
 0x255   :  { %19191 = vst [vmem:[#allocation228_spill] sm:$0xff] %v15361_v44  ;;  %19192 = vst [vmem:[#allocation229_spill] sm:$0xff] %v15363_v63  ;;  %2708 = vmatprep.subr.bf16.mxu1 %v19196_v21  ;;  %v12763_v63 = vld [vmem:[#allocation7 + $0x40] sm:$0xff]  }
 0x256   :  { %10812 = vmatmul.mubr.msk.bf16.gmra.mrb[212].mxu1 %vm548_vm0, %v15122_v59  ;;  %10818 = vmatmul.mubr.msk.bf16.vlgmr.msra.gmra.mrb[212].mxu0 %vm548_vm0, %v14956_v28  ;;  %v12764_v21 = vld [vmem:[#allocation7] sm:$0xff]  }
 0x257   :  { %2536 = vmatprep.mubr.bf16.mxu1 %v18853_v13  ;;  %2629 = vmatprep.mubr.bf16.mxu0 %v18853_v13 }
 0x258   :  { %2709 = vmatpush1.bf16.msra.mxu1 %v19197_v51  ;;  %11362 = vmatprep.subr.bf16.mxu0 %v12763_v63 }
 0x259   :  { %v15378_v52 = vpop.f32.mrb[108].mxu0  ;;  %v15380_v42 = vpop.f32.mrb[108].mxu1  ;;  %2710 = vmatprep.subr.bf16.mxu1 %v19200_v49  ;;  %11363 = vmatpush3.bf16.msra.mxu0 %v12764_v21 }
 0x25a   :  { %19198 = vst [vmem:[#allocation67_spill] sm:$0xff] %v15378_v52  ;;  %19199 = vst [vmem:[#allocation68_spill] sm:$0xff] %v15380_v42  ;;  %v15387_v9 = vpop.f32.mrb[109].mxu0  ;;  %v15389_v44 = vpop.f32.mrb[109].mxu1  ;;  %11364 = vmatprep.subr.bf16.mxu0 %v12765_v12  ;;  %v12779_v12 = vld [vmem:[#allocation7 + $0x30] sm:$0xff]  }
 0x25b   :  { %19202 = vst [vmem:[#allocation69_spill] sm:$0xff] %v15387_v9  ;;  %19203 = vst [vmem:[#allocation70_spill] sm:$0xff] %v15389_v44  ;;  %v15395_v46 = vpop.f32.mrb[110].mxu0  ;;  %v15397_v50 = vpop.f32.mrb[110].mxu1  ;;  %v12766_v9 = vld [vmem:[#allocation7 + $0x8] sm:$0xff]  }
 0x25c   :  { %19205 = vst [vmem:[#allocation230_spill] sm:$0xff] %v15395_v46  ;;  %19206 = vst [vmem:[#allocation231_spill] sm:$0xff] %v15397_v50  ;;  %v15403_v42 = vpop.f32.mrb[111].mxu0  ;;  %v15405_v4 = vpop.f32.mrb[111].mxu1  ;;  %2711 = vmatpush1.bf16.msra.mxu1 %v19211_v17 }
 0x25d   :  { %19209 = vst [vmem:[#allocation232_spill] sm:$0xff] %v15403_v42  ;;  %19210 = vst [vmem:[#allocation233_spill] sm:$0xff] %v15405_v4  ;;  %11365 = vmatpush3.bf16.msra.mxu0 %v12766_v9  ;;  %v12769_v9 = vld [vmem:[#allocation7 + $0x58] sm:$0xff]   ;;  %11426 = vmatprep.subr.bf16.mxu1 %v12772_v37  ;;  %v12780_v37 = vld [vmem:[#allocation7 + $0x88] sm:$0xff]  }
 0x25e   :  { %10813 = vmatmul.mubr.msk.bf16.gmra.mrb[216].mxu1 %vm548_vm0, %v15168_v19  ;;  %10819 = vmatmul.mubr.msk.bf16.gmra.mrb[216].mxu0 %vm548_vm0, %v14995_v36 }
 0x25f   :  { %2546 = vmatprep.mubr.bf16.mxu1 %v18853_v13  ;;  %2639 = vmatprep.mubr.bf16.mxu0 %v18853_v13 }
 0x261   :  { %v15418_v50 = vpop.f32.mrb[112].mxu0  ;;  %v15420_v17 = vpop.f32.mrb[112].mxu1 }
 0x262   :  { %19214 = vst [vmem:[#allocation71_spill] sm:$0xff] %v15418_v50  ;;  %19215 = vst [vmem:[#allocation234_spill] sm:$0xff] %v15420_v17  ;;  %v15426_v42 = vpop.f32.mrb[113].mxu0  ;;  %v15428_v35 = vpop.f32.mrb[113].mxu1  ;;  %v12767_v17 = vld [vmem:[#allocation7 + $0x50] sm:$0xff]  }
 0x263   :  { %19218 = vst [vmem:[#allocation235_spill] sm:$0xff] %v15426_v42  ;;  %19219 = vst [vmem:[#allocation236_spill] sm:$0xff] %v15428_v35  ;;  %v15434_v5 = vpop.f32.mrb[114].mxu0  ;;  %v15436_v63 = vpop.f32.mrb[114].mxu1  ;;  %v12768_v50 = vld [vmem:[#allocation7 + $0x10] sm:$0xff]   ;;  %11366 = vmatprep.subr.bf16.mxu0 %v12767_v17  ;;  %v12770_v35 = vld [vmem:[#allocation7 + $0x18] sm:$0xff]  }
 0x264   :  { %19222 = vst [vmem:[#allocation237_spill] sm:$0xff] %v15434_v5  ;;  %19223 = vst [vmem:[#allocation238_spill] sm:$0xff] %v15436_v63  ;;  %v15442_v4 = vpop.f32.mrb[115].mxu0  ;;  %v15444_v21 = vpop.f32.mrb[115].mxu1  ;;  %11367 = vmatpush3.bf16.msra.mxu0 %v12768_v50  ;;  %v12771_v50 = vld [vmem:[#allocation7 + $0x60] sm:$0xff]  }
 0x265   :  { %19226 = vst [vmem:[#allocation239_spill] sm:$0xff] %v15442_v4  ;;  %19227 = vst [vmem:[#allocation240_spill] sm:$0xff] %v15444_v21  ;;  %11368 = vmatprep.subr.bf16.mxu0 %v12769_v9  ;;  %v15483_v4 = vld [vmem:[%s18407_s1 + $0x28] sm:$0xff]  }
 0x266   :  { %10814 = vmatmul.mubr.msk.bf16.gmra.mrb[220].mxu1 %vm548_vm0, %v15211_v57  ;;  %10820 = vmatmul.mubr.msk.bf16.gmra.mrb[220].mxu0 %vm548_vm0, %v15122_v59  ;;  %v12773_v5 = vld [vmem:[#allocation7 + $0x20] sm:$0xff]  }
 0x267   :  { %2556 = vmatprep.mubr.bf16.mxu1 %v18853_v13  ;;  %2649 = vmatprep.mubr.bf16.mxu0 %v18853_v13 }
 0x268   :  { %11369 = vmatpush3.bf16.msra.mxu0 %v12770_v35  ;;  %v12775_v35 = vld [vmem:[#allocation7 + $0x68] sm:$0xff]  }
 0x269   :  { %v15456_v63 = vpop.f32.mrb[116].mxu1  ;;  %v15458_v42 = vpop.f32.mrb[116].mxu0  ;;  %11370 = vmatprep.subr.bf16.mxu0 %v12771_v50 }
 0x26a   :  { %19230 = vst [vmem:[#allocation241_spill] sm:$0xff] %v15456_v63  ;;  %v15462_v21 = vpop.f32.mrb[117].mxu1  ;;  %v15464_v51 = vpop.f32.mrb[117].mxu0 }
 0x26b   :  { %19232 = vst [vmem:[#allocation242_spill] sm:$0xff] %v15462_v21  ;;  %v15468_v46 = vpop.f32.mrb[118].mxu1  ;;  %v15470_v3 = vpop.f32.mrb[118].mxu0 }
 0x26c   :  { %19233 = vst [vmem:[#allocation243_spill] sm:$0xff] %v15468_v46  ;;  %v15474_v44 = vpop.f32.mrb[119].mxu1  ;;  %v15476_v17 = vpop.f32.mrb[119].mxu0  ;;  %11371 = vmatpush3.bf16.msra.mxu0 %v12773_v5  ;;  %v12777_v5 = vld [vmem:[#allocation7 + $0x70] sm:$0xff]  }
 0x26d   :  { %19234 = vst [vmem:[#allocation244_spill] sm:$0xff] %v15474_v44  ;;  %v12776_v44 = vld [vmem:[#allocation7 + $0x28] sm:$0xff]   ;;  %11372 = vmatprep.subr.bf16.mxu0 %v12775_v35 }
 0x26e   :  { %10815 = vmatmul.mubr.msk.bf16.gmra.mrb[224].mxu1 %vm548_vm0, %v15483_v4  ;;  %10821 = vmatmul.mubr.msk.bf16.gmra.mrb[224].mxu0 %vm548_vm0, %v15168_v19 }
 0x26f   :  { %2566 = vmatprep.mubr.bf16.mxu1 %v18853_v13  ;;  %2659 = vmatprep.mubr.bf16.mxu0 %v18853_v13 }
 0x270   :  { %11373 = vmatpush3.bf16.msra.mxu0 %v12776_v44  ;;  %v12781_v44 = vld [vmem:[#allocation7 + $0x78] sm:$0xff]  }
 0x271   :  { %v15491_v63 = vpop.f32.mrb[120].mxu1  ;;  %v15493_v9 = vpop.f32.mrb[120].mxu0  ;;  %11374 = vmatprep.subr.bf16.mxu0 %v12777_v5 }
 0x272   :  { %19235 = vst [vmem:[#allocation245_spill] sm:$0xff] %v15491_v63  ;;  %v15497_v53 = vpop.f32.mrb[121].mxu1  ;;  %v15499_v46 = vpop.f32.mrb[121].mxu0 }
 0x273   :  { %19236 = vst [vmem:[#allocation246_spill] sm:$0xff] %v15497_v53  ;;  %v15503_v21 = vpop.f32.mrb[122].mxu1  ;;  %v15505_v8 = vpop.f32.mrb[122].mxu0 }
 0x274   :  { %19237 = vst [vmem:[#allocation247_spill] sm:$0xff] %v15503_v21  ;;  %v15509_v49 = vpop.f32.mrb[123].mxu1  ;;  %v15511_v50 = vpop.f32.mrb[123].mxu0  ;;  %11375 = vmatpush3.bf16.msra.mxu0 %v12779_v12 }
 0x275   :  { %19238 = vst [vmem:[#allocation248_spill] sm:$0xff] %v15509_v49  ;;  %v12782_v49 = vld [vmem:[#allocation7 + $0x38] sm:$0xff]   ;;  %11376 = vmatprep.subr.bf16.mxu0 %v12781_v44 }
 0x276   :  { %10816 = vmatmul.mubr.msk.bf16.gmra.mrb[228].mxu1 %vm548_vm0, %v15518_v62  ;;  %10822 = vmatmul.mubr.msk.bf16.gmra.mrb[228].mxu0 %vm548_vm0, %v15211_v57 }
 0x277   :  { %2576 = vmatprep.mubr.bf16.mxu1 %v18853_v13  ;;  %2669 = vmatprep.mubr.bf16.mxu0 %v18853_v13 }
 0x278   :  { %11377 = vmatpush3.bf16.msra.mxu0 %v12782_v49 }
 0x279   :  { %v15526_v63 = vpop.f32.mrb[124].mxu1  ;;  %v15528_v35 = vpop.f32.mrb[124].mxu0  ;;  %11490 = vmatprep.subr.bf16.mxu0 %v12792_v6  ;;  %v12791_v6 = vld [vmem:[#allocation7 + $0xf0] sm:$0xff]  }
 0x27a   :  { %19239 = vst [vmem:[#allocation249_spill] sm:$0xff] %v15526_v63  ;;  %v15532_v38 = vpop.f32.mrb[125].mxu1  ;;  %v15534_v21 = vpop.f32.mrb[125].mxu0 }
 0x27b   :  { %19240 = vst [vmem:[#allocation250_spill] sm:$0xff] %v15532_v38  ;;  %v15538_v53 = vpop.f32.mrb[126].mxu1  ;;  %v15540_v39 = vpop.f32.mrb[126].mxu0 }
 0x27c   :  { %19241 = vst [vmem:[#allocation251_spill] sm:$0xff] %v15538_v53  ;;  %v15544_v52 = vpop.f32.mrb[127].mxu1  ;;  %v15546_v5 = vpop.f32.mrb[127].mxu0  ;;  %v12778_v53 = vld [vmem:[#allocation7 + $0xc8] sm:$0xff]  }
 0x27d   :  { %19242 = vst [vmem:[#allocation252_spill] sm:$0xff] %v15544_v52 }
 0x27e   :  { %10817 = vmatmul.mubr.msk.bf16.gmra.mrb[232].mxu1 %vm548_vm0, %v15553_v22  ;;  %10823 = vmatmul.mubr.msk.bf16.gmra.mrb[232].mxu0 %vm548_vm0, %v15483_v4 }
 0x27f   :  { %2679 = vmatprep.mubr.bf16.mxu0 %v18853_v13  ;;  %2732 = vmatprep.mubr.bf16.mxu1 %v18853_v13 }
 0x281   :  { %v15561_v12 = vpop.f32.mrb[128].mxu1  ;;  %v15563_v44 = vpop.f32.mrb[128].mxu0 }
 0x282   :  { %19243 = vst [vmem:[#allocation253_spill] sm:$0xff] %v15561_v12  ;;  %v15567_v52 = vpop.f32.mrb[129].mxu1  ;;  %v15569_v25 = vpop.f32.mrb[129].mxu0 }
 0x283   :  { %19244 = vst [vmem:[#allocation254_spill] sm:$0xff] %v15567_v52  ;;  %v15573_v33 = vpop.f32.mrb[130].mxu1  ;;  %v15575_v38 = vpop.f32.mrb[130].mxu0 }
 0x284   :  { %19245 = vst [vmem:[#allocation255_spill] sm:$0xff] %v15573_v33  ;;  %v15579_v49 = vpop.f32.mrb[131].mxu1  ;;  %v15581_v61 = vpop.f32.mrb[131].mxu0 }
 0x285   :  { %19246 = vst [vmem:[#allocation256_spill] sm:$0xff] %v15579_v49 }
 0x286   :  { %10824 = vmatmul.mubr.msk.bf16.gmra.mrb[236].mxu0 %vm548_vm0, %v15518_v62  ;;  %10826 = vmatmul.mubr.msk.bf16.vlgmr.msra.gmra.mrb[236].mxu1 %vm548_vm0, %v14956_v28  ;;  %v12783_v28 = vld [vmem:[#allocation7 + $0xd0] sm:$0xff]  }
 0x287   :  { %2689 = vmatprep.mubr.bf16.mxu0 %v18853_v13  ;;  %2742 = vmatprep.mubr.bf16.mxu1 %v18853_v13 }
 0x288   :  { %11427 = vmatpush3.bf16.msra.mxu1 %v12774_v20 }
 0x289   :  { %v15591_v33 = vpop.f32.mrb[132].mxu1  ;;  %v15593_v26 = vpop.f32.mrb[132].mxu0  ;;  %11428 = vmatprep.subr.bf16.mxu1 %v12778_v53 }
 0x28a   :  { %19247 = vst [vmem:[#allocation257_spill] sm:$0xff] %v15591_v33  ;;  %v15597_v18 = vpop.f32.mrb[133].mxu1  ;;  %v15599_v52 = vpop.f32.mrb[133].mxu0 }
 0x28b   :  { %19249 = vst [vmem:[#allocation258_spill] sm:$0xff] %v15597_v18  ;;  %v15603_v48 = vpop.f32.mrb[134].mxu1  ;;  %v15605_v12 = vpop.f32.mrb[134].mxu0  ;;  %v12784_v18 = vld [vmem:[#allocation7 + $0x90] sm:$0xff]  }
 0x28c   :  { %19250 = vst [vmem:[#allocation259_spill] sm:$0xff] %v15603_v48  ;;  %v15609_v14 = vpop.f32.mrb[135].mxu1  ;;  %v15611_v53 = vpop.f32.mrb[135].mxu0  ;;  %11429 = vmatpush3.bf16.msra.mxu1 %v12780_v37 }
 0x28d   :  { %19251 = vst [vmem:[#allocation260_spill] sm:$0xff] %v15609_v14  ;;  %11430 = vmatprep.subr.bf16.mxu1 %v12783_v28 }
 0x28e   :  { %10825 = vmatmul.mubr.msk.bf16.gmra.mrb[240].mxu0 %vm548_vm0, %v15553_v22  ;;  %10827 = vmatmul.mubr.msk.bf16.gmra.mrb[240].mxu1 %vm548_vm0, %v14995_v36 }
 0x28f   :  { %2752 = vmatprep.mubr.bf16.mxu1 %v18853_v13 }
 0x290   :  { %11431 = vmatpush3.bf16.msra.mxu1 %v12784_v18 }
 0x291   :  { %v15620_v20 = vpop.f32.mrb[136].mxu1  ;;  %v15622_v48 = vpop.f32.mrb[136].mxu0 }
 0x292   :  { %19252 = vst [vmem:[#allocation261_spill] sm:$0xff] %v15620_v20  ;;  %v15626_v49 = vpop.f32.mrb[137].mxu1  ;;  %v15628_v14 = vpop.f32.mrb[137].mxu0  ;;  %v12785_v20 = vld [vmem:[#allocation7 + $0xd8] sm:$0xff]  }
 0x293   :  { %19253 = vst [vmem:[#allocation262_spill] sm:$0xff] %v15626_v49  ;;  %v15632_v10 = vpop.f32.mrb[138].mxu1  ;;  %v15634_v1 = vpop.f32.mrb[138].mxu0  ;;  %11432 = vmatprep.subr.bf16.mxu1 %v12785_v20  ;;  %v12787_v20 = vld [vmem:[#allocation7 + $0xe0] sm:$0xff]  }
 0x294   :  { %19254 = vst [vmem:[#allocation263_spill] sm:$0xff] %v15632_v10  ;;  %v15638_v47 = vpop.f32.mrb[139].mxu1  ;;  %v15640_v18 = vpop.f32.mrb[139].mxu0  ;;  %11433 = vmatpush3.bf16.msra.mxu1 %v12786_v41 }
 0x295   :  { %19255 = vst [vmem:[#allocation264_spill] sm:$0xff] %v15638_v47  ;;  %11434 = vmatprep.subr.bf16.mxu1 %v12787_v20 }
 0x296   :  { %10828 = vmatmul.mubr.msk.bf16.gmra.mrb[244].mxu1 %vm548_vm0, %v15122_v59 }
 0x297   :  { %2762 = vmatprep.mubr.bf16.mxu1 %v18853_v13 }
 0x298   :  { %11435 = vmatpush3.bf16.msra.mxu1 %v12788_v16  ;;  %v12790_v16 = vld [vmem:[#allocation7 + $0xa8] sm:$0xff]  }
 0x299   :  { %v15647_v36 = vpop.f32.mrb[140].mxu1  ;;  %v15649_v49 = vpop.f32.mrb[140].mxu0  ;;  %11436 = vmatprep.subr.bf16.mxu1 %v12789_v30 }
 0x29a   :  { %v15651_v28 = vpop.f32.mrb[141].mxu1  ;;  %v15653_v10 = vpop.f32.mrb[141].mxu0 }
 0x29b   :  { %v15655_v27 = vpop.f32.mrb[142].mxu1  ;;  %v15657_v37 = vpop.f32.mrb[142].mxu0 }
 0x29c   :  { %v15659_v47 = vpop.f32.mrb[143].mxu1  ;;  %v15661_v59 = vpop.f32.mrb[143].mxu0  ;;  %11437 = vmatpush3.bf16.msra.mxu1 %v12790_v16  ;;  %v12797_v16 = vld [vmem:[#allocation7 + $0xf8] sm:$0xff]  }
 0x29d   :  { %19256 = vst [vmem:[#allocation265_spill] sm:$0xff] %v15659_v47  ;;  %11438 = vmatprep.subr.bf16.mxu1 %v12791_v6 }
 0x29e   :  { %10829 = vmatmul.mubr.msk.bf16.gmra.mrb[248].mxu1 %vm548_vm0, %v15168_v19 }
 0x29f   :  { %2772 = vmatprep.mubr.bf16.mxu1 %v18853_v13 }
 0x2a1   :  { %v15666_v41 = vpop.f32.mrb[144].mxu1  ;;  %v15668_v54 = vpop.f32.mrb[144].mxu0 }
 0x2a2   :  { %19257 = vst [vmem:[#allocation266_spill] sm:$0xff] %v15666_v41  ;;  %19258 = vst [vmem:[#allocation267_spill] sm:$0xff] %v15668_v54  ;;  %v15670_v33 = vpop.f32.mrb[145].mxu1  ;;  %v15672_v63 = vpop.f32.mrb[145].mxu0  ;;  %v19339_v54 = vld [vmem:[#allocation74_spill] sm:$0xff] }
 0x2a3   :  { %19259 = vst [vmem:[#allocation268_spill] sm:$0xff] %v15670_v33  ;;  %19260 = vst [vmem:[#allocation269_spill] sm:$0xff] %v15672_v63  ;;  %v15674_v55 = vpop.f32.mrb[146].mxu1  ;;  %v15676_v60 = vpop.f32.mrb[146].mxu0  ;;  %v19336_v33 = vld [vmem:[#allocation73_spill] sm:$0xff]  ;;  %v19337_v63 = vld [vmem:[#allocation38_spill] sm:$0xff] }
 0x2a4   :  { %19261 = vst [vmem:[#allocation270_spill] sm:$0xff] %v15674_v55  ;;  %19262 = vst [vmem:[#allocation271_spill] sm:$0xff] %v15676_v60  ;;  %v15678_v19 = vpop.f32.mrb[147].mxu1  ;;  %v15680_v43 = vpop.f32.mrb[147].mxu0 }
 0x2a5   :  { %19263 = vst [vmem:[#allocation272_spill] sm:$0xff] %v15678_v19  ;;  %19264 = vst [vmem:[#allocation273_spill] sm:$0xff] %v15680_v43 }
 0x2a6   :  { %10830 = vmatmul.mubr.msk.bf16.gmra.mrb[252].mxu1 %vm548_vm0, %v15211_v57  ;;  %v12793_v57 = vld [vmem:[#allocation7 + $0xb0] sm:$0xff]  }
 0x2a7   :  { %2782 = vmatprep.mubr.bf16.mxu1 %v18853_v13  ;;  %11439 = vmatpush3.bf16.msra.mxu1 %v12793_v57 }
 0x2a8   :  { %11440 = vmatprep.subr.bf16.mxu1 %v12797_v16 }
 0x2a9   :  { %v15685_v20 = vpop.f32.mrb[148].mxu1  ;;  %v15687_v2 = vpop.f32.mrb[148].mxu0 }
 0x2aa   :  { %19265 = vst [vmem:[#allocation274_spill] sm:$0xff] %v15685_v20  ;;  %19266 = vst [vmem:[#allocation275_spill] sm:$0xff] %v15687_v2  ;;  %v15689_v32 = vpop.f32.mrb[149].mxu1  ;;  %v15691_v34 = vpop.f32.mrb[149].mxu0 }
 0x2ab   :  { %19267 = vst [vmem:[#allocation276_spill] sm:$0xff] %v15689_v32  ;;  %19268 = vst [vmem:[#allocation277_spill] sm:$0xff] %v15691_v34  ;;  %v15693_v19 = vpop.f32.mrb[150].mxu1  ;;  %v15695_v43 = vpop.f32.mrb[150].mxu0 }
 0x2ac   :  { %19269 = vst [vmem:[#allocation278_spill] sm:$0xff] %v15693_v19  ;;  %19270 = vst [vmem:[#allocation279_spill] sm:$0xff] %v15695_v43  ;;  %v15697_v55 = vpop.f32.mrb[151].mxu1  ;;  %v15699_v30 = vpop.f32.mrb[151].mxu0  ;;  %v12799_v19 = vld [vmem:[#allocation7 + $0xb8] sm:$0xff]  }
 0x2ad   :  { %19271 = vst [vmem:[#allocation280_spill] sm:$0xff] %v15697_v55  ;;  %19272 = vst [vmem:[#allocation281_spill] sm:$0xff] %v15699_v30  ;;  %11441 = vmatpush3.bf16.msra.mxu1 %v12799_v19 }
 0x2ae   :  { %10831 = vmatmul.mubr.msk.bf16.gmra.mrb[0].mxu1 %vm548_vm0, %v15483_v4  ;;  %4203 = vmatprep.subr.bf16.mxu1 %v18853_v13 }
 0x2af   :  { %2792 = vmatprep.mubr.bf16.mxu1 %v18853_v13 }
 0x2b1   :  { %v15704_v32 = vpop.f32.mrb[152].mxu1  ;;  %v15706_v34 = vpop.f32.mrb[152].mxu0 }
 0x2b2   :  { %19273 = vst [vmem:[#allocation282_spill] sm:$0xff] %v15704_v32  ;;  %19274 = vst [vmem:[#allocation283_spill] sm:$0xff] %v15706_v34  ;;  %v15708_v43 = vpop.f32.mrb[153].mxu1  ;;  %v15710_v2 = vpop.f32.mrb[153].mxu0  ;;  %v19333_v32 = vld [vmem:[#allocation72_spill] sm:$0xff] }
 0x2b3   :  { %19275 = vst [vmem:[#allocation284_spill] sm:$0xff] %v15708_v43  ;;  %19276 = vst [vmem:[#allocation285_spill] sm:$0xff] %v15710_v2  ;;  %v15712_v30 = vpop.f32.mrb[154].mxu1  ;;  %v15714_v6 = vpop.f32.mrb[154].mxu0  ;;  %v15825_v43 = vld [vmem:[#allocation6] sm:$0xff] }
 0x2b4   :  { %19277 = vst [vmem:[#allocation286_spill] sm:$0xff] %v15712_v30  ;;  %19278 = vst [vmem:[#allocation287_spill] sm:$0xff] %v15714_v6  ;;  %v15716_v4 = vpop.f32.mrb[155].mxu1  ;;  %v15718_v55 = vpop.f32.mrb[155].mxu0 }
 0x2b5   :  { %19279 = vst [vmem:[#allocation288_spill] sm:$0xff] %v15716_v4  ;;  %19280 = vst [vmem:[#allocation289_spill] sm:$0xff] %v15718_v55 }
 0x2b6   :  { %10832 = vmatmul.mubr.msk.bf16.gmra.mrb[4].mxu1 %vm548_vm0, %v15518_v62 }
 0x2b7   :  { %2802 = vmatprep.mubr.bf16.mxu1 %v18853_v13 }
 0x2b9   :  { %v15724_v57 = vpop.f32.mrb[156].mxu1  ;;  %v15726_v2 = vpop.f32.mrb[156].mxu0 }
 0x2ba   :  { %19281 = vst [vmem:[#allocation290_spill] sm:$0xff] %v15724_v57  ;;  %19282 = vst [vmem:[#allocation291_spill] sm:$0xff] %v15726_v2  ;;  %v15728_v16 = vpop.f32.mrb[157].mxu1  ;;  %v15730_v30 = vpop.f32.mrb[157].mxu0 }
 0x2bb   :  { %19283 = vst [vmem:[#allocation292_spill] sm:$0xff] %v15728_v16  ;;  %19284 = vst [vmem:[#allocation293_spill] sm:$0xff] %v15730_v30  ;;  %v15732_v19 = vpop.f32.mrb[158].mxu1  ;;  %v15734_v4 = vpop.f32.mrb[158].mxu0 }
 0x2bc   :  { %19285 = vst [vmem:[#allocation294_spill] sm:$0xff] %v15732_v19  ;;  %19286 = vst [vmem:[#allocation295_spill] sm:$0xff] %v15734_v4  ;;  %v15736_v55 = vpop.f32.mrb[159].mxu1  ;;  %v15738_v6 = vpop.f32.mrb[159].mxu0 }
 0x2bd   :  { %19287 = vst [vmem:[#allocation296_spill] sm:$0xff] %v15736_v55  ;;  %19288 = vst [vmem:[#allocation297_spill] sm:$0xff] %v15738_v6 }
 0x2be   :  { %10833 = vmatmul.mubr.msk.bf16.gmra.mrb[8].mxu1 %vm548_vm0, %v15553_v22  ;;  %vm10583_vm0 = vcmask 80896  }
 0x2c1   :  { %v15742_v62 = vpop.f32.mrb[160].mxu1  ;;  %v15744_v57 = vpop.f32.mrb[160].mxu0 }
 0x2c2   :  { %19289 = vst [vmem:[#allocation298_spill] sm:$0xff] %v15742_v62  ;;  %19290 = vst [vmem:[#allocation299_spill] sm:$0xff] %v15744_v57  ;;  %v15746_v2 = vpop.f32.mrb[161].mxu1  ;;  %v15748_v16 = vpop.f32.mrb[161].mxu0 }
 0x2c3   :  { %19291 = vst [vmem:[#allocation300_spill] sm:$0xff] %v15746_v2  ;;  %19292 = vst [vmem:[#allocation301_spill] sm:$0xff] %v15748_v16  ;;  %v15750_v30 = vpop.f32.mrb[162].mxu1  ;;  %v15752_v19 = vpop.f32.mrb[162].mxu0 }
 0x2c4   :  { %19293 = vst [vmem:[#allocation302_spill] sm:$0xff] %v15750_v30  ;;  %19294 = vst [vmem:[#allocation303_spill] sm:$0xff] %v15752_v19  ;;  %v15754_v4 = vpop.f32.mrb[163].mxu1  ;;  %v15756_v55 = vpop.f32.mrb[163].mxu0 }
 0x2c5   :  { %19295 = vst [vmem:[#allocation304_spill] sm:$0xff] %v15754_v4  ;;  %19296 = vst [vmem:[#allocation305_spill] sm:$0xff] %v15756_v55 }
 0x2c9   :  { %v15758_v6 = vpop.f32.mrb[164].mxu1  ;;  %v15760_v13 = vpop.f32.mrb[164].mxu0 }
 0x2ca   :  { %19297 = vst [vmem:[#allocation306_spill] sm:$0xff] %v15758_v6  ;;  %19298 = vst [vmem:[#allocation307_spill] sm:$0xff] %v15760_v13  ;;  %v15762_v22 = vpop.f32.mrb[165].mxu1  ;;  %v15764_v62 = vpop.f32.mrb[165].mxu0 }
 0x2cb   :  { %19299 = vst [vmem:[#allocation308_spill] sm:$0xff] %v15762_v22  ;;  %19300 = vst [vmem:[#allocation309_spill] sm:$0xff] %v15764_v62  ;;  %v15766_v57 = vpop.f32.mrb[166].mxu1  ;;  %v15768_v2 = vpop.f32.mrb[166].mxu0 }
 0x2cc   :  { %19301 = vst [vmem:[#allocation310_spill] sm:$0xff] %v15766_v57  ;;  %19302 = vst [vmem:[#allocation311_spill] sm:$0xff] %v15768_v2  ;;  %v15770_v16 = vpop.f32.mrb[167].mxu1  ;;  %v15772_v30 = vpop.f32.mrb[167].mxu0 }
 0x2cd   :  { %19303 = vst [vmem:[#allocation312_spill] sm:$0xff] %v15770_v16  ;;  %19304 = vst [vmem:[#allocation313_spill] sm:$0xff] %v15772_v30 }
 0x2d1   :  { %v15774_v19 = vpop.f32.mrb[168].mxu1  ;;  %v15776_v4 = vpop.f32.mrb[168].mxu0 }
 0x2d2   :  { %19305 = vst [vmem:[#allocation314_spill] sm:$0xff] %v15774_v19  ;;  %19306 = vst [vmem:[#allocation315_spill] sm:$0xff] %v15776_v4  ;;  %v15778_v55 = vpop.f32.mrb[169].mxu1  ;;  %v15780_v6 = vpop.f32.mrb[169].mxu0 }
 0x2d3   :  { %19307 = vst [vmem:[#allocation316_spill] sm:$0xff] %v15778_v55  ;;  %19308 = vst [vmem:[#allocation317_spill] sm:$0xff] %v15780_v6  ;;  %v15782_v13 = vpop.f32.mrb[170].mxu1  ;;  %v15784_v22 = vpop.f32.mrb[170].mxu0 }
 0x2d4   :  { %19309 = vst [vmem:[#allocation318_spill] sm:$0xff] %v15782_v13  ;;  %19310 = vst [vmem:[#allocation319_spill] sm:$0xff] %v15784_v22  ;;  %v15786_v62 = vpop.f32.mrb[171].mxu1  ;;  %v15788_v57 = vpop.f32.mrb[171].mxu0  ;;  %v3071_v22 = vlaneseq }
 0x2d5   :  { %19311 = vst [vmem:[#allocation320_spill] sm:$0xff] %v15786_v62  ;;  %19312 = vst [vmem:[#allocation321_spill] sm:$0xff] %v15788_v57 }
 0x2d9   :  { %v15790_v2 = vpop.f32.mrb[172].mxu1  ;;  %v15792_v16 = vpop.f32.mrb[172].mxu0 }
 0x2da   :  { %19313 = vst [vmem:[#allocation322_spill] sm:$0xff] %v15790_v2  ;;  %19314 = vst [vmem:[#allocation323_spill] sm:$0xff] %v15792_v16  ;;  %v15794_v30 = vpop.f32.mrb[173].mxu1  ;;  %v15796_v19 = vpop.f32.mrb[173].mxu0 }
 0x2db   :  { %19315 = vst [vmem:[#allocation324_spill] sm:$0xff] %v15794_v30  ;;  %19316 = vst [vmem:[#allocation325_spill] sm:$0xff] %v15796_v19  ;;  %v15798_v4 = vpop.f32.mrb[174].mxu1  ;;  %v15800_v55 = vpop.f32.mrb[174].mxu0  ;;  %v15814_v30 = vshrl.u32 %v3071_v22, 7 }
 0x2dc   :  { %19317 = vst [vmem:[#allocation326_spill] sm:$0xff] %v15798_v4  ;;  %19318 = vst [vmem:[#allocation327_spill] sm:$0xff] %v15800_v55  ;;  %v15802_v6 = vpop.f32.mrb[175].mxu1  ;;  %v15804_v13 = vpop.f32.mrb[175].mxu0 }
 0x2dd   :  { %19319 = vst [vmem:[#allocation328_spill] sm:$0xff] %v15802_v6  ;;  %19320 = vst [vmem:[#allocation329_spill] sm:$0xff] %v15804_v13  ;;  %v18717_v13 = vsub.s32 0, %v15814_v30 }
 0x2de   :  { %19325 = vst [vmem:[#allocation334_spill] sm:$0xff] %v15814_v30 }
 0x2e1   :  { %v15806_v62 = vpop.f32.mrb[176].mxu1  ;;  %v15808_v57 = vpop.f32.mrb[176].mxu0 }
 0x2e2   :  { %19321 = vst [vmem:[#allocation330_spill] sm:$0xff] %v15806_v62  ;;  %19322 = vst [vmem:[#allocation331_spill] sm:$0xff] %v15808_v57  ;;  %v15810_v2 = vpop.f32.mrb[177].mxu1  ;;  %v15812_v16 = vpop.f32.mrb[177].mxu0  ;;  %v18718_v62 = vsub.s32 1, %v15814_v30 }
 0x2e3   :  { %19323 = vst [vmem:[#allocation332_spill] sm:$0xff] %v15810_v2  ;;  %19324 = vst [vmem:[#allocation333_spill] sm:$0xff] %v15812_v16  ;;  %v15816_v19 = vpop.f32.mrb[178].mxu1  ;;  %v15818_v4 = vpop.f32.mrb[178].mxu0 }
 0x2e4   :  { %19326 = vst [vmem:[#allocation335_spill] sm:$0xff] %v15816_v19  ;;  %19327 = vst [vmem:[#allocation336_spill] sm:$0xff] %v15818_v4  ;;  %v15820_v55 = vpop.f32.mrb[179].mxu1  ;;  %v15822_v6 = vpop.f32.mrb[179].mxu0  ;;  %v15834_v19 = vrot.slane %v15825_v43, %v18717_v13  ;;  %v15842_v16 = vrot.slane %v15825_v43, %v18718_v62 }
 0x2e5   :  { %19328 = vst [vmem:[#allocation337_spill] sm:$0xff] %v15820_v55  ;;  %19329 = vst [vmem:[#allocation338_spill] sm:$0xff] %v15822_v6 }
 0x2e9   :  { %v15828_v57 = vpop.f32.mrb[180].mxu1  ;;  %v2395_v2 = vpop.f32.mrb[180].mxu0 }
 0x2ea   :  { %19330 = vst [vmem:[#allocation339_spill] sm:$0xff] %v15828_v57  ;;  %v2813_v22 = vmax.f32 %v15458_v42, %v2395_v2  ;;  %v15836_v4 = vpop.f32.mrb[181].mxu1  ;;  %v2397_v55 = vpop.f32.mrb[181].mxu0  ;;  %v19334_v42 = vld [vmem:[#allocation36_spill] sm:$0xff] }
 0x2eb   :  { %19331 = vst [vmem:[#allocation340_spill] sm:$0xff] %v15836_v4  ;;  %v2814_v6 = vmax.f32 %v15464_v51, %v2397_v55  ;;  %v15844_v34 = vpop.f32.mrb[182].mxu1  ;;  %v2399_v57 = vpop.f32.mrb[182].mxu0  ;;  %v19335_v2 = vmax.f32 %v19333_v32, %v19334_v42  ;;  %v19338_v55 = vmax.f32 %v19336_v33, %v19337_v63  ;;  %v19343_v42 = vld [vmem:[#allocation157_spill] sm:$0xff] }
 0x2ec   :  { %19332 = vst [vmem:[#allocation341_spill] sm:$0xff] %v15844_v34  ;;  %v2821_v13 = vmax.f32 %v15470_v3, %v2399_v57  ;;  %v15850_v60 = vpop.f32.mrb[183].mxu1  ;;  %v2401_v4 = vpop.f32.mrb[183].mxu0  ;;  %v19340_v34 = vld [vmem:[#allocation155_spill] sm:$0xff] }
 0x2ed   :  { %v2941_v20 = vmax.f32 %v19335_v2, %v2813_v22  ;;  %v2942_v51 = vmax.f32 %v19338_v55, %v2814_v6  ;;  %v2822_v41 = vmax.f32 %v15476_v17, %v2401_v4  ;;  %v19341_v47 = vmax.f32 %v19339_v54, %v19340_v34  ;;  %v19342_v22 = vld [vmem:[#allocation76_spill] sm:$0xff]  ;;  %v19345_v6 = vld [vmem:[#allocation77_spill] sm:$0xff] }
 0x2ee   :  { %v19344_v3 = vmax.f32 %v19342_v22, %v19343_v42  ;;  %v19349_v22 = vld [vmem:[#allocation78_spill] sm:$0xff] }
 0x2ef   :  { %v3111_v62 = vadd.f32 %v15834_v19, %v2941_v20  ;;  %v2949_v45 = vmax.f32 %v19341_v47, %v2821_v13  ;;  %v3112_v32 = vadd.f32 %v15842_v16, %v2942_v51 }
 0x2f0   :  { %v2950_v57 = vmax.f32 %v19344_v3, %v2822_v41 }
 0x2f1   :  { %13244 = vtanh.f32 %v3111_v62  ;;  %v3119_v2 = vadd.f32 %v15834_v19, %v2949_v45  ;;  %v15866_v63 = vpop.f32.mrb[184].mxu1  ;;  %v2405_v17 = vpop.f32.mrb[184].mxu0  ;;  %v19346_v45 = vld [vmem:[#allocation40_spill] sm:$0xff] }
 0x2f2   :  { %13246 = vtanh.f32 %v3112_v32  ;;  %v3120_v33 = vadd.f32 %v15842_v16, %v2950_v57  ;;  %v2829_v20 = vmax.f32 %v15493_v9, %v2405_v17  ;;  %v15869_v54 = vpop.f32.mrb[185].mxu1  ;;  %v2407_v13 = vpop.f32.mrb[185].mxu0  ;;  %v19347_v4 = vmax.f32 %v19345_v6, %v19346_v45  ;;  %v19350_v9 = vld [vmem:[#allocation159_spill] sm:$0xff] }
 0x2f3   :  { %13248 = vtanh.f32 %v3119_v2  ;;  %v2830_v47 = vmax.f32 %v15499_v46, %v2407_v13  ;;  %v15872_v34 = vpop.f32.mrb[186].mxu1  ;;  %v2409_v41 = vpop.f32.mrb[186].mxu0  ;;  %v19351_v42 = vmax.f32 %v19349_v22, %v19350_v9  ;;  %v19352_v2 = vld [vmem:[#allocation79_spill] sm:$0xff] }
 0x2f4   :  { %13250 = vtanh.f32 %v3120_v33  ;;  %v2957_v62 = vmax.f32 %v19347_v4, %v2829_v20  ;;  %v2837_v55 = vmax.f32 %v15505_v8, %v2409_v41  ;;  %v15878_v51 = vpop.f32.mrb[187].mxu1  ;;  %v2411_v32 = vpop.f32.mrb[187].mxu0  ;;  %v19353_v33 = vld [vmem:[#allocation161_spill] sm:$0xff]  ;;  %v19356_v45 = vld [vmem:[#allocation163_spill] sm:$0xff] }
 0x2f5   :  { %19348 = vst [vmem:[#allocation72_spill] sm:$0xff] %v15878_v51  ;;  %v2958_v3 = vmax.f32 %v19351_v42, %v2830_v47  ;;  %v2838_v57 = vmax.f32 %v15511_v50, %v2411_v32  ;;  %v19354_v17 = vmax.f32 %v19352_v2, %v19353_v33  ;;  %v19355_v20 = vld [vmem:[#allocation81_spill] sm:$0xff]  ;;  %v19361_v33 = vld [vmem:[#allocation83_spill] sm:$0xff] }
 0x2f6   :  { %v3127_v46 = vadd.f32 %v15834_v19, %v2957_v62  ;;  %v19357_v8 = vmax.f32 %v19355_v20, %v19356_v45  ;;  %v12795_v51 = vld [vmem:[#allocation7 + $0x148] sm:$0xff]  }
 0x2f7   :  { %v2965_v13 = vmax.f32 %v19354_v17, %v2837_v55  ;;  %v3128_v6 = vadd.f32 %v15842_v16, %v2958_v3  ;;  %v19362_v17 = vld [vmem:[#allocation165_spill] sm:$0xff] }
 0x2f8   :  { %v2966_v41 = vmax.f32 %v19357_v8, %v2838_v57  ;;  %13252 = vtanh.f32 %v3127_v46 }
 0x2f9   :  { %v3135_v4 = vadd.f32 %v15834_v19, %v2965_v13  ;;  %13254 = vtanh.f32 %v3128_v6  ;;  %v15894_v22 = vpop.f32.mrb[188].mxu1  ;;  %v2415_v50 = vpop.f32.mrb[188].mxu0  ;;  %v19363_v13 = vmax.f32 %v19361_v33, %v19362_v17  ;;  %v19370_v33 = vld [vmem:[#allocation87_spill] sm:$0xff] }
 0x2fa   :  { %v3136_v47 = vadd.f32 %v15842_v16, %v2966_v41  ;;  %19358 = vst [vmem:[#allocation36_spill] sm:$0xff] %v15894_v22  ;;  %v2845_v32 = vmax.f32 %v15528_v35, %v2415_v50  ;;  %v15897_v55 = vpop.f32.mrb[189].mxu1  ;;  %v2417_v9 = vpop.f32.mrb[189].mxu0 }
 0x2fb   :  { %v13245_v62 = vpop.eup %13244  ;;  %13256 = vtanh.f32 %v3135_v4  ;;  %19359 = vst [vmem:[#allocation73_spill] sm:$0xff] %v15897_v55  ;;  %v2846_v3 = vmax.f32 %v15534_v21, %v2417_v9  ;;  %v15900_v57 = vpop.f32.mrb[190].mxu1  ;;  %v19366_v4 = vld [vmem:[#allocation85_spill] sm:$0xff] }
 0x2fc   :  { %v13247_v42 = vpop.eup %13246  ;;  %13258 = vtanh.f32 %v3136_v47  ;;  %19360 = vst [vmem:[#allocation38_spill] sm:$0xff] %v15900_v57  ;;  %v2419_v46 = vpop.f32.mrb[190].mxu0  ;;  %v2973_v6 = vmax.f32 %v19363_v13, %v2845_v32  ;;  %v19367_v47 = vld [vmem:[#allocation167_spill] sm:$0xff]  ;;  %v19371_v32 = vld [vmem:[#allocation169_spill] sm:$0xff] }
 0x2fd   :  { %v13249_v2 = vpop.eup %13248  ;;  %v2853_v20 = vmax.f32 %v15540_v39, %v2419_v46  ;;  %v15906_v45 = vpop.f32.mrb[191].mxu1  ;;  %v19368_v50 = vmax.f32 %v19366_v4, %v19367_v47  ;;  %v19372_v17 = vmax.f32 %v19370_v33, %v19371_v32  ;;  %v12794_v46 = vld [vmem:[#allocation7 + $0x100] sm:$0xff]   ;;  %v19377_v32 = vld [vmem:[#allocation173_spill] sm:$0xff] }
 0x2fe   :  { %19364 = vst [vmem:[#allocation74_spill] sm:$0xff] %v15906_v45  ;;  %v2421_v35 = vpop.f32.mrb[191].mxu0  ;;  %v13251_v8 = vpop.eup %13250  ;;  %v15908_v41 = vpack.c.bf16 %v13249_v2, %v13245_v62  ;;  %v3143_v55 = vadd.f32 %v15834_v19, %v2973_v6  ;;  %v19373_v45 = vld [vmem:[#allocation89_spill] sm:$0xff]  ;;  %v19374_v62 = vld [vmem:[#allocation171_spill] sm:$0xff] }
 0x2ff   :  { %v2974_v21 = vmax.f32 %v19368_v50, %v2846_v3  ;;  %v2854_v9 = vmax.f32 %v15546_v5, %v2421_v35  ;;  %v15914_v57 = vpack.c.bf16 %v13251_v8, %v13247_v42  ;;  %v2981_v39 = vmax.f32 %v19372_v17, %v2853_v20  ;;  %v19376_v33 = vld [vmem:[#allocation91_spill] sm:$0xff] }
 0x300   :  { %19365 = vst [vmem:[#allocation155_spill] sm:$0xff] %v15908_v41  ;;  %v19375_v2 = vmax.f32 %v19373_v45, %v19374_v62  ;;  %13260 = vtanh.f32 %v3143_v55  ;;  %v12796_v55 = vld [vmem:[#allocation7 + $0x108] sm:$0xff]   ;;  %v19378_v17 = vmax.f32 %v19376_v33, %v19377_v32  ;;  %v19385_v33 = vld [vmem:[#allocation94_spill] sm:$0xff] }
 0x301   :  { %19369 = vst [vmem:[#allocation76_spill] sm:$0xff] %v15914_v57  ;;  %v3144_v13 = vadd.f32 %v15842_v16, %v2974_v21  ;;  %v3151_v3 = vadd.f32 %v15834_v19, %v2981_v39  ;;  %3968 = vmatprep.mubr.bf16.mxu0 %v15914_v57  ;;  %v15927_v42 = vpop.f32.mrb[192].mxu1  ;;  %v2425_v6 = vpop.f32.mrb[192].mxu0  ;;  %v12798_v21 = vld [vmem:[#allocation7 + $0x150] sm:$0xff]  }
 0x302   :  { %v2982_v22 = vmax.f32 %v19375_v2, %v2854_v9  ;;  %3969 = vmatmul.mubr.bf16.vlgmr.msra.gmra.mrb[244].mxu0 %v15908_v41  ;;  %v13253_v20 = vpop.eup %13252  ;;  %v2861_v35 = vmax.f32 %v15563_v44, %v2425_v6  ;;  %v15931_v45 = vpop.f32.mrb[193].mxu1 }
 0x303   :  { %13262 = vtanh.f32 %v3144_v13  ;;  %v2427_v8 = vpop.f32.mrb[193].mxu0  ;;  %11491 = vmatpush3.bf16.msra.mxu0 %v12794_v46  ;;  %v13255_v4 = vpop.eup %13254 }
 0x304   :  { %v3152_v5 = vadd.f32 %v15842_v16, %v2982_v22  ;;  %13264 = vtanh.f32 %v3151_v3  ;;  %v2862_v47 = vmax.f32 %v15569_v25, %v2427_v8  ;;  %v15934_v50 = vpop.f32.mrb[194].mxu1  ;;  %v2429_v22 = vpop.f32.mrb[194].mxu0  ;;  %11492 = vmatprep.subr.bf16.mxu0 %v12795_v51  ;;  %v2989_v39 = vmax.f32 %v19378_v17, %v2861_v35  ;;  %v19381_v3 = vld [vmem:[#allocation93_spill] sm:$0xff]  ;;  %v19382_v25 = vld [vmem:[#allocation175_spill] sm:$0xff] }
 0x305   :  { %v13257_v9 = vpop.eup %13256  ;;  %v2869_v44 = vmax.f32 %v15575_v38, %v2429_v22  ;;  %v15940_v13 = vpop.f32.mrb[195].mxu1  ;;  %v19386_v35 = vld [vmem:[#allocation177_spill] sm:$0xff] }
 0x306   :  { %13266 = vtanh.f32 %v3152_v5  ;;  %19379 = vst [vmem:[#allocation157_spill] sm:$0xff] %v15940_v13  ;;  %v2431_v46 = vpop.f32.mrb[195].mxu0  ;;  %v13259_v62 = vpop.eup %13258  ;;  %v15942_v2 = vpack.c.bf16 %v13257_v9, %v13253_v20  ;;  %v19383_v5 = vmax.f32 %v19381_v3, %v19382_v25  ;;  %v3159_v41 = vadd.f32 %v15834_v19, %v2989_v39  ;;  %v12800_v22 = vld [vmem:[#allocation7 + $0x110] sm:$0xff]   ;;  %v19388_v20 = vld [vmem:[#allocation96_spill] sm:$0xff]  ;;  %v19389_v9 = vld [vmem:[#allocation179_spill] sm:$0xff] }
 0x307   :  { %v2870_v51 = vmax.f32 %v15581_v61, %v2431_v46  ;;  %v15948_v8 = vpack.c.bf16 %v13259_v62, %v13255_v4  ;;  %v19387_v32 = vmax.f32 %v19385_v33, %v19386_v35  ;;  %11493 = vmatpush3.bf16.msra.mxu0 %v12796_v55  ;;  %v19390_v57 = vmax.f32 %v19388_v20, %v19389_v9  ;;  %v19392_v33 = vld [vmem:[#allocation42_spill] sm:$0xff]  ;;  %v19395_v9 = vld [vmem:[#allocation100_spill] sm:$0xff] }
 0x308   :  { %19380 = vst [vmem:[#allocation77_spill] sm:$0xff] %v15942_v2  ;;  %v2990_v6 = vmax.f32 %v19383_v5, %v2862_v47  ;;  %11494 = vmatprep.subr.bf16.mxu0 %v12798_v21  ;;  %v12801_v47 = vld [vmem:[#allocation7 + $0x158] sm:$0xff]   ;;  %13268 = vtanh.f32 %v3159_v41  ;;  %v12803_v5 = vld [vmem:[#allocation7 + $0x160] sm:$0xff]  }
 0x309   :  { %19384 = vst [vmem:[#allocation40_spill] sm:$0xff] %v15948_v8  ;;  %v2997_v38 = vmax.f32 %v19387_v32, %v2869_v44  ;;  %v2998_v13 = vmax.f32 %v19390_v57, %v2870_v51  ;;  %3975 = vmatprep.mubr.bf16.mxu0 %v15948_v8  ;;  %v15961_v39 = vpop.f32.mrb[196].mxu1  ;;  %v2435_v55 = vpop.f32.mrb[196].mxu0  ;;  %v12802_v41 = vld [vmem:[#allocation7 + $0x118] sm:$0xff]  }
 0x30a   :  { %v3160_v17 = vadd.f32 %v15842_v16, %v2990_v6  ;;  %3976 = vmatmul.mubr.bf16.gmra.mrb[248].mxu0 %v15942_v2  ;;  %v13261_v44 = vpop.eup %13260  ;;  %v2877_v46 = vmax.f32 %v15593_v26, %v2435_v55  ;;  %v15965_v57 = vpop.f32.mrb[197].mxu1  ;;  %v19391_v51 = vld [vmem:[#allocation98_spill] sm:$0xff] }
 0x30b   :  { %v3167_v61 = vadd.f32 %v15834_v19, %v2997_v38  ;;  %v3168_v4 = vadd.f32 %v15842_v16, %v2998_v13  ;;  %v2437_v21 = vpop.f32.mrb[197].mxu0  ;;  %11495 = vmatpush3.bf16.msra.mxu0 %v12800_v22  ;;  %v15968_v25 = vpop.f32.mrb[198].mxu1  ;;  %v19393_v35 = vmax.f32 %v19391_v51, %v19392_v33  ;;  %v19398_v51 = vld [vmem:[#allocation102_spill] sm:$0xff] }
 0x30c   :  { %13270 = vtanh.f32 %v3160_v17  ;;  %v2878_v3 = vmax.f32 %v15599_v52, %v2437_v21  ;;  %v2439_v13 = vpop.f32.mrb[198].mxu0  ;;  %11496 = vmatprep.subr.bf16.mxu0 %v12801_v47  ;;  %v15974_v38 = vpop.f32.mrb[199].mxu1  ;;  %v19396_v52 = vld [vmem:[#allocation181_spill] sm:$0xff] }
 0x30d   :  { %13272 = vtanh.f32 %v3167_v61  ;;  %v13263_v62 = vpop.eup %13262  ;;  %v3005_v32 = vmax.f32 %v19393_v35, %v2877_v46  ;;  %v2885_v26 = vmax.f32 %v15605_v12, %v2439_v13  ;;  %v2441_v22 = vpop.f32.mrb[199].mxu0  ;;  %v19397_v61 = vmax.f32 %v19395_v9, %v19396_v52  ;;  %v19399_v46 = vld [vmem:[#allocation183_spill] sm:$0xff] }
 0x30e   :  { %13274 = vtanh.f32 %v3168_v4  ;;  %v13265_v6 = vpop.eup %13264  ;;  %v2886_v47 = vmax.f32 %v15611_v53, %v2441_v22  ;;  %v19400_v33 = vmax.f32 %v19398_v51, %v19399_v46  ;;  %v12804_v13 = vld [vmem:[#allocation7 + $0x120] sm:$0xff]  }
 0x30f   :  { %v15976_v20 = vpack.c.bf16 %v13265_v6, %v13261_v44  ;;  %v3006_v4 = vmax.f32 %v19397_v61, %v2878_v3  ;;  %v3175_v21 = vadd.f32 %v15834_v19, %v3005_v32  ;;  %11497 = vmatpush3.bf16.msra.mxu0 %v12802_v41  ;;  %v19401_v44 = vld [vmem:[#allocation104_spill] sm:$0xff] }
 0x310   :  { %v13267_v17 = vpop.eup %13266  ;;  %v3013_v12 = vmax.f32 %v19400_v33, %v2885_v26  ;;  %v19402_v6 = vld [vmem:[#allocation184_spill] sm:$0xff]  ;;  %11498 = vmatprep.subr.bf16.mxu0 %v12803_v5 }
 0x311   :  { %19394 = vst [vmem:[#allocation78_spill] sm:$0xff] %v15976_v20  ;;  %v15982_v55 = vpack.c.bf16 %v13267_v17, %v13263_v62  ;;  %v3176_v35 = vadd.f32 %v15842_v16, %v3006_v4  ;;  %v19403_v2 = vmax.f32 %v19401_v44, %v19402_v6  ;;  %v12806_v3 = vld [vmem:[#allocation7 + $0x168] sm:$0xff]   ;;  %13276 = vtanh.f32 %v3175_v21  ;;  %v15995_v32 = vpop.f32.mrb[200].mxu1  ;;  %v2445_v41 = vpop.f32.mrb[200].mxu0  ;;  %v12809_v4 = vld [vmem:[#allocation7 + $0x170] sm:$0xff]  }
 0x312   :  { %v3183_v53 = vadd.f32 %v15834_v19, %v3013_v12  ;;  %v13269_v26 = vpop.eup %13268  ;;  %v2893_v22 = vmax.f32 %v15622_v48, %v2445_v41  ;;  %v2447_v5 = vpop.f32.mrb[201].mxu0  ;;  %v12807_v17 = vld [vmem:[#allocation7 + $0x128] sm:$0xff]  }
 0x313   :  { %v3014_v8 = vmax.f32 %v19403_v2, %v2886_v47  ;;  %3982 = vmatprep.mubr.bf16.mxu0 %v15982_v55  ;;  %13278 = vtanh.f32 %v3176_v35  ;;  %v15999_v2 = vpop.f32.mrb[201].mxu1  ;;  %11499 = vmatpush3.bf16.msra.mxu0 %v12804_v13  ;;  %v2894_v52 = vmax.f32 %v15628_v14, %v2447_v5  ;;  %v19404_v21 = vld [vmem:[#allocation45_spill] sm:$0xff]  ;;  %v3081_v13 = vsub.s32 2, %v15814_v30 }
 0x314   :  { %3983 = vmatmul.mubr.bf16.gmra.mrb[252].mxu0 %v15976_v20  ;;  %13280 = vtanh.f32 %v3183_v53  ;;  %v16002_v61 = vpop.f32.mrb[202].mxu1  ;;  %11500 = vmatprep.subr.bf16.mxu0 %v12806_v3  ;;  %v19405_v51 = vmax.f32 %v14457_v7, %v19404_v21  ;;  %v19407_v14 = vmax.f32 %v14461_v11, %v15011_v31  ;;  %v3085_v53 = vsub.s32 3, %v15814_v30  ;;  %v12810_v5 = vld [vmem:[#allocation7 + $0x130] sm:$0xff]  }
 0x315   :  { %v3184_v62 = vadd.f32 %v15842_v16, %v3014_v8  ;;  %v2449_v8 = vpop.f32.mrb[202].mxu0  ;;  %v16008_v33 = vpop.f32.mrb[203].mxu1 }
 0x316   :  { %v13271_v9 = vpop.eup %13270  ;;  %v3021_v46 = vmax.f32 %v19405_v51, %v2893_v22  ;;  %v2901_v48 = vmax.f32 %v15634_v1, %v2449_v8  ;;  %v2451_v12 = vpop.f32.mrb[203].mxu0  ;;  %v3022_v6 = vmax.f32 %v19407_v14, %v2894_v52  ;;  %v19411_v8 = vld [vmem:[#allocation75_spill] sm:$0xff]  ;;  %v16033_v51 = vrot.slane %v15825_v43, %v3081_v13 }
 0x317   :  { %13282 = vtanh.f32 %v3184_v62  ;;  %v13273_v47 = vpop.eup %13272  ;;  %v2902_v3 = vmax.f32 %v15640_v18, %v2451_v12  ;;  %v19409_v62 = vld [vmem:[#allocation187_spill] sm:$0xff]  ;;  %11501 = vmatpush3.bf16.msra.mxu0 %v12807_v17  ;;  %v3089_v18 = vsub.s32 4, %v15814_v30 }
 0x318   :  { %v13275_v35 = vpop.eup %13274  ;;  %v16011_v44 = vpack.c.bf16 %v13273_v47, %v13269_v26  ;;  %v3191_v1 = vadd.f32 %v15834_v19, %v3021_v46  ;;  %v19410_v41 = vmax.f32 %v14465_v15, %v19409_v62  ;;  %v3192_v26 = vadd.f32 %v15842_v16, %v3022_v6  ;;  %v19412_v47 = vld [vmem:[#allocation189_spill] sm:$0xff]  ;;  %11502 = vmatprep.subr.bf16.mxu0 %v12809_v4  ;;  %v12811_v52 = vld [vmem:[#allocation7 + $0x178] sm:$0xff]  }
 0x319   :  { %v16018_v7 = vpack.c.bf16 %v13275_v35, %v13271_v9  ;;  %v19413_v31 = vmax.f32 %v19411_v8, %v19412_v47  ;;  %v2455_v17 = vpop.f32.mrb[204].mxu0  ;;  %v2508_v21 = vpop.f32.mrb[204].mxu1  ;;  %v16037_v46 = vrot.slane %v15825_v43, %v3085_v53  ;;  %v3093_v6 = vsub.s32 5, %v15814_v30  ;;  %v19416_v47 = vld [vmem:[#allocation46_spill] sm:$0xff] }
 0x31a   :  { %19406 = vst [vmem:[#allocation159_spill] sm:$0xff] %v16011_v44  ;;  %v3029_v22 = vmax.f32 %v19410_v41, %v2901_v48  ;;  %13284 = vtanh.f32 %v3191_v1  ;;  %v2909_v48 = vmax.f32 %v15649_v49, %v2455_v17  ;;  %v2815_v12 = vmax.f32 %v15647_v36, %v2508_v21  ;;  %v2457_v35 = vpop.f32.mrb[205].mxu0  ;;  %v2510_v14 = vpop.f32.mrb[205].mxu1  ;;  %v12820_v49 = vld [vmem:[#allocation7 + $0x220] sm:$0xff]  }
 0x31b   :  { %19408 = vst [vmem:[#allocation79_spill] sm:$0xff] %v16018_v7  ;;  %v3030_v11 = vmax.f32 %v19413_v31, %v2902_v3  ;;  %3989 = vmatprep.mubr.bf16.mxu0 %v16018_v7  ;;  %13286 = vtanh.f32 %v3192_v26  ;;  %v13277_v4 = vpop.eup %13276  ;;  %11503 = vmatpush3.bf16.msra.mxu0 %v12810_v5  ;;  %v12813_v3 = vld [vmem:[#allocation7 + $0x138] sm:$0xff]   ;;  %v2910_v13 = vmax.f32 %v15653_v10, %v2457_v35  ;;  %v2459_v53 = vpop.f32.mrb[206].mxu0  ;;  %v19420_v35 = vld [vmem:[#allocation92_spill] sm:$0xff] }
 0x31c   :  { %v3199_v9 = vadd.f32 %v15834_v19, %v3029_v22  ;;  %3990 = vmatmul.mubr.bf16.gmra.mrb[0].mxu0 %v16011_v44  ;;  %v2816_v62 = vmax.f32 %v15651_v28, %v2510_v14  ;;  %v2512_v41 = vpop.f32.mrb[206].mxu1  ;;  %v16045_v22 = vrot.slane %v15825_v43, %v3089_v18  ;;  %11504 = vmatprep.subr.bf16.mxu0 %v12811_v52  ;;  %v19415_v5 = vld [vmem:[#allocation90_spill] sm:$0xff] }
 0x31d   :  { %v3200_v15 = vadd.f32 %v15842_v16, %v3030_v11  ;;  %v13279_v1 = vpop.eup %13278  ;;  %v19414_v26 = vmax.f32 %v14481_v23, %v15037_v58  ;;  %v19417_v31 = vmax.f32 %v19415_v5, %v19416_v47  ;;  %v2917_v10 = vmax.f32 %v15657_v37, %v2459_v53  ;;  %v19421_v23 = vld [vmem:[#allocation47_spill] sm:$0xff]  ;;  %v19430_v5 = vld [vmem:[#allocation265_spill] sm:$0xff] }
 0x31e   :  { %13288 = vtanh.f32 %v3199_v9  ;;  %v13281_v36 = vpop.eup %13280  ;;  %v2823_v28 = vmax.f32 %v15655_v27, %v2512_v41  ;;  %v2461_v9 = vpop.f32.mrb[207].mxu0  ;;  %v19419_v52 = vmax.f32 %v14485_v29, %v15047_v0  ;;  %v19422_v58 = vmax.f32 %v19420_v35, %v19421_v23 }
 0x31f   :  { %13290 = vtanh.f32 %v3200_v15  ;;  %v3037_v8 = vmax.f32 %v19414_v26, %v2909_v48  ;;  %v2943_v11 = vmax.f32 %v19417_v31, %v2815_v12  ;;  %v2514_v15 = vpop.f32.mrb[207].mxu1  ;;  %v16055_v18 = vpack.c.bf16 %v13281_v36, %v13277_v4  ;;  %11505 = vmatpush3.bf16.msra.mxu0 %v12813_v3 }
 0x320   :  { %v3038_v21 = vmax.f32 %v19419_v52, %v2910_v13  ;;  %v2944_v48 = vmax.f32 %v19422_v58, %v2816_v62  ;;  %v2918_v14 = vmax.f32 %v15661_v59, %v2461_v9  ;;  %v19424_v4 = vmax.f32 %v14489_v24, %v15055_v40  ;;  %v19425_v13 = vld [vmem:[#allocation48_spill] sm:$0xff]  ;;  %11554 = vmatprep.subr.bf16.mxu0 %v12820_v49  ;;  %v19435_v52 = vld [vmem:[#allocation266_spill] sm:$0xff] }
 0x321   :  { %v13283_v17 = vpop.eup %13282  ;;  %19418 = vst [vmem:[#allocation161_spill] sm:$0xff] %v16055_v18  ;;  %v3207_v37 = vadd.f32 %v15834_v19, %v3037_v8  ;;  %v3113_v27 = vadd.f32 %v16033_v51, %v2943_v11  ;;  %v19426_v62 = vmax.f32 %v14553_v56, %v19425_v13  ;;  %v19427_v59 = vld [vmem:[#allocation80_spill] sm:$0xff]  ;;  %v2824_v40 = vmax.f32 %v19430_v5, %v2514_v15  ;;  %v2465_v47 = vpop.f32.mrb[208].mxu0  ;;  %v19442_v5 = vld [vmem:[#allocation51_spill] sm:$0xff] }
 0x322   :  { %v16064_v12 = vpack.c.bf16 %v13283_v17, %v13279_v1  ;;  %v3045_v53 = vmax.f32 %v19424_v4, %v2917_v10  ;;  %v3208_v29 = vadd.f32 %v15842_v16, %v3038_v21  ;;  %v3114_v0 = vadd.f32 %v16037_v46, %v2944_v48  ;;  %v19428_v1 = vld [vmem:[#allocation49_spill] sm:$0xff]  ;;  %v2518_v31 = vpop.f32.mrb[208].mxu1  ;;  %v19431_v10 = vld [vmem:[#allocation95_spill] sm:$0xff]  ;;  %v2467_v35 = vpop.f32.mrb[209].mxu0 }
 0x323   :  { %v2951_v41 = vmax.f32 %v19426_v62, %v2823_v28  ;;  %v19429_v36 = vmax.f32 %v19427_v59, %v19428_v1  ;;  %13292 = vtanh.f32 %v3207_v37  ;;  %v16083_v24 = vrot.slane %v15825_v43, %v3093_v6  ;;  %v19432_v28 = vld [vmem:[#allocation190_spill] sm:$0xff]  ;;  %v19434_v17 = vld [vmem:[#allocation267_spill] sm:$0xff]  ;;  %v2520_v23 = vpop.f32.mrb[209].mxu1  ;;  %v19436_v48 = vld [vmem:[#allocation269_spill] sm:$0xff]  ;;  %v2469_v4 = vpop.f32.mrb[210].mxu0 }
 0x324   :  { %19423 = vst [vmem:[#allocation81_spill] sm:$0xff] %v16064_v12  ;;  %v3215_v8 = vadd.f32 %v15834_v19, %v3045_v53  ;;  %3996 = vmatprep.mubr.bf16.mxu0 %v16064_v12  ;;  %13294 = vtanh.f32 %v3113_v27  ;;  %v3097_v49 = vsub.s32 6, %v15814_v30  ;;  %v13285_v11 = vpop.eup %13284  ;;  %v19433_v9 = vmax.f32 %v19431_v10, %v19432_v28  ;;  %v19437_v37 = vld [vmem:[#allocation268_spill] sm:$0xff]  ;;  %v2522_v53 = vpop.f32.mrb[210].mxu1  ;;  %v19439_v59 = vld [vmem:[#allocation50_spill] sm:$0xff] }
 0x325   :  { %v3046_v26 = vmax.f32 %v19429_v36, %v2918_v14  ;;  %v3121_v3 = vadd.f32 %v16033_v51, %v2951_v41  ;;  %3997 = vmatmul.mubr.bf16.gmra.mrb[4].mxu0 %v16055_v18  ;;  %13296 = vtanh.f32 %v3208_v29  ;;  %v2925_v6 = vmax.f32 %v19434_v17, %v2465_v47  ;;  %v13287_v58 = vpop.eup %13286  ;;  %v19438_v41 = vld [vmem:[#allocation82_spill] sm:$0xff]  ;;  %v2471_v47 = vpop.f32.mrb[211].mxu0  ;;  %v19446_v17 = vld [vmem:[#allocation52_spill] sm:$0xff]  ;;  %v19586_v18 = vld [vmem:[#allocation301_spill] sm:$0xff] }
 0x326   :  { %v2952_v15 = vmax.f32 %v19433_v9, %v2824_v40  ;;  %v2831_v21 = vmax.f32 %v19435_v52, %v2518_v31  ;;  %13298 = vtanh.f32 %v3114_v0  ;;  %v2926_v14 = vmax.f32 %v19436_v48, %v2467_v35  ;;  %v2524_v31 = vpop.f32.mrb[211].mxu1  ;;  %v19445_v9 = vld [vmem:[#allocation84_spill] sm:$0xff]  ;;  %v19448_v35 = vld [vmem:[#allocation99_spill] sm:$0xff]  ;;  %v19587_v12 = vld [vmem:[#allocation302_spill] sm:$0xff] }
 0x327   :  { %v3216_v56 = vadd.f32 %v15842_v16, %v3046_v26  ;;  %v2832_v27 = vmax.f32 %v19437_v37, %v2520_v23  ;;  %v3101_v29 = vsub.s32 7, %v15814_v30  ;;  %13300 = vtanh.f32 %v3215_v8  ;;  %v19441_v26 = vld [vmem:[#allocation97_spill] sm:$0xff] }
 0x328   :  { %v13289_v13 = vpop.eup %13288  ;;  %v3122_v62 = vadd.f32 %v16037_v46, %v2952_v15  ;;  %v19440_v1 = vmax.f32 %v19438_v41, %v19439_v59  ;;  %v19443_v40 = vmax.f32 %v19441_v26, %v19442_v5  ;;  %13302 = vtanh.f32 %v3121_v3  ;;  %v19449_v15 = vld [vmem:[#allocation53_spill] sm:$0xff] }
 0x329   :  { %v13291_v10 = vpop.eup %13290  ;;  %v16104_v28 = vpack.c.bf16 %v13289_v13, %v13285_v11  ;;  %v19447_v52 = vmax.f32 %v19445_v9, %v19446_v17  ;;  %v19450_v23 = vmax.f32 %v19448_v35, %v19449_v15  ;;  %13304 = vtanh.f32 %v3216_v56  ;;  %v19452_v13 = vld [vmem:[#allocation271_spill] sm:$0xff]  ;;  %v19456_v56 = vld [vmem:[#allocation86_spill] sm:$0xff] }
 0x32a   :  { %v3053_v36 = vmax.f32 %v19440_v1, %v2925_v6  ;;  %v2959_v0 = vmax.f32 %v19443_v40, %v2831_v21  ;;  %v16112_v37 = vpack.c.bf16 %v13291_v10, %v13287_v58  ;;  %13306 = vtanh.f32 %v3122_v62  ;;  %v19454_v1 = vld [vmem:[#allocation273_spill] sm:$0xff]  ;;  %v2528_v40 = vpop.f32.mrb[212].mxu1  ;;  %v19460_v10 = vld [vmem:[#allocation55_spill] sm:$0xff] }
 0x32b   :  { %19444 = vst [vmem:[#allocation163_spill] sm:$0xff] %v16104_v28  ;;  %v3054_v8 = vmax.f32 %v19447_v52, %v2926_v14  ;;  %v2960_v48 = vmax.f32 %v19450_v23, %v2832_v27  ;;  %v2933_v41 = vmax.f32 %v19452_v13, %v2469_v4  ;;  %v19453_v14 = vld [vmem:[#allocation270_spill] sm:$0xff]  ;;  %v2934_v26 = vmax.f32 %v19454_v1, %v2471_v47  ;;  %v19455_v27 = vld [vmem:[#allocation272_spill] sm:$0xff]  ;;  %v19465_v23 = vld [vmem:[#allocation103_spill] sm:$0xff]  ;;  %v2530_v13 = vpop.f32.mrb[213].mxu1 }
 0x32c   :  { %19451 = vst [vmem:[#allocation83_spill] sm:$0xff] %v16112_v37  ;;  %v3223_v6 = vadd.f32 %v15834_v19, %v3053_v36  ;;  %v3129_v21 = vadd.f32 %v16033_v51, %v2959_v0  ;;  %v2839_v59 = vmax.f32 %v19453_v14, %v2522_v53  ;;  %v2840_v58 = vmax.f32 %v19455_v27, %v2524_v31  ;;  %v19457_v36 = vld [vmem:[#allocation54_spill] sm:$0xff]  ;;  %v2621_v0 = vpop.f32.mrb[212].mxu0  ;;  %v19459_v31 = vld [vmem:[#allocation101_spill] sm:$0xff]  ;;  %v19462_v52 = vld [vmem:[#allocation88_spill] sm:$0xff]  ;;  %v2532_v27 = vpop.f32.mrb[214].mxu1 }
 0x32d   :  { %v3224_v11 = vadd.f32 %v15842_v16, %v3054_v8  ;;  %v3130_v3 = vadd.f32 %v16037_v46, %v2960_v48  ;;  %4003 = vmatprep.mubr.bf16.mxu0 %v16112_v37  ;;  %v19458_v5 = vmax.f32 %v19456_v56, %v19457_v36  ;;  %v16128_v4 = vrot.slane %v15825_v43, %v3097_v49  ;;  %v13293_v47 = vpop.eup %13292  ;;  %v19463_v8 = vld [vmem:[#allocation191_spill] sm:$0xff]  ;;  %v19466_v48 = vld [vmem:[#allocation192_spill] sm:$0xff]  ;;  %v2623_v49 = vpop.f32.mrb[213].mxu0 }
 0x32e   :  { %13308 = vtanh.f32 %v3223_v6  ;;  %4004 = vmatmul.mubr.bf16.gmra.mrb[8].mxu0 %v16104_v28  ;;  %v16131_v53 = vrot.slane %v15825_v43, %v3101_v29  ;;  %v19461_v9 = vmax.f32 %v19459_v31, %v19460_v10  ;;  %v19464_v35 = vmax.f32 %v19462_v52, %v19463_v8  ;;  %v19468_v29 = vld [vmem:[#allocation274_spill] sm:$0xff]  ;;  %v19469_v14 = vld [vmem:[#allocation275_spill] sm:$0xff]  ;;  %v2534_v10 = vpop.f32.mrb[215].mxu1  ;;  %v19475_v8 = vld [vmem:[#allocation57_spill] sm:$0xff] }
 0x32f   :  { %13310 = vtanh.f32 %v3129_v21  ;;  %v3061_v62 = vmax.f32 %v19458_v5, %v2933_v41  ;;  %v19467_v6 = vmax.f32 %v19465_v23, %v19466_v48  ;;  %v13295_v41 = vpop.eup %13294  ;;  %v2817_v1 = vmax.f32 %v19469_v14, %v2621_v0  ;;  %v19474_v0 = vld [vmem:[#allocation106_spill] sm:$0xff]  ;;  %v19477_v48 = vld [vmem:[#allocation277_spill] sm:$0xff] }
 0x330   :  { %13312 = vtanh.f32 %v3224_v11  ;;  %v2967_v17 = vmax.f32 %v19461_v9, %v2839_v59  ;;  %v3062_v15 = vmax.f32 %v19464_v35, %v2934_v26  ;;  %v2847_v11 = vmax.f32 %v19468_v29, %v2528_v40  ;;  %v2625_v59 = vpop.f32.mrb[214].mxu0  ;;  %v13297_v56 = vpop.eup %13296  ;;  %v19481_v29 = vld [vmem:[#allocation278_spill] sm:$0xff] }
 0x331   :  { %v2968_v21 = vmax.f32 %v19467_v6, %v2840_v58  ;;  %13314 = vtanh.f32 %v3130_v3  ;;  %v3231_v43 = vadd.f32 %v15834_v19, %v3061_v62  ;;  %v19470_v58 = vld [vmem:[#allocation276_spill] sm:$0xff]  ;;  %v2627_v9 = vpop.f32.mrb[215].mxu0  ;;  %v13299_v3 = vpop.eup %13298  ;;  %v19471_v19 = vld [vmem:[#allocation105_spill] sm:$0xff]  ;;  %v19476_v35 = vmax.f32 %v19474_v0, %v19475_v8 }
 0x332   :  { %v3137_v36 = vadd.f32 %v16033_v51, %v2967_v17  ;;  %v3232_v26 = vadd.f32 %v15842_v16, %v3062_v15  ;;  %v2848_v31 = vmax.f32 %v19470_v58, %v2530_v13  ;;  %v19472_v62 = vld [vmem:[#allocation56_spill] sm:$0xff]  ;;  %v2818_v17 = vmax.f32 %v19477_v48, %v2623_v49  ;;  %v13301_v6 = vpop.eup %13300  ;;  %v19478_v16 = vld [vmem:[#allocation107_spill] sm:$0xff]  ;;  %v19479_v15 = vld [vmem:[#allocation58_spill] sm:$0xff] }
 0x333   :  { %v3138_v5 = vadd.f32 %v16037_v46, %v2968_v21  ;;  %13316 = vtanh.f32 %v3231_v43  ;;  %v19473_v40 = vmax.f32 %v19471_v19, %v19472_v62  ;;  %v2945_v23 = vmax.f32 %v19476_v35, %v2817_v1  ;;  %v19482_v58 = vld [vmem:[#allocation279_spill] sm:$0xff]  ;;  %v13303_v30 = vpop.eup %13302  ;;  %v19485_v62 = vld [vmem:[#allocation108_spill] sm:$0xff]  ;;  %v19492_v35 = vld [vmem:[#allocation110_spill] sm:$0xff] }
 0x334   :  { %13318 = vtanh.f32 %v3137_v36  ;;  %v19480_v21 = vmax.f32 %v19478_v16, %v19479_v15  ;;  %v2855_v14 = vmax.f32 %v19481_v29, %v2532_v27  ;;  %v2825_v43 = vmax.f32 %v19482_v58, %v2625_v59  ;;  %v13305_v19 = vpop.eup %13304  ;;  %v19496_v15 = vld [vmem:[#allocation280_spill] sm:$0xff] }
 0x335   :  { %v2975_v52 = vmax.f32 %v19473_v40, %v2847_v11  ;;  %v16161_v28 = vpack.c.bf16 %v13301_v6, %v13293_v47  ;;  %13320 = vtanh.f32 %v3232_v26  ;;  %v3115_v1 = vadd.f32 %v16045_v22, %v2945_v23  ;;  %v13307_v0 = vpop.eup %13306  ;;  %v19489_v47 = vld [vmem:[#allocation109_spill] sm:$0xff]  ;;  %v19493_v23 = vld [vmem:[#allocation194_spill] sm:$0xff]  ;;  %v12805_v29 = vld [vmem:[#allocation7 + $0x180] sm:$0xff]  }
 0x336   :  { %v2976_v13 = vmax.f32 %v19480_v21, %v2848_v31  ;;  %v16165_v49 = vpack.c.bf16 %v13303_v30, %v13295_v41  ;;  %13322 = vtanh.f32 %v3138_v5  ;;  %v19486_v31 = vld [vmem:[#allocation59_spill] sm:$0xff]  ;;  %v16171_v59 = vpack.c.bf16 %v13305_v19, %v13297_v56  ;;  %v19490_v26 = vld [vmem:[#allocation193_spill] sm:$0xff]  ;;  %v2538_v41 = vpop.f32.mrb[216].mxu1  ;;  %v2631_v5 = vpop.f32.mrb[216].mxu0 }
 0x337   :  { %19483 = vst [vmem:[#allocation165_spill] sm:$0xff] %v16161_v28  ;;  %v3145_v11 = vadd.f32 %v16033_v51, %v2975_v52  ;;  %v19487_v40 = vmax.f32 %v19485_v62, %v19486_v31  ;;  %v19491_v8 = vmax.f32 %v19489_v47, %v19490_v26  ;;  %v19494_v48 = vmax.f32 %v19492_v35, %v19493_v23  ;;  %v2540_v21 = vpop.f32.mrb[217].mxu1  ;;  %v19498_v31 = vld [vmem:[#allocation111_spill] sm:$0xff]  ;;  %v19503_v35 = vld [vmem:[#allocation112_spill] sm:$0xff] }
 0x338   :  { %19484 = vst [vmem:[#allocation85_spill] sm:$0xff] %v16165_v49  ;;  %v3146_v36 = vadd.f32 %v16037_v46, %v2976_v13  ;;  %19488 = vst [vmem:[#allocation167_spill] sm:$0xff] %v16171_v59  ;;  %v13309_v6 = vpop.eup %13308  ;;  %v16179_v16 = vpack.c.bf16 %v13307_v0, %v13299_v3  ;;  %v2856_v56 = vmax.f32 %v19496_v15, %v2534_v10  ;;  %v2633_v13 = vpop.f32.mrb[217].mxu0  ;;  %4010 = vmatprep.mubr.bf16.mxu0 %v16171_v59  ;;  %v19501_v0 = vld [vmem:[#allocation282_spill] sm:$0xff]  ;;  %v19502_v47 = vld [vmem:[#allocation283_spill] sm:$0xff] }
 0x339   :  { %v2946_v27 = vmax.f32 %v19487_v40, %v2818_v17  ;;  %13324 = vtanh.f32 %v3145_v11  ;;  %v2983_v52 = vmax.f32 %v19491_v8, %v2855_v14  ;;  %v2953_v30 = vmax.f32 %v19494_v48, %v2825_v43  ;;  %v13311_v58 = vpop.eup %13310  ;;  %v19497_v43 = vld [vmem:[#allocation281_spill] sm:$0xff]  ;;  %v2542_v3 = vpop.f32.mrb[218].mxu1  ;;  %v19499_v40 = vld [vmem:[#allocation195_spill] sm:$0xff]  ;;  %4011 = vmatmul.mubr.bf16.gmra.mrb[12].mxu0 %v16161_v28  ;;  %v19504_v23 = vld [vmem:[#allocation196_spill] sm:$0xff] }
 0x33a   :  { %19495 = vst [vmem:[#allocation87_spill] sm:$0xff] %v16179_v16  ;;  %13326 = vtanh.f32 %v3115_v1  ;;  %v2826_v19 = vmax.f32 %v19497_v43, %v2627_v9  ;;  %v2635_v62 = vpop.f32.mrb[218].mxu0  ;;  %v13313_v1 = vpop.eup %13312  ;;  %v19500_v10 = vmax.f32 %v19498_v31, %v19499_v40  ;;  %4057 = vmatprep.mubr.bf16.mxu1 %v16179_v16  ;;  %v2833_v26 = vmax.f32 %v19502_v47, %v2631_v5  ;;  %v19508_v5 = vld [vmem:[#allocation23_spill] sm:$0xff]  ;;  %v19509_v31 = vld [vmem:[#allocation60_spill] sm:$0xff]  ;;  %v19512_v47 = vld [vmem:[#allocation197_spill] sm:$0xff] }
 0x33b   :  { %v3116_v17 = vadd.f32 %v16083_v24, %v2946_v27  ;;  %13328 = vtanh.f32 %v3146_v36  ;;  %v3153_v14 = vadd.f32 %v16033_v51, %v2983_v52  ;;  %v3123_v11 = vadd.f32 %v16045_v22, %v2953_v30  ;;  %v2544_v8 = vpop.f32.mrb[219].mxu1  ;;  %v2637_v9 = vpop.f32.mrb[219].mxu0  ;;  %4058 = vmatmul.mubr.bf16.vlgmr.msra.gmra.mrb[12].mxu1 %v16165_v49  ;;  %v19520_v16 = vld [vmem:[#allocation286_spill] sm:$0xff] }
 0x33c   :  { %v2984_v27 = vmax.f32 %v19500_v10, %v2856_v56  ;;  %v2863_v36 = vmax.f32 %v19501_v0, %v2538_v41  ;;  %v13315_v52 = vpop.eup %13314  ;;  %v19505_v48 = vmax.f32 %v19503_v35, %v19504_v23  ;;  %v19507_v56 = vld [vmem:[#allocation285_spill] sm:$0xff]  ;;  %v19510_v40 = vmax.f32 %v19508_v5, %v19509_v31  ;;  %4204 = vmatpush1.bf16.msra.mxu1 %v12805_v29 }
 0x33d   :  { %13330 = vtanh.f32 %v3116_v17  ;;  %v19506_v17 = vld [vmem:[#allocation284_spill] sm:$0xff]  ;;  %v2834_v43 = vmax.f32 %v19507_v56, %v2633_v13  ;;  %v19511_v0 = vld [vmem:[#allocation113_spill] sm:$0xff]  ;;  %v19518_v56 = vld [vmem:[#allocation199_spill] sm:$0xff]  ;;  %v2871_v5 = vmax.f32 %v19520_v16, %v2542_v3  ;;  %v2641_v16 = vpop.f32.mrb[220].mxu0 }
 0x33e   :  { %13332 = vtanh.f32 %v3153_v14  ;;  %v2954_v30 = vmax.f32 %v19505_v48, %v2826_v19  ;;  %v2864_v15 = vmax.f32 %v19506_v17, %v2540_v21  ;;  %v3154_v41 = vadd.f32 %v16037_v46, %v2984_v27  ;;  %v12808_v35 = vld [vmem:[#allocation7 + $0x188] sm:$0xff]   ;;  %v13317_v19 = vpop.eup %13316  ;;  %v19514_v48 = vld [vmem:[#allocation114_spill] sm:$0xff] }
 0x33f   :  { %13334 = vtanh.f32 %v3123_v11  ;;  %v2991_v10 = vmax.f32 %v19510_v40, %v2863_v36  ;;  %v19513_v14 = vmax.f32 %v19511_v0, %v19512_v47  ;;  %v19515_v21 = vld [vmem:[#allocation198_spill] sm:$0xff]  ;;  %v19517_v11 = vld [vmem:[#allocation115_spill] sm:$0xff]  ;;  %v19521_v36 = vmov 0   ;;  %v13319_v31 = vpop.eup %13318  ;;  %v2548_v47 = vpop.f32.mrb[220].mxu1 }
 0x340   :  { %v3124_v23 = vadd.f32 %v16083_v24, %v2954_v30  ;;  %v19516_v17 = vmax.f32 %v19514_v48, %v19515_v21  ;;  %v19519_v27 = vmax.f32 %v19517_v11, %v19518_v56  ;;  %4205 = vmatprep.subr.bf16.mxu1 %v19521_v36  ;;  %v16216_v40 = vpack.c.bf16 %v13317_v19, %v13309_v6  ;;  %v13321_v30 = vpop.eup %13320  ;;  %v19525_v6 = vld [vmem:[#allocation116_spill] sm:$0xff]  ;;  %v19528_v48 = vld [vmem:[#allocation287_spill] sm:$0xff]  ;;  %v2643_v21 = vpop.f32.mrb[221].mxu0  ;;  %v19531_v11 = vld [vmem:[#allocation289_spill] sm:$0xff] }
 0x341   :  { %v2961_v28 = vmax.f32 %v19513_v14, %v2833_v26  ;;  %13336 = vtanh.f32 %v3154_v41  ;;  %v3161_v29 = vadd.f32 %v16033_v51, %v2991_v10  ;;  %v16220_v0 = vpack.c.bf16 %v13319_v31, %v13311_v58  ;;  %v13323_v3 = vpop.eup %13322  ;;  %v19526_v41 = vld [vmem:[#allocation200_spill] sm:$0xff]  ;;  %4206 = vmatpush1.bf16.msra.mxu1 %v12808_v35  ;;  %v2550_v58 = vpop.f32.mrb[221].mxu1  ;;  %v19532_v35 = vld [vmem:[#allocation117_spill] sm:$0xff] }
 0x342   :  { %v2992_v13 = vmax.f32 %v19516_v17, %v2864_v15  ;;  %v2962_v49 = vmax.f32 %v19519_v27, %v2834_v43  ;;  %19522 = vst [vmem:[#allocation169_spill] sm:$0xff] %v16216_v40  ;;  %13338 = vtanh.f32 %v3124_v23  ;;  %v16224_v14 = vpack.c.bf16 %v13321_v30, %v13313_v1  ;;  %v16234_v1 = vpop.f32.mrb[222].mxu1  ;;  %v16236_v27 = vpop.f32.mrb[222].mxu0  ;;  %4207 = vmatprep.subr.bf16.mxu1 %v19521_v36 }
 0x343   :  { %v3131_v26 = vadd.f32 %v16045_v22, %v2961_v28  ;;  %19523 = vst [vmem:[#allocation89_spill] sm:$0xff] %v16220_v0  ;;  %13340 = vtanh.f32 %v3161_v29  ;;  %v19527_v19 = vmax.f32 %v19525_v6, %v19526_v41  ;;  %v2841_v28 = vmax.f32 %v19528_v48, %v2635_v62  ;;  %v13325_v23 = vpop.eup %13324  ;;  %v19533_v29 = vld [vmem:[#allocation201_spill] sm:$0xff]  ;;  %v19536_v41 = vld [vmem:[#allocation118_spill] sm:$0xff] }
 0x344   :  { %v3162_v15 = vadd.f32 %v16037_v46, %v2992_v13  ;;  %v3132_v43 = vadd.f32 %v16083_v24, %v2962_v49  ;;  %19524 = vst [vmem:[#allocation171_spill] sm:$0xff] %v16224_v14  ;;  %v16230_v17 = vpack.c.bf16 %v13323_v3, %v13315_v52  ;;  %v19530_v49 = vld [vmem:[#allocation288_spill] sm:$0xff]  ;;  %v2842_v56 = vmax.f32 %v19531_v11, %v2637_v9  ;;  %v13327_v31 = vpop.eup %13326  ;;  %v2554_v9 = vpop.f32.mrb[223].mxu1  ;;  %v19540_v11 = vld [vmem:[#allocation203_spill] sm:$0xff] }
 0x345   :  { %v2999_v10 = vmax.f32 %v19527_v19, %v2871_v5  ;;  %13342 = vtanh.f32 %v3131_v26  ;;  %v2872_v13 = vmax.f32 %v19530_v49, %v2544_v8  ;;  %v12812_v5 = vld [vmem:[#allocation7 + $0x190] sm:$0xff]   ;;  %v19534_v52 = vmax.f32 %v19532_v35, %v19533_v29  ;;  %4017 = vmatprep.mubr.bf16.mxu0 %v16224_v14  ;;  %v16245_v3 = vpop.f32.mrb[223].mxu0  ;;  %v13329_v6 = vpop.eup %13328 }
 0x346   :  { %19529 = vst [vmem:[#allocation91_spill] sm:$0xff] %v16230_v17  ;;  %13344 = vtanh.f32 %v3162_v15  ;;  %v19535_v8 = vld [vmem:[#allocation290_spill] sm:$0xff]  ;;  %v19539_v15 = vld [vmem:[#allocation119_spill] sm:$0xff]  ;;  %4064 = vmatprep.mubr.bf16.mxu1 %v16230_v17  ;;  %4018 = vmatmul.mubr.bf16.gmra.mrb[16].mxu0 %v16216_v40 }
 0x347   :  { %v3169_v62 = vadd.f32 %v16033_v51, %v2999_v10  ;;  %v2969_v30 = vmax.f32 %v19534_v52, %v2841_v28  ;;  %v2879_v26 = vmax.f32 %v19535_v8, %v2548_v47  ;;  %13346 = vtanh.f32 %v3132_v43  ;;  %v19537_v19 = vld [vmem:[#allocation202_spill] sm:$0xff]  ;;  %v19542_v28 = vld [vmem:[#allocation291_spill] sm:$0xff]  ;;  %v13331_v47 = vpop.eup %13330  ;;  %v19543_v52 = vld [vmem:[#allocation120_spill] sm:$0xff]  ;;  %4065 = vmatmul.mubr.bf16.gmra.mrb[16].mxu1 %v16220_v0 }
 0x348   :  { %v19538_v48 = vmax.f32 %v19536_v41, %v19537_v19  ;;  %v19541_v10 = vmax.f32 %v19539_v15, %v19540_v11  ;;  %v2849_v35 = vmax.f32 %v19542_v28, %v2641_v16  ;;  %v19544_v43 = vld [vmem:[#allocation204_spill] sm:$0xff]  ;;  %v13333_v19 = vpop.eup %13332  ;;  %v19547_v16 = vld [vmem:[#allocation121_spill] sm:$0xff]  ;;  %4208 = vmatpush1.bf16.msra.mxu1 %v12812_v5  ;;  %v19557_v5 = vld [vmem:[#allocation207_spill] sm:$0xff] }
 0x349   :  { %13348 = vtanh.f32 %v3169_v62  ;;  %v3139_v29 = vadd.f32 %v16045_v22, %v2969_v30  ;;  %v19545_v8 = vmax.f32 %v19543_v52, %v19544_v43  ;;  %v19548_v15 = vld [vmem:[#allocation205_spill] sm:$0xff]  ;;  %v12814_v30 = vld [vmem:[#allocation7 + $0x198] sm:$0xff]   ;;  %v13335_v40 = vpop.eup %13334  ;;  %v16268_v52 = vpack.c.bf16 %v13333_v19, %v13325_v23  ;;  %4209 = vmatprep.subr.bf16.mxu1 %v19521_v36  ;;  %v2558_v23 = vpop.f32.mrb[224].mxu1 }
 0x34a   :  { %v3000_v49 = vmax.f32 %v19538_v48, %v2872_v13  ;;  %v2970_v59 = vmax.f32 %v19541_v10, %v2842_v56  ;;  %v19546_v13 = vld [vmem:[#allocation292_spill] sm:$0xff]  ;;  %v19549_v11 = vmax.f32 %v19547_v16, %v19548_v15  ;;  %v19550_v62 = vld [vmem:[#allocation293_spill] sm:$0xff]  ;;  %v19553_v43 = vld [vmem:[#allocation206_spill] sm:$0xff]  ;;  %v2651_v19 = vpop.f32.mrb[224].mxu0 }
 0x34b   :  { %v3007_v14 = vmax.f32 %v19545_v8, %v2879_v26  ;;  %v2880_v41 = vmax.f32 %v19546_v13, %v2550_v58  ;;  %v2850_v28 = vmax.f32 %v19550_v62, %v2643_v21  ;;  %19551 = vst [vmem:[#allocation173_spill] sm:$0xff] %v16268_v52  ;;  %13350 = vtanh.f32 %v3139_v29  ;;  %v19552_v58 = vld [vmem:[#allocation122_spill] sm:$0xff]  ;;  %v19556_v21 = vld [vmem:[#allocation123_spill] sm:$0xff]  ;;  %v13337_v29 = vpop.eup %13336 }
 0x34c   :  { %v3170_v56 = vadd.f32 %v16037_v46, %v3000_v49  ;;  %v3140_v48 = vadd.f32 %v16083_v24, %v2970_v59  ;;  %v2977_v10 = vmax.f32 %v19549_v11, %v2849_v35  ;;  %v19554_v8 = vmax.f32 %v19552_v58, %v19553_v43  ;;  %v19559_v15 = vld [vmem:[#allocation294_spill] sm:$0xff]  ;;  %v19560_v11 = vld [vmem:[#allocation295_spill] sm:$0xff]  ;;  %v13339_v62 = vpop.eup %13338  ;;  %v19562_v58 = vld [vmem:[#allocation296_spill] sm:$0xff]  ;;  %4210 = vmatpush1.bf16.msra.mxu1 %v12814_v30 }
 0x34d   :  { %v3177_v26 = vadd.f32 %v16033_v51, %v3007_v14  ;;  %v16275_v59 = vpack.c.bf16 %v13335_v40, %v13327_v31  ;;  %v19558_v13 = vmax.f32 %v19556_v21, %v19557_v5  ;;  %v2857_v40 = vmax.f32 %v19560_v11, %v16236_v27  ;;  %v2560_v31 = vpop.f32.mrb[225].mxu1  ;;  %v19565_v27 = vld [vmem:[#allocation208_spill] sm:$0xff]  ;;  %4211 = vmatprep.subr.bf16.mxu1 %v19521_v36 }
 0x34e   :  { %v3008_v49 = vmax.f32 %v19554_v8, %v2880_v41  ;;  %13352 = vtanh.f32 %v3170_v56  ;;  %v3147_v35 = vadd.f32 %v16045_v22, %v2977_v10  ;;  %v2887_v41 = vmax.f32 %v19559_v15, %v16234_v1  ;;  %v2653_v56 = vpop.f32.mrb[225].mxu0  ;;  %v19564_v1 = vld [vmem:[#allocation124_spill] sm:$0xff]  ;;  %v19567_v15 = vld [vmem:[#allocation125_spill] sm:$0xff] }
 0x34f   :  { %19555 = vst [vmem:[#allocation93_spill] sm:$0xff] %v16275_v59  ;;  %v2978_v16 = vmax.f32 %v19558_v13, %v2850_v28  ;;  %13354 = vtanh.f32 %v3140_v48  ;;  %v16286_v10 = vpack.c.bf16 %v13337_v29, %v13329_v6  ;;  %v2888_v43 = vmax.f32 %v19562_v58, %v2554_v9  ;;  %v2562_v48 = vpop.f32.mrb[226].mxu1  ;;  %v16290_v8 = vpop.f32.mrb[226].mxu0  ;;  %v19568_v6 = vld [vmem:[#allocation209_spill] sm:$0xff]  ;;  %v12815_v9 = vld [vmem:[#allocation7 + $0x1a0] sm:$0xff]  }
 0x350   :  { %v3178_v14 = vadd.f32 %v16037_v46, %v3008_v49  ;;  %13356 = vtanh.f32 %v3177_v26  ;;  %v13341_v49 = vpop.eup %13340  ;;  %v16292_v21 = vpack.c.bf16 %v13339_v62, %v13331_v47  ;;  %v19566_v5 = vmax.f32 %v19564_v1, %v19565_v27  ;;  %v16300_v11 = vpop.f32.mrb[227].mxu1  ;;  %v12822_v30 = vld [vmem:[#allocation7 + $0x1e0] sm:$0xff]   ;;  %v19570_v47 = vld [vmem:[#allocation126_spill] sm:$0xff]  ;;  %4212 = vmatpush1.bf16.msra.mxu1 %v12815_v9 }
 0x351   :  { %19561 = vst [vmem:[#allocation175_spill] sm:$0xff] %v16286_v10  ;;  %v3148_v28 = vadd.f32 %v16083_v24, %v2978_v16  ;;  %13358 = vtanh.f32 %v3147_v35  ;;  %v19569_v29 = vmax.f32 %v19567_v15, %v19568_v6  ;;  %v16302_v16 = vpop.f32.mrb[227].mxu0  ;;  %v13343_v58 = vpop.eup %13342  ;;  %v19571_v35 = vld [vmem:[#allocation210_spill] sm:$0xff]  ;;  %4071 = vmatprep.mubr.bf16.mxu1 %v16286_v10  ;;  %v2903_v44 = vmax.f32 %v19587_v12, %v2562_v48  ;;  %v19593_v9 = vld [vmem:[#allocation215_spill] sm:$0xff] }
 0x352   :  { %19563 = vst [vmem:[#allocation94_spill] sm:$0xff] %v16292_v21  ;;  %v3015_v13 = vmax.f32 %v19566_v5, %v2887_v41  ;;  %13360 = vtanh.f32 %v3178_v14  ;;  %v19572_v62 = vmax.f32 %v19570_v47, %v19571_v35  ;;  %v19573_v41 = vld [vmem:[#allocation297_spill] sm:$0xff]  ;;  %v13345_v15 = vpop.eup %13344  ;;  %4146 = vmatprep.mubr.bf16.mxu0 %v16292_v21  ;;  %v19575_v14 = vld [vmem:[#allocation299_spill] sm:$0xff]  ;;  %4072 = vmatmul.mubr.bf16.gmra.mrb[20].mxu1 %v16268_v52 }
 0x353   :  { %v2985_v26 = vmax.f32 %v19569_v29, %v2857_v40  ;;  %v2858_v1 = vmax.f32 %v19573_v41, %v16245_v3  ;;  %v19574_v40 = vld [vmem:[#allocation298_spill] sm:$0xff]  ;;  %v12823_v5 = vld [vmem:[#allocation7 + $0x228] sm:$0xff]   ;;  %13362 = vtanh.f32 %v3148_v28  ;;  %v2865_v17 = vmax.f32 %v19575_v14, %v2651_v19  ;;  %v19576_v47 = vld [vmem:[#allocation127_spill] sm:$0xff]  ;;  %4147 = vmatmul.mubr.bf16.vlgmr.msra.gmra.mrb[20].mxu0 %v16275_v59  ;;  %4213 = vmatprep.subr.bf16.mxu1 %v19521_v36 }
 0x354   :  { %v3016_v0 = vmax.f32 %v19572_v62, %v2888_v43  ;;  %v2895_v27 = vmax.f32 %v19574_v40, %v2558_v23  ;;  %v3185_v6 = vadd.f32 %v16033_v51, %v3015_v13  ;;  %v13347_v43 = vpop.eup %13346  ;;  %v19577_v35 = vld [vmem:[#allocation211_spill] sm:$0xff]  ;;  %v19579_v41 = vld [vmem:[#allocation128_spill] sm:$0xff]  ;;  %v19583_v19 = vld [vmem:[#allocation129_spill] sm:$0xff]  ;;  %11555 = vmatpush3.bf16.msra.mxu0 %v12822_v30 }
 0x355   :  { %v3155_v29 = vadd.f32 %v16045_v22, %v2985_v26  ;;  %v19578_v62 = vmax.f32 %v19576_v47, %v19577_v35  ;;  %v19580_v40 = vld [vmem:[#allocation212_spill] sm:$0xff]  ;;  %v13349_v21 = vpop.eup %13348  ;;  %v19584_v14 = vld [vmem:[#allocation213_spill] sm:$0xff]  ;;  %11556 = vmatprep.subr.bf16.mxu0 %v12823_v5 }
 0x356   :  { %v3186_v3 = vadd.f32 %v16037_v46, %v3016_v0  ;;  %v19581_v28 = vmax.f32 %v19579_v41, %v19580_v40  ;;  %v19582_v13 = vld [vmem:[#allocation300_spill] sm:$0xff]  ;;  %13364 = vtanh.f32 %v3185_v6  ;;  %v19585_v52 = vmax.f32 %v19583_v19, %v19584_v14  ;;  %v2568_v6 = vpop.f32.mrb[228].mxu1 }
 0x357   :  { %v2986_v23 = vmax.f32 %v19578_v62, %v2858_v1  ;;  %v2896_v26 = vmax.f32 %v19582_v13, %v2560_v31  ;;  %v2866_v0 = vmax.f32 %v19586_v18, %v2653_v56  ;;  %v12816_v1 = vld [vmem:[#allocation7 + $0x1a8] sm:$0xff]   ;;  %v16331_v35 = vpack.c.bf16 %v13349_v21, %v13341_v49  ;;  %v2661_v62 = vpop.f32.mrb[228].mxu0  ;;  %v13351_v18 = vpop.eup %13350  ;;  %v19590_v56 = vld [vmem:[#allocation214_spill] sm:$0xff]  ;;  %v19592_v21 = vld [vmem:[#allocation131_spill] sm:$0xff] }
 0x358   :  { %v3023_v10 = vmax.f32 %v19581_v28, %v2895_v27  ;;  %v2993_v37 = vmax.f32 %v19585_v52, %v2865_v17  ;;  %v12824_v47 = vld [vmem:[#allocation7 + $0x1e8] sm:$0xff]   ;;  %13366 = vtanh.f32 %v3155_v29  ;;  %v12826_v17 = vld [vmem:[#allocation7 + $0x230] sm:$0xff]   ;;  %v19594_v30 = vmax.f32 %v19592_v21, %v19593_v9  ;;  %v13353_v41 = vpop.eup %13352  ;;  %4214 = vmatpush1.bf16.msra.mxu1 %v12816_v1 }
 0x359   :  { %19588 = vst [vmem:[#allocation177_spill] sm:$0xff] %v16331_v35  ;;  %v3156_v27 = vadd.f32 %v16083_v24, %v2986_v23  ;;  %13368 = vtanh.f32 %v3186_v3  ;;  %v19589_v52 = vld [vmem:[#allocation130_spill] sm:$0xff]  ;;  %v2570_v23 = vpop.f32.mrb[229].mxu1  ;;  %v16345_v40 = vpack.c.bf16 %v13351_v18, %v13343_v58  ;;  %v19596_v5 = vld [vmem:[#allocation132_spill] sm:$0xff]  ;;  %11557 = vmatpush3.bf16.msra.mxu0 %v12824_v47  ;;  %v19603_v9 = vld [vmem:[#allocation217_spill] sm:$0xff]  ;;  %4215 = vmatprep.subr.bf16.mxu1 %v19521_v36 }
 0x35a   :  { %v3193_v31 = vadd.f32 %v16033_v51, %v3023_v10  ;;  %v3163_v12 = vadd.f32 %v16045_v22, %v2993_v37  ;;  %v19591_v48 = vmax.f32 %v19589_v52, %v19590_v56  ;;  %v2994_v29 = vmax.f32 %v19594_v30, %v2866_v0  ;;  %v16343_v10 = vpop.f32.mrb[229].mxu0  ;;  %v19597_v28 = vld [vmem:[#allocation216_spill] sm:$0xff]  ;;  %v19599_v37 = vld [vmem:[#allocation303_spill] sm:$0xff]  ;;  %v16352_v14 = vpop.f32.mrb[230].mxu1  ;;  %11558 = vmatprep.subr.bf16.mxu0 %v12826_v17  ;;  %v19606_v47 = vld [vmem:[#allocation305_spill] sm:$0xff] }
 0x35b   :  { %19595 = vst [vmem:[#allocation96_spill] sm:$0xff] %v16345_v40  ;;  %13370 = vtanh.f32 %v3156_v27  ;;  %v19598_v3 = vmax.f32 %v19596_v5, %v19597_v28  ;;  %v2873_v19 = vmax.f32 %v19599_v37, %v16290_v8  ;;  %v13355_v52 = vpop.eup %13354  ;;  %v16356_v0 = vpack.c.bf16 %v13353_v41, %v13345_v15  ;;  %v16360_v27 = vpop.f32.mrb[231].mxu1  ;;  %v19602_v15 = vld [vmem:[#allocation133_spill] sm:$0xff]  ;;  %v19605_v1 = vld [vmem:[#allocation304_spill] sm:$0xff]  ;;  %v12829_v28 = vld [vmem:[#allocation7 + $0x238] sm:$0xff]  }
 0x35c   :  { %v3024_v49 = vmax.f32 %v19591_v48, %v2896_v26  ;;  %v16354_v26 = vpop.f32.mrb[230].mxu0  ;;  %13372 = vtanh.f32 %v3193_v31  ;;  %v3164_v58 = vadd.f32 %v16083_v24, %v2994_v29  ;;  %v13357_v8 = vpop.eup %13356  ;;  %v16364_v48 = vpack.c.bf16 %v13355_v52, %v13347_v43  ;;  %v19608_v17 = vld [vmem:[#allocation307_spill] sm:$0xff] }
 0x35d   :  { %v3031_v13 = vmax.f32 %v19598_v3, %v2903_v44  ;;  %19600 = vst [vmem:[#allocation179_spill] sm:$0xff] %v16356_v0  ;;  %v16362_v18 = vpop.f32.mrb[231].mxu0  ;;  %v12817_v44 = vld [vmem:[#allocation7 + $0x1b0] sm:$0xff]   ;;  %13374 = vtanh.f32 %v3163_v12  ;;  %v19604_v31 = vmax.f32 %v19602_v15, %v19603_v9  ;;  %v13359_v29 = vpop.eup %13358  ;;  %v2904_v41 = vmax.f32 %v19605_v1, %v16300_v11  ;;  %4078 = vmatprep.mubr.bf16.mxu1 %v16356_v0 }
 0x35e   :  { %v3194_v56 = vadd.f32 %v16037_v46, %v3024_v49  ;;  %19601 = vst [vmem:[#allocation98_spill] sm:$0xff] %v16364_v48  ;;  %v12827_v49 = vld [vmem:[#allocation7 + $0x1f0] sm:$0xff]   ;;  %v2874_v43 = vmax.f32 %v19606_v47, %v16302_v16  ;;  %v13361_v3 = vpop.eup %13360  ;;  %4153 = vmatprep.mubr.bf16.mxu0 %v16364_v48  ;;  %v2881_v37 = vmax.f32 %v19608_v17, %v2661_v62  ;;  %v19616_v47 = vld [vmem:[#allocation20_spill] sm:$0xff]  ;;  %v12818_v62 = vld [vmem:[#allocation7 + $0x1b8] sm:$0xff]  }
 0x35f   :  { %v3201_v21 = vadd.f32 %v16033_v51, %v3031_v13  ;;  %v3001_v30 = vmax.f32 %v19604_v31, %v2873_v19  ;;  %v19607_v12 = vld [vmem:[#allocation306_spill] sm:$0xff]  ;;  %4079 = vmatmul.mubr.bf16.gmra.mrb[24].mxu1 %v16331_v35  ;;  %v19609_v19 = vld [vmem:[#allocation308_spill] sm:$0xff]  ;;  %v13363_v52 = vpop.eup %13362  ;;  %v19614_v31 = vld [vmem:[#allocation219_spill] sm:$0xff]  ;;  %4154 = vmatmul.mubr.bf16.gmra.mrb[24].mxu0 %v16345_v40 }
 0x360   :  { %13376 = vtanh.f32 %v3194_v56  ;;  %v2911_v5 = vmax.f32 %v19607_v12, %v2568_v6  ;;  %v2912_v11 = vmax.f32 %v19609_v19, %v2570_v23  ;;  %v19610_v16 = vld [vmem:[#allocation134_spill] sm:$0xff]  ;;  %v19613_v6 = vld [vmem:[#allocation135_spill] sm:$0xff]  ;;  %4216 = vmatpush1.bf16.msra.mxu1 %v12817_v44  ;;  %v19619_v23 = vld [vmem:[#allocation21_spill] sm:$0xff]  ;;  %11559 = vmatpush3.bf16.msra.mxu0 %v12827_v49 }
 0x361   :  { %13378 = vtanh.f32 %v3164_v58  ;;  %v3171_v13 = vadd.f32 %v16045_v22, %v3001_v30  ;;  %v19611_v56 = vld [vmem:[#allocation218_spill] sm:$0xff]  ;;  %v19615_v1 = vmax.f32 %v19613_v6, %v19614_v31  ;;  %v19617_v30 = vld [vmem:[#allocation61_spill] sm:$0xff]  ;;  %v19622_v35 = vld [vmem:[#allocation136_spill] sm:$0xff]  ;;  %v16400_v6 = vpop.f32.mrb[232].mxu1  ;;  %v16402_v31 = vpop.f32.mrb[232].mxu0  ;;  %4217 = vmatprep.subr.bf16.mxu1 %v19521_v36  ;;  %11560 = vmatprep.subr.bf16.mxu0 %v12829_v28 }
 0x362   :  { %13380 = vtanh.f32 %v3201_v21  ;;  %v19612_v15 = vmax.f32 %v19610_v16, %v19611_v56  ;;  %v19618_v12 = vmax.f32 %v19616_v47, %v19617_v30  ;;  %v19620_v17 = vld [vmem:[#allocation62_spill] sm:$0xff]  ;;  %v19623_v16 = vld [vmem:[#allocation220_spill] sm:$0xff]  ;;  %v2580_v47 = vpop.f32.mrb[233].mxu1 }
 0x363   :  { %v3002_v58 = vmax.f32 %v19615_v1, %v2874_v43  ;;  %13382 = vtanh.f32 %v3171_v13  ;;  %v19621_v21 = vmax.f32 %v19619_v23, %v19620_v17  ;;  %v12830_v44 = vld [vmem:[#allocation7 + $0x1f8] sm:$0xff]   ;;  %v12831_v30 = vld [vmem:[#allocation7 + $0x240] sm:$0xff]  }
 0x364   :  { %v3032_v9 = vmax.f32 %v19612_v15, %v2904_v41  ;;  %v3039_v0 = vmax.f32 %v19618_v12, %v2911_v5  ;;  %v19624_v41 = vmax.f32 %v19622_v35, %v19623_v16  ;;  %v19625_v15 = vld [vmem:[#allocation309_spill] sm:$0xff]  ;;  %v13365_v5 = vpop.eup %13364  ;;  %v19626_v35 = vld [vmem:[#allocation310_spill] sm:$0xff]  ;;  %4218 = vmatpush1.bf16.msra.mxu1 %v12818_v62  ;;  %11561 = vmatpush3.bf16.msra.mxu0 %v12830_v44 }
 0x365   :  { %v3009_v19 = vmax.f32 %v19621_v21, %v2881_v37  ;;  %v2882_v43 = vmax.f32 %v19625_v15, %v16343_v10  ;;  %v3172_v37 = vadd.f32 %v16083_v24, %v3002_v58  ;;  %v16410_v10 = vpop.f32.mrb[233].mxu0  ;;  %v13367_v12 = vpop.eup %13366  ;;  %v16412_v23 = vpack.c.bf16 %v13365_v5, %v13357_v8  ;;  %v19629_v21 = vld [vmem:[#allocation221_spill] sm:$0xff]  ;;  %v19632_v28 = vld [vmem:[#allocation138_spill] sm:$0xff]  ;;  %4219 = vmatprep.subr.bf16.mxu1 %v19521_v36 }
 0x366   :  { %v3040_v56 = vmax.f32 %v19624_v41, %v2912_v11  ;;  %v3202_v13 = vadd.f32 %v16037_v46, %v3032_v9  ;;  %v3209_v1 = vadd.f32 %v16033_v51, %v3039_v0  ;;  %v2919_v11 = vmax.f32 %v19626_v35, %v16352_v14  ;;  %v19628_v9 = vld [vmem:[#allocation137_spill] sm:$0xff]  ;;  %v16419_v0 = vpop.f32.mrb[234].mxu1  ;;  %v16421_v41 = vpop.f32.mrb[234].mxu0  ;;  %v19633_v35 = vld [vmem:[#allocation222_spill] sm:$0xff]  ;;  %11562 = vmatprep.subr.bf16.mxu0 %v12831_v30  ;;  %v19647_v30 = vld [vmem:[#allocation315_spill] sm:$0xff] }
 0x367   :  { %19627 = vst [vmem:[#allocation42_spill] sm:$0xff] %v16412_v23  ;;  %v3179_v49 = vadd.f32 %v16045_v22, %v3009_v19  ;;  %v19630_v58 = vmax.f32 %v19628_v9, %v19629_v21  ;;  %v13369_v14 = vpop.eup %13368  ;;  %v16423_v15 = vpack.c.bf16 %v13367_v12, %v13359_v29  ;;  %v19634_v8 = vmax.f32 %v19632_v28, %v19633_v35  ;;  %v19635_v19 = vld [vmem:[#allocation311_spill] sm:$0xff]  ;;  %v16432_v48 = vpop.f32.mrb[235].mxu0  ;;  %v19639_v62 = vld [vmem:[#allocation22_spill] sm:$0xff]  ;;  %v19645_v44 = vld [vmem:[#allocation313_spill] sm:$0xff] }
 0x368   :  { %v3210_v17 = vadd.f32 %v16037_v46, %v3040_v56  ;;  %13384 = vtanh.f32 %v3202_v13  ;;  %v2889_v40 = vmax.f32 %v19635_v19, %v16354_v26  ;;  %v16430_v56 = vpop.f32.mrb[235].mxu1  ;;  %v16434_v9 = vpack.c.bf16 %v13369_v14, %v13361_v3  ;;  %v19637_v13 = vld [vmem:[#allocation312_spill] sm:$0xff]  ;;  %v19640_v28 = vld [vmem:[#allocation223_spill] sm:$0xff] }
 0x369   :  { %v3010_v16 = vmax.f32 %v19630_v58, %v2882_v43  ;;  %19631 = vst [vmem:[#allocation100_spill] sm:$0xff] %v16423_v15  ;;  %v3047_v5 = vmax.f32 %v19634_v8, %v2919_v11  ;;  %v13371_v43 = vpop.eup %13370  ;;  %13386 = vtanh.f32 %v3172_v37  ;;  %v2920_v12 = vmax.f32 %v19637_v13, %v16360_v27  ;;  %v12819_v11 = vld [vmem:[#allocation7 + $0x1c0] sm:$0xff]  }
 0x36a   :  { %19636 = vst [vmem:[#allocation181_spill] sm:$0xff] %v16434_v9  ;;  %v13373_v21 = vpop.eup %13372  ;;  %v16440_v26 = vpack.c.bf16 %v13371_v43, %v13363_v52  ;;  %13388 = vtanh.f32 %v3209_v1  ;;  %v19641_v3 = vmax.f32 %v19639_v62, %v19640_v28  ;;  %v12833_v37 = vld [vmem:[#allocation7 + $0x200] sm:$0xff]   ;;  %v2890_v13 = vmax.f32 %v19645_v44, %v16362_v18  ;;  %4085 = vmatprep.mubr.bf16.mxu1 %v16434_v9  ;;  %v19646_v52 = vld [vmem:[#allocation314_spill] sm:$0xff] }
 0x36b   :  { %v3180_v29 = vadd.f32 %v16083_v24, %v3010_v16  ;;  %v3217_v58 = vadd.f32 %v16033_v51, %v3047_v5  ;;  %v13375_v16 = vpop.eup %13374  ;;  %13390 = vtanh.f32 %v3179_v49  ;;  %v19642_v35 = vld [vmem:[#allocation139_spill] sm:$0xff]  ;;  %v2927_v1 = vmax.f32 %v19646_v52, %v16400_v6  ;;  %v12835_v5 = vld [vmem:[#allocation7 + $0x248] sm:$0xff]   ;;  %4086 = vmatmul.mubr.bf16.gmra.mrb[28].mxu1 %v16412_v23  ;;  %v2681_v52 = vpop.f32.mrb[236].mxu0  ;;  %v19658_v9 = vld [vmem:[#allocation26_spill] sm:$0xff]  ;;  %11563 = vmatpush3.bf16.msra.mxu0 %v12833_v37 }
 0x36c   :  { %19638 = vst [vmem:[#allocation102_spill] sm:$0xff] %v16440_v26  ;;  %v3017_v14 = vmax.f32 %v19641_v3, %v2889_v40  ;;  %v19643_v27 = vld [vmem:[#allocation63_spill] sm:$0xff]  ;;  %v13377_v43 = vpop.eup %13376  ;;  %13392 = vtanh.f32 %v3210_v17  ;;  %4160 = vmatprep.mubr.bf16.mxu0 %v16440_v26  ;;  %v2897_v49 = vmax.f32 %v19647_v30, %v16402_v31  ;;  %v19649_v3 = vld [vmem:[#allocation140_spill] sm:$0xff]  ;;  %v16468_v31 = vpop.f32.mrb[236].mxu1  ;;  %4220 = vmatpush1.bf16.msra.mxu1 %v12819_v11 }
 0x36d   :  { %v19644_v8 = vmax.f32 %v19642_v35, %v19643_v27  ;;  %v13379_v18 = vpop.eup %13378  ;;  %13394 = vtanh.f32 %v3180_v29  ;;  %v19650_v6 = vld [vmem:[#allocation224_spill] sm:$0xff]  ;;  %4161 = vmatmul.mubr.bf16.gmra.mrb[28].mxu0 %v16423_v15  ;;  %v19655_v29 = vld [vmem:[#allocation25_spill] sm:$0xff]  ;;  %4221 = vmatprep.subr.bf16.mxu1 %v19521_v36 }
 0x36e   :  { %v3187_v40 = vadd.f32 %v16045_v22, %v3017_v14  ;;  %v19651_v35 = vmax.f32 %v19649_v3, %v19650_v6  ;;  %v19652_v17 = vld [vmem:[#allocation24_spill] sm:$0xff]  ;;  %13396 = vtanh.f32 %v3217_v58  ;;  %v19659_v3 = vld [vmem:[#allocation66_spill] sm:$0xff]  ;;  %11564 = vmatprep.subr.bf16.mxu0 %v12835_v5  ;;  %v19670_v15 = vld [vmem:[#allocation321_spill] sm:$0xff] }
 0x36f   :  { %v3048_v19 = vmax.f32 %v19644_v8, %v2920_v12  ;;  %v19648_v12 = vld [vmem:[#allocation316_spill] sm:$0xff]  ;;  %v2906_v26 = vmax.f32 %v19670_v15, %v16432_v48  ;;  %v19677_v48 = vld [vmem:[#allocation143_spill] sm:$0xff] }
 0x370   :  { %v2928_v62 = vmax.f32 %v19648_v12, %v2580_v47  ;;  %v3018_v27 = vmax.f32 %v19651_v35, %v2890_v13  ;;  %v19653_v8 = vld [vmem:[#allocation64_spill] sm:$0xff]  ;;  %v13381_v47 = vpop.eup %13380  ;;  %v19656_v12 = vld [vmem:[#allocation65_spill] sm:$0xff]  ;;  %v19660_v13 = vmax.f32 %v19658_v9, %v19659_v3  ;;  %13398 = vtanh.f32 %v3187_v40  ;;  %v19678_v15 = vld [vmem:[#allocation227_spill] sm:$0xff] }
 0x371   :  { %v3218_v28 = vadd.f32 %v16037_v46, %v3048_v19  ;;  %v19654_v14 = vmax.f32 %v19652_v17, %v19653_v8  ;;  %v12821_v30 = vld [vmem:[#allocation7 + $0x1c8] sm:$0xff]   ;;  %v19657_v19 = vmax.f32 %v19655_v29, %v19656_v12  ;;  %v16478_v17 = vpop.f32.mrb[237].mxu0  ;;  %v16480_v8 = vpop.f32.mrb[237].mxu1 }
 0x372   :  { %v3056_v6 = vmax.f32 %v19660_v13, %v2928_v62  ;;  %v19661_v35 = vld [vmem:[#allocation317_spill] sm:$0xff]  ;;  %v13383_v58 = vpop.eup %13382  ;;  %v16487_v62 = vpop.f32.mrb[238].mxu0  ;;  %v19667_v13 = vld [vmem:[#allocation318_spill] sm:$0xff]  ;;  %4222 = vmatpush1.bf16.msra.mxu1 %v12821_v30 }
 0x373   :  { %v3055_v44 = vmax.f32 %v19654_v14, %v2927_v1  ;;  %v3025_v23 = vmax.f32 %v19657_v19, %v2897_v49  ;;  %v2898_v1 = vmax.f32 %v19661_v35, %v16410_v10  ;;  %v12836_v11 = vld [vmem:[#allocation7 + $0x208] sm:$0xff]   ;;  %v16483_v14 = vpack.c.bf16 %v13381_v47, %v13373_v21  ;;  %v16489_v29 = vpop.f32.mrb[238].mxu1  ;;  %v12837_v10 = vld [vmem:[#allocation7 + $0x250] sm:$0xff]   ;;  %v16495_v21 = vpop.f32.mrb[239].mxu0  ;;  %4223 = vmatprep.subr.bf16.mxu1 %v19521_v36 }
 0x374   :  { %v3188_v49 = vadd.f32 %v16083_v24, %v3018_v27  ;;  %v16491_v12 = vpack.c.bf16 %v13383_v58, %v13375_v16  ;;  %13400 = vtanh.f32 %v3218_v28  ;;  %v3226_v19 = vadd.f32 %v16037_v46, %v3056_v6  ;;  %v16497_v40 = vpop.f32.mrb[239].mxu1  ;;  %v19664_v27 = vld [vmem:[#allocation141_spill] sm:$0xff]  ;;  %v19668_v16 = vld [vmem:[#allocation319_spill] sm:$0xff]  ;;  %v19669_v6 = vld [vmem:[#allocation320_spill] sm:$0xff]  ;;  %11565 = vmatpush3.bf16.msra.mxu0 %v12836_v11 }
 0x375   :  { %19662 = vst [vmem:[#allocation183_spill] sm:$0xff] %v16483_v14  ;;  %v3225_v9 = vadd.f32 %v16033_v51, %v3055_v44  ;;  %v3195_v37 = vadd.f32 %v16045_v22, %v3025_v23  ;;  %v19665_v44 = vld [vmem:[#allocation225_spill] sm:$0xff]  ;;  %v2935_v5 = vmax.f32 %v19667_v13, %v16419_v0  ;;  %v2905_v35 = vmax.f32 %v19668_v16, %v16421_v41  ;;  %v13385_v23 = vpop.eup %13384  ;;  %v19673_v41 = vld [vmem:[#allocation142_spill] sm:$0xff]  ;;  %v19680_v11 = vld [vmem:[#allocation144_spill] sm:$0xff] }
 0x376   :  { %19663 = vst [vmem:[#allocation104_spill] sm:$0xff] %v16491_v12  ;;  %13402 = vtanh.f32 %v3188_v49  ;;  %v19666_v47 = vmax.f32 %v19664_v27, %v19665_v44  ;;  %v12825_v28 = vld [vmem:[#allocation7 + $0x1d0] sm:$0xff]   ;;  %v2936_v58 = vmax.f32 %v19669_v6, %v16430_v56  ;;  %v19671_v49 = vld [vmem:[#allocation323_spill] sm:$0xff]  ;;  %v16512_v27 = vpack.c.bf16 %v13385_v23, %v13377_v43  ;;  %11566 = vmatprep.subr.bf16.mxu0 %v12837_v10  ;;  %v19681_v6 = vld [vmem:[#allocation228_spill] sm:$0xff] }
 0x377   :  { %v2913_v59 = vmax.f32 %v19671_v49, %v2681_v52  ;;  %13404 = vtanh.f32 %v3225_v9  ;;  %v19674_v30 = vld [vmem:[#allocation226_spill] sm:$0xff]  ;;  %v19679_v52 = vmax.f32 %v19677_v48, %v19678_v15  ;;  %v19682_v43 = vmax.f32 %v19680_v11, %v19681_v6  ;;  %v16536_v48 = vpop.f32.mrb[240].mxu1  ;;  %4224 = vmatpush1.bf16.msra.mxu1 %v12825_v28  ;;  %v12832_v28 = vld [vmem:[#allocation7 + $0x2a0] sm:$0xff]  }
 0x378   :  { %v3026_v3 = vmax.f32 %v19666_v47, %v2898_v1  ;;  %v13387_v1 = vpop.eup %13386  ;;  %19672 = vst [vmem:[#allocation184_spill] sm:$0xff] %v16512_v27  ;;  %v19675_v44 = vmax.f32 %v19673_v41, %v19674_v30  ;;  %13406 = vtanh.f32 %v3195_v37  ;;  %v12839_v9 = vld [vmem:[#allocation7 + $0x210] sm:$0xff]   ;;  %4092 = vmatprep.mubr.bf16.mxu1 %v16512_v27  ;;  %v19687_v37 = vld [vmem:[#allocation67_spill] sm:$0xff]  ;;  %v16546_v11 = vpop.f32.mrb[241].mxu1  ;;  %4225 = vmatprep.subr.bf16.mxu1 %v19521_v36 }
 0x379   :  { %v13389_v56 = vpop.eup %13388  ;;  %v16518_v13 = vpack.c.bf16 %v13387_v1, %v13379_v18  ;;  %v3033_v16 = vmax.f32 %v19679_v52, %v2905_v35  ;;  %v3064_v23 = vmax.f32 %v19682_v43, %v2936_v58  ;;  %13408 = vtanh.f32 %v3226_v19  ;;  %v19683_v41 = vld [vmem:[#allocation145_spill] sm:$0xff]  ;;  %v19686_v18 = vld [vmem:[#allocation28_spill] sm:$0xff]  ;;  %v16534_v35 = vpop.f32.mrb[240].mxu0  ;;  %v12828_v58 = vld [vmem:[#allocation7 + $0x1d8] sm:$0xff]   ;;  %4093 = vmatmul.mubr.bf16.gmra.mrb[32].mxu1 %v16483_v14  ;;  %11567 = vmatpush3.bf16.msra.mxu0 %v12839_v9 }
 0x37a   :  { %v3196_v0 = vadd.f32 %v16083_v24, %v3026_v3  ;;  %v3063_v47 = vmax.f32 %v19675_v44, %v2935_v5  ;;  %v13391_v49 = vpop.eup %13390  ;;  %v19684_v5 = vld [vmem:[#allocation229_spill] sm:$0xff]  ;;  %v19688_v1 = vmax.f32 %v19686_v18, %v19687_v37  ;;  %v12841_v15 = vld [vmem:[#allocation7 + $0x258] sm:$0xff]  }
 0x37b   :  { %19676 = vst [vmem:[#allocation45_spill] sm:$0xff] %v16518_v13  ;;  %v19685_v10 = vmax.f32 %v19683_v41, %v19684_v5  ;;  %v13393_v19 = vpop.eup %13392  ;;  %4167 = vmatprep.mubr.bf16.mxu0 %v16518_v13  ;;  %v19691_v5 = vld [vmem:[#allocation27_spill] sm:$0xff]  ;;  %v19698_v27 = vld [vmem:[#allocation69_spill] sm:$0xff]  ;;  %4226 = vmatpush1.bf16.msra.mxu1 %v12828_v58  ;;  %v19706_v58 = vld [vmem:[#allocation148_spill] sm:$0xff] }
 0x37c   :  { %v3233_v3 = vadd.f32 %v16033_v51, %v3063_v47  ;;  %v3041_v44 = vmax.f32 %v19688_v1, %v2913_v59  ;;  %13410 = vtanh.f32 %v3196_v0  ;;  %v3203_v51 = vadd.f32 %v16045_v22, %v3033_v16  ;;  %v16544_v59 = vpop.f32.mrb[241].mxu0  ;;  %v13395_v6 = vpop.eup %13394  ;;  %4168 = vmatmul.mubr.bf16.gmra.mrb[32].mxu0 %v16491_v12  ;;  %v19695_v1 = vld [vmem:[#allocation327_spill] sm:$0xff]  ;;  %11568 = vmatprep.subr.bf16.mxu0 %v12841_v15  ;;  %v19707_v15 = vld [vmem:[#allocation230_spill] sm:$0xff] }
 0x37d   :  { %v3034_v30 = vmax.f32 %v19685_v10, %v2906_v26  ;;  %v3234_v47 = vadd.f32 %v16037_v46, %v3064_v23  ;;  %v19689_v26 = vld [vmem:[#allocation322_spill] sm:$0xff]  ;;  %v19690_v46 = vld [vmem:[#allocation325_spill] sm:$0xff]  ;;  %v16553_v23 = vpop.f32.mrb[242].mxu0  ;;  %v13397_v41 = vpop.eup %13396  ;;  %v19692_v10 = vld [vmem:[#allocation68_spill] sm:$0xff]  ;;  %11618 = vmatprep.subr.bf16.mxu1 %v12832_v28 }
 0x37e   :  { %v2819_v52 = vmax.f32 %v19689_v26, %v16468_v31  ;;  %13412 = vtanh.f32 %v3233_v3  ;;  %v3211_v16 = vadd.f32 %v16045_v22, %v3041_v44  ;;  %v2914_v43 = vmax.f32 %v19690_v46, %v16478_v17  ;;  %v16555_v31 = vpop.f32.mrb[242].mxu1  ;;  %v16565_v26 = vpop.f32.mrb[243].mxu0  ;;  %v12842_v46 = vld [vmem:[#allocation7 + $0x218] sm:$0xff]  }
 0x37f   :  { %v3204_v0 = vadd.f32 %v16083_v24, %v3034_v30  ;;  %13414 = vtanh.f32 %v3203_v51  ;;  %v19693_v3 = vmax.f32 %v19691_v5, %v19692_v10  ;;  %v19694_v30 = vld [vmem:[#allocation324_spill] sm:$0xff]  ;;  %v2921_v44 = vmax.f32 %v19695_v1, %v16487_v62  ;;  %v16567_v17 = vpop.f32.mrb[243].mxu1  ;;  %v13399_v14 = vpop.eup %13398  ;;  %v19697_v51 = vld [vmem:[#allocation146_spill] sm:$0xff]  ;;  %v19702_v1 = vld [vmem:[#allocation29_spill] sm:$0xff]  ;;  %11569 = vmatpush3.bf16.msra.mxu0 %v12842_v46 }
 0x380   :  { %v2820_v37 = vmax.f32 %v19694_v30, %v16480_v8  ;;  %v16569_v12 = vpack.c.bf16 %v13397_v41, %v13389_v56  ;;  %13416 = vtanh.f32 %v3234_v47  ;;  %v19699_v5 = vmax.f32 %v19697_v51, %v19698_v27  ;;  %v19700_v10 = vld [vmem:[#allocation326_spill] sm:$0xff]  ;;  %v12852_v62 = vld [vmem:[#allocation7 + $0x320] sm:$0xff]  }
 0x381   :  { %v2947_v18 = vmax.f32 %v19693_v3, %v2819_v52  ;;  %v2827_v8 = vmax.f32 %v19700_v10, %v16489_v29  ;;  %v13401_v3 = vpop.eup %13400  ;;  %v16576_v30 = vpack.c.bf16 %v13399_v14, %v13391_v49  ;;  %13418 = vtanh.f32 %v3204_v0  ;;  %v19703_v56 = vld [vmem:[#allocation70_spill] sm:$0xff]  ;;  %v19710_v0 = vld [vmem:[#allocation147_spill] sm:$0xff]  ;;  %v19714_v10 = vld [vmem:[#allocation328_spill] sm:$0xff]  ;;  %11682 = vmatprep.subr.bf16.mxu0 %v12852_v62 }
 0x382   :  { %19696 = vst [vmem:[#allocation187_spill] sm:$0xff] %v16569_v12  ;;  %v3042_v52 = vmax.f32 %v19699_v5, %v2914_v43  ;;  %v19704_v41 = vmax.f32 %v19702_v1, %v19703_v56  ;;  %v13403_v13 = vpop.eup %13402  ;;  %v16582_v27 = vpack.c.bf16 %v13401_v3, %v13393_v19  ;;  %13420 = vtanh.f32 %v3211_v16  ;;  %v19713_v16 = vld [vmem:[#allocation329_spill] sm:$0xff]  ;;  %v19715_v46 = vld [vmem:[#allocation331_spill] sm:$0xff]  ;;  %v19717_v56 = vld [vmem:[#allocation150_spill] sm:$0xff] }
 0x383   :  { %19701 = vst [vmem:[#allocation75_spill] sm:$0xff] %v16576_v30  ;;  %v3117_v9 = vadd.f32 %v16128_v4, %v2947_v18  ;;  %v19708_v43 = vmax.f32 %v19706_v58, %v19707_v15  ;;  %v16588_v14 = vpack.c.bf16 %v13403_v13, %v13395_v6  ;;  %v19711_v18 = vld [vmem:[#allocation231_spill] sm:$0xff]  ;;  %v13405_v28 = vpop.eup %13404  ;;  %v16600_v13 = vpop.f32.mrb[244].mxu1  ;;  %v2929_v3 = vmax.f32 %v19715_v46, %v16534_v35  ;;  %v19718_v62 = vld [vmem:[#allocation232_spill] sm:$0xff]  ;;  %v19721_v58 = vld [vmem:[#allocation233_spill] sm:$0xff] }
 0x384   :  { %v2948_v47 = vmax.f32 %v19704_v41, %v2820_v37  ;;  %19705 = vst [vmem:[#allocation189_spill] sm:$0xff] %v16582_v27  ;;  %v3212_v29 = vadd.f32 %v16083_v24, %v3042_v52  ;;  %v19712_v5 = vmax.f32 %v19710_v0, %v19711_v18  ;;  %v2922_v52 = vmax.f32 %v19713_v16, %v16495_v21  ;;  %v13407_v6 = vpop.eup %13406  ;;  %v19723_v35 = vld [vmem:[#allocation333_spill] sm:$0xff]  ;;  %v19724_v0 = vld [vmem:[#allocation31_spill] sm:$0xff]  ;;  %v19728_v16 = vld [vmem:[#allocation234_spill] sm:$0xff] }
 0x385   :  { %v3049_v51 = vmax.f32 %v19708_v43, %v2921_v44  ;;  %19709 = vst [vmem:[#allocation90_spill] sm:$0xff] %v16588_v14  ;;  %13422 = vtanh.f32 %v3117_v9  ;;  %v2828_v44 = vmax.f32 %v19714_v10, %v16497_v40  ;;  %4099 = vmatprep.mubr.bf16.mxu1 %v16582_v27  ;;  %4174 = vmatprep.mubr.bf16.mxu0 %v16588_v14  ;;  %v19716_v9 = vld [vmem:[#allocation330_spill] sm:$0xff]  ;;  %v16609_v40 = vpop.f32.mrb[245].mxu1  ;;  %v13409_v1 = vpop.eup %13408  ;;  %v19725_v18 = vld [vmem:[#allocation71_spill] sm:$0xff]  ;;  %v19730_v46 = vld [vmem:[#allocation332_spill] sm:$0xff] }
 0x386   :  { %v3118_v49 = vadd.f32 %v16131_v53, %v2948_v47  ;;  %v2955_v37 = vmax.f32 %v19712_v5, %v2827_v8  ;;  %13424 = vtanh.f32 %v3212_v29  ;;  %v2835_v21 = vmax.f32 %v19716_v9, %v16536_v48  ;;  %4100 = vmatmul.mubr.bf16.gmra.mrb[36].mxu1 %v16569_v12  ;;  %v19720_v29 = vld [vmem:[#allocation149_spill] sm:$0xff]  ;;  %4175 = vmatmul.mubr.bf16.gmra.mrb[36].mxu0 %v16576_v30  ;;  %v2758_v48 = vpop.f32.mrb[246].mxu1 }
 0x387   :  { %v3219_v19 = vadd.f32 %v16045_v22, %v3049_v51  ;;  %v19719_v41 = vmax.f32 %v19717_v56, %v19718_v62  ;;  %v19722_v15 = vmax.f32 %v19720_v29, %v19721_v58  ;;  %v2930_v51 = vmax.f32 %v19723_v35, %v16544_v59 }
 0x388   :  { %13426 = vtanh.f32 %v3118_v49  ;;  %v3125_v8 = vadd.f32 %v16128_v4, %v2955_v37  ;;  %v13411_v49 = vpop.eup %13410  ;;  %v19726_v5 = vmax.f32 %v19724_v0, %v19725_v18  ;;  %v2836_v9 = vmax.f32 %v19730_v46, %v16546_v11  ;;  %v19736_v18 = vld [vmem:[#allocation32_spill] sm:$0xff]  ;;  %v19741_v46 = vld [vmem:[#allocation237_spill] sm:$0xff] }
 0x389   :  { %13428 = vtanh.f32 %v3219_v19  ;;  %v3050_v47 = vmax.f32 %v19719_v41, %v2922_v52  ;;  %v2956_v43 = vmax.f32 %v19722_v15, %v2828_v44  ;;  %v19727_v19 = vld [vmem:[#allocation30_spill] sm:$0xff]  ;;  %v16628_v44 = vpop.f32.mrb[247].mxu1  ;;  %v13413_v56 = vpop.eup %13412  ;;  %v19731_v41 = vld [vmem:[#allocation33_spill] sm:$0xff] }
 0x38a   :  { %13430 = vtanh.f32 %v3125_v8  ;;  %v3057_v37 = vmax.f32 %v19726_v5, %v2929_v3  ;;  %v19729_v10 = vmax.f32 %v19727_v19, %v19728_v16  ;;  %v19732_v8 = vld [vmem:[#allocation235_spill] sm:$0xff]  ;;  %v19734_v3 = vld [vmem:[#allocation336_spill] sm:$0xff]  ;;  %v13415_v35 = vpop.eup %13414  ;;  %v16637_v0 = vpack.c.bf16 %v13413_v56, %v13405_v28 }
 0x38b   :  { %v3220_v62 = vadd.f32 %v16083_v24, %v3050_v47  ;;  %v3126_v59 = vadd.f32 %v16131_v53, %v2956_v43  ;;  %v19733_v29 = vmax.f32 %v19731_v41, %v19732_v8  ;;  %v2937_v15 = vmax.f32 %v19734_v3, %v16553_v23  ;;  %v19737_v5 = vld [vmem:[#allocation236_spill] sm:$0xff]  ;;  %v13417_v16 = vpop.eup %13416  ;;  %v2764_v3 = vpop.f32.mrb[248].mxu1 }
 0x38c   :  { %v2963_v52 = vmax.f32 %v19729_v10, %v2835_v21  ;;  %19735 = vst [vmem:[#allocation46_spill] sm:$0xff] %v16637_v0  ;;  %v3227_v21 = vadd.f32 %v16045_v22, %v3057_v37  ;;  %v19738_v19 = vmax.f32 %v19736_v18, %v19737_v5  ;;  %v16644_v43 = vpack.c.bf16 %v13415_v35, %v13407_v6  ;;  %v19740_v10 = vld [vmem:[#allocation151_spill] sm:$0xff]  ;;  %v13419_v28 = vpop.eup %13418  ;;  %v19748_v35 = vld [vmem:[#allocation238_spill] sm:$0xff]  ;;  %v19750_v5 = vld [vmem:[#allocation337_spill] sm:$0xff] }
 0x38d   :  { %v3058_v58 = vmax.f32 %v19733_v29, %v2930_v51  ;;  %13432 = vtanh.f32 %v3220_v62  ;;  %v19742_v23 = vmax.f32 %v19740_v10, %v19741_v46  ;;  %v16650_v56 = vpack.c.bf16 %v13417_v16, %v13409_v1  ;;  %v19746_v62 = vld [vmem:[#allocation338_spill] sm:$0xff] }
 0x38e   :  { %v3133_v11 = vadd.f32 %v16128_v4, %v2963_v52  ;;  %v2964_v47 = vmax.f32 %v19738_v19, %v2836_v9  ;;  %19739 = vst [vmem:[#allocation92_spill] sm:$0xff] %v16644_v43  ;;  %13434 = vtanh.f32 %v3126_v59  ;;  %v19744_v52 = vld [vmem:[#allocation335_spill] sm:$0xff]  ;;  %v13421_v9 = vpop.eup %13420  ;;  %v16655_v29 = vpack.c.bf16 %v13419_v28, %v13411_v49  ;;  %v19747_v1 = vld [vmem:[#allocation34_spill] sm:$0xff] }
 0x38f   :  { %v3228_v51 = vadd.f32 %v16083_v24, %v3058_v58  ;;  %v3065_v41 = vmax.f32 %v19742_v23, %v2937_v15  ;;  %19743 = vst [vmem:[#allocation47_spill] sm:$0xff] %v16650_v56  ;;  %v2843_v8 = vmax.f32 %v19744_v52, %v16555_v31  ;;  %13436 = vtanh.f32 %v3227_v21  ;;  %v13423_v15 = vpop.eup %13422  ;;  %4106 = vmatprep.mubr.bf16.mxu1 %v16650_v56  ;;  %v19751_v31 = vld [vmem:[#allocation339_spill] sm:$0xff]  ;;  %v2766_v21 = vpop.f32.mrb[249].mxu1  ;;  %v19757_v52 = vld [vmem:[#allocation152_spill] sm:$0xff] }
 0x390   :  { %v3134_v37 = vadd.f32 %v16131_v53, %v2964_v47  ;;  %19745 = vst [vmem:[#allocation48_spill] sm:$0xff] %v16655_v29  ;;  %v2938_v58 = vmax.f32 %v19746_v62, %v16565_v26  ;;  %13438 = vtanh.f32 %v3133_v11  ;;  %v19749_v59 = vmax.f32 %v19747_v1, %v19748_v35  ;;  %v19752_v47 = vld [vmem:[#allocation153_spill] sm:$0xff]  ;;  %v19753_v26 = vld [vmem:[#allocation239_spill] sm:$0xff]  ;;  %4181 = vmatprep.mubr.bf16.mxu0 %v16655_v29  ;;  %v19755_v11 = vld [vmem:[#allocation340_spill] sm:$0xff] }
 0x391   :  { %v3235_v6 = vadd.f32 %v16045_v22, %v3065_v41  ;;  %v2844_v19 = vmax.f32 %v19750_v5, %v16567_v17  ;;  %v2851_v49 = vmax.f32 %v19751_v31, %v16600_v13  ;;  %v13425_v22 = vpop.eup %13424  ;;  %13440 = vtanh.f32 %v3228_v51  ;;  %4107 = vmatmul.mubr.bf16.gmra.mrb[40].mxu1 %v16637_v0  ;;  %v19756_v17 = vld [vmem:[#allocation341_spill] sm:$0xff]  ;;  %v2768_v41 = vpop.f32.mrb[250].mxu1  ;;  %v19758_v51 = vld [vmem:[#allocation240_spill] sm:$0xff]  ;;  %v19760_v1 = vld [vmem:[#allocation35_spill] sm:$0xff]  ;;  %4182 = vmatmul.mubr.bf16.gmra.mrb[40].mxu0 %v16644_v43 }
 0x392   :  { %v2971_v18 = vmax.f32 %v19749_v59, %v2843_v8  ;;  %v19754_v16 = vmax.f32 %v19752_v47, %v19753_v26  ;;  %v2852_v46 = vmax.f32 %v19755_v11, %v16609_v40  ;;  %v2859_v23 = vmax.f32 %v19756_v17, %v2758_v48  ;;  %v13427_v28 = vpop.eup %13426  ;;  %v2770_v5 = vpop.f32.mrb[251].mxu1  ;;  %v19763_v48 = vld [vmem:[#allocation37_spill] sm:$0xff]  ;;  %v19764_v47 = vld [vmem:[#allocation242_spill] sm:$0xff] }
 0x393   :  { %13442 = vtanh.f32 %v3134_v37  ;;  %v19759_v8 = vmax.f32 %v19757_v52, %v19758_v51  ;;  %v13429_v31 = vpop.eup %13428  ;;  %v19765_v37 = vmax.f32 %v19763_v48, %v19764_v47 }
 0x394   :  { %v3066_v10 = vmax.f32 %v19754_v16, %v2938_v58  ;;  %v3141_v13 = vadd.f32 %v16128_v4, %v2971_v18  ;;  %v19761_v58 = vld [vmem:[#allocation241_spill] sm:$0xff]  ;;  %13444 = vtanh.f32 %v3235_v6  ;;  %v19766_v18 = vld [vmem:[#allocation154_spill] sm:$0xff]  ;;  %v19767_v16 = vld [vmem:[#allocation243_spill] sm:$0xff]  ;;  %v16691_v52 = vpack.c.bf16 %v13429_v31, %v13421_v9 }
 0x395   :  { %v2972_v62 = vmax.f32 %v19759_v8, %v2844_v19  ;;  %v19762_v35 = vmax.f32 %v19760_v1, %v19761_v58  ;;  %v2980_v26 = vmax.f32 %v19765_v37, %v2852_v46  ;;  %v19768_v11 = vmax.f32 %v19766_v18, %v19767_v16  ;;  %v13431_v19 = vpop.eup %13430  ;;  %v2774_v1 = vpop.f32.mrb[252].mxu1  ;;  %v19774_v31 = vld [vmem:[#allocation244_spill] sm:$0xff]  ;;  %v19784_v18 = vld [vmem:[#allocation247_spill] sm:$0xff] }
 0x396   :  { %v3236_v40 = vadd.f32 %v16083_v24, %v3066_v10  ;;  %19769 = vst [vmem:[#allocation80_spill] sm:$0xff] %v16691_v52  ;;  %13446 = vtanh.f32 %v3141_v13  ;;  %v16695_v8 = vpack.c.bf16 %v13431_v19, %v13423_v15  ;;  %v2860_v6 = vmax.f32 %v15850_v60, %v16628_v44 }
 0x397   :  { %v2979_v59 = vmax.f32 %v19762_v35, %v2851_v49  ;;  %v2987_v17 = vmax.f32 %v19768_v11, %v2859_v23  ;;  %v3142_v49 = vadd.f32 %v16131_v53, %v2972_v62  ;;  %v2867_v10 = vmax.f32 %v15866_v63, %v2764_v3  ;;  %v13433_v9 = vpop.eup %13432  ;;  %v19771_v62 = vld [vmem:[#allocation72_spill] sm:$0xff]  ;;  %v19776_v63 = vld [vmem:[#allocation39_spill] sm:$0xff]  ;;  %v19777_v3 = vld [vmem:[#allocation245_spill] sm:$0xff] }
 0x398   :  { %19770 = vst [vmem:[#allocation49_spill] sm:$0xff] %v16695_v8  ;;  %13448 = vtanh.f32 %v3236_v40  ;;  %v2868_v46 = vmax.f32 %v15869_v54, %v2766_v21  ;;  %v3150_v23 = vadd.f32 %v16131_v53, %v2980_v26  ;;  %v2875_v13 = vmax.f32 %v15872_v34, %v2768_v41  ;;  %v13435_v58 = vpop.eup %13434  ;;  %v2776_v40 = vpop.f32.mrb[253].mxu1  ;;  %v19780_v34 = vld [vmem:[#allocation158_spill] sm:$0xff]  ;;  %v19783_v26 = vld [vmem:[#allocation160_spill] sm:$0xff] }
 0x399   :  { %v3149_v51 = vadd.f32 %v16128_v4, %v2979_v59  ;;  %v3157_v24 = vadd.f32 %v16128_v4, %v2987_v17  ;;  %13450 = vtanh.f32 %v3142_v49  ;;  %v2876_v15 = vmax.f32 %v19771_v62, %v2770_v5  ;;  %v19773_v59 = vld [vmem:[#allocation156_spill] sm:$0xff]  ;;  %v13437_v48 = vpop.eup %13436  ;;  %v19781_v41 = vld [vmem:[#allocation246_spill] sm:$0xff]  ;;  %v2778_v17 = vpop.f32.mrb[254].mxu1 }
 0x39a   :  { %v16705_v35 = vpack.c.bf16 %v13433_v9, %v13425_v22  ;;  %v19775_v60 = vmax.f32 %v19773_v59, %v19774_v31  ;;  %v19778_v54 = vmax.f32 %v19776_v63, %v19777_v3  ;;  %v16713_v47 = vpack.c.bf16 %v13435_v58, %v13427_v28  ;;  %v12834_v22 = vld [vmem:[#allocation7 + $0x260] sm:$0xff]   ;;  %v13439_v19 = vpop.eup %13438  ;;  %v19786_v28 = vld [vmem:[#allocation162_spill] sm:$0xff]  ;;  %v2780_v58 = vpop.f32.mrb[255].mxu1  ;;  %v19792_v3 = vld [vmem:[#allocation249_spill] sm:$0xff] }
 0x39b   :  { %13452 = vtanh.f32 %v3149_v51  ;;  %v19782_v5 = vmax.f32 %v19780_v34, %v19781_v41  ;;  %v19785_v16 = vmax.f32 %v19783_v26, %v19784_v18  ;;  %v19789_v9 = vld [vmem:[#allocation36_spill] sm:$0xff]  ;;  %v13441_v59 = vpop.eup %13440 }
 0x39c   :  { %19772 = vst [vmem:[#allocation265_spill] sm:$0xff] %v16705_v35  ;;  %v2988_v44 = vmax.f32 %v19775_v60, %v2860_v6  ;;  %v2995_v21 = vmax.f32 %v19778_v54, %v2867_v10  ;;  %19779 = vst [vmem:[#allocation95_spill] sm:$0xff] %v16713_v47  ;;  %13454 = vtanh.f32 %v3157_v24  ;;  %4188 = vmatprep.mubr.bf16.mxu0 %v16705_v35  ;;  %v19787_v6 = vld [vmem:[#allocation248_spill] sm:$0xff]  ;;  %10894 = vmatprep.mubr.msk.bf16.mxu1 %vm3911_vm1, %v16713_v47  ;;  %v19790_v60 = vld [vmem:[#allocation73_spill] sm:$0xff] }
 0x39d   :  { %v2996_v37 = vmax.f32 %v19782_v5, %v2868_v46  ;;  %v3003_v11 = vmax.f32 %v19785_v16, %v2875_v13  ;;  %v19788_v24 = vmax.f32 %v19786_v28, %v19787_v6  ;;  %v2883_v62 = vmax.f32 %v19789_v9, %v2774_v1  ;;  %v12838_v46 = vld [vmem:[#allocation7 + $0x2a8] sm:$0xff]   ;;  %4189 = vmatmul.mubr.bf16.gmra.mrb[44].mxu0 %v16691_v52  ;;  %v13443_v63 = vpop.eup %13442  ;;  %v19795_v5 = vld [vmem:[#allocation166_spill] sm:$0xff] }
 0x39e   :  { %v3158_v49 = vadd.f32 %v16131_v53, %v2988_v44  ;;  %v3165_v51 = vadd.f32 %v16128_v4, %v2995_v21  ;;  %13456 = vtanh.f32 %v3150_v23  ;;  %v2884_v44 = vmax.f32 %v19790_v60, %v2776_v40  ;;  %4236 = vmatmul.mubr.bf16.vlgmr.msra.gmra.mrb[44].mxu1 %v16695_v8  ;;  %v19791_v1 = vld [vmem:[#allocation164_spill] sm:$0xff]  ;;  %v19794_v21 = vld [vmem:[#allocation38_spill] sm:$0xff]  ;;  %v13445_v41 = vpop.eup %13444 }
 0x39f   :  { %v3004_v10 = vmax.f32 %v19788_v24, %v2876_v15  ;;  %v3166_v13 = vadd.f32 %v16131_v53, %v2996_v37  ;;  %v3173_v31 = vadd.f32 %v16128_v4, %v3003_v11  ;;  %v19793_v23 = vmax.f32 %v19791_v1, %v19792_v3  ;;  %11619 = vmatpush3.bf16.msra.mxu1 %v12834_v22  ;;  %v19796_v37 = vld [vmem:[#allocation250_spill] sm:$0xff]  ;;  %v12840_v40 = vld [vmem:[#allocation7 + $0x268] sm:$0xff]   ;;  %v2784_v3 = vpop.f32.mrb[0].mxu1 }
 0x3a0   :  { %13458 = vtanh.f32 %v3158_v49  ;;  %v2891_v34 = vmax.f32 %v19794_v21, %v2778_v17  ;;  %v19797_v26 = vmax.f32 %v19795_v5, %v19796_v37  ;;  %v19798_v16 = vld [vmem:[#allocation74_spill] sm:$0xff]  ;;  %v13447_v49 = vpop.eup %13446  ;;  %v16744_v28 = vpack.c.bf16 %v13445_v41, %v13437_v48  ;;  %11620 = vmatprep.subr.bf16.mxu1 %v12838_v46  ;;  %v19800_v24 = vld [vmem:[#allocation168_spill] sm:$0xff]  ;;  %v2786_v21 = vpop.f32.mrb[1].mxu1 }
 0x3a1   :  { %v3174_v15 = vadd.f32 %v16131_v53, %v3004_v10  ;;  %v3011_v54 = vmax.f32 %v19793_v23, %v2883_v62  ;;  %13460 = vtanh.f32 %v3165_v51  ;;  %v2892_v11 = vmax.f32 %v19798_v16, %v2780_v58  ;;  %v19801_v10 = vld [vmem:[#allocation251_spill] sm:$0xff]  ;;  %v12843_v51 = vld [vmem:[#allocation7 + $0x2b0] sm:$0xff]   ;;  %v19805_v58 = vld [vmem:[#allocation252_spill] sm:$0xff]  ;;  %v2788_v5 = vpop.f32.mrb[2].mxu1 }
 0x3a2   :  { %v3012_v18 = vmax.f32 %v19797_v26, %v2884_v44  ;;  %19799 = vst [vmem:[#allocation190_spill] sm:$0xff] %v16744_v28  ;;  %13462 = vtanh.f32 %v3166_v13  ;;  %v19802_v17 = vmax.f32 %v19800_v24, %v19801_v10  ;;  %v13449_v22 = vpop.eup %13448  ;;  %v16750_v62 = vpack.c.bf16 %v13447_v49, %v13439_v19  ;;  %v19804_v44 = vld [vmem:[#allocation170_spill] sm:$0xff]  ;;  %v19815_v24 = vld [vmem:[#allocation157_spill] sm:$0xff] }
 0x3a3   :  { %v3181_v6 = vadd.f32 %v16128_v4, %v3011_v54  ;;  %13464 = vtanh.f32 %v3173_v31  ;;  %v19806_v1 = vmax.f32 %v19804_v44, %v19805_v58  ;;  %v13451_v13 = vpop.eup %13450  ;;  %v16756_v23 = vpack.c.bf16 %v13449_v22, %v13441_v59  ;;  %11621 = vmatpush3.bf16.msra.mxu1 %v12840_v40  ;;  %v12844_v41 = vld [vmem:[#allocation7 + $0x270] sm:$0xff]   ;;  %v19809_v59 = vld [vmem:[#allocation172_spill] sm:$0xff]  ;;  %v12845_v16 = vld [vmem:[#allocation7 + $0x2b8] sm:$0xff]  }
 0x3a4   :  { %v3019_v9 = vmax.f32 %v19802_v17, %v2891_v34  ;;  %19803 = vst [vmem:[#allocation267_spill] sm:$0xff] %v16750_v62  ;;  %v3182_v60 = vadd.f32 %v16131_v53, %v3012_v18  ;;  %13466 = vtanh.f32 %v3174_v15  ;;  %v2899_v54 = vmax.f32 %v15927_v42, %v2784_v3  ;;  %v19810_v15 = vld [vmem:[#allocation253_spill] sm:$0xff]  ;;  %11622 = vmatprep.subr.bf16.mxu1 %v12843_v51  ;;  %v19818_v51 = vld [vmem:[#allocation176_spill] sm:$0xff]  ;;  %v19819_v22 = vld [vmem:[#allocation255_spill] sm:$0xff] }
 0x3a5   :  { %v3020_v48 = vmax.f32 %v19806_v1, %v2892_v11  ;;  %19807 = vst [vmem:[#allocation266_spill] sm:$0xff] %v16756_v23  ;;  %v16760_v34 = vpack.c.bf16 %v13451_v13, %v13443_v63  ;;  %13468 = vtanh.f32 %v3181_v6  ;;  %v2900_v31 = vmax.f32 %v15931_v45, %v2786_v21  ;;  %v13453_v37 = vpop.eup %13452  ;;  %4195 = vmatprep.mubr.bf16.mxu0 %v16756_v23  ;;  %v2790_v63 = vpop.f32.mrb[3].mxu1  ;;  %v19812_v45 = vld [vmem:[#allocation174_spill] sm:$0xff]  ;;  %v19822_v3 = vld [vmem:[#allocation256_spill] sm:$0xff] }
 0x3a6   :  { %v3189_v46 = vadd.f32 %v16128_v4, %v3019_v9  ;;  %13470 = vtanh.f32 %v3182_v60  ;;  %v19811_v26 = vmax.f32 %v19809_v59, %v19810_v15  ;;  %v2907_v42 = vmax.f32 %v15934_v50, %v2788_v5  ;;  %v13455_v40 = vpop.eup %13454  ;;  %4196 = vmatmul.mubr.bf16.gmra.mrb[48].mxu0 %v16744_v28  ;;  %v19813_v11 = vld [vmem:[#allocation254_spill] sm:$0xff]  ;;  %v19817_v50 = vld [vmem:[#allocation76_spill] sm:$0xff]  ;;  %v2794_v15 = vpop.f32.mrb[4].mxu1 }
 0x3a7   :  { %19808 = vst [vmem:[#allocation269_spill] sm:$0xff] %v16760_v34  ;;  %v3190_v19 = vadd.f32 %v16131_v53, %v3020_v48  ;;  %10895 = vmatprep.mubr.msk.bf16.mxu1 %vm3911_vm1, %v16760_v34  ;;  %v19814_v49 = vmax.f32 %v19812_v45, %v19813_v11  ;;  %v2908_v10 = vmax.f32 %v19815_v24, %v2790_v63  ;;  %v19821_v48 = vld [vmem:[#allocation178_spill] sm:$0xff] }
 0x3a8   :  { %v3027_v18 = vmax.f32 %v19811_v26, %v2899_v54  ;;  %13472 = vtanh.f32 %v3189_v46  ;;  %v16776_v17 = vpack.c.bf16 %v13455_v40, %v13453_v37  ;;  %4243 = vmatmul.mubr.bf16.gmra.mrb[48].mxu1 %v16750_v62  ;;  %4805 = vmatprep.mubr.bf16.mxu0 %v19817_v50  ;;  %v19820_v60 = vmax.f32 %v19818_v51, %v19819_v22  ;;  %v13457_v58 = vpop.eup %13456  ;;  %v12846_v54 = vld [vmem:[#allocation7 + $0x278] sm:$0xff]   ;;  %v12848_v40 = vld [vmem:[#allocation7 + $0x280] sm:$0xff]   ;;  %v12849_v51 = vld [vmem:[#allocation7 + $0x2c8] sm:$0xff]  }
 0x3a9   :  { %v3028_v6 = vmax.f32 %v19814_v49, %v2900_v31  ;;  %13474 = vtanh.f32 %v3190_v19  ;;  %11623 = vmatpush3.bf16.msra.mxu1 %v12844_v41  ;;  %v19823_v13 = vmax.f32 %v19821_v48, %v19822_v3  ;;  %v12847_v19 = vld [vmem:[#allocation7 + $0x2c0] sm:$0xff]   ;;  %v2915_v41 = vmax.f32 %v15961_v39, %v2794_v15  ;;  %v19825_v49 = vld [vmem:[#allocation41_spill] sm:$0xff] }
 0x3aa   :  { %19816 = vst [vmem:[#allocation268_spill] sm:$0xff] %v16776_v17  ;;  %v3197_v9 = vadd.f32 %v16128_v4, %v3027_v18  ;;  %v3035_v44 = vmax.f32 %v19820_v60, %v2907_v42  ;;  %v13459_v21 = vpop.eup %13458  ;;  %11624 = vmatprep.subr.bf16.mxu1 %v12845_v16  ;;  %v2796_v18 = vpop.f32.mrb[5].mxu1  ;;  %v12854_v22 = vld [vmem:[#allocation7 + $0x2e0] sm:$0xff]  }
 0x3ab   :  { %v3198_v1 = vadd.f32 %v16131_v53, %v3028_v6  ;;  %v3036_v46 = vmax.f32 %v19823_v13, %v2908_v10  ;;  %v13461_v5 = vpop.eup %13460  ;;  %v16789_v37 = vpack.c.bf16 %v13459_v21, %v13457_v58  ;;  %v2916_v63 = vmax.f32 %v15965_v57, %v2796_v18  ;;  %v2798_v16 = vpop.f32.mrb[6].mxu1  ;;  %v19826_v6 = vld [vmem:[#allocation257_spill] sm:$0xff]  ;;  %v19829_v57 = vld [vmem:[#allocation155_spill] sm:$0xff]  ;;  %v19830_v58 = vld [vmem:[#allocation180_spill] sm:$0xff] }
 0x3ac   :  { %13476 = vtanh.f32 %v3197_v9  ;;  %v3205_v31 = vadd.f32 %v16128_v4, %v3035_v44  ;;  %v13463_v26 = vpop.eup %13462  ;;  %v19827_v24 = vmax.f32 %v19825_v49, %v19826_v6  ;;  %v2923_v39 = vmax.f32 %v15968_v25, %v2798_v16  ;;  %v2800_v9 = vpop.f32.mrb[7].mxu1  ;;  %v19833_v25 = vld [vmem:[#allocation40_spill] sm:$0xff]  ;;  %v12851_v6 = vld [vmem:[#allocation7 + $0x2d0] sm:$0xff]  }
 0x3ad   :  { %19824 = vst [vmem:[#allocation82_spill] sm:$0xff] %v16789_v37  ;;  %13478 = vtanh.f32 %v3198_v1  ;;  %v3206_v59 = vadd.f32 %v16131_v53, %v3036_v46  ;;  %v13465_v42 = vpop.eup %13464  ;;  %10896 = vmatprep.mubr.msk.bf16.mxu1 %vm3911_vm1, %v16789_v37  ;;  %11625 = vmatpush3.bf16.msra.mxu1 %v12846_v54  ;;  %v19831_v1 = vld [vmem:[#allocation258_spill] sm:$0xff]  ;;  %v2924_v13 = vmax.f32 %v15974_v38, %v2800_v9  ;;  %v12855_v46 = vld [vmem:[#allocation7 + $0x328] sm:$0xff]   ;;  %v2804_v9 = vpop.f32.mrb[8].mxu1 }
 0x3ae   :  { %13480 = vtanh.f32 %v3205_v31  ;;  %v13467_v45 = vpop.eup %13466  ;;  %v16796_v11 = vpack.c.bf16 %v13465_v42, %v13461_v5  ;;  %v3043_v10 = vmax.f32 %v19827_v24, %v2915_v41  ;;  %11626 = vmatprep.subr.bf16.mxu1 %v12847_v19  ;;  %4806 = vmatmul.mubr.bf16.vlgmr.msra.gmra.mrb[52].mxu0 %v19829_v57  ;;  %v19832_v48 = vmax.f32 %v19830_v58, %v19831_v1  ;;  %v19834_v31 = vld [vmem:[#allocation182_spill] sm:$0xff]  ;;  %v19835_v19 = vld [vmem:[#allocation259_spill] sm:$0xff]  ;;  %v19838_v38 = vld [vmem:[#allocation260_spill] sm:$0xff]  ;;  %v2806_v1 = vpop.f32.mrb[9].mxu1 }
 0x3af   :  { %13482 = vtanh.f32 %v3206_v59  ;;  %v13469_v60 = vpop.eup %13468  ;;  %v16802_v44 = vpack.c.bf16 %v13467_v45, %v13463_v26  ;;  %4813 = vmatprep.mubr.bf16.mxu0 %v19833_v25  ;;  %v19836_v5 = vmax.f32 %v19834_v31, %v19835_v19  ;;  %v19837_v41 = vld [vmem:[#allocation43_spill] sm:$0xff]  ;;  %11683 = vmatpush3.bf16.msra.mxu0 %v12854_v22  ;;  %v12856_v24 = vld [vmem:[#allocation7 + $0x2e8] sm:$0xff]   ;;  %v12858_v58 = vld [vmem:[#allocation7 + $0x330] sm:$0xff]  }
 0x3b0   :  { %v3044_v3 = vmax.f32 %v19832_v48, %v2916_v63  ;;  %v13471_v54 = vpop.eup %13470  ;;  %4250 = vmatmul.mubr.bf16.gmra.mrb[52].mxu1 %v16776_v17  ;;  %v3213_v21 = vadd.f32 %v16128_v4, %v3043_v10  ;;  %v19839_v18 = vmax.f32 %v19837_v41, %v19838_v38  ;;  %v12850_v63 = vld [vmem:[#allocation7 + $0x288] sm:$0xff]   ;;  %11684 = vmatprep.subr.bf16.mxu0 %v12855_v46  ;;  %v12853_v22 = vld [vmem:[#allocation7 + $0x290] sm:$0xff]  }
 0x3b1   :  { %19828 = vst [vmem:[#allocation50_spill] sm:$0xff] %v16802_v44  ;;  %v3051_v59 = vmax.f32 %v19836_v5, %v2923_v39  ;;  %10897 = vmatprep.mubr.msk.bf16.mxu1 %vm3911_vm1, %v16802_v44  ;;  %11627 = vmatpush3.bf16.msra.mxu1 %v12848_v40  ;;  %v19845_v41 = vld [vmem:[#allocation77_spill] sm:$0xff]  ;;  %v19847_v38 = vld [vmem:[#allocation262_spill] sm:$0xff] }
 0x3b2   :  { %v13473_v15 = vpop.eup %13472  ;;  %v3214_v26 = vadd.f32 %v16131_v53, %v3044_v3  ;;  %v3052_v42 = vmax.f32 %v19839_v18, %v2924_v13  ;;  %13484 = vtanh.f32 %v3213_v21  ;;  %11628 = vmatprep.subr.bf16.mxu1 %v12849_v51  ;;  %v2932_v51 = vmax.f32 %v15999_v2, %v2806_v1  ;;  %v2808_v3 = vpop.f32.mrb[10].mxu1  ;;  %v19843_v21 = vld [vmem:[#allocation261_spill] sm:$0xff] }
 0x3b3   :  { %v13475_v16 = vpop.eup %13474  ;;  %v16821_v45 = vpack.c.bf16 %v13473_v15, %v13469_v60  ;;  %v3221_v49 = vadd.f32 %v16128_v4, %v3051_v59  ;;  %v2931_v60 = vmax.f32 %v15995_v32, %v2804_v9  ;;  %v2939_v46 = vmax.f32 %v16002_v61, %v2808_v3  ;;  %v2810_v5 = vpop.f32.mrb[11].mxu1  ;;  %11685 = vmatpush3.bf16.msra.mxu0 %v12856_v24  ;;  %v12857_v59 = vld [vmem:[#allocation7 + $0x2d8] sm:$0xff]   ;;  %v12860_v32 = vld [vmem:[#allocation7 + $0x2f0] sm:$0xff]  }
 0x3b4   :  { %v16824_v10 = vpack.c.bf16 %v13475_v16, %v13471_v54  ;;  %13486 = vtanh.f32 %v3214_v26  ;;  %v3222_v39 = vadd.f32 %v16131_v53, %v3052_v42  ;;  %v19842_v54 = vld [vmem:[#allocation44_spill] sm:$0xff]  ;;  %v19846_v2 = vld [vmem:[#allocation185_spill] sm:$0xff]  ;;  %11686 = vmatprep.subr.bf16.mxu0 %v12858_v58  ;;  %v12861_v16 = vld [vmem:[#allocation7 + $0x338] sm:$0xff]  }
 0x3b5   :  { %19840 = vst [vmem:[#allocation97_spill] sm:$0xff] %v16821_v45  ;;  %13488 = vtanh.f32 %v3221_v49  ;;  %11629 = vmatpush3.bf16.msra.mxu1 %v12850_v63  ;;  %v19844_v31 = vmax.f32 %v19842_v54, %v19843_v21  ;;  %v19848_v18 = vmax.f32 %v19846_v2, %v19847_v38  ;;  %v2940_v63 = vmax.f32 %v16008_v33, %v2810_v5  ;;  %v19851_v24 = vld [vmem:[#allocation263_spill] sm:$0xff]  ;;  %v19853_v33 = vld [vmem:[#allocation188_spill] sm:$0xff] }
 0x3b6   :  { %19841 = vst [vmem:[#allocation51_spill] sm:$0xff] %v16824_v10  ;;  %v13477_v40 = vpop.eup %13476  ;;  %13490 = vtanh.f32 %v3222_v39  ;;  %11630 = vmatprep.subr.bf16.mxu1 %v12851_v6  ;;  %4814 = vmatmul.mubr.bf16.gmra.mrb[56].mxu0 %v19845_v41  ;;  %v19850_v6 = vld [vmem:[#allocation186_spill] sm:$0xff]  ;;  %v19854_v58 = vld [vmem:[#allocation264_spill] sm:$0xff] }
 0x3b7   :  { %v13479_v48 = vpop.eup %13478  ;;  %v3059_v19 = vmax.f32 %v19844_v31, %v2931_v60  ;;  %v3060_v42 = vmax.f32 %v19848_v18, %v2932_v51  ;;  %4821 = vmatprep.mubr.bf16.mxu0 %v15982_v55  ;;  %v19852_v39 = vmax.f32 %v19850_v6, %v19851_v24  ;;  %v19855_v60 = vmax.f32 %v19853_v33, %v19854_v58  ;;  %v12862_v3 = vld [vmem:[#allocation7 + $0x2f8] sm:$0xff]   ;;  %v12863_v54 = vld [vmem:[#allocation7 + $0x340] sm:$0xff]   ;;  %v12866_v5 = vld [vmem:[#allocation7 + $0x348] sm:$0xff]  }
 0x3b8   :  { %v13481_v13 = vpop.eup %13480  ;;  %4257 = vmatmul.mubr.bf16.gmra.mrb[56].mxu1 %v16796_v11  ;;  %11687 = vmatpush3.bf16.msra.mxu0 %v12860_v32  ;;  %v12869_v32 = vld [vmem:[#allocation7 + $0x350] sm:$0xff]   ;;  %v19859_v33 = vld [vmem:[#allocation83_spill] sm:$0xff] }
 0x3b9   :  { %v13483_v15 = vpop.eup %13482  ;;  %v16833_v26 = vpack.c.bf16 %v13481_v13, %v13477_v40  ;;  %v3229_v61 = vadd.f32 %v16128_v4, %v3059_v19  ;;  %v3067_v9 = vmax.f32 %v19852_v39, %v2939_v46  ;;  %10898 = vmatprep.mubr.msk.bf16.mxu1 %vm3911_vm1, %v16824_v10  ;;  %v3230_v40 = vadd.f32 %v16131_v53, %v3060_v42  ;;  %v12870_v18 = vld [vmem:[#allocation7 + $0x310] sm:$0xff]   ;;  %v12873_v39 = vld [vmem:[#allocation7 + $0x318] sm:$0xff]  }
 0x3ba   :  { %v16840_v49 = vpack.c.bf16 %v13483_v15, %v13479_v48  ;;  %v3068_v1 = vmax.f32 %v19855_v60, %v2940_v63  ;;  %11631 = vmatpush3.bf16.msra.mxu1 %v12853_v22  ;;  %v12859_v48 = vld [vmem:[#allocation7 + $0x298] sm:$0xff]   ;;  %11688 = vmatprep.subr.bf16.mxu0 %v12861_v16  ;;  %v12864_v22 = vld [vmem:[#allocation7 + $0x300] sm:$0xff]   ;;  %v19857_v24 = vld [vmem:[#allocation81_spill] sm:$0xff] }
 0x3bb   :  { %13492 = vtanh.f32 %v3229_v61  ;;  %v3237_v51 = vadd.f32 %v16128_v4, %v3067_v9  ;;  %11632 = vmatprep.subr.bf16.mxu1 %v12857_v59  ;;  %v12867_v59 = vld [vmem:[#allocation7 + $0x308] sm:$0xff]   ;;  %v19856_v16 = vld [vmem:[#allocation159_spill] sm:$0xff] }
 0x3bc   :  { %19849 = vst [vmem:[#allocation84_spill] sm:$0xff] %v16840_v49  ;;  %13494 = vtanh.f32 %v3230_v40  ;;  %v3238_v13 = vadd.f32 %v16131_v53, %v3068_v1  ;;  %v13485_v21 = vpop.eup %13484  ;;  %11689 = vmatpush3.bf16.msra.mxu0 %v12862_v3  ;;  %v12871_v61 = vld [vmem:[#allocation7 + $0x358] sm:$0xff]   ;;  %v12880_v9 = vld [vmem:[#allocation7 + $0x400] sm:$0xff]   ;;  %v19858_v40 = vld [vmem:[#allocation161_spill] sm:$0xff] }
 0x3bd   :  { %13496 = vtanh.f32 %v3237_v51  ;;  %11690 = vmatprep.subr.bf16.mxu0 %v12863_v54  ;;  %v19860_v58 = vld [vmem:[#allocation163_spill] sm:$0xff]  ;;  %v19863_v51 = vld [vmem:[#allocation165_spill] sm:$0xff] }
 0x3be   :  { %v13487_v31 = vpop.eup %13486  ;;  %13498 = vtanh.f32 %v3238_v13  ;;  %11633 = vmatpush3.bf16.msra.mxu1 %v12859_v48  ;;  %4822 = vmatmul.mubr.bf16.gmra.mrb[60].mxu0 %v15976_v20  ;;  %v19861_v60 = vld [vmem:[#allocation167_spill] sm:$0xff]  ;;  %v19864_v3 = vld [vmem:[#allocation85_spill] sm:$0xff] }
 0x3bf   :  { %v13489_v19 = vpop.eup %13488  ;;  %5064 = vmatprep.subr.bf16.mxu1 %v19521_v36  ;;  %4829 = vmatprep.mubr.bf16.mxu0 %v16018_v7  ;;  %v19862_v1 = vld [vmem:[#allocation87_spill] sm:$0xff] }
 0x3c0   :  { %v13491_v46 = vpop.eup %13490  ;;  %v16857_v4 = vpack.c.bf16 %v13489_v19, %v13485_v21  ;;  %4264 = vmatmul.mubr.bf16.gmra.mrb[60].mxu1 %v16821_v45  ;;  %11691 = vmatpush3.bf16.msra.mxu0 %v12864_v22  ;;  %v12865_v48 = vld [vmem:[#allocation7 + $0x360] sm:$0xff]   ;;  %v12868_v21 = vld [vmem:[#allocation7 + $0x368] sm:$0xff]  }
 0x3c1   :  { %v16860_v53 = vpack.c.bf16 %v13491_v46, %v13487_v31  ;;  %10899 = vmatprep.mubr.msk.bf16.mxu1 %vm3911_vm1, %v16840_v49  ;;  %11692 = vmatprep.subr.bf16.mxu0 %v12866_v5  ;;  %v19865_v13 = vld [vmem:[#allocation171_spill] sm:$0xff]  ;;  %v12872_v31 = vld [vmem:[#allocation7 + $0x370] sm:$0xff]  }
 0x3c2   :  { %v19866_v54 = vld [vmem:[#allocation91_spill] sm:$0xff]  ;;  %v19867_v19 = vld [vmem:[#allocation169_spill] sm:$0xff]  ;;  %v19869_v46 = vld [vmem:[#allocation94_spill] sm:$0xff] }
 0x3c3   :  { %v19868_v22 = vld [vmem:[#allocation89_spill] sm:$0xff]  ;;  %v19870_v5 = vld [vmem:[#allocation175_spill] sm:$0xff] }
 0x3c4   :  { %11693 = vmatpush3.bf16.msra.mxu0 %v12867_v59  ;;  %v12874_v59 = vld [vmem:[#allocation7 + $0x378] sm:$0xff]  }
 0x3c5   :  { %v13493_v15 = vpop.eup %13492  ;;  %11694 = vmatprep.subr.bf16.mxu0 %v12869_v32  ;;  %v12875_v32 = vld [vmem:[#allocation7 + $0x380] sm:$0xff]  }
 0x3c6   :  { %v13495_v2 = vpop.eup %13494  ;;  %4830 = vmatmul.mubr.bf16.gmra.mrb[64].mxu0 %v19856_v16 }
 0x3c7   :  { %v13497_v38 = vpop.eup %13496  ;;  %4837 = vmatprep.mubr.bf16.mxu0 %v19857_v24 }
 0x3c8   :  { %v13499_v42 = vpop.eup %13498  ;;  %v16866_v63 = vpack.c.bf16 %v13497_v38, %v13493_v15  ;;  %4271 = vmatmul.mubr.bf16.gmra.mrb[64].mxu1 %v16833_v26  ;;  %11695 = vmatpush3.bf16.msra.mxu0 %v12870_v18  ;;  %v12882_v15 = vld [vmem:[#allocation7 + $0x3c0] sm:$0xff]   ;;  %v12883_v38 = vld [vmem:[#allocation7 + $0x408] sm:$0xff]  }
 0x3c9   :  { %v16869_v6 = vpack.c.bf16 %v13499_v42, %v13495_v2  ;;  %10900 = vmatprep.mubr.msk.bf16.mxu1 %vm3911_vm1, %v16860_v53  ;;  %11696 = vmatprep.subr.bf16.mxu0 %v12871_v61  ;;  %v19871_v2 = vld [vmem:[#allocation93_spill] sm:$0xff]  ;;  %v19873_v42 = vld [vmem:[#allocation98_spill] sm:$0xff]  ;;  %v19874_v61 = vld [vmem:[#allocation179_spill] sm:$0xff] }
 0x3ca   :  { %v19872_v18 = vld [vmem:[#allocation173_spill] sm:$0xff] }
 0x3cc   :  { %11697 = vmatpush3.bf16.msra.mxu0 %v12873_v39  ;;  %v12876_v39 = vld [vmem:[#allocation7 + $0x388] sm:$0xff]  }
 0x3cd   :  { %11746 = vmatprep.subr.bf16.mxu0 %v12880_v9  ;;  %v12884_v9 = vld [vmem:[#allocation7 + $0x3c8] sm:$0xff]  }
 0x3ce   :  { %4838 = vmatmul.mubr.bf16.gmra.mrb[68].mxu0 %v19858_v40 }
 0x3cf   :  { %4845 = vmatprep.mubr.bf16.mxu0 %v19859_v33 }
 0x3d0   :  { %4278 = vmatmul.mubr.bf16.gmra.mrb[68].mxu1 %v16857_v4 }
 0x3d1   :  { %10901 = vmatprep.mubr.msk.bf16.mxu1 %vm3911_vm1, %v16869_v6 }
 0x3d6   :  { %4846 = vmatmul.mubr.bf16.gmra.mrb[72].mxu0 %v19860_v58 }
 0x3d7   :  { %4853 = vmatprep.mubr.bf16.mxu0 %v19861_v60 }
 0x3d8   :  { %4285 = vmatmul.mubr.bf16.gmra.mrb[72].mxu1 %v16866_v63 }
 0x3d9   :  { %4902 = vmatprep.mubr.bf16.mxu1 %v19862_v1 }
 0x3de   :  { %4854 = vmatmul.mubr.bf16.gmra.mrb[76].mxu0 %v19863_v51 }
 0x3df   :  { %4861 = vmatprep.mubr.bf16.mxu0 %v19865_v13 }
 0x3e0   :  { %4903 = vmatmul.mubr.bf16.vlgmr.msra.gmra.mrb[76].mxu1 %v19864_v3 }
 0x3e1   :  { %4910 = vmatprep.mubr.bf16.mxu1 %v19866_v54  ;;  %5065 = vmatpush1.bf16.msra.mxu1 %v12865_v48  ;;  %v12886_v48 = vld [vmem:[#allocation7 + $0x410] sm:$0xff]  }
 0x3e2   :  { %5066 = vmatprep.subr.bf16.mxu1 %v19521_v36 }
 0x3e5   :  { %5067 = vmatpush1.bf16.msra.mxu1 %v12868_v21  ;;  %v12877_v21 = vld [vmem:[#allocation7 + $0x390] sm:$0xff]  }
 0x3e6   :  { %5068 = vmatprep.subr.bf16.mxu1 %v19521_v36  ;;  %4862 = vmatmul.mubr.bf16.gmra.mrb[80].mxu0 %v19867_v19 }
 0x3e7   :  { %4999 = vmatprep.mubr.bf16.mxu0 %v19869_v46  ;;  %v12878_v46 = vld [vmem:[#allocation7 + $0x398] sm:$0xff]  }
 0x3e8   :  { %4911 = vmatmul.mubr.bf16.gmra.mrb[80].mxu1 %v19868_v22 }
 0x3e9   :  { %4918 = vmatprep.mubr.bf16.mxu1 %v19870_v5  ;;  %5069 = vmatpush1.bf16.msra.mxu1 %v12872_v31  ;;  %v11378_v31 = vpop.f32.mrb[244].mxu0  ;;  %v19878_v5 = vld [vmem:[#allocation181_spill] sm:$0xff] }
 0x3ea   :  { %5070 = vmatprep.subr.bf16.mxu1 %v19521_v36 }
 0x3ed   :  { %5071 = vmatpush1.bf16.msra.mxu1 %v12874_v59  ;;  %v12887_v59 = vld [vmem:[#allocation7 + $0x3d0] sm:$0xff]  }
 0x3ee   :  { %5072 = vmatprep.subr.bf16.mxu1 %v19521_v36  ;;  %5000 = vmatmul.mubr.bf16.vlgmr.msra.gmra.mrb[84].mxu0 %v19871_v2  ;;  %v19877_v2 = vld [vmem:[#allocation102_spill] sm:$0xff] }
 0x3ef   :  { %5007 = vmatprep.mubr.bf16.mxu0 %v19873_v42  ;;  %11747 = vmatpush3.bf16.msra.mxu0 %v12882_v15  ;;  %v11379_v42 = vpop.f32.mrb[245].mxu0 }
 0x3f0   :  { %4919 = vmatmul.mubr.bf16.gmra.mrb[84].mxu1 %v19872_v18  ;;  %11748 = vmatprep.subr.bf16.mxu0 %v12883_v38  ;;  %v19875_v18 = vld [vmem:[#allocation96_spill] sm:$0xff]  ;;  %v16905_v15 = vadd.f32 %v11379_v42, %v11378_v31  ;;  %v11381_v38 = vpop.f32.mrb[246].mxu0 }
 0x3f1   :  { %4926 = vmatprep.mubr.bf16.mxu1 %v19874_v61  ;;  %5073 = vmatpush1.bf16.msra.mxu1 %v12875_v32  ;;  %v12889_v61 = vld [vmem:[#allocation7 + $0x418] sm:$0xff]   ;;  %v19876_v32 = vld [vmem:[#allocation177_spill] sm:$0xff]  ;;  %v12893_v42 = vld [vmem:[#allocation7 + $0x3e0] sm:$0xff]  }
 0x3f2   :  { %5074 = vmatprep.subr.bf16.mxu1 %v19521_v36  ;;  %v19879_v31 = vld [vmem:[#allocation100_spill] sm:$0xff] }
 0x3f3   :  { %11749 = vmatpush3.bf16.msra.mxu0 %v12884_v9  ;;  %v12890_v9 = vld [vmem:[#allocation7 + $0x3d8] sm:$0xff]  }
 0x3f4   :  { %11750 = vmatprep.subr.bf16.mxu0 %v12886_v48  ;;  %v12879_v48 = vld [vmem:[#allocation7 + $0x3a0] sm:$0xff]  }
 0x3f5   :  { %5075 = vmatpush1.bf16.msra.mxu1 %v12876_v39  ;;  %v11382_v39 = vpop.f32.mrb[247].mxu0 }
 0x3f6   :  { %5076 = vmatprep.subr.bf16.mxu1 %v19521_v36  ;;  %5008 = vmatmul.mubr.bf16.gmra.mrb[88].mxu0 %v19875_v18  ;;  %v12891_v18 = vld [vmem:[#allocation7 + $0x420] sm:$0xff]   ;;  %v11384_v22 = vpop.f32.mrb[248].mxu0  ;;  %v19880_v39 = vld [vmem:[#allocation42_spill] sm:$0xff] }
 0x3f7   :  { %5015 = vmatprep.mubr.bf16.mxu0 %v19877_v2  ;;  %11751 = vmatpush3.bf16.msra.mxu0 %v12887_v59  ;;  %v11385_v38 = vpop.f32.mrb[249].mxu0  ;;  %v19882_v2 = vld [vmem:[#allocation184_spill] sm:$0xff] }
 0x3f8   :  { %4927 = vmatmul.mubr.bf16.gmra.mrb[88].mxu1 %v19876_v32  ;;  %11752 = vmatprep.subr.bf16.mxu0 %v12889_v61  ;;  %v16913_v59 = vadd.f32 %v11385_v38, %v11384_v22  ;;  %v11387_v61 = vpop.f32.mrb[250].mxu0  ;;  %v12881_v32 = vld [vmem:[#allocation7 + $0x3a8] sm:$0xff]   ;;  %v12899_v22 = vld [vmem:[#allocation7 + $0x3f0] sm:$0xff]  }
 0x3f9   :  { %4934 = vmatprep.mubr.bf16.mxu1 %v19878_v5  ;;  %5077 = vmatpush1.bf16.msra.mxu1 %v12877_v21  ;;  %v12895_v21 = vld [vmem:[#allocation7 + $0x428] sm:$0xff]  }
 0x3fa   :  { %5078 = vmatprep.subr.bf16.mxu1 %v19521_v36  ;;  %v19881_v5 = vld [vmem:[#allocation45_spill] sm:$0xff]  ;;  %v19883_v38 = vld [vmem:[#allocation104_spill] sm:$0xff] }
 0x3fb   :  { %11753 = vmatpush3.bf16.msra.mxu0 %v12890_v9  ;;  %v12896_v9 = vld [vmem:[#allocation7 + $0x3e8] sm:$0xff]  }
 0x3fc   :  { %11754 = vmatprep.subr.bf16.mxu0 %v12891_v18  ;;  %v12885_v18 = vld [vmem:[#allocation7 + $0x3b0] sm:$0xff]  }
 0x3fd   :  { %5079 = vmatpush1.bf16.msra.mxu1 %v12878_v46  ;;  %v11388_v46 = vpop.f32.mrb[251].mxu0 }
 0x3fe   :  { %5080 = vmatprep.subr.bf16.mxu1 %v19521_v36  ;;  %5016 = vmatmul.mubr.bf16.gmra.mrb[92].mxu0 %v19879_v31  ;;  %v12897_v31 = vld [vmem:[#allocation7 + $0x430] sm:$0xff]   ;;  %v11390_v19 = vpop.f32.mrb[252].mxu0  ;;  %v19884_v46 = vld [vmem:[#allocation183_spill] sm:$0xff] }
 0x3ff   :  { %5023 = vmatprep.mubr.bf16.mxu0 %v19881_v5  ;;  %11755 = vmatpush3.bf16.msra.mxu0 %v12893_v42  ;;  %v11391_v61 = vpop.f32.mrb[253].mxu0 }
 0x400   :  { %4935 = vmatmul.mubr.bf16.gmra.mrb[92].mxu1 %v19880_v39  ;;  %11756 = vmatprep.subr.bf16.mxu0 %v12895_v21  ;;  %v16921_v42 = vadd.f32 %v11391_v61, %v11390_v19  ;;  %v11393_v21 = vpop.f32.mrb[254].mxu0 }
 0x401   :  { %4942 = vmatprep.mubr.bf16.mxu1 %v19882_v2  ;;  %5081 = vmatpush1.bf16.msra.mxu1 %v12879_v48  ;;  %v12901_v48 = vld [vmem:[#allocation7 + $0x438] sm:$0xff]  }
 0x402   :  { %5082 = vmatprep.subr.bf16.mxu1 %v19521_v36  ;;  %v12888_v2 = vld [vmem:[#allocation7 + $0x3b8] sm:$0xff]  }
 0x403   :  { %11757 = vmatpush3.bf16.msra.mxu0 %v12896_v9  ;;  %v12892_v9 = vld [vmem:[#allocation7 + $0x480] sm:$0xff]  }
 0x404   :  { %11758 = vmatprep.subr.bf16.mxu0 %v12897_v31  ;;  %v12912_v31 = vld [vmem:[#allocation7 + $0x500] sm:$0xff]  }
 0x405   :  { %5083 = vmatpush1.bf16.msra.mxu1 %v12881_v32  ;;  %v11394_v32 = vpop.f32.mrb[255].mxu0 }
 0x406   :  { %5084 = vmatprep.subr.bf16.mxu1 %v19521_v36  ;;  %5024 = vmatmul.mubr.bf16.gmra.mrb[96].mxu0 %v19883_v38  ;;  %v12902_v38 = vld [vmem:[#allocation7 + $0x3f8] sm:$0xff]   ;;  %v11396_v5 = vpop.f32.mrb[0].mxu0  ;;  %v12894_v32 = vld [vmem:[#allocation7 + $0x440] sm:$0xff]  }
 0x407   :  { %5031 = vmatprep.mubr.bf16.mxu0 %v16588_v14  ;;  %11759 = vmatpush3.bf16.msra.mxu0 %v12899_v22  ;;  %v11397_v19 = vpop.f32.mrb[1].mxu0 }
 0x408   :  { %4943 = vmatmul.mubr.bf16.gmra.mrb[96].mxu1 %v19884_v46  ;;  %11760 = vmatprep.subr.bf16.mxu0 %v12901_v48  ;;  %v11399_v61 = vpop.f32.mrb[2].mxu0 }
 0x409   :  { %4950 = vmatprep.mubr.bf16.mxu1 %v16582_v27  ;;  %5085 = vmatpush1.bf16.msra.mxu1 %v12885_v18  ;;  %v16928_v18 = vadd.f32 %v11397_v19, %v11396_v5  ;;  %v11400_v22 = vpop.f32.mrb[3].mxu0 }
 0x40a   :  { %5086 = vmatprep.subr.bf16.mxu1 %v19521_v36  ;;  %v11402_v48 = vpop.f32.mrb[4].mxu0 }
 0x40b   :  { %11761 = vmatpush3.bf16.msra.mxu0 %v12902_v38 }
 0x40c   :  { %11874 = vmatprep.subr.bf16.mxu0 %v12912_v31 }
 0x40d   :  { %5087 = vmatpush1.bf16.msra.mxu1 %v12888_v2  ;;  %v11403_v2 = vpop.f32.mrb[5].mxu0 }
 0x40e   :  { %11810 = vmatprep.subr.bf16.mxu1 %v12892_v9  ;;  %5032 = vmatmul.mubr.bf16.gmra.mrb[100].mxu0 %v16576_v30  ;;  %v16934_v38 = vadd.f32 %v11403_v2, %v11402_v48  ;;  %v11405_v21 = vpop.f32.mrb[6].mxu0  ;;  %v12898_v9 = vld [vmem:[#allocation7 + $0x488] sm:$0xff]  }
 0x40f   :  { %5039 = vmatprep.mubr.bf16.mxu0 %v16655_v29  ;;  %v11406_v5 = vpop.f32.mrb[7].mxu0  ;;  %v12900_v48 = vld [vmem:[#allocation7 + $0x448] sm:$0xff]   ;;  %v12903_v21 = vld [vmem:[#allocation7 + $0x490] sm:$0xff]  }
 0x410   :  { %4951 = vmatmul.mubr.bf16.gmra.mrb[100].mxu1 %v16569_v12  ;;  %v11408_v31 = vpop.f32.mrb[8].mxu0  ;;  %v12904_v5 = vld [vmem:[#allocation7 + $0x450] sm:$0xff]  }
 0x411   :  { %4958 = vmatprep.mubr.bf16.mxu1 %v16650_v56  ;;  %v11409_v19 = vpop.f32.mrb[9].mxu0 }
 0x412   :  { %v16941_v61 = vadd.f32 %v11409_v19, %v11408_v31  ;;  %v11411_v22 = vpop.f32.mrb[10].mxu0  ;;  %v11442_v19 = vpop.f32.mrb[12].mxu1 }
 0x413   :  { %v11412_v2 = vpop.f32.mrb[11].mxu0 }
 0x414   :  { %v11414_v31 = vpop.f32.mrb[12].mxu0  ;;  %v11443_v2 = vpop.f32.mrb[13].mxu1 }
 0x415   :  { %v11415_v22 = vpop.f32.mrb[13].mxu0 }
 0x416   :  { %5040 = vmatmul.mubr.bf16.gmra.mrb[104].mxu0 %v16644_v43 }
 0x417   :  { %5047 = vmatprep.mubr.bf16.mxu0 %v16705_v35 }
 0x418   :  { %4959 = vmatmul.mubr.bf16.gmra.mrb[104].mxu1 %v16637_v0 }
 0x419   :  { %10962 = vmatprep.mubr.msk.bf16.mxu1 %vm3911_vm1, %v16713_v47 }
 0x41e   :  { %5048 = vmatmul.mubr.bf16.gmra.mrb[108].mxu0 %v16691_v52  ;;  %v12905_v52 = vld [vmem:[#allocation7 + $0x498] sm:$0xff]  }
 0x41f   :  { %5055 = vmatprep.mubr.bf16.mxu0 %v16756_v23 }
 0x420   :  { %5097 = vmatmul.mubr.bf16.vlgmr.msra.gmra.mrb[108].mxu1 %v16695_v8 }
 0x421   :  { %10963 = vmatprep.mubr.msk.bf16.mxu1 %vm3911_vm1, %v16760_v34  ;;  %11811 = vmatpush3.bf16.msra.mxu1 %v12894_v32  ;;  %v12906_v32 = vld [vmem:[#allocation7 + $0x458] sm:$0xff]   ;;  %v11444_v34 = vadd.f32 %v11443_v2, %v11442_v19 }
 0x422   :  { %11812 = vmatprep.subr.bf16.mxu1 %v12898_v9  ;;  %v12907_v9 = vld [vmem:[#allocation7 + $0x4a0] sm:$0xff]  }
 0x423   :  { %v16953_v8 = vadd.f32 %v11444_v34, %v16905_v15  ;;  %v12916_v34 = vld [vmem:[#allocation7 + $0x4c8] sm:$0xff]  }
 0x425   :  { %11813 = vmatpush3.bf16.msra.mxu1 %v12900_v48  ;;  %v16950_v48 = vadd.f32 %v11415_v22, %v11414_v31 }
 0x426   :  { %11814 = vmatprep.subr.bf16.mxu1 %v12903_v21  ;;  %5056 = vmatmul.mubr.bf16.gmra.mrb[112].mxu0 %v16744_v28  ;;  %v11417_v21 = vpop.f32.mrb[14].mxu0  ;;  %v11445_v28 = vpop.f32.mrb[14].mxu1 }
 0x427   :  { %5731 = vmatprep.mubr.bf16.mxu0 %v19817_v50  ;;  %v11418_v23 = vpop.f32.mrb[15].mxu0  ;;  %v12908_v50 = vld [vmem:[#allocation7 + $0x460] sm:$0xff]   ;;  %v12910_v28 = vld [vmem:[#allocation7 + $0x468] sm:$0xff]  }
 0x428   :  { %5105 = vmatmul.mubr.bf16.gmra.mrb[112].mxu1 %v16750_v62  ;;  %v11446_v62 = vpop.f32.mrb[15].mxu1  ;;  %v12911_v23 = vld [vmem:[#allocation7 + $0x4b0] sm:$0xff]  }
 0x429   :  { %10964 = vmatprep.mubr.msk.bf16.mxu1 %vm3911_vm1, %v16789_v37  ;;  %11815 = vmatpush3.bf16.msra.mxu1 %v12904_v5  ;;  %v12909_v5 = vld [vmem:[#allocation7 + $0x4a8] sm:$0xff]   ;;  %v12914_v37 = vld [vmem:[#allocation7 + $0x4c0] sm:$0xff]   ;;  %v11420_v62 = vpop.f32.mrb[16].mxu0  ;;  %v11448_v15 = vpop.f32.mrb[16].mxu1 }
 0x42a   :  { %11816 = vmatprep.subr.bf16.mxu1 %v12905_v52  ;;  %v12915_v52 = vld [vmem:[#allocation7 + $0x508] sm:$0xff]   ;;  %v11421_v31 = vpop.f32.mrb[17].mxu0  ;;  %v11449_v22 = vpop.f32.mrb[17].mxu1 }
 0x42b   :  { %v16960_v19 = vadd.f32 %v11421_v31, %v11420_v62  ;;  %v11450_v2 = vadd.f32 %v11449_v22, %v11448_v15  ;;  %v11451_v21 = vpop.f32.mrb[18].mxu1 }
 0x42d   :  { %11817 = vmatpush3.bf16.msra.mxu1 %v12906_v32  ;;  %v12918_v32 = vld [vmem:[#allocation7 + $0x510] sm:$0xff]  }
 0x42e   :  { %11818 = vmatprep.subr.bf16.mxu1 %v12907_v9  ;;  %5732 = vmatmul.mubr.bf16.vlgmr.msra.gmra.mrb[116].mxu0 %v19829_v57  ;;  %v11423_v9 = vpop.f32.mrb[18].mxu0 }
 0x42f   :  { %5739 = vmatprep.mubr.bf16.mxu0 %v19833_v25  ;;  %11875 = vmatpush3.bf16.msra.mxu0 %v12914_v37  ;;  %v11424_v25 = vpop.f32.mrb[19].mxu0  ;;  %v4067_v37 = vadd.f32 %v11450_v2, %v16913_v59 }
 0x430   :  { %5113 = vmatmul.mubr.bf16.gmra.mrb[116].mxu1 %v16776_v17  ;;  %11876 = vmatprep.subr.bf16.mxu0 %v12915_v52  ;;  %v12920_v17 = vld [vmem:[#allocation7 + $0x4d0] sm:$0xff]   ;;  %v12921_v52 = vld [vmem:[#allocation7 + $0x518] sm:$0xff]  }
 0x431   :  { %10965 = vmatprep.mubr.msk.bf16.mxu1 %vm3911_vm1, %v16802_v44  ;;  %11819 = vmatpush3.bf16.msra.mxu1 %v12908_v50  ;;  %v12913_v44 = vld [vmem:[#allocation7 + $0x470] sm:$0xff]   ;;  %v11452_v50 = vpop.f32.mrb[19].mxu1  ;;  %v12919_v25 = vld [vmem:[#allocation7 + $0x478] sm:$0xff]  }
 0x432   :  { %11820 = vmatprep.subr.bf16.mxu1 %v12909_v5  ;;  %v12917_v5 = vld [vmem:[#allocation7 + $0x4b8] sm:$0xff]   ;;  %v11454_v62 = vpop.f32.mrb[20].mxu1  ;;  %v12926_v50 = vld [vmem:[#allocation7 + $0x528] sm:$0xff]  }
 0x433   :  { %11877 = vmatpush3.bf16.msra.mxu0 %v12916_v34  ;;  %v11506_v34 = vpop.f32.mrb[20].mxu0  ;;  %v11455_v15 = vpop.f32.mrb[21].mxu1 }
 0x434   :  { %11878 = vmatprep.subr.bf16.mxu0 %v12918_v32  ;;  %v11456_v59 = vadd.f32 %v11455_v15, %v11454_v62  ;;  %v11507_v31 = vpop.f32.mrb[21].mxu0  ;;  %v11457_v32 = vpop.f32.mrb[22].mxu1 }
 0x435   :  { %11821 = vmatpush3.bf16.msra.mxu1 %v12910_v28  ;;  %v12922_v28 = vld [vmem:[#allocation7 + $0x4d8] sm:$0xff]   ;;  %v11508_v22 = vadd.f32 %v11507_v31, %v11506_v34  ;;  %v11509_v9 = vpop.f32.mrb[22].mxu0  ;;  %v11458_v2 = vpop.f32.mrb[23].mxu1 }
 0x436   :  { %11822 = vmatprep.subr.bf16.mxu1 %v12911_v23  ;;  %5740 = vmatmul.mubr.bf16.gmra.mrb[120].mxu0 %v19845_v41  ;;  %v12923_v23 = vld [vmem:[#allocation7 + $0x520] sm:$0xff]   ;;  %v11510_v21 = vpop.f32.mrb[23].mxu0 }
 0x437   :  { %5747 = vmatprep.mubr.bf16.mxu0 %v15982_v55  ;;  %11879 = vmatpush3.bf16.msra.mxu0 %v12920_v17  ;;  %v4074_v17 = vadd.f32 %v11456_v59, %v16921_v42  ;;  %v11512_v62 = vpop.f32.mrb[24].mxu0  ;;  %v12930_v59 = vld [vmem:[#allocation7 + $0x4f0] sm:$0xff]   ;;  %v12933_v21 = vld [vmem:[#allocation7 + $0x4f8] sm:$0xff]  }
 0x438   :  { %5121 = vmatmul.mubr.bf16.gmra.mrb[120].mxu1 %v16796_v11  ;;  %11880 = vmatprep.subr.bf16.mxu0 %v12921_v52  ;;  %v12927_v52 = vld [vmem:[#allocation7 + $0x4e8] sm:$0xff]  }
 0x439   :  { %10966 = vmatprep.mubr.msk.bf16.mxu1 %vm3911_vm1, %v16824_v10  ;;  %11823 = vmatpush3.bf16.msra.mxu1 %v12913_v44  ;;  %v12924_v44 = vld [vmem:[#allocation7 + $0x4e0] sm:$0xff]  }
 0x43a   :  { %11824 = vmatprep.subr.bf16.mxu1 %v12917_v5  ;;  %v16974_v5 = vadd.f32 %v11508_v22, %v16953_v8  ;;  %v12931_v22 = vld [vmem:[#allocation7 + $0x538] sm:$0xff]  }
 0x43b   :  { %11881 = vmatpush3.bf16.msra.mxu0 %v12922_v28  ;;  %v11460_v28 = vpop.f32.mrb[24].mxu1 }
 0x43c   :  { %11882 = vmatprep.subr.bf16.mxu0 %v12923_v23  ;;  %v11461_v42 = vpop.f32.mrb[25].mxu1  ;;  %v11513_v23 = vpop.f32.mrb[25].mxu0 }
 0x43d   :  { %11825 = vmatpush3.bf16.msra.mxu1 %v12919_v25  ;;  %v12929_v25 = vld [vmem:[#allocation7 + $0x530] sm:$0xff]   ;;  %v11462_v34 = vadd.f32 %v11461_v42, %v11460_v28  ;;  %v11463_v15 = vpop.f32.mrb[26].mxu1  ;;  %v11514_v31 = vadd.f32 %v11513_v23, %v11512_v62  ;;  %v11515_v8 = vpop.f32.mrb[26].mxu0 }
 0x43e   :  { %5990 = vmatprep.subr.bf16.mxu1 %v19521_v36  ;;  %5748 = vmatmul.mubr.bf16.gmra.mrb[124].mxu0 %v15976_v20  ;;  %v11464_v32 = vpop.f32.mrb[27].mxu1  ;;  %v11516_v2 = vpop.f32.mrb[27].mxu0 }
 0x43f   :  { %5755 = vmatprep.mubr.bf16.mxu0 %v16018_v7  ;;  %11883 = vmatpush3.bf16.msra.mxu0 %v12924_v44  ;;  %v4081_v9 = vadd.f32 %v11462_v34, %v16928_v18  ;;  %v16984_v44 = vadd.f32 %v11514_v31, %v4067_v37 }
 0x440   :  { %5129 = vmatmul.mubr.bf16.gmra.mrb[124].mxu1 %v16821_v45  ;;  %11884 = vmatprep.subr.bf16.mxu0 %v12926_v50  ;;  %v12940_v50 = vld [vmem:[#allocation7 + $0x5e0] sm:$0xff]   ;;  %v11518_v28 = vpop.f32.mrb[28].mxu0 }
 0x441   :  { %10967 = vmatprep.mubr.msk.bf16.mxu1 %vm3911_vm1, %v16840_v49  ;;  %v11519_v42 = vpop.f32.mrb[29].mxu0 }
 0x442   :  { %v11520_v18 = vadd.f32 %v11519_v42, %v11518_v28  ;;  %v11521_v37 = vpop.f32.mrb[30].mxu0  ;;  %v12925_v42 = vld [vmem:[#allocation7 + $0x540] sm:$0xff]  }
 0x443   :  { %11885 = vmatpush3.bf16.msra.mxu0 %v12927_v52  ;;  %v11466_v52 = vpop.f32.mrb[28].mxu1 }
 0x444   :  { %11886 = vmatprep.subr.bf16.mxu0 %v12929_v25  ;;  %v11467_v25 = vpop.f32.mrb[29].mxu1  ;;  %v16992_v31 = vadd.f32 %v11520_v18, %v4074_v17 }
 0x445   :  { %v11468_v62 = vadd.f32 %v11467_v25, %v11466_v52  ;;  %v11469_v23 = vpop.f32.mrb[30].mxu1 }
 0x446   :  { %5756 = vmatmul.mubr.bf16.gmra.mrb[128].mxu0 %v19856_v16  ;;  %v11470_v34 = vpop.f32.mrb[31].mxu1 }
 0x447   :  { %5763 = vmatprep.mubr.bf16.mxu0 %v19857_v24  ;;  %11887 = vmatpush3.bf16.msra.mxu0 %v12930_v59  ;;  %v4088_v15 = vadd.f32 %v11468_v62, %v16934_v38  ;;  %v11522_v59 = vpop.f32.mrb[31].mxu0 }
 0x448   :  { %5137 = vmatmul.mubr.bf16.gmra.mrb[128].mxu1 %v16833_v26  ;;  %11888 = vmatprep.subr.bf16.mxu0 %v12931_v22 }
 0x449   :  { %10968 = vmatprep.mubr.msk.bf16.mxu1 %vm3911_vm1, %v16860_v53 }
 0x44b   :  { %11889 = vmatpush3.bf16.msra.mxu0 %v12933_v21 }
 0x44c   :  { %11938 = vmatprep.subr.bf16.mxu0 %v12940_v50  ;;  %v11472_v8 = vpop.f32.mrb[32].mxu1 }
 0x44d   :  { %v11473_v22 = vpop.f32.mrb[33].mxu1 }
 0x44e   :  { %5764 = vmatmul.mubr.bf16.gmra.mrb[132].mxu0 %v19858_v40  ;;  %v11474_v2 = vadd.f32 %v11473_v22, %v11472_v8  ;;  %v11475_v50 = vpop.f32.mrb[34].mxu1 }
 0x44f   :  { %5771 = vmatprep.mubr.bf16.mxu0 %v19859_v33  ;;  %v11524_v32 = vpop.f32.mrb[32].mxu0  ;;  %v11476_v38 = vpop.f32.mrb[35].mxu1 }
 0x450   :  { %5145 = vmatmul.mubr.bf16.gmra.mrb[132].mxu1 %v16857_v4  ;;  %v11525_v21 = vpop.f32.mrb[33].mxu0  ;;  %v4095_v17 = vadd.f32 %v11474_v2, %v16941_v61  ;;  %v12928_v61 = vld [vmem:[#allocation7 + $0x548] sm:$0xff]  }
 0x451   :  { %10969 = vmatprep.mubr.msk.bf16.mxu1 %vm3911_vm1, %v16869_v6  ;;  %v11526_v52 = vadd.f32 %v11525_v21, %v11524_v32  ;;  %v11527_v28 = vpop.f32.mrb[34].mxu0  ;;  %v19886_v38 = vld [vmem:[#allocation89_spill] sm:$0xff] }
 0x452   :  { %v11528_v25 = vpop.f32.mrb[35].mxu0  ;;  %v19885_v28 = vld [vmem:[#allocation169_spill] sm:$0xff] }
 0x453   :  { %v16999_v62 = vadd.f32 %v11526_v52, %v4081_v9  ;;  %v12932_v52 = vld [vmem:[#allocation7 + $0x550] sm:$0xff]  }
 0x454   :  { %v19887_v25 = vld [vmem:[#allocation94_spill] sm:$0xff] }
 0x456   :  { %5772 = vmatmul.mubr.bf16.gmra.mrb[136].mxu0 %v19860_v58 }
 0x457   :  { %5779 = vmatprep.mubr.bf16.mxu0 %v19861_v60 }
 0x458   :  { %5153 = vmatmul.mubr.bf16.gmra.mrb[136].mxu1 %v16866_v63 }
 0x459   :  { %5828 = vmatprep.mubr.bf16.mxu1 %v19862_v1  ;;  %v11478_v23 = vpop.f32.mrb[36].mxu1  ;;  %v11530_v18 = vpop.f32.mrb[36].mxu0 }
 0x45a   :  { %v11479_v37 = vpop.f32.mrb[37].mxu1  ;;  %v11531_v59 = vpop.f32.mrb[37].mxu0 }
 0x45b   :  { %v11480_v34 = vadd.f32 %v11479_v37, %v11478_v23  ;;  %v11481_v8 = vpop.f32.mrb[38].mxu1  ;;  %v11532_v32 = vadd.f32 %v11531_v59, %v11530_v18  ;;  %v11533_v9 = vpop.f32.mrb[38].mxu0  ;;  %v19888_v23 = vld [vmem:[#allocation175_spill] sm:$0xff] }
 0x45c   :  { %v11482_v22 = vpop.f32.mrb[39].mxu1  ;;  %v11534_v21 = vpop.f32.mrb[39].mxu0 }
 0x45d   :  { %v4102_v2 = vadd.f32 %v11480_v34, %v16950_v48  ;;  %v17007_v50 = vadd.f32 %v11532_v32, %v4088_v15  ;;  %v12934_v48 = vld [vmem:[#allocation7 + $0x558] sm:$0xff]   ;;  %v12935_v21 = vld [vmem:[#allocation7 + $0x560] sm:$0xff]  }
 0x45e   :  { %5780 = vmatmul.mubr.bf16.gmra.mrb[140].mxu0 %v19863_v51 }
 0x45f   :  { %5787 = vmatprep.mubr.bf16.mxu0 %v19865_v13 }
 0x460   :  { %5829 = vmatmul.mubr.bf16.vlgmr.msra.gmra.mrb[140].mxu1 %v19864_v3 }
 0x461   :  { %5836 = vmatprep.mubr.bf16.mxu1 %v19866_v54  ;;  %5991 = vmatpush1.bf16.msra.mxu1 %v12925_v42 }
 0x462   :  { %5992 = vmatprep.subr.bf16.mxu1 %v19521_v36 }
 0x464   :  { %v11484_v42 = vpop.f32.mrb[40].mxu1  ;;  %v11536_v18 = vpop.f32.mrb[40].mxu0 }
 0x465   :  { %5993 = vmatpush1.bf16.msra.mxu1 %v12928_v61  ;;  %v11485_v37 = vpop.f32.mrb[41].mxu1  ;;  %v11537_v15 = vpop.f32.mrb[41].mxu0 }
 0x466   :  { %5994 = vmatprep.subr.bf16.mxu1 %v19521_v36  ;;  %5788 = vmatmul.mubr.bf16.gmra.mrb[144].mxu0 %v19885_v28  ;;  %v11486_v34 = vadd.f32 %v11485_v37, %v11484_v42  ;;  %v11487_v59 = vpop.f32.mrb[42].mxu1  ;;  %v11538_v8 = vadd.f32 %v11537_v15, %v11536_v18  ;;  %v11539_v61 = vpop.f32.mrb[42].mxu0  ;;  %v12943_v42 = vld [vmem:[#allocation7 + $0x5e8] sm:$0xff]   ;;  %v19892_v18 = vld [vmem:[#allocation179_spill] sm:$0xff] }
 0x467   :  { %5925 = vmatprep.mubr.bf16.mxu0 %v19887_v25  ;;  %v11488_v32 = vpop.f32.mrb[43].mxu1  ;;  %v11540_v22 = vpop.f32.mrb[43].mxu0  ;;  %v19890_v37 = vld [vmem:[#allocation173_spill] sm:$0xff]  ;;  %v19891_v59 = vld [vmem:[#allocation98_spill] sm:$0xff]  ;;  %v19894_v28 = vld [vmem:[#allocation96_spill] sm:$0xff] }
 0x468   :  { %5837 = vmatmul.mubr.bf16.gmra.mrb[144].mxu1 %v19886_v38  ;;  %v17016_v9 = vadd.f32 %v11486_v34, %v16960_v19  ;;  %v17018_v25 = vadd.f32 %v11538_v8, %v4095_v17  ;;  %v12936_v19 = vld [vmem:[#allocation7 + $0x568] sm:$0xff]   ;;  %v12946_v8 = vld [vmem:[#allocation7 + $0x5f0] sm:$0xff]  }
 0x469   :  { %5844 = vmatprep.mubr.bf16.mxu1 %v19888_v23  ;;  %5995 = vmatpush1.bf16.msra.mxu1 %v12932_v52  ;;  %v12942_v52 = vld [vmem:[#allocation7 + $0x5a0] sm:$0xff]   ;;  %v19889_v23 = vld [vmem:[#allocation93_spill] sm:$0xff] }
 0x46a   :  { %5996 = vmatprep.subr.bf16.mxu1 %v19521_v36  ;;  %v12944_v17 = vld [vmem:[#allocation7 + $0x5a8] sm:$0xff]  }
 0x46d   :  { %5997 = vmatpush1.bf16.msra.mxu1 %v12934_v48 }
 0x46e   :  { %5998 = vmatprep.subr.bf16.mxu1 %v19521_v36  ;;  %5926 = vmatmul.mubr.bf16.vlgmr.msra.gmra.mrb[148].mxu0 %v19889_v23 }
 0x46f   :  { %5933 = vmatprep.mubr.bf16.mxu0 %v19891_v59  ;;  %11939 = vmatpush3.bf16.msra.mxu0 %v12942_v52  ;;  %v12947_v52 = vld [vmem:[#allocation7 + $0x5b0] sm:$0xff]  }
 0x470   :  { %5845 = vmatmul.mubr.bf16.gmra.mrb[148].mxu1 %v19890_v37  ;;  %v11542_v34 = vpop.f32.mrb[44].mxu0  ;;  %11940 = vmatprep.subr.bf16.mxu0 %v12943_v42  ;;  %v12949_v42 = vld [vmem:[#allocation7 + $0x5f8] sm:$0xff]  }
 0x471   :  { %5852 = vmatprep.mubr.bf16.mxu1 %v19892_v18  ;;  %5999 = vmatpush1.bf16.msra.mxu1 %v12935_v21  ;;  %v4237_v48 = vpop.f32.mrb[44].mxu1  ;;  %v11543_v15 = vpop.f32.mrb[45].mxu0  ;;  %v12937_v21 = vld [vmem:[#allocation7 + $0x570] sm:$0xff]  }
 0x472   :  { %6000 = vmatprep.subr.bf16.mxu1 %v19521_v36  ;;  %v17027_v61 = vadd.f32 %v4237_v48, %v16974_v5  ;;  %v11544_v32 = vadd.f32 %v11543_v15, %v11542_v34  ;;  %v4239_v22 = vpop.f32.mrb[45].mxu1  ;;  %v11545_v37 = vpop.f32.mrb[46].mxu0  ;;  %v19895_v5 = vld [vmem:[#allocation177_spill] sm:$0xff]  ;;  %v19896_v34 = vld [vmem:[#allocation102_spill] sm:$0xff] }
 0x473   :  { %v4240_v59 = vpop.f32.mrb[46].mxu1  ;;  %v11546_v23 = vpop.f32.mrb[47].mxu0  ;;  %11941 = vmatpush3.bf16.msra.mxu0 %v12944_v17  ;;  %v19897_v37 = vld [vmem:[#allocation181_spill] sm:$0xff]  ;;  %v12951_v17 = vld [vmem:[#allocation7 + $0x600] sm:$0xff]  }
 0x474   :  { %19893 = vst [vmem:[#allocation52_spill] sm:$0xff] %v17027_v61  ;;  %v4241_v18 = vpop.f32.mrb[47].mxu1  ;;  %v17030_v38 = vadd.f32 %v11544_v32, %v4102_v2  ;;  %11942 = vmatprep.subr.bf16.mxu0 %v12946_v8  ;;  %v12938_v23 = vld [vmem:[#allocation7 + $0x578] sm:$0xff]  }
 0x475   :  { %6001 = vmatpush1.bf16.msra.mxu1 %v12936_v19  ;;  %v12950_v18 = vld [vmem:[#allocation7 + $0x5b8] sm:$0xff]  }
 0x476   :  { %6002 = vmatprep.subr.bf16.mxu1 %v19521_v36  ;;  %5934 = vmatmul.mubr.bf16.gmra.mrb[152].mxu0 %v19894_v28 }
 0x477   :  { %5941 = vmatprep.mubr.bf16.mxu0 %v19896_v34  ;;  %11943 = vmatpush3.bf16.msra.mxu0 %v12947_v52  ;;  %v12953_v52 = vld [vmem:[#allocation7 + $0x5c0] sm:$0xff]  }
 0x478   :  { %5853 = vmatmul.mubr.bf16.gmra.mrb[152].mxu1 %v19895_v5  ;;  %11944 = vmatprep.subr.bf16.mxu0 %v12949_v42  ;;  %v19899_v42 = vld [vmem:[#allocation100_spill] sm:$0xff] }
 0x479   :  { %5860 = vmatprep.mubr.bf16.mxu1 %v19897_v37  ;;  %6003 = vmatpush1.bf16.msra.mxu1 %v12937_v21  ;;  %v11548_v59 = vpop.f32.mrb[48].mxu0  ;;  %v12939_v21 = vld [vmem:[#allocation7 + $0x580] sm:$0xff]  }
 0x47a   :  { %6004 = vmatprep.subr.bf16.mxu1 %v19521_v36  ;;  %v11549_v2 = vpop.f32.mrb[49].mxu0 }
 0x47b   :  { %v4244_v19 = vpop.f32.mrb[48].mxu1  ;;  %v11550_v15 = vadd.f32 %v11549_v2, %v11548_v59  ;;  %v11551_v32 = vpop.f32.mrb[50].mxu0  ;;  %11945 = vmatpush3.bf16.msra.mxu0 %v12950_v18  ;;  %v19900_v59 = vld [vmem:[#allocation45_spill] sm:$0xff] }
 0x47c   :  { %v17038_v48 = vadd.f32 %v4244_v19, %v16984_v44  ;;  %v4246_v8 = vpop.f32.mrb[49].mxu1  ;;  %v11552_v61 = vpop.f32.mrb[51].mxu0  ;;  %11946 = vmatprep.subr.bf16.mxu0 %v12951_v17  ;;  %v12955_v44 = vld [vmem:[#allocation7 + $0x608] sm:$0xff]   ;;  %v12957_v2 = vld [vmem:[#allocation7 + $0x610] sm:$0xff]  }
 0x47d   :  { %v4247_v22 = vpop.f32.mrb[50].mxu1  ;;  %6005 = vmatpush1.bf16.msra.mxu1 %v12938_v23  ;;  %v17042_v34 = vadd.f32 %v11550_v15, %v17016_v9  ;;  %v19901_v19 = vld [vmem:[#allocation184_spill] sm:$0xff] }
 0x47e   :  { %19898 = vst [vmem:[#allocation99_spill] sm:$0xff] %v17038_v48  ;;  %v4248_v37 = vpop.f32.mrb[51].mxu1  ;;  %6006 = vmatprep.subr.bf16.mxu1 %v19521_v36  ;;  %5942 = vmatmul.mubr.bf16.gmra.mrb[156].mxu0 %v19899_v42  ;;  %v12941_v61 = vld [vmem:[#allocation7 + $0x588] sm:$0xff]  }
 0x47f   :  { %5949 = vmatprep.mubr.bf16.mxu0 %v19900_v59  ;;  %11947 = vmatpush3.bf16.msra.mxu0 %v12953_v52  ;;  %v12956_v23 = vld [vmem:[#allocation7 + $0x5c8] sm:$0xff]   ;;  %v12959_v52 = vld [vmem:[#allocation7 + $0x5d0] sm:$0xff]  }
 0x480   :  { %5861 = vmatmul.mubr.bf16.gmra.mrb[156].mxu1 %v19880_v39  ;;  %11948 = vmatprep.subr.bf16.mxu0 %v12955_v44  ;;  %v19903_v44 = vld [vmem:[#allocation104_spill] sm:$0xff] }
 0x481   :  { %5868 = vmatprep.mubr.bf16.mxu1 %v19901_v19  ;;  %6007 = vmatpush1.bf16.msra.mxu1 %v12939_v21  ;;  %v11570_v37 = vpop.f32.mrb[52].mxu0  ;;  %v12945_v21 = vld [vmem:[#allocation7 + $0x590] sm:$0xff]  }
 0x482   :  { %6008 = vmatprep.subr.bf16.mxu1 %v19521_v36  ;;  %v11571_v9 = vpop.f32.mrb[53].mxu0 }
 0x483   :  { %v4251_v18 = vpop.f32.mrb[52].mxu1  ;;  %v17052_v8 = vadd.f32 %v11571_v9, %v11570_v37  ;;  %v11573_v32 = vpop.f32.mrb[54].mxu0  ;;  %11949 = vmatpush3.bf16.msra.mxu0 %v12956_v23  ;;  %v12972_v9 = vld [vmem:[#allocation7 + $0x6e0] sm:$0xff]  }
 0x484   :  { %v17050_v17 = vadd.f32 %v4251_v18, %v16992_v31  ;;  %v4253_v15 = vpop.f32.mrb[53].mxu1  ;;  %v11574_v48 = vpop.f32.mrb[55].mxu0  ;;  %11950 = vmatprep.subr.bf16.mxu0 %v12957_v2  ;;  %v12961_v31 = vld [vmem:[#allocation7 + $0x618] sm:$0xff]  }
 0x485   :  { %v4254_v22 = vpop.f32.mrb[54].mxu1  ;;  %6009 = vmatpush1.bf16.msra.mxu1 %v12941_v61  ;;  %v17054_v59 = vadd.f32 %v11574_v48, %v11573_v32  ;;  %v12948_v61 = vld [vmem:[#allocation7 + $0x598] sm:$0xff]   ;;  %v12952_v48 = vld [vmem:[#allocation7 + $0x660] sm:$0xff]  }
 0x486   :  { %19902 = vst [vmem:[#allocation53_spill] sm:$0xff] %v17050_v17  ;;  %v4255_v19 = vpop.f32.mrb[55].mxu1  ;;  %6010 = vmatprep.subr.bf16.mxu1 %v19521_v36  ;;  %5950 = vmatmul.mubr.bf16.gmra.mrb[160].mxu0 %v19903_v44 }
 0x487   :  { %5957 = vmatprep.mubr.bf16.mxu0 %v16588_v14  ;;  %11951 = vmatpush3.bf16.msra.mxu0 %v12959_v52  ;;  %v12962_v19 = vld [vmem:[#allocation7 + $0x5d8] sm:$0xff]  }
 0x488   :  { %5869 = vmatmul.mubr.bf16.gmra.mrb[160].mxu1 %v19884_v46  ;;  %11952 = vmatprep.subr.bf16.mxu0 %v12961_v31 }
 0x489   :  { %5876 = vmatprep.mubr.bf16.mxu1 %v16582_v27  ;;  %6011 = vmatpush1.bf16.msra.mxu1 %v12945_v21  ;;  %v11576_v37 = vpop.f32.mrb[56].mxu0 }
 0x48a   :  { %6012 = vmatprep.subr.bf16.mxu1 %v19521_v36  ;;  %v11577_v18 = vpop.f32.mrb[57].mxu0 }
 0x48b   :  { %v4258_v23 = vpop.f32.mrb[56].mxu1  ;;  %v17065_v32 = vadd.f32 %v11577_v18, %v11576_v37  ;;  %v11579_v22 = vpop.f32.mrb[58].mxu0  ;;  %11953 = vmatpush3.bf16.msra.mxu0 %v12962_v19 }
 0x48c   :  { %v17063_v2 = vadd.f32 %v4258_v23, %v16999_v62  ;;  %v4260_v15 = vpop.f32.mrb[57].mxu1  ;;  %v11580_v21 = vpop.f32.mrb[59].mxu0  ;;  %12066 = vmatprep.subr.bf16.mxu0 %v12972_v9 }
 0x48d   :  { %v4261_v17 = vpop.f32.mrb[58].mxu1  ;;  %6013 = vmatpush1.bf16.msra.mxu1 %v12948_v61  ;;  %v17067_v14 = vadd.f32 %v11580_v21, %v11579_v22 }
 0x48e   :  { %19904 = vst [vmem:[#allocation271_spill] sm:$0xff] %v17063_v2  ;;  %v4262_v27 = vpop.f32.mrb[59].mxu1  ;;  %12002 = vmatprep.subr.bf16.mxu1 %v12952_v48  ;;  %5958 = vmatmul.mubr.bf16.gmra.mrb[164].mxu0 %v16576_v30  ;;  %v19914_v2 = vld [vmem:[#allocation76_spill] sm:$0xff] }
 0x48f   :  { %5965 = vmatprep.mubr.bf16.mxu0 %v16655_v29 }
 0x490   :  { %5877 = vmatmul.mubr.bf16.gmra.mrb[164].mxu1 %v16569_v12 }
 0x491   :  { %5884 = vmatprep.mubr.bf16.mxu1 %v16650_v56  ;;  %v11582_v62 = vpop.f32.mrb[60].mxu0  ;;  %v19917_v56 = vld [vmem:[#allocation268_spill] sm:$0xff] }
 0x492   :  { %v11583_v31 = vpop.f32.mrb[61].mxu0 }
 0x493   :  { %v4265_v52 = vpop.f32.mrb[60].mxu1  ;;  %v17076_v61 = vadd.f32 %v11583_v31, %v11582_v62  ;;  %v11585_v37 = vpop.f32.mrb[62].mxu0 }
 0x494   :  { %v17074_v17 = vadd.f32 %v4265_v52, %v17007_v50  ;;  %v4267_v27 = vpop.f32.mrb[61].mxu1  ;;  %v11586_v19 = vpop.f32.mrb[63].mxu0 }
 0x495   :  { %v4268_v48 = vpop.f32.mrb[62].mxu1  ;;  %v17078_v18 = vadd.f32 %v11586_v19, %v11585_v37  ;;  %v12954_v37 = vld [vmem:[#allocation7 + $0x620] sm:$0xff]  }
 0x496   :  { %19905 = vst [vmem:[#allocation270_spill] sm:$0xff] %v17074_v17  ;;  %v4269_v23 = vpop.f32.mrb[63].mxu1  ;;  %5966 = vmatmul.mubr.bf16.gmra.mrb[168].mxu0 %v16644_v43  ;;  %v19907_v17 = vld [vmem:[#allocation80_spill] sm:$0xff]  ;;  %v19913_v43 = vld [vmem:[#allocation267_spill] sm:$0xff] }
 0x497   :  { %5973 = vmatprep.mubr.bf16.mxu0 %v16705_v35  ;;  %v12958_v23 = vld [vmem:[#allocation7 + $0x668] sm:$0xff]   ;;  %v19909_v35 = vld [vmem:[#allocation266_spill] sm:$0xff] }
 0x498   :  { %5885 = vmatmul.mubr.bf16.gmra.mrb[168].mxu1 %v16637_v0  ;;  %v19910_v0 = vld [vmem:[#allocation269_spill] sm:$0xff] }
 0x499   :  { %11030 = vmatprep.mubr.msk.bf16.mxu1 %vm3911_vm1, %v16713_v47  ;;  %v11588_v50 = vpop.f32.mrb[64].mxu0  ;;  %v19908_v47 = vld [vmem:[#allocation49_spill] sm:$0xff] }
 0x49a   :  { %v11589_v15 = vpop.f32.mrb[65].mxu0 }
 0x49b   :  { %v4272_v9 = vpop.f32.mrb[64].mxu1  ;;  %v17088_v62 = vadd.f32 %v11589_v15, %v11588_v50  ;;  %v11591_v52 = vpop.f32.mrb[66].mxu0 }
 0x49c   :  { %v17086_v22 = vadd.f32 %v4272_v9, %v17018_v25  ;;  %v4274_v21 = vpop.f32.mrb[65].mxu1  ;;  %v11592_v27 = vpop.f32.mrb[67].mxu0  ;;  %v12960_v25 = vld [vmem:[#allocation7 + $0x628] sm:$0xff]   ;;  %v12963_v9 = vld [vmem:[#allocation7 + $0x670] sm:$0xff]  }
 0x49d   :  { %v4275_v31 = vpop.f32.mrb[66].mxu1  ;;  %v17090_v19 = vadd.f32 %v11592_v27, %v11591_v52 }
 0x49e   :  { %19906 = vst [vmem:[#allocation273_spill] sm:$0xff] %v17086_v22  ;;  %v4276_v48 = vpop.f32.mrb[67].mxu1  ;;  %5974 = vmatmul.mubr.bf16.gmra.mrb[172].mxu0 %v19907_v17 }
 0x49f   :  { %5981 = vmatprep.mubr.bf16.mxu0 %v19909_v35  ;;  %v12964_v35 = vld [vmem:[#allocation7 + $0x630] sm:$0xff]  }
 0x4a0   :  { %6023 = vmatmul.mubr.bf16.vlgmr.msra.gmra.mrb[172].mxu1 %v19908_v47 }
 0x4a1   :  { %11031 = vmatprep.mubr.msk.bf16.mxu1 %vm3911_vm1, %v19910_v0  ;;  %12003 = vmatpush3.bf16.msra.mxu1 %v12954_v37  ;;  %v11594_v50 = vpop.f32.mrb[68].mxu0  ;;  %v12965_v37 = vld [vmem:[#allocation7 + $0x678] sm:$0xff]  }
 0x4a2   :  { %12004 = vmatprep.subr.bf16.mxu1 %v12958_v23  ;;  %v11595_v21 = vpop.f32.mrb[69].mxu0  ;;  %v19912_v23 = vld [vmem:[#allocation190_spill] sm:$0xff] }
 0x4a3   :  { %v4279_v15 = vpop.f32.mrb[68].mxu1  ;;  %v17100_v27 = vadd.f32 %v11595_v21, %v11594_v50  ;;  %v11597_v48 = vpop.f32.mrb[70].mxu0  ;;  %v12966_v50 = vld [vmem:[#allocation7 + $0x638] sm:$0xff]  }
 0x4a4   :  { %v17098_v52 = vadd.f32 %v4279_v15, %v17030_v38  ;;  %v4281_v31 = vpop.f32.mrb[69].mxu1  ;;  %v11598_v47 = vpop.f32.mrb[71].mxu0  ;;  %v19915_v38 = vld [vmem:[#allocation82_spill] sm:$0xff] }
 0x4a5   :  { %v4282_v22 = vpop.f32.mrb[70].mxu1  ;;  %12005 = vmatpush3.bf16.msra.mxu1 %v12960_v25  ;;  %v17102_v0 = vadd.f32 %v11598_v47, %v11597_v48  ;;  %v12967_v25 = vld [vmem:[#allocation7 + $0x680] sm:$0xff]  }
 0x4a6   :  { %19911 = vst [vmem:[#allocation272_spill] sm:$0xff] %v17098_v52  ;;  %v4283_v17 = vpop.f32.mrb[71].mxu1  ;;  %12006 = vmatprep.subr.bf16.mxu1 %v12963_v9  ;;  %5982 = vmatmul.mubr.bf16.gmra.mrb[176].mxu0 %v19912_v23  ;;  %v12975_v23 = vld [vmem:[#allocation7 + $0x6e8] sm:$0xff]  }
 0x4a7   :  { %6657 = vmatprep.mubr.bf16.mxu0 %v19914_v2  ;;  %v12968_v2 = vld [vmem:[#allocation7 + $0x640] sm:$0xff]  }
 0x4a8   :  { %6031 = vmatmul.mubr.bf16.gmra.mrb[176].mxu1 %v19913_v43 }
 0x4a9   :  { %11032 = vmatprep.mubr.msk.bf16.mxu1 %vm3911_vm1, %v19915_v38  ;;  %12007 = vmatpush3.bf16.msra.mxu1 %v12964_v35  ;;  %v11600_v22 = vpop.f32.mrb[72].mxu0  ;;  %v12969_v35 = vld [vmem:[#allocation7 + $0x688] sm:$0xff]  }
 0x4aa   :  { %12008 = vmatprep.subr.bf16.mxu1 %v12965_v37  ;;  %v11601_v17 = vpop.f32.mrb[73].mxu0  ;;  %v12974_v37 = vld [vmem:[#allocation7 + $0x6a0] sm:$0xff]  }
 0x4ab   :  { %v4286_v15 = vpop.f32.mrb[72].mxu1  ;;  %v17112_v21 = vadd.f32 %v11601_v17, %v11600_v22  ;;  %v11603_v31 = vpop.f32.mrb[74].mxu0  ;;  %v19919_v22 = vld [vmem:[#allocation50_spill] sm:$0xff] }
 0x4ac   :  { %v17110_v47 = vadd.f32 %v4286_v15, %v17042_v34  ;;  %v4288_v9 = vpop.f32.mrb[73].mxu1  ;;  %v11604_v52 = vpop.f32.mrb[75].mxu0  ;;  %v19918_v34 = vld [vmem:[#allocation40_spill] sm:$0xff] }
 0x4ad   :  { %v4289_v48 = vpop.f32.mrb[74].mxu1  ;;  %12009 = vmatpush3.bf16.msra.mxu1 %v12966_v50  ;;  %v17114_v38 = vadd.f32 %v11604_v52, %v11603_v31  ;;  %v12970_v15 = vld [vmem:[#allocation7 + $0x648] sm:$0xff]   ;;  %v12978_v9 = vld [vmem:[#allocation7 + $0x6f0] sm:$0xff]  }
 0x4ae   :  { %19916 = vst [vmem:[#allocation86_spill] sm:$0xff] %v17110_v47  ;;  %v4290_v43 = vpop.f32.mrb[75].mxu1  ;;  %12010 = vmatprep.subr.bf16.mxu1 %v12967_v25  ;;  %6658 = vmatmul.mubr.bf16.vlgmr.msra.gmra.mrb[180].mxu0 %v19829_v57  ;;  %v12976_v52 = vld [vmem:[#allocation7 + $0x6a8] sm:$0xff]  }
 0x4af   :  { %6665 = vmatprep.mubr.bf16.mxu0 %v19918_v34  ;;  %v12971_v43 = vld [vmem:[#allocation7 + $0x690] sm:$0xff]   ;;  %12067 = vmatpush3.bf16.msra.mxu0 %v12974_v37 }
 0x4b0   :  { %6039 = vmatmul.mubr.bf16.gmra.mrb[180].mxu1 %v19917_v56  ;;  %12068 = vmatprep.subr.bf16.mxu0 %v12975_v23  ;;  %v12980_v37 = vld [vmem:[#allocation7 + $0x6b0] sm:$0xff]  }
 0x4b1   :  { %11033 = vmatprep.mubr.msk.bf16.mxu1 %vm3911_vm1, %v19919_v22  ;;  %12011 = vmatpush3.bf16.msra.mxu1 %v12968_v2  ;;  %v11606_v50 = vpop.f32.mrb[76].mxu0  ;;  %v12973_v22 = vld [vmem:[#allocation7 + $0x650] sm:$0xff]  }
 0x4b2   :  { %12012 = vmatprep.subr.bf16.mxu1 %v12969_v35  ;;  %v11607_v17 = vpop.f32.mrb[77].mxu0  ;;  %v12977_v35 = vld [vmem:[#allocation7 + $0x698] sm:$0xff]  }
 0x4b3   :  { %v11634_v25 = vpop.f32.mrb[76].mxu1  ;;  %v17121_v31 = vadd.f32 %v11607_v17, %v11606_v50  ;;  %v11609_v47 = vpop.f32.mrb[78].mxu0  ;;  %12069 = vmatpush3.bf16.msra.mxu0 %v12976_v52  ;;  %v12981_v50 = vld [vmem:[#allocation7 + $0x6f8] sm:$0xff]  }
 0x4b4   :  { %v11635_v48 = vpop.f32.mrb[77].mxu1  ;;  %v11610_v57 = vpop.f32.mrb[79].mxu0  ;;  %12070 = vmatprep.subr.bf16.mxu0 %v12978_v9 }
 0x4b5   :  { %v11636_v56 = vadd.f32 %v11635_v48, %v11634_v25  ;;  %v11637_v34 = vpop.f32.mrb[78].mxu1  ;;  %12013 = vmatpush3.bf16.msra.mxu1 %v12970_v15  ;;  %v17123_v2 = vadd.f32 %v11610_v57, %v11609_v47  ;;  %v12979_v57 = vld [vmem:[#allocation7 + $0x658] sm:$0xff]  }
 0x4b6   :  { %v11638_v29 = vpop.f32.mrb[79].mxu1  ;;  %12014 = vmatprep.subr.bf16.mxu1 %v12971_v43  ;;  %6666 = vmatmul.mubr.bf16.gmra.mrb[184].mxu0 %v19845_v41 }
 0x4b7   :  { %v4905_v12 = vadd.f32 %v11636_v56, %v17052_v8  ;;  %v11639_v23 = vadd.f32 %v11638_v29, %v11637_v34  ;;  %6673 = vmatprep.mubr.bf16.mxu0 %v15982_v55  ;;  %12071 = vmatpush3.bf16.msra.mxu0 %v12980_v37  ;;  %v12982_v56 = vld [vmem:[#allocation7 + $0x6b8] sm:$0xff]   ;;  %v12983_v34 = vld [vmem:[#allocation7 + $0x700] sm:$0xff]  }
 0x4b8   :  { %6047 = vmatmul.mubr.bf16.gmra.mrb[184].mxu1 %v16796_v11  ;;  %12072 = vmatprep.subr.bf16.mxu0 %v12981_v50  ;;  %v12986_v50 = vld [vmem:[#allocation7 + $0x708] sm:$0xff]  }
 0x4b9   :  { %v4908_v15 = vadd.f32 %v11639_v23, %v17054_v59  ;;  %11034 = vmatprep.mubr.msk.bf16.mxu1 %vm3911_vm1, %v16824_v10  ;;  %12015 = vmatpush3.bf16.msra.mxu1 %v12973_v22  ;;  %v11612_v47 = vpop.f32.mrb[80].mxu0 }
 0x4ba   :  { %12016 = vmatprep.subr.bf16.mxu1 %v12977_v35  ;;  %v11613_v8 = vpop.f32.mrb[81].mxu0  ;;  %v12984_v35 = vld [vmem:[#allocation7 + $0x6c0] sm:$0xff]  }
 0x4bb   :  { %v11640_v29 = vpop.f32.mrb[80].mxu1  ;;  %v17132_v43 = vadd.f32 %v11613_v8, %v11612_v47  ;;  %v11615_v25 = vpop.f32.mrb[82].mxu0  ;;  %12073 = vmatpush3.bf16.msra.mxu0 %v12982_v56  ;;  %v12987_v56 = vld [vmem:[#allocation7 + $0x6c8] sm:$0xff]  }
 0x4bc   :  { %v11641_v52 = vpop.f32.mrb[81].mxu1  ;;  %v11616_v59 = vpop.f32.mrb[83].mxu0  ;;  %12074 = vmatprep.subr.bf16.mxu0 %v12983_v34 }
 0x4bd   :  { %v11642_v17 = vadd.f32 %v11641_v52, %v11640_v29  ;;  %v11643_v9 = vpop.f32.mrb[82].mxu1  ;;  %12017 = vmatpush3.bf16.msra.mxu1 %v12979_v57  ;;  %v17134_v48 = vadd.f32 %v11616_v59, %v11615_v25 }
 0x4be   :  { %v11644_v22 = vpop.f32.mrb[83].mxu1  ;;  %6916 = vmatprep.subr.bf16.mxu1 %v19521_v36  ;;  %6674 = vmatmul.mubr.bf16.gmra.mrb[188].mxu0 %v15976_v20 }
 0x4bf   :  { %v4913_v37 = vadd.f32 %v11642_v17, %v17065_v32  ;;  %v11645_v23 = vadd.f32 %v11644_v22, %v11643_v9  ;;  %6681 = vmatprep.mubr.bf16.mxu0 %v16018_v7  ;;  %12075 = vmatpush3.bf16.msra.mxu0 %v12984_v35  ;;  %v12989_v32 = vld [vmem:[#allocation7 + $0x710] sm:$0xff]  }
 0x4c0   :  { %6055 = vmatmul.mubr.bf16.gmra.mrb[188].mxu1 %v16821_v45  ;;  %12076 = vmatprep.subr.bf16.mxu0 %v12986_v50  ;;  %v12991_v50 = vld [vmem:[#allocation7 + $0x718] sm:$0xff]  }
 0x4c1   :  { %v4916_v57 = vadd.f32 %v11645_v23, %v17067_v14  ;;  %11035 = vmatprep.mubr.msk.bf16.mxu1 %vm3911_vm1, %v16840_v49  ;;  %v11698_v47 = vpop.f32.mrb[84].mxu0  ;;  %v12990_v14 = vld [vmem:[#allocation7 + $0x6d0] sm:$0xff]  }
 0x4c2   :  { %v11699_v8 = vpop.f32.mrb[85].mxu0 }
 0x4c3   :  { %v11646_v29 = vpop.f32.mrb[84].mxu1  ;;  %v11700_v25 = vadd.f32 %v11699_v8, %v11698_v47  ;;  %v11701_v34 = vpop.f32.mrb[86].mxu0  ;;  %12077 = vmatpush3.bf16.msra.mxu0 %v12987_v56  ;;  %v12993_v56 = vld [vmem:[#allocation7 + $0x6d8] sm:$0xff]  }
 0x4c4   :  { %v11647_v52 = vpop.f32.mrb[85].mxu1  ;;  %v11702_v59 = vpop.f32.mrb[87].mxu0  ;;  %12078 = vmatprep.subr.bf16.mxu0 %v12989_v32 }
 0x4c5   :  { %v11648_v17 = vadd.f32 %v11647_v52, %v11646_v29  ;;  %v11649_v9 = vpop.f32.mrb[86].mxu1  ;;  %v11703_v7 = vadd.f32 %v11702_v59, %v11701_v34  ;;  %v17144_v23 = vadd.f32 %v11700_v25, %v4905_v12  ;;  %v13000_v52 = vld [vmem:[#allocation7 + $0x7c0] sm:$0xff]  }
 0x4c6   :  { %v11650_v22 = vpop.f32.mrb[87].mxu1  ;;  %6682 = vmatmul.mubr.bf16.gmra.mrb[192].mxu0 %v19856_v16 }
 0x4c7   :  { %v4921_v49 = vadd.f32 %v11648_v17, %v17076_v61  ;;  %v11651_v35 = vadd.f32 %v11650_v22, %v11649_v9  ;;  %6689 = vmatprep.mubr.bf16.mxu0 %v19857_v24  ;;  %v17150_v47 = vadd.f32 %v11703_v7, %v4908_v15  ;;  %12079 = vmatpush3.bf16.msra.mxu0 %v12990_v14 }
 0x4c8   :  { %6063 = vmatmul.mubr.bf16.gmra.mrb[192].mxu1 %v16833_v26  ;;  %12080 = vmatprep.subr.bf16.mxu0 %v12991_v50 }
 0x4c9   :  { %v4924_v29 = vadd.f32 %v11651_v35, %v17078_v18  ;;  %11036 = vmatprep.mubr.msk.bf16.mxu1 %vm3911_vm1, %v16860_v53  ;;  %v11704_v12 = vpop.f32.mrb[88].mxu0 }
 0x4ca   :  { %v11705_v8 = vpop.f32.mrb[89].mxu0 }
 0x4cb   :  { %v11652_v61 = vpop.f32.mrb[88].mxu1  ;;  %v11706_v25 = vadd.f32 %v11705_v8, %v11704_v12  ;;  %v11707_v34 = vpop.f32.mrb[90].mxu0  ;;  %12081 = vmatpush3.bf16.msra.mxu0 %v12993_v56 }
 0x4cc   :  { %v11653_v32 = vpop.f32.mrb[89].mxu1  ;;  %v11708_v59 = vpop.f32.mrb[91].mxu0  ;;  %12130 = vmatprep.subr.bf16.mxu0 %v13000_v52 }
 0x4cd   :  { %v11654_v17 = vadd.f32 %v11653_v32, %v11652_v61  ;;  %v11655_v9 = vpop.f32.mrb[90].mxu1  ;;  %v11709_v15 = vadd.f32 %v11708_v59, %v11707_v34  ;;  %v17155_v18 = vadd.f32 %v11706_v25, %v4913_v37 }
 0x4ce   :  { %v11656_v7 = vpop.f32.mrb[91].mxu1  ;;  %6690 = vmatmul.mubr.bf16.gmra.mrb[196].mxu0 %v19858_v40 }
 0x4cf   :  { %v4929_v22 = vadd.f32 %v11654_v17, %v17088_v62  ;;  %v11657_v35 = vadd.f32 %v11656_v7, %v11655_v9  ;;  %6697 = vmatprep.mubr.bf16.mxu0 %v19859_v33  ;;  %v17161_v14 = vadd.f32 %v11709_v15, %v4916_v57 }
 0x4d0   :  { %6071 = vmatmul.mubr.bf16.gmra.mrb[196].mxu1 %v16857_v4 }
 0x4d1   :  { %v4932_v50 = vadd.f32 %v11657_v35, %v17090_v19  ;;  %11037 = vmatprep.mubr.msk.bf16.mxu1 %vm3911_vm1, %v16869_v6  ;;  %v11710_v12 = vpop.f32.mrb[92].mxu0 }
 0x4d2   :  { %v11711_v56 = vpop.f32.mrb[93].mxu0 }
 0x4d3   :  { %v11658_v37 = vpop.f32.mrb[92].mxu1  ;;  %v11712_v62 = vadd.f32 %v11711_v56, %v11710_v12  ;;  %v11713_v8 = vpop.f32.mrb[94].mxu0 }
 0x4d4   :  { %v11659_v61 = vpop.f32.mrb[93].mxu1  ;;  %v11714_v52 = vpop.f32.mrb[95].mxu0 }
 0x4d5   :  { %v11660_v32 = vadd.f32 %v11659_v61, %v11658_v37  ;;  %v11661_v25 = vpop.f32.mrb[94].mxu1  ;;  %v11715_v17 = vadd.f32 %v11714_v52, %v11713_v8  ;;  %v17166_v9 = vadd.f32 %v11712_v62, %v4921_v49  ;;  %v12985_v8 = vld [vmem:[#allocation7 + $0x720] sm:$0xff]  }
 0x4d6   :  { %v11662_v34 = vpop.f32.mrb[95].mxu1  ;;  %6698 = vmatmul.mubr.bf16.gmra.mrb[200].mxu0 %v19860_v58 }
 0x4d7   :  { %v4937_v57 = vadd.f32 %v11660_v32, %v17100_v27  ;;  %v11663_v59 = vadd.f32 %v11662_v34, %v11661_v25  ;;  %6705 = vmatprep.mubr.bf16.mxu0 %v19861_v60  ;;  %v17172_v19 = vadd.f32 %v11715_v17, %v4924_v29 }
 0x4d8   :  { %6079 = vmatmul.mubr.bf16.gmra.mrb[200].mxu1 %v16866_v63 }
 0x4d9   :  { %v4940_v7 = vadd.f32 %v11663_v59, %v17102_v0  ;;  %6754 = vmatprep.mubr.bf16.mxu1 %v19862_v1  ;;  %v11716_v15 = vpop.f32.mrb[96].mxu0  ;;  %v12988_v59 = vld [vmem:[#allocation7 + $0x728] sm:$0xff]  }
 0x4da   :  { %v11717_v12 = vpop.f32.mrb[97].mxu0 }
 0x4db   :  { %v11664_v35 = vpop.f32.mrb[96].mxu1  ;;  %v11718_v37 = vadd.f32 %v11717_v12, %v11716_v15  ;;  %v11719_v56 = vpop.f32.mrb[98].mxu0 }
 0x4dc   :  { %v11665_v49 = vpop.f32.mrb[97].mxu1  ;;  %v11720_v62 = vpop.f32.mrb[99].mxu0 }
 0x4dd   :  { %v11666_v27 = vadd.f32 %v11665_v49, %v11664_v35  ;;  %v11667_v61 = vpop.f32.mrb[98].mxu1  ;;  %v11721_v25 = vadd.f32 %v11720_v62, %v11719_v56  ;;  %v17176_v52 = vadd.f32 %v11718_v37, %v4929_v22 }
 0x4de   :  { %v11668_v32 = vpop.f32.mrb[99].mxu1  ;;  %6706 = vmatmul.mubr.bf16.gmra.mrb[204].mxu0 %v19863_v51 }
 0x4df   :  { %v4945_v29 = vadd.f32 %v11666_v27, %v17112_v21  ;;  %v11669_v34 = vadd.f32 %v11668_v32, %v11667_v61  ;;  %6713 = vmatprep.mubr.bf16.mxu0 %v19865_v13  ;;  %v17182_v0 = vadd.f32 %v11721_v25, %v4932_v50  ;;  %v12992_v50 = vld [vmem:[#allocation7 + $0x730] sm:$0xff]  }
 0x4e0   :  { %6755 = vmatmul.mubr.bf16.vlgmr.msra.gmra.mrb[204].mxu1 %v19864_v3  ;;  %v19920_v25 = vld [vmem:[#allocation169_spill] sm:$0xff] }
 0x4e1   :  { %v4948_v17 = vadd.f32 %v11669_v34, %v17114_v38  ;;  %6762 = vmatprep.mubr.bf16.mxu1 %v19866_v54  ;;  %6917 = vmatpush1.bf16.msra.mxu1 %v12985_v8  ;;  %v11722_v15 = vpop.f32.mrb[100].mxu0  ;;  %v19921_v34 = vld [vmem:[#allocation89_spill] sm:$0xff] }
 0x4e2   :  { %6918 = vmatprep.subr.bf16.mxu1 %v19521_v36  ;;  %v11723_v21 = vpop.f32.mrb[101].mxu0 }
 0x4e3   :  { %v11670_v22 = vpop.f32.mrb[100].mxu1  ;;  %v11724_v12 = vadd.f32 %v11723_v21, %v11722_v15  ;;  %v11725_v49 = vpop.f32.mrb[102].mxu0  ;;  %v19922_v15 = vld [vmem:[#allocation94_spill] sm:$0xff]  ;;  %v19923_v21 = vld [vmem:[#allocation175_spill] sm:$0xff] }
 0x4e4   :  { %v11671_v35 = vpop.f32.mrb[101].mxu1  ;;  %v11726_v27 = vpop.f32.mrb[103].mxu0 }
 0x4e5   :  { %v11672_v37 = vadd.f32 %v11671_v35, %v11670_v22  ;;  %v11673_v56 = vpop.f32.mrb[102].mxu1  ;;  %6919 = vmatpush1.bf16.msra.mxu1 %v12988_v59  ;;  %v11727_v62 = vadd.f32 %v11726_v27, %v11725_v49  ;;  %v17188_v38 = vadd.f32 %v11724_v12, %v4937_v57  ;;  %v12994_v35 = vld [vmem:[#allocation7 + $0x738] sm:$0xff]  }
 0x4e6   :  { %v11674_v61 = vpop.f32.mrb[103].mxu1  ;;  %6920 = vmatprep.subr.bf16.mxu1 %v19521_v36  ;;  %6714 = vmatmul.mubr.bf16.gmra.mrb[208].mxu0 %v19920_v25  ;;  %v19924_v25 = vld [vmem:[#allocation93_spill] sm:$0xff] }
 0x4e7   :  { %v4953_v8 = vadd.f32 %v11672_v37, %v17121_v31  ;;  %v11675_v32 = vadd.f32 %v11674_v61, %v11673_v56  ;;  %6851 = vmatprep.mubr.bf16.mxu0 %v19922_v15  ;;  %v17194_v22 = vadd.f32 %v11727_v62, %v4940_v7  ;;  %v12995_v7 = vld [vmem:[#allocation7 + $0x740] sm:$0xff]  }
 0x4e8   :  { %6763 = vmatmul.mubr.bf16.gmra.mrb[208].mxu1 %v19921_v34 }
 0x4e9   :  { %v17197_v59 = vadd.f32 %v11675_v32, %v17123_v2  ;;  %6770 = vmatprep.mubr.bf16.mxu1 %v19923_v21  ;;  %6921 = vmatpush1.bf16.msra.mxu1 %v12992_v50  ;;  %v11728_v57 = vpop.f32.mrb[104].mxu0  ;;  %v13002_v32 = vld [vmem:[#allocation7 + $0x780] sm:$0xff]  }
 0x4ea   :  { %6922 = vmatprep.subr.bf16.mxu1 %v19521_v36  ;;  %v11729_v12 = vpop.f32.mrb[105].mxu0 }
 0x4eb   :  { %v11676_v31 = vpop.f32.mrb[104].mxu1  ;;  %v11730_v37 = vadd.f32 %v11729_v12, %v11728_v57  ;;  %v11731_v56 = vpop.f32.mrb[106].mxu0  ;;  %v13003_v57 = vld [vmem:[#allocation7 + $0x7c8] sm:$0xff]  }
 0x4ec   :  { %v11677_v49 = vpop.f32.mrb[105].mxu1  ;;  %v11732_v15 = vpop.f32.mrb[107].mxu0  ;;  %v19925_v12 = vld [vmem:[#allocation173_spill] sm:$0xff] }
 0x4ed   :  { %v11678_v27 = vadd.f32 %v11677_v49, %v11676_v31  ;;  %v11679_v61 = vpop.f32.mrb[106].mxu1  ;;  %6923 = vmatpush1.bf16.msra.mxu1 %v12994_v35  ;;  %v11733_v2 = vadd.f32 %v11732_v15, %v11731_v56  ;;  %v17202_v50 = vadd.f32 %v11730_v37, %v4945_v29  ;;  %v19926_v31 = vld [vmem:[#allocation98_spill] sm:$0xff]  ;;  %v19927_v49 = vld [vmem:[#allocation179_spill] sm:$0xff]  ;;  %v12996_v29 = vld [vmem:[#allocation7 + $0x748] sm:$0xff]  }
 0x4ee   :  { %v11680_v62 = vpop.f32.mrb[107].mxu1  ;;  %6924 = vmatprep.subr.bf16.mxu1 %v19521_v36  ;;  %6852 = vmatmul.mubr.bf16.vlgmr.msra.gmra.mrb[212].mxu0 %v19924_v25 }
 0x4ef   :  { %v17205_v21 = vadd.f32 %v11678_v27, %v17132_v43  ;;  %v11681_v34 = vadd.f32 %v11680_v62, %v11679_v61  ;;  %6859 = vmatprep.mubr.bf16.mxu0 %v19926_v31  ;;  %v17210_v35 = vadd.f32 %v11733_v2, %v4948_v17  ;;  %12131 = vmatpush3.bf16.msra.mxu0 %v13002_v32  ;;  %v13004_v43 = vld [vmem:[#allocation7 + $0x788] sm:$0xff]   ;;  %v13006_v61 = vld [vmem:[#allocation7 + $0x7d0] sm:$0xff]  }
 0x4f0   :  { %6771 = vmatmul.mubr.bf16.gmra.mrb[212].mxu1 %v19925_v12  ;;  %12132 = vmatprep.subr.bf16.mxu0 %v13003_v57  ;;  %v13007_v32 = vld [vmem:[#allocation7 + $0x790] sm:$0xff]  }
 0x4f1   :  { %v17213_v15 = vadd.f32 %v11681_v34, %v17134_v48  ;;  %6778 = vmatprep.mubr.bf16.mxu1 %v19927_v49  ;;  %6925 = vmatpush1.bf16.msra.mxu1 %v12995_v7  ;;  %v11734_v37 = vpop.f32.mrb[108].mxu0  ;;  %v12997_v49 = vld [vmem:[#allocation7 + $0x750] sm:$0xff]  }
 0x4f2   :  { %6926 = vmatprep.subr.bf16.mxu1 %v19521_v36  ;;  %v11735_v27 = vpop.f32.mrb[109].mxu0 }
 0x4f3   :  { %v5098_v56 = vpop.f32.mrb[108].mxu1  ;;  %v11736_v17 = vadd.f32 %v11735_v27, %v11734_v37  ;;  %v11737_v31 = vpop.f32.mrb[110].mxu0  ;;  %12133 = vmatpush3.bf16.msra.mxu0 %v13004_v43  ;;  %v19930_v27 = vld [vmem:[#allocation52_spill] sm:$0xff] }
 0x4f4   :  { %v5099_v62 = vadd.f32 %v5098_v56, %v17144_v23  ;;  %v5100_v2 = vpop.f32.mrb[109].mxu1  ;;  %v11738_v34 = vpop.f32.mrb[111].mxu0  ;;  %12134 = vmatprep.subr.bf16.mxu0 %v13006_v61  ;;  %v13009_v23 = vld [vmem:[#allocation7 + $0x7d8] sm:$0xff]  }
 0x4f5   :  { %v5101_v48 = vpop.f32.mrb[110].mxu1  ;;  %6927 = vmatpush1.bf16.msra.mxu1 %v12996_v29  ;;  %v11739_v12 = vadd.f32 %v11738_v34, %v11737_v31  ;;  %v17220_v54 = vadd.f32 %v11736_v17, %v4953_v8  ;;  %v19928_v29 = vld [vmem:[#allocation102_spill] sm:$0xff]  ;;  %v13011_v2 = vld [vmem:[#allocation7 + $0x7e0] sm:$0xff]  }
 0x4f6   :  { %v5102_v7 = vadd.f32 %v5101_v48, %v17150_v47  ;;  %v5103_v25 = vpop.f32.mrb[111].mxu1  ;;  %6928 = vmatprep.subr.bf16.mxu1 %v19521_v36  ;;  %6860 = vmatmul.mubr.bf16.gmra.mrb[216].mxu0 %v19894_v28  ;;  %v5178_v57 = vrot.slane %v5099_v62, 1  ;;  %v12998_v31 = vld [vmem:[#allocation7 + $0x758] sm:$0xff]  }
 0x4f7   :  { %6867 = vmatprep.mubr.bf16.mxu0 %v19928_v29  ;;  %v17226_v47 = vadd.f32 %v11739_v12, %v17197_v59  ;;  %v19929_v25 = vld [vmem:[#allocation181_spill] sm:$0xff]  ;;  %12135 = vmatpush3.bf16.msra.mxu0 %v13007_v32  ;;  %v13010_v56 = vld [vmem:[#allocation7 + $0x798] sm:$0xff]  }
 0x4f8   :  { %v5179_v37 = vrot.slane %v5102_v7, 1  ;;  %6779 = vmatmul.mubr.bf16.gmra.mrb[216].mxu1 %v19895_v5  ;;  %12136 = vmatprep.subr.bf16.mxu0 %v13009_v23 }
 0x4f9   :  { %6786 = vmatprep.mubr.bf16.mxu1 %v19929_v25  ;;  %6929 = vmatpush1.bf16.msra.mxu1 %v12997_v49  ;;  %v11740_v43 = vpop.f32.mrb[112].mxu0 }
 0x4fa   :  { %v5180_v8 = vsel %vm5177_vm2, %v5178_v57, %v5179_v37  ;;  %6930 = vmatprep.subr.bf16.mxu1 %v19521_v36  ;;  %v11741_v17 = vpop.f32.mrb[113].mxu0  ;;  %v12999_v57 = vld [vmem:[#allocation7 + $0x760] sm:$0xff]  }
 0x4fb   :  { %v17232_v61 = vadd.f32 %v5180_v8, %v19930_v27  ;;  %v5106_v62 = vpop.f32.mrb[112].mxu1  ;;  %v11742_v12 = vadd.f32 %v11741_v17, %v11740_v43  ;;  %v11743_v49 = vpop.f32.mrb[114].mxu0  ;;  %12137 = vmatpush3.bf16.msra.mxu0 %v13010_v56  ;;  %v13013_v8 = vld [vmem:[#allocation7 + $0x7a0] sm:$0xff]   ;;  %v13001_v56 = vld [vmem:[#allocation7 + $0x768] sm:$0xff]  }
 0x4fc   :  { %v5107_v59 = vadd.f32 %v5106_v62, %v17155_v18  ;;  %v5108_v48 = vpop.f32.mrb[113].mxu1  ;;  %v11744_v7 = vpop.f32.mrb[115].mxu0  ;;  %12138 = vmatprep.subr.bf16.mxu0 %v13011_v2  ;;  %v13015_v18 = vld [vmem:[#allocation7 + $0x7e8] sm:$0xff]   ;;  %v19933_v2 = vld [vmem:[#allocation99_spill] sm:$0xff] }
 0x4fd   :  { %v5109_v34 = vpop.f32.mrb[114].mxu1  ;;  %6931 = vmatpush1.bf16.msra.mxu1 %v12998_v31  ;;  %v11745_v32 = vadd.f32 %v11744_v7, %v11743_v49  ;;  %v17238_v23 = vadd.f32 %v11742_v12, %v17205_v21  ;;  %v19931_v31 = vld [vmem:[#allocation45_spill] sm:$0xff] }
 0x4fe   :  { %v5110_v37 = vadd.f32 %v5109_v34, %v17161_v14  ;;  %v5111_v25 = vpop.f32.mrb[115].mxu1  ;;  %6932 = vmatprep.subr.bf16.mxu1 %v19521_v36  ;;  %6868 = vmatmul.mubr.bf16.gmra.mrb[220].mxu0 %v19899_v42  ;;  %v5181_v43 = vrot.slane %v5107_v59, 1  ;;  %v13016_v17 = vld [vmem:[#allocation7 + $0x7a8] sm:$0xff]   ;;  %v13017_v49 = vld [vmem:[#allocation7 + $0x7f0] sm:$0xff]  }
 0x4ff   :  { %6875 = vmatprep.mubr.bf16.mxu0 %v19931_v31  ;;  %v17244_v14 = vadd.f32 %v11745_v32, %v17213_v15  ;;  %v19932_v25 = vld [vmem:[#allocation184_spill] sm:$0xff]  ;;  %12139 = vmatpush3.bf16.msra.mxu0 %v13013_v8 }
 0x500   :  { %v5182_v27 = vrot.slane %v5110_v37, 1  ;;  %6787 = vmatmul.mubr.bf16.gmra.mrb[220].mxu1 %v19880_v39  ;;  %12140 = vmatprep.subr.bf16.mxu0 %v13015_v18  ;;  %v13019_v18 = vld [vmem:[#allocation7 + $0x7b0] sm:$0xff]  }
 0x501   :  { %6794 = vmatprep.mubr.bf16.mxu1 %v19932_v25  ;;  %6933 = vmatpush1.bf16.msra.mxu1 %v12999_v57  ;;  %v11762_v62 = vpop.f32.mrb[116].mxu0 }
 0x502   :  { %v5183_v21 = vsel %vm5177_vm2, %v5181_v43, %v5182_v27  ;;  %6934 = vmatprep.subr.bf16.mxu1 %v19521_v36  ;;  %v11763_v48 = vpop.f32.mrb[117].mxu0  ;;  %v13005_v43 = vld [vmem:[#allocation7 + $0x770] sm:$0xff]  }
 0x503   :  { %v17250_v59 = vadd.f32 %v5183_v21, %v19933_v2  ;;  %v5114_v12 = vpop.f32.mrb[116].mxu1  ;;  %v17253_v7 = vadd.f32 %v11763_v48, %v11762_v62  ;;  %v11765_v57 = vpop.f32.mrb[118].mxu0  ;;  %12141 = vmatpush3.bf16.msra.mxu0 %v13016_v17  ;;  %v19934_v2 = vld [vmem:[#allocation90_spill] sm:$0xff]  ;;  %v13012_v17 = vld [vmem:[#allocation7 + $0x840] sm:$0xff]  }
 0x504   :  { %v5115_v15 = vadd.f32 %v5114_v12, %v17166_v9  ;;  %v5116_v34 = vpop.f32.mrb[117].mxu1  ;;  %v11766_v32 = vpop.f32.mrb[119].mxu0  ;;  %12142 = vmatprep.subr.bf16.mxu0 %v13017_v49  ;;  %v13021_v9 = vld [vmem:[#allocation7 + $0x7f8] sm:$0xff]   ;;  %v19936_v49 = vld [vmem:[#allocation53_spill] sm:$0xff] }
 0x505   :  { %v5117_v37 = vpop.f32.mrb[118].mxu1  ;;  %6935 = vmatpush1.bf16.msra.mxu1 %v13001_v56  ;;  %v17256_v25 = vadd.f32 %v11766_v32, %v11765_v57  ;;  %v19935_v56 = vld [vmem:[#allocation189_spill] sm:$0xff]  ;;  %v13022_v34 = vld [vmem:[#allocation7 + $0x7b8] sm:$0xff]   ;;  %v13032_v32 = vld [vmem:[#allocation7 + $0x8c0] sm:$0xff]  }
 0x506   :  { %v5118_v8 = vadd.f32 %v5117_v37, %v17172_v19  ;;  %v5119_v27 = vpop.f32.mrb[119].mxu1  ;;  %6936 = vmatprep.subr.bf16.mxu1 %v19521_v36  ;;  %6876 = vmatmul.mubr.bf16.gmra.mrb[224].mxu0 %v19903_v44  ;;  %v5184_v21 = vrot.slane %v5115_v15, 1  ;;  %v13008_v19 = vld [vmem:[#allocation7 + $0x778] sm:$0xff]  }
 0x507   :  { %6883 = vmatprep.mubr.bf16.mxu0 %v19934_v2  ;;  %12143 = vmatpush3.bf16.msra.mxu0 %v13019_v18 }
 0x508   :  { %v5185_v62 = vrot.slane %v5118_v8, 1  ;;  %6795 = vmatmul.mubr.bf16.gmra.mrb[224].mxu1 %v19884_v46  ;;  %12144 = vmatprep.subr.bf16.mxu0 %v13021_v9 }
 0x509   :  { %6802 = vmatprep.mubr.bf16.mxu1 %v19935_v56  ;;  %6937 = vmatpush1.bf16.msra.mxu1 %v13005_v43  ;;  %v11768_v48 = vpop.f32.mrb[120].mxu0 }
 0x50a   :  { %v5186_v12 = vsel %vm5177_vm2, %v5184_v21, %v5185_v62  ;;  %6938 = vmatprep.subr.bf16.mxu1 %v19521_v36  ;;  %v11769_v37 = vpop.f32.mrb[121].mxu0 }
 0x50b   :  { %v17266_v57 = vadd.f32 %v5186_v12, %v19936_v49  ;;  %v5122_v15 = vpop.f32.mrb[120].mxu1  ;;  %v17269_v43 = vadd.f32 %v11769_v37, %v11768_v48  ;;  %v11771_v56 = vpop.f32.mrb[122].mxu0  ;;  %12145 = vmatpush3.bf16.msra.mxu0 %v13022_v34  ;;  %v19939_v48 = vld [vmem:[#allocation48_spill] sm:$0xff]  ;;  %v19940_v49 = vld [vmem:[#allocation47_spill] sm:$0xff] }
 0x50c   :  { %v5123_v8 = vadd.f32 %v5122_v15, %v17176_v52  ;;  %v5124_v27 = vpop.f32.mrb[121].mxu1  ;;  %v11772_v62 = vpop.f32.mrb[123].mxu0  ;;  %12258 = vmatprep.subr.bf16.mxu0 %v13032_v32  ;;  %v19938_v52 = vld [vmem:[#allocation187_spill] sm:$0xff] }
 0x50d   :  { %19937 = vst [vmem:[#allocation54_spill] sm:$0xff] %v17266_v57  ;;  %v5125_v21 = vpop.f32.mrb[122].mxu1  ;;  %6939 = vmatpush1.bf16.msra.mxu1 %v13008_v19  ;;  %v17272_v46 = vadd.f32 %v11772_v62, %v11771_v56 }
 0x50e   :  { %v5126_v2 = vadd.f32 %v5125_v21, %v17182_v0  ;;  %v5127_v18 = vpop.f32.mrb[123].mxu1  ;;  %12194 = vmatprep.subr.bf16.mxu1 %v13012_v17  ;;  %6884 = vmatmul.mubr.bf16.gmra.mrb[228].mxu0 %v16576_v30  ;;  %v5187_v9 = vrot.slane %v5123_v8, 1  ;;  %v19941_v0 = vld [vmem:[#allocation271_spill] sm:$0xff] }
 0x50f   :  { %6891 = vmatprep.mubr.bf16.mxu0 %v19939_v48 }
 0x510   :  { %v5188_v12 = vrot.slane %v5126_v2, 1  ;;  %6803 = vmatmul.mubr.bf16.gmra.mrb[228].mxu1 %v19938_v52 }
 0x511   :  { %6810 = vmatprep.mubr.bf16.mxu1 %v19940_v49  ;;  %v11774_v15 = vpop.f32.mrb[124].mxu0 }
 0x512   :  { %v5189_v19 = vsel %vm5177_vm2, %v5187_v9, %v5188_v12  ;;  %v11775_v17 = vpop.f32.mrb[125].mxu0  ;;  %v19943_v9 = vld [vmem:[#allocation92_spill] sm:$0xff] }
 0x513   :  { %v17280_v37 = vadd.f32 %v5189_v19, %v19941_v0  ;;  %v5130_v56 = vpop.f32.mrb[124].mxu1  ;;  %v17283_v32 = vadd.f32 %v11775_v17, %v11774_v15  ;;  %v11777_v2 = vpop.f32.mrb[126].mxu0  ;;  %v19944_v0 = vld [vmem:[#allocation46_spill] sm:$0xff] }
 0x514   :  { %v5131_v34 = vadd.f32 %v5130_v56, %v17188_v38  ;;  %v5132_v27 = vpop.f32.mrb[125].mxu1  ;;  %v11778_v21 = vpop.f32.mrb[127].mxu0  ;;  %v19946_v38 = vld [vmem:[#allocation95_spill] sm:$0xff]  ;;  %v19947_v17 = vld [vmem:[#allocation270_spill] sm:$0xff] }
 0x515   :  { %19942 = vst [vmem:[#allocation101_spill] sm:$0xff] %v17280_v37  ;;  %v5133_v8 = vpop.f32.mrb[126].mxu1  ;;  %v17286_v49 = vadd.f32 %v11778_v21, %v11777_v2  ;;  %v19945_v37 = vld [vmem:[#allocation265_spill] sm:$0xff] }
 0x516   :  { %v5134_v62 = vadd.f32 %v5133_v8, %v17194_v22  ;;  %v5135_v18 = vpop.f32.mrb[127].mxu1  ;;  %6892 = vmatmul.mubr.bf16.gmra.mrb[232].mxu0 %v19943_v9  ;;  %v5190_v12 = vrot.slane %v5131_v34, 1 }
 0x517   :  { %6899 = vmatprep.mubr.bf16.mxu0 %v19945_v37  ;;  %v13014_v37 = vld [vmem:[#allocation7 + $0x800] sm:$0xff]  }
 0x518   :  { %v5191_v19 = vrot.slane %v5134_v62, 1  ;;  %6811 = vmatmul.mubr.bf16.gmra.mrb[232].mxu1 %v19944_v0 }
 0x519   :  { %11098 = vmatprep.mubr.msk.bf16.mxu1 %vm3911_vm1, %v19946_v38  ;;  %v11780_v56 = vpop.f32.mrb[128].mxu0 }
 0x51a   :  { %v5192_v15 = vsel %vm5177_vm2, %v5190_v12, %v5191_v19  ;;  %v11781_v2 = vpop.f32.mrb[129].mxu0  ;;  %v13018_v12 = vld [vmem:[#allocation7 + $0x848] sm:$0xff]  }
 0x51b   :  { %v17295_v27 = vadd.f32 %v5192_v15, %v19947_v17  ;;  %v5138_v22 = vpop.f32.mrb[128].mxu1  ;;  %v17298_v34 = vadd.f32 %v11781_v2, %v11780_v56  ;;  %v11783_v62 = vpop.f32.mrb[130].mxu0  ;;  %v19949_v19 = vld [vmem:[#allocation80_spill] sm:$0xff]  ;;  %v19952_v56 = vld [vmem:[#allocation269_spill] sm:$0xff] }
 0x51c   :  { %v5139_v8 = vadd.f32 %v5138_v22, %v17202_v50  ;;  %v5140_v21 = vpop.f32.mrb[129].mxu1  ;;  %v11784_v0 = vpop.f32.mrb[131].mxu0  ;;  %v19951_v50 = vld [vmem:[#allocation266_spill] sm:$0xff]  ;;  %v13020_v22 = vld [vmem:[#allocation7 + $0x808] sm:$0xff]  }
 0x51d   :  { %19948 = vst [vmem:[#allocation55_spill] sm:$0xff] %v17295_v27  ;;  %v5141_v18 = vpop.f32.mrb[130].mxu1  ;;  %v17301_v48 = vadd.f32 %v11784_v0, %v11783_v62  ;;  %v19950_v27 = vld [vmem:[#allocation49_spill] sm:$0xff] }
 0x51e   :  { %v5142_v9 = vadd.f32 %v5141_v18, %v17210_v35  ;;  %v5143_v38 = vpop.f32.mrb[131].mxu1  ;;  %6900 = vmatmul.mubr.bf16.gmra.mrb[236].mxu0 %v19949_v19  ;;  %v5193_v15 = vrot.slane %v5139_v8, 1  ;;  %v13023_v0 = vld [vmem:[#allocation7 + $0x850] sm:$0xff]  }
 0x51f   :  { %6907 = vmatprep.mubr.bf16.mxu0 %v19951_v50  ;;  %v19953_v38 = vld [vmem:[#allocation273_spill] sm:$0xff] }
 0x520   :  { %v5194_v17 = vrot.slane %v5142_v9, 1  ;;  %6949 = vmatmul.mubr.bf16.vlgmr.msra.gmra.mrb[236].mxu1 %v19950_v27 }
 0x521   :  { %11099 = vmatprep.mubr.msk.bf16.mxu1 %vm3911_vm1, %v19952_v56  ;;  %12195 = vmatpush3.bf16.msra.mxu1 %v13014_v37  ;;  %v11786_v35 = vpop.f32.mrb[132].mxu0  ;;  %v13024_v37 = vld [vmem:[#allocation7 + $0x810] sm:$0xff]  }
 0x522   :  { %v5195_v2 = vsel %vm5177_vm2, %v5193_v15, %v5194_v17  ;;  %12196 = vmatprep.subr.bf16.mxu1 %v13018_v12  ;;  %v11787_v8 = vpop.f32.mrb[133].mxu0 }
 0x523   :  { %v17310_v21 = vadd.f32 %v5195_v2, %v19953_v38  ;;  %v5146_v62 = vpop.f32.mrb[132].mxu1  ;;  %v17313_v27 = vadd.f32 %v11787_v8, %v11786_v35  ;;  %v11789_v50 = vpop.f32.mrb[134].mxu0  ;;  %v13025_v2 = vld [vmem:[#allocation7 + $0x858] sm:$0xff]   ;;  %v19957_v35 = vld [vmem:[#allocation76_spill] sm:$0xff] }
 0x524   :  { %v5147_v9 = vadd.f32 %v5146_v62, %v17220_v54  ;;  %v5148_v18 = vpop.f32.mrb[133].mxu1  ;;  %v11790_v56 = vpop.f32.mrb[135].mxu0  ;;  %v19955_v38 = vld [vmem:[#allocation190_spill] sm:$0xff]  ;;  %v19956_v54 = vld [vmem:[#allocation267_spill] sm:$0xff] }
 0x525   :  { %19954 = vst [vmem:[#allocation88_spill] sm:$0xff] %v17310_v21  ;;  %v5149_v19 = vpop.f32.mrb[134].mxu1  ;;  %12197 = vmatpush3.bf16.msra.mxu1 %v13020_v22  ;;  %v17316_v12 = vadd.f32 %v11790_v56, %v11789_v50  ;;  %v19958_v62 = vld [vmem:[#allocation82_spill] sm:$0xff]  ;;  %v13027_v50 = vld [vmem:[#allocation7 + $0x860] sm:$0xff]  }
 0x526   :  { %v5150_v15 = vadd.f32 %v5149_v19, %v17226_v47  ;;  %v5151_v17 = vpop.f32.mrb[135].mxu1  ;;  %12198 = vmatprep.subr.bf16.mxu1 %v13023_v0  ;;  %6908 = vmatmul.mubr.bf16.gmra.mrb[240].mxu0 %v19955_v38  ;;  %v5196_v21 = vrot.slane %v5147_v9, 1  ;;  %v13026_v22 = vld [vmem:[#allocation7 + $0x818] sm:$0xff]   ;;  %v19959_v56 = vld [vmem:[#allocation272_spill] sm:$0xff] }
 0x527   :  { %7583 = vmatprep.mubr.bf16.mxu0 %v19957_v35  ;;  %v13035_v38 = vld [vmem:[#allocation7 + $0x8c8] sm:$0xff]  }
 0x528   :  { %v5197_v52 = vrot.slane %v5150_v15, 1  ;;  %6957 = vmatmul.mubr.bf16.gmra.mrb[240].mxu1 %v19956_v54 }
 0x529   :  { %11100 = vmatprep.mubr.msk.bf16.mxu1 %vm3911_vm1, %v19958_v62  ;;  %12199 = vmatpush3.bf16.msra.mxu1 %v13024_v37  ;;  %v11792_v19 = vpop.f32.mrb[136].mxu0  ;;  %v13028_v37 = vld [vmem:[#allocation7 + $0x820] sm:$0xff]  }
 0x52a   :  { %v5198_v47 = vsel %vm5177_vm2, %v5196_v21, %v5197_v52  ;;  %12200 = vmatprep.subr.bf16.mxu1 %v13025_v2  ;;  %v11793_v9 = vpop.f32.mrb[137].mxu0 }
 0x52b   :  { %v17325_v0 = vadd.f32 %v5198_v47, %v19959_v56  ;;  %v5154_v8 = vpop.f32.mrb[136].mxu1  ;;  %v17328_v17 = vadd.f32 %v11793_v9, %v11792_v19  ;;  %v11795_v35 = vpop.f32.mrb[138].mxu0  ;;  %v13029_v47 = vld [vmem:[#allocation7 + $0x868] sm:$0xff]   ;;  %v13034_v56 = vld [vmem:[#allocation7 + $0x880] sm:$0xff]  }
 0x52c   :  { %v5155_v18 = vadd.f32 %v5154_v8, %v17238_v23  ;;  %v5156_v15 = vpop.f32.mrb[137].mxu1  ;;  %v11796_v62 = vpop.f32.mrb[139].mxu0  ;;  %v19962_v19 = vld [vmem:[#allocation268_spill] sm:$0xff] }
 0x52d   :  { %19960 = vst [vmem:[#allocation191_spill] sm:$0xff] %v17325_v0  ;;  %v5157_v54 = vpop.f32.mrb[138].mxu1  ;;  %12201 = vmatpush3.bf16.msra.mxu1 %v13026_v22  ;;  %v17331_v2 = vadd.f32 %v11796_v62, %v11795_v35  ;;  %v19961_v0 = vld [vmem:[#allocation155_spill] sm:$0xff]  ;;  %v19963_v9 = vld [vmem:[#allocation40_spill] sm:$0xff]  ;;  %v19964_v15 = vld [vmem:[#allocation50_spill] sm:$0xff] }
 0x52e   :  { %v5158_v52 = vadd.f32 %v5157_v54, %v17244_v14  ;;  %v5159_v21 = vpop.f32.mrb[139].mxu1  ;;  %12202 = vmatprep.subr.bf16.mxu1 %v13027_v50  ;;  %7584 = vmatmul.mubr.bf16.vlgmr.msra.gmra.mrb[244].mxu0 %v19961_v0  ;;  %v5199_v23 = vrot.slane %v5155_v18, 1  ;;  %v13030_v14 = vld [vmem:[#allocation7 + $0x828] sm:$0xff]   ;;  %v13031_v62 = vld [vmem:[#allocation7 + $0x870] sm:$0xff]  }
 0x52f   :  { %7591 = vmatprep.mubr.bf16.mxu0 %v19963_v9  ;;  %12259 = vmatpush3.bf16.msra.mxu0 %v13034_v56  ;;  %v13036_v22 = vld [vmem:[#allocation7 + $0x888] sm:$0xff]   ;;  %v19965_v50 = vld [vmem:[#allocation86_spill] sm:$0xff] }
 0x530   :  { %v5200_v8 = vrot.slane %v5158_v52, 1  ;;  %6965 = vmatmul.mubr.bf16.gmra.mrb[244].mxu1 %v19962_v19  ;;  %12260 = vmatprep.subr.bf16.mxu0 %v13035_v38  ;;  %v13038_v19 = vld [vmem:[#allocation7 + $0x8d0] sm:$0xff]  }
 0x531   :  { %11101 = vmatprep.mubr.msk.bf16.mxu1 %vm3911_vm1, %v19964_v15  ;;  %12203 = vmatpush3.bf16.msra.mxu1 %v13028_v37  ;;  %v11798_v35 = vpop.f32.mrb[140].mxu0 }
 0x532   :  { %v5201_v54 = vsel %vm5177_vm2, %v5199_v23, %v5200_v8  ;;  %12204 = vmatprep.subr.bf16.mxu1 %v13029_v47  ;;  %v11799_v52 = vpop.f32.mrb[141].mxu0  ;;  %v13033_v23 = vld [vmem:[#allocation7 + $0x830] sm:$0xff]   ;;  %v13037_v8 = vld [vmem:[#allocation7 + $0x878] sm:$0xff]  }
 0x533   :  { %v17340_v21 = vadd.f32 %v5201_v54, %v19965_v50  ;;  %v11826_v18 = vpop.f32.mrb[140].mxu1  ;;  %v17342_v9 = vadd.f32 %v11799_v52, %v11798_v35  ;;  %v11801_v15 = vpop.f32.mrb[142].mxu0  ;;  %12261 = vmatpush3.bf16.msra.mxu0 %v13036_v22  ;;  %v13040_v54 = vld [vmem:[#allocation7 + $0x890] sm:$0xff]   ;;  %v13041_v35 = vld [vmem:[#allocation7 + $0x8d8] sm:$0xff]  }
 0x534   :  { %v11827_v0 = vpop.f32.mrb[141].mxu1  ;;  %v11802_v57 = vpop.f32.mrb[143].mxu0  ;;  %12262 = vmatprep.subr.bf16.mxu0 %v13038_v19  ;;  %v13043_v19 = vld [vmem:[#allocation7 + $0x8e0] sm:$0xff]  }
 0x535   :  { %v11828_v37 = vadd.f32 %v11827_v0, %v11826_v18  ;;  %v11829_v30 = vpop.f32.mrb[142].mxu1  ;;  %12205 = vmatpush3.bf16.msra.mxu1 %v13030_v14  ;;  %v17344_v47 = vadd.f32 %v11802_v57, %v11801_v15  ;;  %v13039_v57 = vld [vmem:[#allocation7 + $0x838] sm:$0xff]  }
 0x536   :  { %v11830_v56 = vpop.f32.mrb[143].mxu1  ;;  %12206 = vmatprep.subr.bf16.mxu1 %v13031_v62  ;;  %7592 = vmatmul.mubr.bf16.gmra.mrb[248].mxu0 %v19845_v41 }
 0x537   :  { %v5831_v50 = vadd.f32 %v11828_v37, %v17253_v7  ;;  %v11831_v38 = vadd.f32 %v11830_v56, %v11829_v30  ;;  %7599 = vmatprep.mubr.bf16.mxu0 %v15982_v55  ;;  %12263 = vmatpush3.bf16.msra.mxu0 %v13040_v54  ;;  %v13042_v7 = vld [vmem:[#allocation7 + $0x898] sm:$0xff]  }
 0x538   :  { %6973 = vmatmul.mubr.bf16.gmra.mrb[248].mxu1 %v16796_v11  ;;  %12264 = vmatprep.subr.bf16.mxu0 %v13041_v35  ;;  %v13046_v35 = vld [vmem:[#allocation7 + $0x8e8] sm:$0xff]  }
 0x539   :  { %v5834_v0 = vadd.f32 %v11831_v38, %v17256_v25  ;;  %11102 = vmatprep.mubr.msk.bf16.mxu1 %vm3911_vm1, %v16824_v10  ;;  %12207 = vmatpush3.bf16.msra.mxu1 %v13033_v23  ;;  %v11804_v15 = vpop.f32.mrb[144].mxu0 }
 0x53a   :  { %12208 = vmatprep.subr.bf16.mxu1 %v13037_v8  ;;  %v11805_v14 = vpop.f32.mrb[145].mxu0  ;;  %v13044_v8 = vld [vmem:[#allocation7 + $0x8a0] sm:$0xff]  }
 0x53b   :  { %v11832_v30 = vpop.f32.mrb[144].mxu1  ;;  %v17353_v62 = vadd.f32 %v11805_v14, %v11804_v15  ;;  %v11807_v18 = vpop.f32.mrb[146].mxu0  ;;  %12265 = vmatpush3.bf16.msra.mxu0 %v13042_v7  ;;  %v19966_v15 = vld [vmem:[#allocation79_spill] sm:$0xff]  ;;  %v13047_v14 = vld [vmem:[#allocation7 + $0x8a8] sm:$0xff]  }
 0x53c   :  { %v11833_v22 = vpop.f32.mrb[145].mxu1  ;;  %v11808_v25 = vpop.f32.mrb[147].mxu0  ;;  %12266 = vmatprep.subr.bf16.mxu0 %v13043_v19 }
 0x53d   :  { %v11834_v52 = vadd.f32 %v11833_v22, %v11832_v30  ;;  %v11835_v37 = vpop.f32.mrb[146].mxu1  ;;  %12209 = vmatpush3.bf16.msra.mxu1 %v13039_v57  ;;  %v17355_v56 = vadd.f32 %v11808_v25, %v11807_v18  ;;  %v19967_v30 = vld [vmem:[#allocation84_spill] sm:$0xff] }
 0x53e   :  { %v11836_v23 = vpop.f32.mrb[147].mxu1  ;;  %7842 = vmatprep.subr.bf16.mxu1 %v19521_v36  ;;  %7600 = vmatmul.mubr.bf16.gmra.mrb[252].mxu0 %v15976_v20 }
 0x53f   :  { %v5839_v54 = vadd.f32 %v11834_v52, %v17269_v43  ;;  %v11837_v38 = vadd.f32 %v11836_v23, %v11835_v37  ;;  %7607 = vmatprep.mubr.bf16.mxu0 %v19966_v15  ;;  %12267 = vmatpush3.bf16.msra.mxu0 %v13044_v8  ;;  %v13049_v43 = vld [vmem:[#allocation7 + $0x8f0] sm:$0xff]  }
 0x540   :  { %6981 = vmatmul.mubr.bf16.gmra.mrb[252].mxu1 %v16821_v45  ;;  %12268 = vmatprep.subr.bf16.mxu0 %v13046_v35  ;;  %v13051_v35 = vld [vmem:[#allocation7 + $0x8f8] sm:$0xff]  }
 0x541   :  { %v5842_v57 = vadd.f32 %v11837_v38, %v17272_v46  ;;  %11103 = vmatprep.mubr.msk.bf16.mxu1 %vm3911_vm1, %v19967_v30  ;;  %v11890_v7 = vpop.f32.mrb[148].mxu0  ;;  %v13050_v46 = vld [vmem:[#allocation7 + $0x8b0] sm:$0xff]  }
 0x542   :  { %v11891_v18 = vpop.f32.mrb[149].mxu0 }
 0x543   :  { %v11838_v22 = vpop.f32.mrb[148].mxu1  ;;  %v11892_v37 = vadd.f32 %v11891_v18, %v11890_v7  ;;  %v11893_v19 = vpop.f32.mrb[150].mxu0  ;;  %12269 = vmatpush3.bf16.msra.mxu0 %v13047_v14  ;;  %v13060_v14 = vld [vmem:[#allocation7 + $0x9a0] sm:$0xff]  }
 0x544   :  { %v11839_v52 = vpop.f32.mrb[149].mxu1  ;;  %v11894_v45 = vpop.f32.mrb[151].mxu0  ;;  %12270 = vmatprep.subr.bf16.mxu0 %v13049_v43 }
 0x545   :  { %v11840_v25 = vadd.f32 %v11839_v52, %v11838_v22  ;;  %v11841_v23 = vpop.f32.mrb[150].mxu1  ;;  %v11895_v15 = vadd.f32 %v11894_v45, %v11893_v19  ;;  %v17365_v38 = vadd.f32 %v11892_v37, %v5831_v50  ;;  %v13053_v50 = vld [vmem:[#allocation7 + $0x8b8] sm:$0xff]  }
 0x546   :  { %v11842_v20 = vpop.f32.mrb[151].mxu1  ;;  %7608 = vmatmul.mubr.bf16.gmra.mrb[0].mxu0 %v19856_v16 }
 0x547   :  { %v5847_v30 = vadd.f32 %v11840_v25, %v17283_v32  ;;  %v11843_v8 = vadd.f32 %v11842_v20, %v11841_v23  ;;  %7615 = vmatprep.mubr.bf16.mxu0 %v19857_v24  ;;  %v17371_v7 = vadd.f32 %v11895_v15, %v5834_v0  ;;  %12271 = vmatpush3.bf16.msra.mxu0 %v13050_v46 }
 0x548   :  { %6989 = vmatmul.mubr.bf16.gmra.mrb[0].mxu1 %v16833_v26  ;;  %12272 = vmatprep.subr.bf16.mxu0 %v13051_v35 }
 0x549   :  { %v5850_v22 = vadd.f32 %v11843_v8, %v17286_v49  ;;  %11104 = vmatprep.mubr.msk.bf16.mxu1 %vm3911_vm1, %v16860_v53  ;;  %v11896_v45 = vpop.f32.mrb[152].mxu0 }
 0x54a   :  { %v11897_v20 = vpop.f32.mrb[153].mxu0 }
 0x54b   :  { %v11844_v32 = vpop.f32.mrb[152].mxu1  ;;  %v11898_v43 = vadd.f32 %v11897_v20, %v11896_v45  ;;  %v11899_v52 = vpop.f32.mrb[154].mxu0  ;;  %12273 = vmatpush3.bf16.msra.mxu0 %v13053_v50 }
 0x54c   :  { %v11845_v18 = vpop.f32.mrb[153].mxu1  ;;  %v11900_v25 = vpop.f32.mrb[155].mxu0  ;;  %12322 = vmatprep.subr.bf16.mxu0 %v13060_v14 }
 0x54d   :  { %v11846_v37 = vadd.f32 %v11845_v18, %v11844_v32  ;;  %v11847_v19 = vpop.f32.mrb[154].mxu1  ;;  %v11901_v15 = vadd.f32 %v11900_v25, %v11899_v52  ;;  %v17376_v49 = vadd.f32 %v11898_v43, %v5839_v54 }
 0x54e   :  { %v11848_v0 = vpop.f32.mrb[155].mxu1  ;;  %7616 = vmatmul.mubr.bf16.gmra.mrb[4].mxu0 %v19858_v40 }
 0x54f   :  { %v5855_v23 = vadd.f32 %v11846_v37, %v17298_v34  ;;  %v11849_v8 = vadd.f32 %v11848_v0, %v11847_v19  ;;  %7623 = vmatprep.mubr.bf16.mxu0 %v19859_v33  ;;  %v17382_v46 = vadd.f32 %v11901_v15, %v5842_v57 }
 0x550   :  { %6997 = vmatmul.mubr.bf16.gmra.mrb[4].mxu1 %v16857_v4 }
 0x551   :  { %v5858_v35 = vadd.f32 %v11849_v8, %v17301_v48  ;;  %11105 = vmatprep.mubr.msk.bf16.mxu1 %vm3911_vm1, %v16869_v6  ;;  %v11902_v45 = vpop.f32.mrb[156].mxu0 }
 0x552   :  { %v11903_v50 = vpop.f32.mrb[157].mxu0 }
 0x553   :  { %v11850_v54 = vpop.f32.mrb[156].mxu1  ;;  %v11904_v34 = vadd.f32 %v11903_v50, %v11902_v45  ;;  %v11905_v20 = vpop.f32.mrb[158].mxu0 }
 0x554   :  { %v11851_v32 = vpop.f32.mrb[157].mxu1  ;;  %v11906_v14 = vpop.f32.mrb[159].mxu0 }
 0x555   :  { %v11852_v18 = vadd.f32 %v11851_v32, %v11850_v54  ;;  %v11853_v43 = vpop.f32.mrb[158].mxu1  ;;  %v11907_v37 = vadd.f32 %v11906_v14, %v11905_v20  ;;  %v17387_v19 = vadd.f32 %v11904_v34, %v5847_v30  ;;  %v13045_v20 = vld [vmem:[#allocation7 + $0x900] sm:$0xff]  }
 0x556   :  { %v11854_v52 = vpop.f32.mrb[159].mxu1  ;;  %7624 = vmatmul.mubr.bf16.gmra.mrb[8].mxu0 %v19860_v58 }
 0x557   :  { %v5863_v57 = vadd.f32 %v11852_v18, %v17313_v27  ;;  %v11855_v25 = vadd.f32 %v11854_v52, %v11853_v43  ;;  %7631 = vmatprep.mubr.bf16.mxu0 %v19861_v60  ;;  %v17393_v48 = vadd.f32 %v11907_v37, %v5850_v22 }
 0x558   :  { %7005 = vmatmul.mubr.bf16.gmra.mrb[8].mxu1 %v16866_v63 }
 0x559   :  { %v5866_v0 = vadd.f32 %v11855_v25, %v17316_v12  ;;  %7680 = vmatprep.mubr.bf16.mxu1 %v19862_v1  ;;  %v11908_v15 = vpop.f32.mrb[160].mxu0  ;;  %v19968_v25 = vld [vmem:[#allocation91_spill] sm:$0xff] }
 0x55a   :  { %v11909_v45 = vpop.f32.mrb[161].mxu0 }
 0x55b   :  { %v11856_v8 = vpop.f32.mrb[160].mxu1  ;;  %v11910_v54 = vadd.f32 %v11909_v45, %v11908_v15  ;;  %v11911_v50 = vpop.f32.mrb[162].mxu0  ;;  %v13048_v15 = vld [vmem:[#allocation7 + $0x908] sm:$0xff]  }
 0x55c   :  { %v11857_v30 = vpop.f32.mrb[161].mxu1  ;;  %v11912_v34 = vpop.f32.mrb[163].mxu0 }
 0x55d   :  { %v11858_v27 = vadd.f32 %v11857_v30, %v11856_v8  ;;  %v11859_v32 = vpop.f32.mrb[162].mxu1  ;;  %v11913_v43 = vadd.f32 %v11912_v34, %v11911_v50  ;;  %v17397_v14 = vadd.f32 %v11910_v54, %v5855_v23 }
 0x55e   :  { %v11860_v18 = vpop.f32.mrb[163].mxu1  ;;  %7632 = vmatmul.mubr.bf16.gmra.mrb[12].mxu0 %v19863_v51 }
 0x55f   :  { %v5871_v22 = vadd.f32 %v11858_v27, %v17328_v17  ;;  %v11861_v52 = vadd.f32 %v11860_v18, %v11859_v32  ;;  %7639 = vmatprep.mubr.bf16.mxu0 %v19865_v13  ;;  %v17403_v12 = vadd.f32 %v11913_v43, %v5858_v35  ;;  %v13052_v35 = vld [vmem:[#allocation7 + $0x910] sm:$0xff]  }
 0x560   :  { %7681 = vmatmul.mubr.bf16.vlgmr.msra.gmra.mrb[12].mxu1 %v19864_v3 }
 0x561   :  { %v5874_v37 = vadd.f32 %v11861_v52, %v17331_v2  ;;  %7688 = vmatprep.mubr.bf16.mxu1 %v19968_v25  ;;  %7843 = vmatpush1.bf16.msra.mxu1 %v13045_v20  ;;  %v11914_v8 = vpop.f32.mrb[164].mxu0  ;;  %v19969_v52 = vld [vmem:[#allocation169_spill] sm:$0xff] }
 0x562   :  { %7844 = vmatprep.subr.bf16.mxu1 %v19521_v36  ;;  %v11915_v17 = vpop.f32.mrb[165].mxu0  ;;  %v19970_v25 = vld [vmem:[#allocation89_spill] sm:$0xff] }
 0x563   :  { %v11862_v23 = vpop.f32.mrb[164].mxu1  ;;  %v11916_v30 = vadd.f32 %v11915_v17, %v11914_v8  ;;  %v11917_v54 = vpop.f32.mrb[166].mxu0  ;;  %v19971_v8 = vld [vmem:[#allocation94_spill] sm:$0xff]  ;;  %v19972_v17 = vld [vmem:[#allocation175_spill] sm:$0xff] }
 0x564   :  { %v11863_v45 = vpop.f32.mrb[165].mxu1  ;;  %v11918_v32 = vpop.f32.mrb[167].mxu0 }
 0x565   :  { %v11864_v50 = vadd.f32 %v11863_v45, %v11862_v23  ;;  %v11865_v27 = vpop.f32.mrb[166].mxu1  ;;  %7845 = vmatpush1.bf16.msra.mxu1 %v13048_v15  ;;  %v11919_v18 = vadd.f32 %v11918_v32, %v11917_v54  ;;  %v17409_v2 = vadd.f32 %v11916_v30, %v5863_v57  ;;  %v13054_v45 = vld [vmem:[#allocation7 + $0x918] sm:$0xff]  }
 0x566   :  { %v11866_v34 = vpop.f32.mrb[167].mxu1  ;;  %7846 = vmatprep.subr.bf16.mxu1 %v19521_v36  ;;  %7640 = vmatmul.mubr.bf16.gmra.mrb[16].mxu0 %v19969_v52  ;;  %v19973_v52 = vld [vmem:[#allocation93_spill] sm:$0xff] }
 0x567   :  { %v5879_v20 = vadd.f32 %v11864_v50, %v17342_v9  ;;  %v11867_v43 = vadd.f32 %v11866_v34, %v11865_v27  ;;  %7777 = vmatprep.mubr.bf16.mxu0 %v19971_v8  ;;  %v17415_v23 = vadd.f32 %v11919_v18, %v5866_v0  ;;  %v13055_v0 = vld [vmem:[#allocation7 + $0x920] sm:$0xff]  }
 0x568   :  { %7689 = vmatmul.mubr.bf16.gmra.mrb[16].mxu1 %v19970_v25 }
 0x569   :  { %v17418_v15 = vadd.f32 %v11867_v43, %v17344_v47  ;;  %7696 = vmatprep.mubr.bf16.mxu1 %v19972_v17  ;;  %7847 = vmatpush1.bf16.msra.mxu1 %v13052_v35  ;;  %v11920_v57 = vpop.f32.mrb[168].mxu0  ;;  %v13062_v43 = vld [vmem:[#allocation7 + $0x960] sm:$0xff]  }
 0x56a   :  { %7848 = vmatprep.subr.bf16.mxu1 %v19521_v36  ;;  %v11921_v30 = vpop.f32.mrb[169].mxu0 }
 0x56b   :  { %v11868_v9 = vpop.f32.mrb[168].mxu1  ;;  %v11922_v50 = vadd.f32 %v11921_v30, %v11920_v57  ;;  %v11923_v27 = vpop.f32.mrb[170].mxu0  ;;  %v13063_v57 = vld [vmem:[#allocation7 + $0x9a8] sm:$0xff]  }
 0x56c   :  { %v11869_v54 = vpop.f32.mrb[169].mxu1  ;;  %v11924_v8 = vpop.f32.mrb[171].mxu0  ;;  %v19974_v30 = vld [vmem:[#allocation173_spill] sm:$0xff] }
 0x56d   :  { %v11870_v32 = vadd.f32 %v11869_v54, %v11868_v9  ;;  %v11871_v34 = vpop.f32.mrb[170].mxu1  ;;  %7849 = vmatpush1.bf16.msra.mxu1 %v13054_v45  ;;  %v11925_v47 = vadd.f32 %v11924_v8, %v11923_v27  ;;  %v17423_v35 = vadd.f32 %v11922_v50, %v5871_v22  ;;  %v19975_v9 = vld [vmem:[#allocation98_spill] sm:$0xff]  ;;  %v19976_v54 = vld [vmem:[#allocation179_spill] sm:$0xff]  ;;  %v13056_v22 = vld [vmem:[#allocation7 + $0x928] sm:$0xff]  }
 0x56e   :  { %v11872_v18 = vpop.f32.mrb[171].mxu1  ;;  %7850 = vmatprep.subr.bf16.mxu1 %v19521_v36  ;;  %7778 = vmatmul.mubr.bf16.vlgmr.msra.gmra.mrb[20].mxu0 %v19973_v52 }
 0x56f   :  { %v17426_v17 = vadd.f32 %v11870_v32, %v17353_v62  ;;  %v11873_v25 = vadd.f32 %v11872_v18, %v11871_v34  ;;  %7785 = vmatprep.mubr.bf16.mxu0 %v19975_v9  ;;  %v17431_v45 = vadd.f32 %v11925_v47, %v5874_v37  ;;  %12323 = vmatpush3.bf16.msra.mxu0 %v13062_v43  ;;  %v13064_v62 = vld [vmem:[#allocation7 + $0x968] sm:$0xff]   ;;  %v13066_v34 = vld [vmem:[#allocation7 + $0x9b0] sm:$0xff]  }
 0x570   :  { %7697 = vmatmul.mubr.bf16.gmra.mrb[20].mxu1 %v19974_v30  ;;  %12324 = vmatprep.subr.bf16.mxu0 %v13063_v57  ;;  %v13067_v43 = vld [vmem:[#allocation7 + $0x970] sm:$0xff]  }
 0x571   :  { %v17434_v8 = vadd.f32 %v11873_v25, %v17355_v56  ;;  %7704 = vmatprep.mubr.bf16.mxu1 %v19976_v54  ;;  %7851 = vmatpush1.bf16.msra.mxu1 %v13055_v0  ;;  %v11926_v50 = vpop.f32.mrb[172].mxu0  ;;  %v13057_v54 = vld [vmem:[#allocation7 + $0x930] sm:$0xff]  }
 0x572   :  { %7852 = vmatprep.subr.bf16.mxu1 %v19521_v36  ;;  %v11927_v32 = vpop.f32.mrb[173].mxu0 }
 0x573   :  { %v6024_v27 = vpop.f32.mrb[172].mxu1  ;;  %v11928_v37 = vadd.f32 %v11927_v32, %v11926_v50  ;;  %v11929_v9 = vpop.f32.mrb[174].mxu0  ;;  %12325 = vmatpush3.bf16.msra.mxu0 %v13064_v62  ;;  %v13070_v62 = vld [vmem:[#allocation7 + $0x978] sm:$0xff]  }
 0x574   :  { %v6025_v18 = vadd.f32 %v6024_v27, %v17365_v38  ;;  %v6026_v47 = vpop.f32.mrb[173].mxu1  ;;  %v11930_v25 = vpop.f32.mrb[175].mxu0  ;;  %12326 = vmatprep.subr.bf16.mxu0 %v13066_v34  ;;  %v13069_v38 = vld [vmem:[#allocation7 + $0x9b8] sm:$0xff]   ;;  %v13071_v34 = vld [vmem:[#allocation7 + $0x9c0] sm:$0xff]  }
 0x575   :  { %v6027_v56 = vpop.f32.mrb[174].mxu1  ;;  %7853 = vmatpush1.bf16.msra.mxu1 %v13056_v22  ;;  %v11931_v30 = vadd.f32 %v11930_v25, %v11929_v9  ;;  %v17441_v13 = vadd.f32 %v11928_v37, %v5879_v20  ;;  %v13058_v9 = vld [vmem:[#allocation7 + $0x938] sm:$0xff]   ;;  %v13059_v25 = vld [vmem:[#allocation7 + $0x940] sm:$0xff]  }
 0x576   :  { %v6028_v0 = vadd.f32 %v6027_v56, %v17371_v7  ;;  %v6029_v52 = vpop.f32.mrb[175].mxu1  ;;  %7854 = vmatprep.subr.bf16.mxu1 %v19521_v36  ;;  %7786 = vmatmul.mubr.bf16.gmra.mrb[24].mxu0 %v19894_v28  ;;  %v6104_v57 = vrot.slane %v6025_v18, 2 }
 0x577   :  { %7793 = vmatprep.mubr.bf16.mxu0 %v19928_v29  ;;  %v17447_v7 = vadd.f32 %v11931_v30, %v17418_v15  ;;  %v19977_v52 = vld [vmem:[#allocation181_spill] sm:$0xff]  ;;  %12327 = vmatpush3.bf16.msra.mxu0 %v13067_v43 }
 0x578   :  { %v6105_v50 = vrot.slane %v6028_v0, 2  ;;  %7705 = vmatmul.mubr.bf16.gmra.mrb[24].mxu1 %v19895_v5  ;;  %12328 = vmatprep.subr.bf16.mxu0 %v13069_v38  ;;  %v13073_v38 = vld [vmem:[#allocation7 + $0x980] sm:$0xff]  }
 0x579   :  { %7712 = vmatprep.mubr.bf16.mxu1 %v19977_v52  ;;  %7855 = vmatpush1.bf16.msra.mxu1 %v13057_v54  ;;  %v11932_v22 = vpop.f32.mrb[176].mxu0 }
 0x57a   :  { %v6106_v20 = vsel %vm6103_vm3, %v6104_v57, %v6105_v50  ;;  %7856 = vmatprep.subr.bf16.mxu1 %v19521_v36  ;;  %v11933_v32 = vpop.f32.mrb[177].mxu0 }
 0x57b   :  { %v6032_v27 = vpop.f32.mrb[176].mxu1  ;;  %v17453_v18 = vadd.f32 %v6106_v20, %v17232_v61  ;;  %v11934_v30 = vadd.f32 %v11933_v32, %v11932_v22  ;;  %v11935_v54 = vpop.f32.mrb[178].mxu0  ;;  %12329 = vmatpush3.bf16.msra.mxu0 %v13070_v62  ;;  %v13061_v22 = vld [vmem:[#allocation7 + $0x948] sm:$0xff]  }
 0x57c   :  { %v6033_v15 = vadd.f32 %v6032_v27, %v17376_v49  ;;  %v6034_v37 = vpop.f32.mrb[177].mxu1  ;;  %v11936_v56 = vpop.f32.mrb[179].mxu0  ;;  %12330 = vmatprep.subr.bf16.mxu0 %v13071_v34  ;;  %v13075_v49 = vld [vmem:[#allocation7 + $0x9c8] sm:$0xff]  }
 0x57d   :  { %v6035_v47 = vpop.f32.mrb[178].mxu1  ;;  %7857 = vmatpush1.bf16.msra.mxu1 %v13058_v9  ;;  %v11937_v43 = vadd.f32 %v11936_v56, %v11935_v54  ;;  %v17459_v61 = vadd.f32 %v11934_v30, %v17426_v17  ;;  %v19978_v9 = vld [vmem:[#allocation184_spill] sm:$0xff] }
 0x57e   :  { %v6036_v0 = vadd.f32 %v6035_v47, %v17382_v46  ;;  %v6037_v57 = vpop.f32.mrb[179].mxu1  ;;  %7858 = vmatprep.subr.bf16.mxu1 %v19521_v36  ;;  %7794 = vmatmul.mubr.bf16.gmra.mrb[28].mxu0 %v19899_v42  ;;  %v6107_v50 = vrot.slane %v6033_v15, 2  ;;  %v13076_v27 = vld [vmem:[#allocation7 + $0x988] sm:$0xff]   ;;  %v13077_v15 = vld [vmem:[#allocation7 + $0x9d0] sm:$0xff]  }
 0x57f   :  { %7801 = vmatprep.mubr.bf16.mxu0 %v19931_v31  ;;  %v17465_v46 = vadd.f32 %v11937_v43, %v17434_v8  ;;  %12331 = vmatpush3.bf16.msra.mxu0 %v13073_v38  ;;  %v13079_v38 = vld [vmem:[#allocation7 + $0x990] sm:$0xff]  }
 0x580   :  { %v6108_v20 = vrot.slane %v6036_v0, 2  ;;  %7713 = vmatmul.mubr.bf16.gmra.mrb[28].mxu1 %v19880_v39  ;;  %12332 = vmatprep.subr.bf16.mxu0 %v13075_v49  ;;  %v13065_v0 = vld [vmem:[#allocation7 + $0x950] sm:$0xff]  }
 0x581   :  { %7720 = vmatprep.mubr.bf16.mxu1 %v19978_v9  ;;  %7859 = vmatpush1.bf16.msra.mxu1 %v13059_v25  ;;  %v11954_v62 = vpop.f32.mrb[180].mxu0 }
 0x582   :  { %v6109_v17 = vsel %vm6103_vm3, %v6107_v50, %v6108_v20  ;;  %7860 = vmatprep.subr.bf16.mxu1 %v19521_v36  ;;  %v11955_v34 = vpop.f32.mrb[181].mxu0  ;;  %v19979_v20 = vld [vmem:[#allocation183_spill] sm:$0xff] }
 0x583   :  { %v6040_v32 = vpop.f32.mrb[180].mxu1  ;;  %v17471_v30 = vadd.f32 %v6109_v17, %v17250_v59  ;;  %v11957_v54 = vpop.f32.mrb[182].mxu0  ;;  %v17474_v47 = vadd.f32 %v11955_v34, %v11954_v62  ;;  %12333 = vmatpush3.bf16.msra.mxu0 %v13076_v27  ;;  %v13081_v59 = vld [vmem:[#allocation7 + $0x9d8] sm:$0xff]  }
 0x584   :  { %v6041_v8 = vadd.f32 %v6040_v32, %v17387_v19  ;;  %v6042_v37 = vpop.f32.mrb[181].mxu1  ;;  %v11958_v25 = vpop.f32.mrb[183].mxu0  ;;  %12334 = vmatprep.subr.bf16.mxu0 %v13077_v15  ;;  %v19980_v17 = vld [vmem:[#allocation90_spill] sm:$0xff]  ;;  %v13072_v32 = vld [vmem:[#allocation7 + $0xa20] sm:$0xff]  }
 0x585   :  { %v6043_v56 = vpop.f32.mrb[182].mxu1  ;;  %7861 = vmatpush1.bf16.msra.mxu1 %v13061_v22  ;;  %v17478_v49 = vadd.f32 %v11958_v25, %v11957_v54  ;;  %v19981_v22 = vld [vmem:[#allocation189_spill] sm:$0xff]  ;;  %v13082_v34 = vld [vmem:[#allocation7 + $0x998] sm:$0xff]  }
 0x586   :  { %v6044_v43 = vadd.f32 %v6043_v56, %v17393_v48  ;;  %v6045_v57 = vpop.f32.mrb[183].mxu1  ;;  %7862 = vmatprep.subr.bf16.mxu1 %v19521_v36  ;;  %7802 = vmatmul.mubr.bf16.gmra.mrb[32].mxu0 %v19903_v44  ;;  %v6110_v19 = vrot.slane %v6041_v8, 2  ;;  %v13068_v48 = vld [vmem:[#allocation7 + $0x958] sm:$0xff]   ;;  %v13092_v8 = vld [vmem:[#allocation7 + $0xaa0] sm:$0xff]  }
 0x587   :  { %7809 = vmatprep.mubr.bf16.mxu0 %v19980_v17  ;;  %12335 = vmatpush3.bf16.msra.mxu0 %v13079_v38  ;;  %v19982_v54 = vld [vmem:[#allocation54_spill] sm:$0xff] }
 0x588   :  { %v6111_v50 = vrot.slane %v6044_v43, 2  ;;  %7721 = vmatmul.mubr.bf16.gmra.mrb[32].mxu1 %v19979_v20  ;;  %12336 = vmatprep.subr.bf16.mxu0 %v13081_v59  ;;  %v19984_v59 = vld [vmem:[#allocation75_spill] sm:$0xff] }
 0x589   :  { %7728 = vmatprep.mubr.bf16.mxu1 %v19981_v22  ;;  %7863 = vmatpush1.bf16.msra.mxu1 %v13065_v0  ;;  %v11960_v27 = vpop.f32.mrb[184].mxu0 }
 0x58a   :  { %v6112_v62 = vsel %vm6103_vm3, %v6110_v19, %v6111_v50  ;;  %7864 = vmatprep.subr.bf16.mxu1 %v19521_v36  ;;  %v11961_v37 = vpop.f32.mrb[185].mxu0 }
 0x58b   :  { %v6048_v15 = vpop.f32.mrb[184].mxu1  ;;  %v17487_v56 = vadd.f32 %v6112_v62, %v19982_v54  ;;  %v17490_v0 = vadd.f32 %v11961_v37, %v11960_v27  ;;  %v11963_v57 = vpop.f32.mrb[186].mxu0  ;;  %12337 = vmatpush3.bf16.msra.mxu0 %v13082_v34  ;;  %v19986_v27 = vld [vmem:[#allocation48_spill] sm:$0xff] }
 0x58c   :  { %v6049_v25 = vadd.f32 %v6048_v15, %v17397_v14  ;;  %v6050_v43 = vpop.f32.mrb[185].mxu1  ;;  %v11964_v50 = vpop.f32.mrb[187].mxu0  ;;  %12450 = vmatprep.subr.bf16.mxu0 %v13092_v8  ;;  %v19985_v14 = vld [vmem:[#allocation187_spill] sm:$0xff] }
 0x58d   :  { %19983 = vst [vmem:[#allocation103_spill] sm:$0xff] %v17487_v56  ;;  %v6051_v19 = vpop.f32.mrb[186].mxu1  ;;  %7865 = vmatpush1.bf16.msra.mxu1 %v13068_v48  ;;  %v17493_v17 = vadd.f32 %v11964_v50, %v11963_v57  ;;  %v19987_v15 = vld [vmem:[#allocation47_spill] sm:$0xff]  ;;  %v19988_v57 = vld [vmem:[#allocation101_spill] sm:$0xff]  ;;  %v20002_v56 = vld [vmem:[#allocation190_spill] sm:$0xff] }
 0x58e   :  { %v6052_v22 = vadd.f32 %v6051_v19, %v17403_v12  ;;  %v6053_v38 = vpop.f32.mrb[187].mxu1  ;;  %12386 = vmatprep.subr.bf16.mxu1 %v13072_v32  ;;  %7810 = vmatmul.mubr.bf16.gmra.mrb[36].mxu0 %v19984_v59  ;;  %v6113_v62 = vrot.slane %v6049_v25, 2  ;;  %v19991_v59 = vld [vmem:[#allocation46_spill] sm:$0xff] }
 0x58f   :  { %7817 = vmatprep.mubr.bf16.mxu0 %v19986_v27 }
 0x590   :  { %v6114_v54 = vrot.slane %v6052_v22, 2  ;;  %7729 = vmatmul.mubr.bf16.gmra.mrb[36].mxu1 %v19985_v14 }
 0x591   :  { %7736 = vmatprep.mubr.bf16.mxu1 %v19987_v15  ;;  %v11966_v37 = vpop.f32.mrb[188].mxu0 }
 0x592   :  { %v6115_v48 = vsel %vm6103_vm3, %v6113_v62, %v6114_v54  ;;  %v11967_v43 = vpop.f32.mrb[189].mxu0  ;;  %v19990_v62 = vld [vmem:[#allocation92_spill] sm:$0xff] }
 0x593   :  { %v6056_v12 = vpop.f32.mrb[188].mxu1  ;;  %v17501_v19 = vadd.f32 %v6115_v48, %v19988_v57  ;;  %v17504_v8 = vadd.f32 %v11967_v43, %v11966_v37  ;;  %v11969_v22 = vpop.f32.mrb[190].mxu0  ;;  %v19992_v48 = vld [vmem:[#allocation265_spill] sm:$0xff] }
 0x594   :  { %v6057_v32 = vadd.f32 %v6056_v12, %v17409_v2  ;;  %v6058_v34 = vpop.f32.mrb[189].mxu1  ;;  %v11970_v50 = vpop.f32.mrb[191].mxu0  ;;  %v19993_v2 = vld [vmem:[#allocation95_spill] sm:$0xff] }
 0x595   :  { %19989 = vst [vmem:[#allocation192_spill] sm:$0xff] %v17501_v19  ;;  %v6059_v25 = vpop.f32.mrb[190].mxu1  ;;  %v17507_v15 = vadd.f32 %v11970_v50, %v11969_v22 }
 0x596   :  { %v6060_v38 = vadd.f32 %v6059_v25, %v17415_v23  ;;  %v6061_v27 = vpop.f32.mrb[191].mxu1  ;;  %7818 = vmatmul.mubr.bf16.gmra.mrb[40].mxu0 %v19990_v62  ;;  %v6116_v54 = vrot.slane %v6057_v32, 2  ;;  %v19994_v23 = vld [vmem:[#allocation55_spill] sm:$0xff] }
 0x597   :  { %7825 = vmatprep.mubr.bf16.mxu0 %v19992_v48  ;;  %v13074_v48 = vld [vmem:[#allocation7 + $0x9e0] sm:$0xff]  }
 0x598   :  { %v6117_v14 = vrot.slane %v6060_v38, 2  ;;  %7737 = vmatmul.mubr.bf16.gmra.mrb[40].mxu1 %v19991_v59 }
 0x599   :  { %11166 = vmatprep.mubr.msk.bf16.mxu1 %vm3911_vm1, %v19993_v2  ;;  %v11972_v12 = vpop.f32.mrb[192].mxu0 }
 0x59a   :  { %v6118_v37 = vsel %vm6103_vm3, %v6116_v54, %v6117_v14  ;;  %v11973_v57 = vpop.f32.mrb[193].mxu0  ;;  %v13078_v14 = vld [vmem:[#allocation7 + $0xa28] sm:$0xff]  }
 0x59b   :  { %v6064_v43 = vpop.f32.mrb[192].mxu1  ;;  %v17516_v27 = vadd.f32 %v6118_v37, %v19994_v23  ;;  %v17519_v32 = vadd.f32 %v11973_v57, %v11972_v12  ;;  %v11975_v25 = vpop.f32.mrb[194].mxu0  ;;  %v19996_v54 = vld [vmem:[#allocation80_spill] sm:$0xff]  ;;  %v19997_v23 = vld [vmem:[#allocation49_spill] sm:$0xff] }
 0x59c   :  { %v6065_v34 = vadd.f32 %v6064_v43, %v17423_v35  ;;  %v6066_v22 = vpop.f32.mrb[193].mxu1  ;;  %v11976_v38 = vpop.f32.mrb[195].mxu0  ;;  %v19998_v35 = vld [vmem:[#allocation266_spill] sm:$0xff]  ;;  %v19999_v12 = vld [vmem:[#allocation269_spill] sm:$0xff] }
 0x59d   :  { %19995 = vst [vmem:[#allocation274_spill] sm:$0xff] %v17516_v27  ;;  %v6067_v50 = vpop.f32.mrb[194].mxu1  ;;  %v17522_v62 = vadd.f32 %v11976_v38, %v11975_v25  ;;  %v13080_v43 = vld [vmem:[#allocation7 + $0x9e8] sm:$0xff]   ;;  %v13085_v27 = vld [vmem:[#allocation7 + $0xa38] sm:$0xff]  }
 0x59e   :  { %v6068_v59 = vadd.f32 %v6067_v50, %v17431_v45  ;;  %v6069_v2 = vpop.f32.mrb[195].mxu1  ;;  %7826 = vmatmul.mubr.bf16.gmra.mrb[44].mxu0 %v19996_v54  ;;  %v6119_v19 = vrot.slane %v6065_v34, 2  ;;  %v20000_v50 = vld [vmem:[#allocation88_spill] sm:$0xff] }
 0x59f   :  { %7833 = vmatprep.mubr.bf16.mxu0 %v19998_v35  ;;  %v13083_v2 = vld [vmem:[#allocation7 + $0xa30] sm:$0xff]  }
 0x5a0   :  { %v6120_v37 = vrot.slane %v6068_v59, 2  ;;  %7875 = vmatmul.mubr.bf16.vlgmr.msra.gmra.mrb[44].mxu1 %v19997_v23 }
 0x5a1   :  { %11167 = vmatprep.mubr.msk.bf16.mxu1 %vm3911_vm1, %v19999_v12  ;;  %12387 = vmatpush3.bf16.msra.mxu1 %v13074_v48  ;;  %v11978_v45 = vpop.f32.mrb[196].mxu0  ;;  %v13084_v48 = vld [vmem:[#allocation7 + $0x9f0] sm:$0xff]  }
 0x5a2   :  { %v6121_v57 = vsel %vm6103_vm3, %v6119_v19, %v6120_v37  ;;  %12388 = vmatprep.subr.bf16.mxu1 %v13078_v14  ;;  %v11979_v25 = vpop.f32.mrb[197].mxu0 }
 0x5a3   :  { %v6072_v22 = vpop.f32.mrb[196].mxu1  ;;  %v17531_v38 = vadd.f32 %v6121_v57, %v20000_v50  ;;  %v17534_v23 = vadd.f32 %v11979_v25, %v11978_v45  ;;  %v11981_v35 = vpop.f32.mrb[198].mxu0  ;;  %v20004_v45 = vld [vmem:[#allocation76_spill] sm:$0xff]  ;;  %v20006_v25 = vld [vmem:[#allocation191_spill] sm:$0xff] }
 0x5a4   :  { %v6073_v59 = vadd.f32 %v6072_v22, %v17441_v13  ;;  %v6074_v34 = vpop.f32.mrb[197].mxu1  ;;  %v11982_v12 = vpop.f32.mrb[199].mxu0  ;;  %v20003_v13 = vld [vmem:[#allocation267_spill] sm:$0xff]  ;;  %v20005_v22 = vld [vmem:[#allocation82_spill] sm:$0xff] }
 0x5a5   :  { %20001 = vst [vmem:[#allocation275_spill] sm:$0xff] %v17531_v38  ;;  %v6075_v54 = vpop.f32.mrb[198].mxu1  ;;  %12389 = vmatpush3.bf16.msra.mxu1 %v13080_v43  ;;  %v17537_v14 = vadd.f32 %v11982_v12, %v11981_v35  ;;  %v13086_v43 = vld [vmem:[#allocation7 + $0x9f8] sm:$0xff]   ;;  %v13087_v35 = vld [vmem:[#allocation7 + $0xa40] sm:$0xff]  }
 0x5a6   :  { %v6076_v19 = vadd.f32 %v6075_v54, %v17447_v7  ;;  %v6077_v37 = vpop.f32.mrb[199].mxu1  ;;  %12390 = vmatprep.subr.bf16.mxu1 %v13083_v2  ;;  %7834 = vmatmul.mubr.bf16.gmra.mrb[48].mxu0 %v20002_v56  ;;  %v6122_v57 = vrot.slane %v6073_v59, 2  ;;  %v13089_v56 = vld [vmem:[#allocation7 + $0xa48] sm:$0xff]   ;;  %v13094_v38 = vld [vmem:[#allocation7 + $0xa60] sm:$0xff]  }
 0x5a7   :  { %8509 = vmatprep.mubr.bf16.mxu0 %v20004_v45 }
 0x5a8   :  { %v6123_v50 = vrot.slane %v6076_v19, 2  ;;  %7883 = vmatmul.mubr.bf16.gmra.mrb[48].mxu1 %v20003_v13 }
 0x5a9   :  { %11168 = vmatprep.mubr.msk.bf16.mxu1 %vm3911_vm1, %v20005_v22  ;;  %12391 = vmatpush3.bf16.msra.mxu1 %v13084_v48  ;;  %v11984_v54 = vpop.f32.mrb[200].mxu0  ;;  %v13088_v48 = vld [vmem:[#allocation7 + $0xa00] sm:$0xff]  }
 0x5aa   :  { %v6124_v7 = vsel %vm6103_vm3, %v6122_v57, %v6123_v50  ;;  %12392 = vmatprep.subr.bf16.mxu1 %v13085_v27  ;;  %v11985_v2 = vpop.f32.mrb[201].mxu0 }
 0x5ab   :  { %v6080_v12 = vpop.f32.mrb[200].mxu1  ;;  %v17546_v34 = vadd.f32 %v6124_v7, %v20006_v25  ;;  %v17549_v37 = vadd.f32 %v11985_v2, %v11984_v54  ;;  %v11987_v45 = vpop.f32.mrb[202].mxu0  ;;  %v20008_v7 = vld [vmem:[#allocation155_spill] sm:$0xff]  ;;  %v13095_v25 = vld [vmem:[#allocation7 + $0xaa8] sm:$0xff]  }
 0x5ac   :  { %v6081_v59 = vadd.f32 %v6080_v12, %v17459_v61  ;;  %v6082_v19 = vpop.f32.mrb[201].mxu1  ;;  %v11988_v22 = vpop.f32.mrb[203].mxu0  ;;  %v20009_v54 = vld [vmem:[#allocation268_spill] sm:$0xff] }
 0x5ad   :  { %20007 = vst [vmem:[#allocation276_spill] sm:$0xff] %v17546_v34  ;;  %v6083_v13 = vpop.f32.mrb[202].mxu1  ;;  %12393 = vmatpush3.bf16.msra.mxu1 %v13086_v43  ;;  %v17552_v27 = vadd.f32 %v11988_v22, %v11987_v45  ;;  %v20010_v2 = vld [vmem:[#allocation40_spill] sm:$0xff]  ;;  %v20011_v19 = vld [vmem:[#allocation50_spill] sm:$0xff] }
 0x5ae   :  { %v6084_v57 = vadd.f32 %v6083_v13, %v17465_v46  ;;  %v6085_v50 = vpop.f32.mrb[203].mxu1  ;;  %12394 = vmatprep.subr.bf16.mxu1 %v13087_v35  ;;  %8510 = vmatmul.mubr.bf16.vlgmr.msra.gmra.mrb[52].mxu0 %v20008_v7  ;;  %v6125_v61 = vrot.slane %v6081_v59, 2  ;;  %v13090_v46 = vld [vmem:[#allocation7 + $0xa08] sm:$0xff]   ;;  %v13091_v22 = vld [vmem:[#allocation7 + $0xa50] sm:$0xff]  }
 0x5af   :  { %8517 = vmatprep.mubr.bf16.mxu0 %v20010_v2  ;;  %12451 = vmatpush3.bf16.msra.mxu0 %v13094_v38  ;;  %v13096_v43 = vld [vmem:[#allocation7 + $0xa68] sm:$0xff]   ;;  %v13098_v59 = vld [vmem:[#allocation7 + $0xab0] sm:$0xff]  }
 0x5b0   :  { %v6126_v12 = vrot.slane %v6084_v57, 2  ;;  %7891 = vmatmul.mubr.bf16.gmra.mrb[52].mxu1 %v20009_v54  ;;  %12452 = vmatprep.subr.bf16.mxu0 %v13095_v25  ;;  %v13100_v25 = vld [vmem:[#allocation7 + $0xa70] sm:$0xff]  }
 0x5b1   :  { %11169 = vmatprep.mubr.msk.bf16.mxu1 %vm3911_vm1, %v20011_v19  ;;  %12395 = vmatpush3.bf16.msra.mxu1 %v13088_v48  ;;  %v11990_v45 = vpop.f32.mrb[204].mxu0 }
 0x5b2   :  { %v6127_v13 = vsel %vm6103_vm3, %v6125_v61, %v6126_v12  ;;  %12396 = vmatprep.subr.bf16.mxu1 %v13089_v56  ;;  %v11991_v50 = vpop.f32.mrb[205].mxu0  ;;  %v13093_v61 = vld [vmem:[#allocation7 + $0xa10] sm:$0xff]   ;;  %v13097_v12 = vld [vmem:[#allocation7 + $0xa58] sm:$0xff]  }
 0x5b3   :  { %v12018_v35 = vpop.f32.mrb[204].mxu1  ;;  %v17561_v57 = vadd.f32 %v6127_v13, %v17340_v21  ;;  %v17563_v2 = vadd.f32 %v11991_v50, %v11990_v45  ;;  %v11993_v19 = vpop.f32.mrb[206].mxu0  ;;  %12453 = vmatpush3.bf16.msra.mxu0 %v13096_v43  ;;  %v13101_v21 = vld [vmem:[#allocation7 + $0xab8] sm:$0xff]  }
 0x5b4   :  { %v12019_v54 = vpop.f32.mrb[205].mxu1  ;;  %v11994_v34 = vpop.f32.mrb[207].mxu0  ;;  %12454 = vmatprep.subr.bf16.mxu0 %v13098_v59 }
 0x5b5   :  { %v12020_v48 = vadd.f32 %v12019_v54, %v12018_v35  ;;  %v12021_v7 = vpop.f32.mrb[206].mxu1  ;;  %12397 = vmatpush3.bf16.msra.mxu1 %v13090_v46  ;;  %v17565_v56 = vadd.f32 %v11994_v34, %v11993_v19  ;;  %v13099_v34 = vld [vmem:[#allocation7 + $0xa18] sm:$0xff]  }
 0x5b6   :  { %v12022_v38 = vpop.f32.mrb[207].mxu1  ;;  %12398 = vmatprep.subr.bf16.mxu1 %v13091_v22  ;;  %8518 = vmatmul.mubr.bf16.gmra.mrb[56].mxu0 %v19845_v41  ;;  %v13103_v22 = vld [vmem:[#allocation7 + $0xac0] sm:$0xff]  }
 0x5b7   :  { %v12023_v20 = vadd.f32 %v12022_v38, %v12021_v7  ;;  %v6757_v13 = vadd.f32 %v12020_v48, %v17474_v47  ;;  %8525 = vmatprep.mubr.bf16.mxu0 %v15982_v55  ;;  %12455 = vmatpush3.bf16.msra.mxu0 %v13100_v25  ;;  %v13102_v7 = vld [vmem:[#allocation7 + $0xa78] sm:$0xff]  }
 0x5b8   :  { %7899 = vmatmul.mubr.bf16.gmra.mrb[56].mxu1 %v16796_v11  ;;  %12456 = vmatprep.subr.bf16.mxu0 %v13101_v21  ;;  %v20012_v25 = vld [vmem:[#allocation78_spill] sm:$0xff]  ;;  %v13106_v21 = vld [vmem:[#allocation7 + $0xac8] sm:$0xff]  }
 0x5b9   :  { %11170 = vmatprep.mubr.msk.bf16.mxu1 %vm3911_vm1, %v16824_v10  ;;  %12399 = vmatpush3.bf16.msra.mxu1 %v13093_v61  ;;  %v6760_v54 = vadd.f32 %v12023_v20, %v17478_v49  ;;  %v11996_v19 = vpop.f32.mrb[208].mxu0  ;;  %v13104_v49 = vld [vmem:[#allocation7 + $0xa80] sm:$0xff]  }
 0x5ba   :  { %12400 = vmatprep.subr.bf16.mxu1 %v13097_v12  ;;  %v11997_v45 = vpop.f32.mrb[209].mxu0 }
 0x5bb   :  { %v12024_v46 = vpop.f32.mrb[208].mxu1  ;;  %v17574_v47 = vadd.f32 %v11997_v45, %v11996_v19  ;;  %v11999_v35 = vpop.f32.mrb[210].mxu0  ;;  %12457 = vmatpush3.bf16.msra.mxu0 %v13102_v7  ;;  %v20013_v19 = vld [vmem:[#allocation97_spill] sm:$0xff]  ;;  %v20015_v45 = vld [vmem:[#allocation84_spill] sm:$0xff] }
 0x5bc   :  { %v12025_v43 = vpop.f32.mrb[209].mxu1  ;;  %v12000_v48 = vpop.f32.mrb[211].mxu0  ;;  %12458 = vmatprep.subr.bf16.mxu0 %v13103_v22 }
 0x5bd   :  { %v12026_v50 = vadd.f32 %v12025_v43, %v12024_v46  ;;  %v12027_v59 = vpop.f32.mrb[210].mxu1  ;;  %12401 = vmatpush3.bf16.msra.mxu1 %v13099_v34  ;;  %v17576_v61 = vadd.f32 %v12000_v48, %v11999_v35  ;;  %v20014_v46 = vld [vmem:[#allocation79_spill] sm:$0xff]  ;;  %v13107_v43 = vld [vmem:[#allocation7 + $0xa88] sm:$0xff]  }
 0x5be   :  { %v12028_v38 = vpop.f32.mrb[211].mxu1  ;;  %8768 = vmatprep.subr.bf16.mxu1 %v19521_v36  ;;  %8526 = vmatmul.mubr.bf16.gmra.mrb[60].mxu0 %v20012_v25 }
 0x5bf   :  { %v6765_v20 = vadd.f32 %v12026_v50, %v17490_v0  ;;  %v12029_v12 = vadd.f32 %v12028_v38, %v12027_v59  ;;  %8533 = vmatprep.mubr.bf16.mxu0 %v20014_v46  ;;  %12459 = vmatpush3.bf16.msra.mxu0 %v13104_v49  ;;  %v13109_v0 = vld [vmem:[#allocation7 + $0xad0] sm:$0xff]  }
 0x5c0   :  { %7907 = vmatmul.mubr.bf16.gmra.mrb[60].mxu1 %v20013_v19  ;;  %12460 = vmatprep.subr.bf16.mxu0 %v13106_v21  ;;  %v13111_v21 = vld [vmem:[#allocation7 + $0xad8] sm:$0xff]  }
 0x5c1   :  { %v6768_v34 = vadd.f32 %v12029_v12, %v17493_v17  ;;  %11171 = vmatprep.mubr.msk.bf16.mxu1 %vm3911_vm1, %v20015_v45  ;;  %v12082_v7 = vpop.f32.mrb[212].mxu0  ;;  %v13110_v17 = vld [vmem:[#allocation7 + $0xa90] sm:$0xff]  }
 0x5c2   :  { %v12083_v48 = vpop.f32.mrb[213].mxu0 }
 0x5c3   :  { %v12030_v35 = vpop.f32.mrb[212].mxu1  ;;  %v12084_v59 = vadd.f32 %v12083_v48, %v12082_v7  ;;  %v12085_v22 = vpop.f32.mrb[214].mxu0  ;;  %12461 = vmatpush3.bf16.msra.mxu0 %v13107_v43 }
 0x5c4   :  { %v12031_v50 = vpop.f32.mrb[213].mxu1  ;;  %v12086_v19 = vpop.f32.mrb[215].mxu0  ;;  %12462 = vmatprep.subr.bf16.mxu0 %v13109_v0 }
 0x5c5   :  { %v12032_v38 = vadd.f32 %v12031_v50, %v12030_v35  ;;  %v12033_v25 = vpop.f32.mrb[214].mxu1  ;;  %v12087_v46 = vadd.f32 %v12086_v19, %v12085_v22  ;;  %v17586_v12 = vadd.f32 %v12084_v59, %v6757_v13  ;;  %v13113_v19 = vld [vmem:[#allocation7 + $0xa98] sm:$0xff]  }
 0x5c6   :  { %v12034_v10 = vpop.f32.mrb[215].mxu1  ;;  %8534 = vmatmul.mubr.bf16.gmra.mrb[64].mxu0 %v19856_v16 }
 0x5c7   :  { %v6773_v45 = vadd.f32 %v12032_v38, %v17504_v8  ;;  %v12035_v49 = vadd.f32 %v12034_v10, %v12033_v25  ;;  %8541 = vmatprep.mubr.bf16.mxu0 %v19857_v24  ;;  %v17592_v7 = vadd.f32 %v12087_v46, %v6760_v54  ;;  %12463 = vmatpush3.bf16.msra.mxu0 %v13110_v17  ;;  %v13120_v25 = vld [vmem:[#allocation7 + $0xb80] sm:$0xff]  }
 0x5c8   :  { %7915 = vmatmul.mubr.bf16.gmra.mrb[64].mxu1 %v16833_v26  ;;  %12464 = vmatprep.subr.bf16.mxu0 %v13111_v21 }
 0x5c9   :  { %v6776_v35 = vadd.f32 %v12035_v49, %v17507_v15  ;;  %11172 = vmatprep.mubr.msk.bf16.mxu1 %vm3911_vm1, %v16860_v53  ;;  %v12088_v13 = vpop.f32.mrb[216].mxu0 }
 0x5ca   :  { %v12089_v10 = vpop.f32.mrb[217].mxu0 }
 0x5cb   :  { %v12036_v8 = vpop.f32.mrb[216].mxu1  ;;  %v12090_v48 = vadd.f32 %v12089_v10, %v12088_v13  ;;  %v12091_v0 = vpop.f32.mrb[218].mxu0  ;;  %12465 = vmatpush3.bf16.msra.mxu0 %v13113_v19 }
 0x5cc   :  { %v12037_v43 = vpop.f32.mrb[217].mxu1  ;;  %v12092_v22 = vpop.f32.mrb[219].mxu0  ;;  %12514 = vmatprep.subr.bf16.mxu0 %v13120_v25 }
 0x5cd   :  { %v12038_v50 = vadd.f32 %v12037_v43, %v12036_v8  ;;  %v12039_v59 = vpop.f32.mrb[218].mxu1  ;;  %v12093_v46 = vadd.f32 %v12092_v22, %v12091_v0  ;;  %v17597_v15 = vadd.f32 %v12090_v48, %v6765_v20 }
 0x5ce   :  { %v12040_v54 = vpop.f32.mrb[219].mxu1  ;;  %8542 = vmatmul.mubr.bf16.gmra.mrb[68].mxu0 %v19858_v40 }
 0x5cf   :  { %v6781_v38 = vadd.f32 %v12038_v50, %v17519_v32  ;;  %v12041_v49 = vadd.f32 %v12040_v54, %v12039_v59  ;;  %8549 = vmatprep.mubr.bf16.mxu0 %v19859_v33  ;;  %v17603_v17 = vadd.f32 %v12093_v46, %v6768_v34 }
 0x5d0   :  { %7923 = vmatmul.mubr.bf16.gmra.mrb[68].mxu1 %v16857_v4 }
 0x5d1   :  { %v6784_v21 = vadd.f32 %v12041_v49, %v17522_v62  ;;  %11173 = vmatprep.mubr.msk.bf16.mxu1 %vm3911_vm1, %v16869_v6  ;;  %v12094_v13 = vpop.f32.mrb[220].mxu0 }
 0x5d2   :  { %v12095_v19 = vpop.f32.mrb[221].mxu0 }
 0x5d3   :  { %v12042_v20 = vpop.f32.mrb[220].mxu1  ;;  %v12096_v32 = vadd.f32 %v12095_v19, %v12094_v13  ;;  %v12097_v10 = vpop.f32.mrb[222].mxu0 }
 0x5d4   :  { %v12043_v8 = vpop.f32.mrb[221].mxu1  ;;  %v12098_v25 = vpop.f32.mrb[223].mxu0 }
 0x5d5   :  { %v12044_v43 = vadd.f32 %v12043_v8, %v12042_v20  ;;  %v12045_v48 = vpop.f32.mrb[222].mxu1  ;;  %v12099_v50 = vadd.f32 %v12098_v25, %v12097_v10  ;;  %v17608_v59 = vadd.f32 %v12096_v32, %v6773_v45  ;;  %v13105_v10 = vld [vmem:[#allocation7 + $0xae0] sm:$0xff]  }
 0x5d6   :  { %v12046_v0 = vpop.f32.mrb[223].mxu1  ;;  %8550 = vmatmul.mubr.bf16.gmra.mrb[72].mxu0 %v19860_v58 }
 0x5d7   :  { %v6789_v34 = vadd.f32 %v12044_v43, %v17534_v23  ;;  %v12047_v22 = vadd.f32 %v12046_v0, %v12045_v48  ;;  %8557 = vmatprep.mubr.bf16.mxu0 %v19861_v60  ;;  %v17614_v62 = vadd.f32 %v12099_v50, %v6776_v35 }
 0x5d8   :  { %7931 = vmatmul.mubr.bf16.gmra.mrb[72].mxu1 %v16866_v63 }
 0x5d9   :  { %v6792_v54 = vadd.f32 %v12047_v22, %v17537_v14  ;;  %8606 = vmatprep.mubr.bf16.mxu1 %v19862_v1  ;;  %v12100_v46 = vpop.f32.mrb[224].mxu0  ;;  %v20016_v14 = vld [vmem:[#allocation171_spill] sm:$0xff] }
 0x5da   :  { %v12101_v13 = vpop.f32.mrb[225].mxu0 }
 0x5db   :  { %v12048_v49 = vpop.f32.mrb[224].mxu1  ;;  %v12102_v20 = vadd.f32 %v12101_v13, %v12100_v46  ;;  %v12103_v19 = vpop.f32.mrb[226].mxu0  ;;  %v20017_v46 = vld [vmem:[#allocation91_spill] sm:$0xff] }
 0x5dc   :  { %v12049_v45 = vpop.f32.mrb[225].mxu1  ;;  %v12104_v32 = vpop.f32.mrb[227].mxu0 }
 0x5dd   :  { %v12050_v23 = vadd.f32 %v12049_v45, %v12048_v49  ;;  %v12051_v8 = vpop.f32.mrb[226].mxu1  ;;  %v12105_v48 = vadd.f32 %v12104_v32, %v12103_v19  ;;  %v17618_v25 = vadd.f32 %v12102_v20, %v6781_v38  ;;  %v13108_v49 = vld [vmem:[#allocation7 + $0xae8] sm:$0xff]  }
 0x5de   :  { %v12052_v43 = vpop.f32.mrb[227].mxu1  ;;  %8558 = vmatmul.mubr.bf16.gmra.mrb[76].mxu0 %v19863_v51 }
 0x5df   :  { %v6797_v35 = vadd.f32 %v12050_v23, %v17549_v37  ;;  %v12053_v0 = vadd.f32 %v12052_v43, %v12051_v8  ;;  %8565 = vmatprep.mubr.bf16.mxu0 %v20016_v14  ;;  %v17624_v50 = vadd.f32 %v12105_v48, %v6784_v21  ;;  %v13112_v21 = vld [vmem:[#allocation7 + $0xaf0] sm:$0xff]  }
 0x5e0   :  { %8607 = vmatmul.mubr.bf16.vlgmr.msra.gmra.mrb[76].mxu1 %v19864_v3  ;;  %v20019_v14 = vld [vmem:[#allocation89_spill] sm:$0xff] }
 0x5e1   :  { %v6800_v22 = vadd.f32 %v12053_v0, %v17552_v27  ;;  %8614 = vmatprep.mubr.bf16.mxu1 %v20017_v46  ;;  %8769 = vmatpush1.bf16.msra.mxu1 %v13105_v10  ;;  %v12106_v13 = vpop.f32.mrb[228].mxu0  ;;  %v20018_v46 = vld [vmem:[#allocation169_spill] sm:$0xff] }
 0x5e2   :  { %8770 = vmatprep.subr.bf16.mxu1 %v19521_v36  ;;  %v12107_v37 = vpop.f32.mrb[229].mxu0 }
 0x5e3   :  { %v12054_v38 = vpop.f32.mrb[228].mxu1  ;;  %v12108_v20 = vadd.f32 %v12107_v37, %v12106_v13  ;;  %v12109_v19 = vpop.f32.mrb[230].mxu0  ;;  %v20020_v13 = vld [vmem:[#allocation94_spill] sm:$0xff]  ;;  %v20021_v37 = vld [vmem:[#allocation175_spill] sm:$0xff] }
 0x5e4   :  { %v12055_v45 = vpop.f32.mrb[229].mxu1  ;;  %v12110_v32 = vpop.f32.mrb[231].mxu0 }
 0x5e5   :  { %v12056_v23 = vadd.f32 %v12055_v45, %v12054_v38  ;;  %v12057_v8 = vpop.f32.mrb[230].mxu1  ;;  %8771 = vmatpush1.bf16.msra.mxu1 %v13108_v49  ;;  %v12111_v48 = vadd.f32 %v12110_v32, %v12109_v19  ;;  %v17630_v27 = vadd.f32 %v12108_v20, %v6789_v34  ;;  %v13114_v45 = vld [vmem:[#allocation7 + $0xaf8] sm:$0xff]  }
 0x5e6   :  { %v12058_v43 = vpop.f32.mrb[231].mxu1  ;;  %8772 = vmatprep.subr.bf16.mxu1 %v19521_v36  ;;  %8566 = vmatmul.mubr.bf16.gmra.mrb[80].mxu0 %v20018_v46  ;;  %v20022_v46 = vld [vmem:[#allocation93_spill] sm:$0xff] }
 0x5e7   :  { %v6805_v10 = vadd.f32 %v12056_v23, %v17563_v2  ;;  %v12059_v0 = vadd.f32 %v12058_v43, %v12057_v8  ;;  %8703 = vmatprep.mubr.bf16.mxu0 %v20020_v13  ;;  %v17636_v38 = vadd.f32 %v12111_v48, %v6792_v54  ;;  %v13115_v54 = vld [vmem:[#allocation7 + $0xb00] sm:$0xff]  }
 0x5e8   :  { %8615 = vmatmul.mubr.bf16.gmra.mrb[80].mxu1 %v20019_v14 }
 0x5e9   :  { %v17639_v49 = vadd.f32 %v12059_v0, %v17565_v56  ;;  %8622 = vmatprep.mubr.bf16.mxu1 %v20021_v37  ;;  %8773 = vmatpush1.bf16.msra.mxu1 %v13112_v21  ;;  %v12112_v34 = vpop.f32.mrb[232].mxu0  ;;  %v13122_v0 = vld [vmem:[#allocation7 + $0xb40] sm:$0xff]  }
 0x5ea   :  { %8774 = vmatprep.subr.bf16.mxu1 %v19521_v36  ;;  %v12113_v20 = vpop.f32.mrb[233].mxu0 }
 0x5eb   :  { %v12060_v2 = vpop.f32.mrb[232].mxu1  ;;  %v12114_v23 = vadd.f32 %v12113_v20, %v12112_v34  ;;  %v12115_v8 = vpop.f32.mrb[234].mxu0  ;;  %v13123_v34 = vld [vmem:[#allocation7 + $0xb88] sm:$0xff]  }
 0x5ec   :  { %v12061_v19 = vpop.f32.mrb[233].mxu1  ;;  %v12116_v13 = vpop.f32.mrb[235].mxu0  ;;  %v20023_v20 = vld [vmem:[#allocation173_spill] sm:$0xff] }
 0x5ed   :  { %v12062_v32 = vadd.f32 %v12061_v19, %v12060_v2  ;;  %v12063_v43 = vpop.f32.mrb[234].mxu1  ;;  %8775 = vmatpush1.bf16.msra.mxu1 %v13114_v45  ;;  %v12117_v56 = vadd.f32 %v12116_v13, %v12115_v8  ;;  %v17644_v21 = vadd.f32 %v12114_v23, %v6797_v35  ;;  %v20024_v2 = vld [vmem:[#allocation98_spill] sm:$0xff]  ;;  %v20025_v19 = vld [vmem:[#allocation179_spill] sm:$0xff]  ;;  %v13116_v35 = vld [vmem:[#allocation7 + $0xb08] sm:$0xff]  }
 0x5ee   :  { %v12064_v48 = vpop.f32.mrb[235].mxu1  ;;  %8776 = vmatprep.subr.bf16.mxu1 %v19521_v36  ;;  %8704 = vmatmul.mubr.bf16.vlgmr.msra.gmra.mrb[84].mxu0 %v20022_v46 }
 0x5ef   :  { %v17647_v37 = vadd.f32 %v12062_v32, %v17574_v47  ;;  %v12065_v14 = vadd.f32 %v12064_v48, %v12063_v43  ;;  %8711 = vmatprep.mubr.bf16.mxu0 %v20024_v2  ;;  %v17652_v45 = vadd.f32 %v12117_v56, %v6800_v22  ;;  %12515 = vmatpush3.bf16.msra.mxu0 %v13122_v0  ;;  %v13124_v47 = vld [vmem:[#allocation7 + $0xb48] sm:$0xff]   ;;  %v13126_v43 = vld [vmem:[#allocation7 + $0xb90] sm:$0xff]  }
 0x5f0   :  { %8623 = vmatmul.mubr.bf16.gmra.mrb[84].mxu1 %v20023_v20  ;;  %12516 = vmatprep.subr.bf16.mxu0 %v13123_v34  ;;  %v13127_v0 = vld [vmem:[#allocation7 + $0xb50] sm:$0xff]  }
 0x5f1   :  { %v17655_v13 = vadd.f32 %v12065_v14, %v17576_v61  ;;  %8630 = vmatprep.mubr.bf16.mxu1 %v20025_v19  ;;  %8777 = vmatpush1.bf16.msra.mxu1 %v13115_v54  ;;  %v12118_v23 = vpop.f32.mrb[236].mxu0  ;;  %v13117_v19 = vld [vmem:[#allocation7 + $0xb10] sm:$0xff]  }
 0x5f2   :  { %8778 = vmatprep.subr.bf16.mxu1 %v19521_v36  ;;  %v12119_v32 = vpop.f32.mrb[237].mxu0 }
 0x5f3   :  { %v6950_v8 = vpop.f32.mrb[236].mxu1  ;;  %v12120_v22 = vadd.f32 %v12119_v32, %v12118_v23  ;;  %v12121_v2 = vpop.f32.mrb[238].mxu0  ;;  %12517 = vmatpush3.bf16.msra.mxu0 %v13124_v47 }
 0x5f4   :  { %v6951_v48 = vadd.f32 %v6950_v8, %v17586_v12  ;;  %v6952_v56 = vpop.f32.mrb[237].mxu1  ;;  %v12122_v14 = vpop.f32.mrb[239].mxu0  ;;  %12518 = vmatprep.subr.bf16.mxu0 %v13126_v43  ;;  %v13129_v12 = vld [vmem:[#allocation7 + $0xb98] sm:$0xff]   ;;  %v13131_v43 = vld [vmem:[#allocation7 + $0xba0] sm:$0xff]  }
 0x5f5   :  { %v6953_v61 = vpop.f32.mrb[238].mxu1  ;;  %8779 = vmatpush1.bf16.msra.mxu1 %v13116_v35  ;;  %v12123_v20 = vadd.f32 %v12122_v14, %v12121_v2  ;;  %v17662_v3 = vadd.f32 %v12120_v22, %v6805_v10  ;;  %v13130_v35 = vld [vmem:[#allocation7 + $0xb58] sm:$0xff]  }
 0x5f6   :  { %v6954_v54 = vadd.f32 %v6953_v61, %v17592_v7  ;;  %v6955_v46 = vpop.f32.mrb[239].mxu1  ;;  %8780 = vmatprep.subr.bf16.mxu1 %v19521_v36  ;;  %8712 = vmatmul.mubr.bf16.gmra.mrb[88].mxu0 %v19894_v28  ;;  %v7030_v34 = vrot.slane %v6951_v48, 3  ;;  %v13119_v61 = vld [vmem:[#allocation7 + $0xb20] sm:$0xff]  }
 0x5f7   :  { %8719 = vmatprep.mubr.bf16.mxu0 %v19928_v29  ;;  %v17668_v7 = vadd.f32 %v12123_v20, %v17639_v49  ;;  %v13118_v46 = vld [vmem:[#allocation7 + $0xb18] sm:$0xff]   ;;  %12519 = vmatpush3.bf16.msra.mxu0 %v13127_v0 }
 0x5f8   :  { %v7031_v23 = vrot.slane %v6954_v54, 3  ;;  %8631 = vmatmul.mubr.bf16.gmra.mrb[88].mxu1 %v19895_v5  ;;  %12520 = vmatprep.subr.bf16.mxu0 %v13129_v12 }
 0x5f9   :  { %8638 = vmatprep.mubr.bf16.mxu1 %v19977_v52  ;;  %8781 = vmatpush1.bf16.msra.mxu1 %v13117_v19  ;;  %v12124_v2 = vpop.f32.mrb[240].mxu0 }
 0x5fa   :  { %v7032_v10 = vsel %vm7029_vm4, %v7030_v34, %v7031_v23  ;;  %8782 = vmatprep.subr.bf16.mxu1 %v19521_v36  ;;  %v12125_v32 = vpop.f32.mrb[241].mxu0 }
 0x5fb   :  { %v17674_v47 = vadd.f32 %v7032_v10, %v17453_v18  ;;  %v6958_v8 = vpop.f32.mrb[240].mxu1  ;;  %v12126_v20 = vadd.f32 %v12125_v32, %v12124_v2  ;;  %v12127_v19 = vpop.f32.mrb[242].mxu0  ;;  %12521 = vmatpush3.bf16.msra.mxu0 %v13130_v35  ;;  %v13133_v18 = vld [vmem:[#allocation7 + $0xb60] sm:$0xff]   ;;  %v13136_v2 = vld [vmem:[#allocation7 + $0xb68] sm:$0xff]  }
 0x5fc   :  { %v6959_v49 = vadd.f32 %v6958_v8, %v17597_v15  ;;  %v6960_v48 = vpop.f32.mrb[241].mxu1  ;;  %v12128_v56 = vpop.f32.mrb[243].mxu0  ;;  %12522 = vmatprep.subr.bf16.mxu0 %v13131_v43  ;;  %v13135_v15 = vld [vmem:[#allocation7 + $0xba8] sm:$0xff]   ;;  %v13137_v43 = vld [vmem:[#allocation7 + $0xbb0] sm:$0xff]  }
 0x5fd   :  { %v6961_v22 = vpop.f32.mrb[242].mxu1  ;;  %8783 = vmatpush1.bf16.msra.mxu1 %v13118_v46  ;;  %v12129_v54 = vadd.f32 %v12128_v56, %v12127_v19  ;;  %v17680_v12 = vadd.f32 %v12126_v20, %v17647_v37  ;;  %v13121_v46 = vld [vmem:[#allocation7 + $0xb28] sm:$0xff]   ;;  %v13125_v56 = vld [vmem:[#allocation7 + $0xb30] sm:$0xff]  }
 0x5fe   :  { %v6962_v14 = vadd.f32 %v6961_v22, %v17603_v17  ;;  %v6963_v0 = vpop.f32.mrb[243].mxu1  ;;  %8784 = vmatprep.subr.bf16.mxu1 %v19521_v36  ;;  %8720 = vmatmul.mubr.bf16.gmra.mrb[92].mxu0 %v19899_v42  ;;  %v7033_v34 = vrot.slane %v6959_v49, 3 }
 0x5ff   :  { %8727 = vmatprep.mubr.bf16.mxu0 %v19931_v31  ;;  %v17686_v17 = vadd.f32 %v12129_v54, %v17655_v13  ;;  %12523 = vmatpush3.bf16.msra.mxu0 %v13133_v18 }
 0x600   :  { %v7034_v23 = vrot.slane %v6962_v14, 3  ;;  %8639 = vmatmul.mubr.bf16.gmra.mrb[92].mxu1 %v19880_v39  ;;  %12524 = vmatprep.subr.bf16.mxu0 %v13135_v15  ;;  %v20026_v15 = vld [vmem:[#allocation183_spill] sm:$0xff] }
 0x601   :  { %8646 = vmatprep.mubr.bf16.mxu1 %v19978_v9  ;;  %8785 = vmatpush1.bf16.msra.mxu1 %v13119_v61  ;;  %v12146_v10 = vpop.f32.mrb[244].mxu0 }
 0x602   :  { %v7035_v37 = vsel %vm7029_vm4, %v7033_v34, %v7034_v23  ;;  %8786 = vmatprep.subr.bf16.mxu1 %v19521_v36  ;;  %v12147_v32 = vpop.f32.mrb[245].mxu0  ;;  %v20027_v34 = vld [vmem:[#allocation90_spill] sm:$0xff]  ;;  %v20028_v23 = vld [vmem:[#allocation189_spill] sm:$0xff] }
 0x603   :  { %v17692_v35 = vadd.f32 %v7035_v37, %v17471_v30  ;;  %v6966_v8 = vpop.f32.mrb[244].mxu1  ;;  %v17695_v20 = vadd.f32 %v12147_v32, %v12146_v10  ;;  %v12149_v48 = vpop.f32.mrb[246].mxu0  ;;  %12525 = vmatpush3.bf16.msra.mxu0 %v13136_v2  ;;  %v13139_v30 = vld [vmem:[#allocation7 + $0xb70] sm:$0xff]   ;;  %v13132_v10 = vld [vmem:[#allocation7 + $0xc00] sm:$0xff]   ;;  %v13142_v2 = vld [vmem:[#allocation7 + $0xb78] sm:$0xff]  }
 0x604   :  { %v6967_v13 = vadd.f32 %v6966_v8, %v17608_v59  ;;  %v6968_v49 = vpop.f32.mrb[245].mxu1  ;;  %v12150_v22 = vpop.f32.mrb[247].mxu0  ;;  %12526 = vmatprep.subr.bf16.mxu0 %v13137_v43  ;;  %v13141_v59 = vld [vmem:[#allocation7 + $0xbb8] sm:$0xff]  }
 0x605   :  { %v6969_v19 = vpop.f32.mrb[246].mxu1  ;;  %8787 = vmatpush1.bf16.msra.mxu1 %v13121_v46  ;;  %v17698_v54 = vadd.f32 %v12150_v22, %v12149_v48  ;;  %v20029_v8 = vld [vmem:[#allocation103_spill] sm:$0xff] }
 0x606   :  { %v6970_v61 = vadd.f32 %v6969_v19, %v17614_v62  ;;  %v6971_v14 = vpop.f32.mrb[247].mxu1  ;;  %8788 = vmatprep.subr.bf16.mxu1 %v19521_v36  ;;  %8728 = vmatmul.mubr.bf16.gmra.mrb[96].mxu0 %v19903_v44  ;;  %v7036_v0 = vrot.slane %v6967_v13, 3  ;;  %v13128_v62 = vld [vmem:[#allocation7 + $0xb38] sm:$0xff]   ;;  %v13152_v49 = vld [vmem:[#allocation7 + $0xc80] sm:$0xff]  }
 0x607   :  { %8735 = vmatprep.mubr.bf16.mxu0 %v20027_v34  ;;  %12527 = vmatpush3.bf16.msra.mxu0 %v13139_v30 }
 0x608   :  { %v7037_v18 = vrot.slane %v6970_v61, 3  ;;  %8647 = vmatmul.mubr.bf16.gmra.mrb[96].mxu1 %v20026_v15  ;;  %12528 = vmatprep.subr.bf16.mxu0 %v13141_v59 }
 0x609   :  { %8654 = vmatprep.mubr.bf16.mxu1 %v20028_v23  ;;  %8789 = vmatpush1.bf16.msra.mxu1 %v13125_v56  ;;  %v12152_v37 = vpop.f32.mrb[248].mxu0 }
 0x60a   :  { %v7038_v46 = vsel %vm7029_vm4, %v7036_v0, %v7037_v18  ;;  %8790 = vmatprep.subr.bf16.mxu1 %v19521_v36  ;;  %v12153_v13 = vpop.f32.mrb[249].mxu0 }
 0x60b   :  { %v17708_v32 = vadd.f32 %v7038_v46, %v20029_v8  ;;  %v6974_v43 = vpop.f32.mrb[248].mxu1  ;;  %v17711_v22 = vadd.f32 %v12153_v13, %v12152_v37  ;;  %v12155_v56 = vpop.f32.mrb[250].mxu0  ;;  %12529 = vmatpush3.bf16.msra.mxu0 %v13142_v2  ;;  %v20031_v46 = vld [vmem:[#allocation75_spill] sm:$0xff]  ;;  %v20033_v37 = vld [vmem:[#allocation48_spill] sm:$0xff] }
 0x60c   :  { %v6975_v48 = vadd.f32 %v6974_v43, %v17618_v25  ;;  %v6976_v19 = vpop.f32.mrb[249].mxu1  ;;  %v12156_v14 = vpop.f32.mrb[251].mxu0  ;;  %12642 = vmatprep.subr.bf16.mxu0 %v13152_v49  ;;  %v20032_v25 = vld [vmem:[#allocation187_spill] sm:$0xff] }
 0x60d   :  { %20030 = vst [vmem:[#allocation105_spill] sm:$0xff] %v17708_v32  ;;  %v6977_v61 = vpop.f32.mrb[250].mxu1  ;;  %8791 = vmatpush1.bf16.msra.mxu1 %v13128_v62  ;;  %v17714_v18 = vadd.f32 %v12156_v14, %v12155_v56  ;;  %v20034_v43 = vld [vmem:[#allocation47_spill] sm:$0xff] }
 0x60e   :  { %v6978_v0 = vadd.f32 %v6977_v61, %v17624_v50  ;;  %v6979_v30 = vpop.f32.mrb[251].mxu1  ;;  %12578 = vmatprep.subr.bf16.mxu1 %v13132_v10  ;;  %8736 = vmatmul.mubr.bf16.gmra.mrb[100].mxu0 %v20031_v46  ;;  %v7039_v59 = vrot.slane %v6975_v48, 3  ;;  %v20035_v50 = vld [vmem:[#allocation192_spill] sm:$0xff] }
 0x60f   :  { %8743 = vmatprep.mubr.bf16.mxu0 %v20033_v37 }
 0x610   :  { %v7040_v8 = vrot.slane %v6978_v0, 3  ;;  %8655 = vmatmul.mubr.bf16.gmra.mrb[100].mxu1 %v20032_v25 }
 0x611   :  { %8662 = vmatprep.mubr.bf16.mxu1 %v20034_v43  ;;  %v12158_v13 = vpop.f32.mrb[252].mxu0 }
 0x612   :  { %v7041_v62 = vsel %vm7029_vm4, %v7039_v59, %v7040_v8  ;;  %v12159_v10 = vpop.f32.mrb[253].mxu0  ;;  %v20037_v59 = vld [vmem:[#allocation92_spill] sm:$0xff] }
 0x613   :  { %v17722_v19 = vadd.f32 %v7041_v62, %v20035_v50  ;;  %v6982_v56 = vpop.f32.mrb[252].mxu1  ;;  %v17725_v49 = vadd.f32 %v12159_v10, %v12158_v13  ;;  %v12161_v48 = vpop.f32.mrb[254].mxu0  ;;  %v20038_v50 = vld [vmem:[#allocation46_spill] sm:$0xff] }
 0x614   :  { %v6983_v2 = vadd.f32 %v6982_v56, %v17630_v27  ;;  %v6984_v61 = vpop.f32.mrb[253].mxu1  ;;  %v12162_v0 = vpop.f32.mrb[255].mxu0  ;;  %v20040_v27 = vld [vmem:[#allocation95_spill] sm:$0xff]  ;;  %v20041_v10 = vld [vmem:[#allocation274_spill] sm:$0xff] }
 0x615   :  { %20036 = vst [vmem:[#allocation56_spill] sm:$0xff] %v17722_v19  ;;  %v6985_v14 = vpop.f32.mrb[254].mxu1  ;;  %v17728_v43 = vadd.f32 %v12162_v0, %v12161_v48  ;;  %v20039_v19 = vld [vmem:[#allocation265_spill] sm:$0xff] }
 0x616   :  { %v6986_v30 = vadd.f32 %v6985_v14, %v17636_v38  ;;  %v6987_v37 = vpop.f32.mrb[255].mxu1  ;;  %8744 = vmatmul.mubr.bf16.gmra.mrb[104].mxu0 %v20037_v59  ;;  %v7042_v8 = vrot.slane %v6983_v2, 3 }
 0x617   :  { %8751 = vmatprep.mubr.bf16.mxu0 %v20039_v19  ;;  %v13134_v19 = vld [vmem:[#allocation7 + $0xbc0] sm:$0xff]  }
 0x618   :  { %v7043_v62 = vrot.slane %v6986_v30, 3  ;;  %8663 = vmatmul.mubr.bf16.gmra.mrb[104].mxu1 %v20038_v50 }
 0x619   :  { %11234 = vmatprep.mubr.msk.bf16.mxu1 %vm3911_vm1, %v20040_v27  ;;  %v12164_v56 = vpop.f32.mrb[0].mxu0 }
 0x61a   :  { %v7044_v13 = vsel %vm7029_vm4, %v7042_v8, %v7043_v62  ;;  %v12165_v37 = vpop.f32.mrb[1].mxu0  ;;  %v13138_v8 = vld [vmem:[#allocation7 + $0xc08] sm:$0xff]  }
 0x61b   :  { %v17737_v61 = vadd.f32 %v7044_v13, %v20041_v10  ;;  %v6990_v38 = vpop.f32.mrb[0].mxu1  ;;  %v17740_v2 = vadd.f32 %v12165_v37, %v12164_v56  ;;  %v12167_v0 = vpop.f32.mrb[2].mxu0  ;;  %v20043_v62 = vld [vmem:[#allocation80_spill] sm:$0xff]  ;;  %v20046_v56 = vld [vmem:[#allocation269_spill] sm:$0xff] }
 0x61c   :  { %v6991_v48 = vadd.f32 %v6990_v38, %v17644_v21  ;;  %v6992_v14 = vpop.f32.mrb[1].mxu1  ;;  %v12168_v50 = vpop.f32.mrb[3].mxu0  ;;  %v20045_v21 = vld [vmem:[#allocation266_spill] sm:$0xff]  ;;  %v13140_v38 = vld [vmem:[#allocation7 + $0xbc8] sm:$0xff]  }
 0x61d   :  { %20042 = vst [vmem:[#allocation106_spill] sm:$0xff] %v17737_v61  ;;  %v6993_v30 = vpop.f32.mrb[2].mxu1  ;;  %v17743_v25 = vadd.f32 %v12168_v50, %v12167_v0  ;;  %v20044_v61 = vld [vmem:[#allocation49_spill] sm:$0xff] }
 0x61e   :  { %v6994_v59 = vadd.f32 %v6993_v30, %v17652_v45  ;;  %v6995_v27 = vpop.f32.mrb[3].mxu1  ;;  %8752 = vmatmul.mubr.bf16.gmra.mrb[108].mxu0 %v20043_v62  ;;  %v7045_v13 = vrot.slane %v6991_v48, 3  ;;  %v13143_v50 = vld [vmem:[#allocation7 + $0xc10] sm:$0xff]  }
 0x61f   :  { %8759 = vmatprep.mubr.bf16.mxu0 %v20045_v21  ;;  %v20047_v27 = vld [vmem:[#allocation275_spill] sm:$0xff] }
 0x620   :  { %v7046_v10 = vrot.slane %v6994_v59, 3  ;;  %8801 = vmatmul.mubr.bf16.vlgmr.msra.gmra.mrb[108].mxu1 %v20044_v61 }
 0x621   :  { %11235 = vmatprep.mubr.msk.bf16.mxu1 %vm3911_vm1, %v20046_v56  ;;  %12579 = vmatpush3.bf16.msra.mxu1 %v13134_v19  ;;  %v12170_v45 = vpop.f32.mrb[4].mxu0  ;;  %v13144_v19 = vld [vmem:[#allocation7 + $0xbd0] sm:$0xff]  }
 0x622   :  { %v7047_v37 = vsel %vm7029_vm4, %v7045_v13, %v7046_v10  ;;  %12580 = vmatprep.subr.bf16.mxu1 %v13138_v8  ;;  %v12171_v48 = vpop.f32.mrb[5].mxu0 }
 0x623   :  { %v17752_v14 = vadd.f32 %v7047_v37, %v20047_v27  ;;  %v6998_v0 = vpop.f32.mrb[4].mxu1  ;;  %v17755_v61 = vadd.f32 %v12171_v48, %v12170_v45  ;;  %v12173_v21 = vpop.f32.mrb[6].mxu0  ;;  %v13145_v37 = vld [vmem:[#allocation7 + $0xc18] sm:$0xff]   ;;  %v20051_v45 = vld [vmem:[#allocation76_spill] sm:$0xff] }
 0x624   :  { %v6999_v59 = vadd.f32 %v6998_v0, %v17662_v3  ;;  %v7000_v30 = vpop.f32.mrb[5].mxu1  ;;  %v12174_v56 = vpop.f32.mrb[7].mxu0  ;;  %v20049_v27 = vld [vmem:[#allocation190_spill] sm:$0xff]  ;;  %v20050_v3 = vld [vmem:[#allocation267_spill] sm:$0xff] }
 0x625   :  { %20048 = vst [vmem:[#allocation57_spill] sm:$0xff] %v17752_v14  ;;  %v7001_v62 = vpop.f32.mrb[6].mxu1  ;;  %12581 = vmatpush3.bf16.msra.mxu1 %v13140_v38  ;;  %v17758_v8 = vadd.f32 %v12174_v56, %v12173_v21  ;;  %v20052_v0 = vld [vmem:[#allocation82_spill] sm:$0xff]  ;;  %v13147_v21 = vld [vmem:[#allocation7 + $0xc20] sm:$0xff]  }
 0x626   :  { %v7002_v13 = vadd.f32 %v7001_v62, %v17668_v7  ;;  %v7003_v10 = vpop.f32.mrb[7].mxu1  ;;  %12582 = vmatprep.subr.bf16.mxu1 %v13143_v50  ;;  %8760 = vmatmul.mubr.bf16.gmra.mrb[112].mxu0 %v20049_v27  ;;  %v7048_v14 = vrot.slane %v6999_v59, 3  ;;  %v13146_v38 = vld [vmem:[#allocation7 + $0xbd8] sm:$0xff]   ;;  %v20053_v56 = vld [vmem:[#allocation276_spill] sm:$0xff] }
 0x627   :  { %9435 = vmatprep.mubr.bf16.mxu0 %v20051_v45  ;;  %v13155_v27 = vld [vmem:[#allocation7 + $0xc88] sm:$0xff]  }
 0x628   :  { %v7049_v46 = vrot.slane %v7002_v13, 3  ;;  %8809 = vmatmul.mubr.bf16.gmra.mrb[112].mxu1 %v20050_v3 }
 0x629   :  { %11236 = vmatprep.mubr.msk.bf16.mxu1 %vm3911_vm1, %v20052_v0  ;;  %12583 = vmatpush3.bf16.msra.mxu1 %v13144_v19  ;;  %v12176_v62 = vpop.f32.mrb[8].mxu0  ;;  %v13148_v19 = vld [vmem:[#allocation7 + $0xbe0] sm:$0xff]  }
 0x62a   :  { %v7050_v7 = vsel %vm7029_vm4, %v7048_v14, %v7049_v46  ;;  %12584 = vmatprep.subr.bf16.mxu1 %v13145_v37  ;;  %v12177_v59 = vpop.f32.mrb[9].mxu0 }
 0x62b   :  { %v17767_v50 = vadd.f32 %v7050_v7, %v20053_v56  ;;  %v7006_v48 = vpop.f32.mrb[8].mxu1  ;;  %v17770_v10 = vadd.f32 %v12177_v59, %v12176_v62  ;;  %v12179_v45 = vpop.f32.mrb[10].mxu0  ;;  %v13149_v7 = vld [vmem:[#allocation7 + $0xc28] sm:$0xff]   ;;  %v13154_v56 = vld [vmem:[#allocation7 + $0xc40] sm:$0xff]  }
 0x62c   :  { %v7007_v30 = vadd.f32 %v7006_v48, %v17680_v12  ;;  %v7008_v13 = vpop.f32.mrb[9].mxu1  ;;  %v12180_v0 = vpop.f32.mrb[11].mxu0  ;;  %v20056_v62 = vld [vmem:[#allocation268_spill] sm:$0xff] }
 0x62d   :  { %20054 = vst [vmem:[#allocation277_spill] sm:$0xff] %v17767_v50  ;;  %v7009_v3 = vpop.f32.mrb[10].mxu1  ;;  %12585 = vmatpush3.bf16.msra.mxu1 %v13146_v38  ;;  %v17773_v37 = vadd.f32 %v12180_v0, %v12179_v45  ;;  %v20055_v50 = vld [vmem:[#allocation155_spill] sm:$0xff]  ;;  %v20057_v59 = vld [vmem:[#allocation40_spill] sm:$0xff]  ;;  %v20058_v13 = vld [vmem:[#allocation50_spill] sm:$0xff] }
 0x62e   :  { %v7010_v46 = vadd.f32 %v7009_v3, %v17686_v17  ;;  %v7011_v14 = vpop.f32.mrb[11].mxu1  ;;  %12586 = vmatprep.subr.bf16.mxu1 %v13147_v21  ;;  %9436 = vmatmul.mubr.bf16.vlgmr.msra.gmra.mrb[116].mxu0 %v20055_v50  ;;  %v7051_v12 = vrot.slane %v7007_v30, 3  ;;  %v13150_v17 = vld [vmem:[#allocation7 + $0xbe8] sm:$0xff]   ;;  %v13151_v38 = vld [vmem:[#allocation7 + $0xc30] sm:$0xff]  }
 0x62f   :  { %9443 = vmatprep.mubr.bf16.mxu0 %v20057_v59  ;;  %12643 = vmatpush3.bf16.msra.mxu0 %v13154_v56  ;;  %v13156_v21 = vld [vmem:[#allocation7 + $0xc48] sm:$0xff]  }
 0x630   :  { %v7052_v48 = vrot.slane %v7010_v46, 3  ;;  %8817 = vmatmul.mubr.bf16.gmra.mrb[116].mxu1 %v20056_v62  ;;  %12644 = vmatprep.subr.bf16.mxu0 %v13155_v27  ;;  %v13158_v46 = vld [vmem:[#allocation7 + $0xc90] sm:$0xff]  }
 0x631   :  { %11237 = vmatprep.mubr.msk.bf16.mxu1 %vm3911_vm1, %v20058_v13  ;;  %12587 = vmatpush3.bf16.msra.mxu1 %v13148_v19  ;;  %v12182_v0 = vpop.f32.mrb[12].mxu0 }
 0x632   :  { %v7053_v3 = vsel %vm7029_vm4, %v7051_v12, %v7052_v48  ;;  %12588 = vmatprep.subr.bf16.mxu1 %v13149_v7  ;;  %v12183_v45 = vpop.f32.mrb[13].mxu0  ;;  %v13153_v12 = vld [vmem:[#allocation7 + $0xbf0] sm:$0xff]  }
 0x633   :  { %v17782_v50 = vadd.f32 %v7053_v3, %v17561_v57  ;;  %v12210_v30 = vpop.f32.mrb[12].mxu1  ;;  %v17784_v14 = vadd.f32 %v12183_v45, %v12182_v0  ;;  %v12185_v13 = vpop.f32.mrb[14].mxu0  ;;  %12645 = vmatpush3.bf16.msra.mxu0 %v13156_v21  ;;  %v13157_v57 = vld [vmem:[#allocation7 + $0xc38] sm:$0xff]   ;;  %v13160_v48 = vld [vmem:[#allocation7 + $0xc50] sm:$0xff]  }
 0x634   :  { %v12211_v59 = vpop.f32.mrb[13].mxu1  ;;  %v12186_v32 = vpop.f32.mrb[15].mxu0  ;;  %12646 = vmatprep.subr.bf16.mxu0 %v13158_v46  ;;  %v13161_v0 = vld [vmem:[#allocation7 + $0xc98] sm:$0xff]  }
 0x635   :  { %v12212_v19 = vadd.f32 %v12211_v59, %v12210_v30  ;;  %v12213_v62 = vpop.f32.mrb[14].mxu1  ;;  %12589 = vmatpush3.bf16.msra.mxu1 %v13150_v17  ;;  %v17786_v7 = vadd.f32 %v12186_v32, %v12185_v13  ;;  %v20059_v32 = vld [vmem:[#allocation51_spill] sm:$0xff] }
 0x636   :  { %v12214_v56 = vpop.f32.mrb[15].mxu1  ;;  %12590 = vmatprep.subr.bf16.mxu1 %v13151_v38  ;;  %9444 = vmatmul.mubr.bf16.gmra.mrb[120].mxu0 %v19845_v41  ;;  %v13159_v13 = vld [vmem:[#allocation7 + $0xbf8] sm:$0xff]   ;;  %v13163_v41 = vld [vmem:[#allocation7 + $0xca0] sm:$0xff]  }
 0x637   :  { %v7683_v3 = vadd.f32 %v12212_v19, %v17695_v20  ;;  %v12215_v27 = vadd.f32 %v12214_v56, %v12213_v62  ;;  %9451 = vmatprep.mubr.bf16.mxu0 %v15982_v55  ;;  %12647 = vmatpush3.bf16.msra.mxu0 %v13160_v48  ;;  %v13162_v20 = vld [vmem:[#allocation7 + $0xc58] sm:$0xff]   ;;  %v13164_v56 = vld [vmem:[#allocation7 + $0xc60] sm:$0xff]  }
 0x638   :  { %8825 = vmatmul.mubr.bf16.gmra.mrb[120].mxu1 %v16796_v11  ;;  %12648 = vmatprep.subr.bf16.mxu0 %v13161_v0  ;;  %v13166_v0 = vld [vmem:[#allocation7 + $0xca8] sm:$0xff]  }
 0x639   :  { %v7686_v17 = vadd.f32 %v12215_v27, %v17698_v54  ;;  %11238 = vmatprep.mubr.msk.bf16.mxu1 %vm3911_vm1, %v20059_v32  ;;  %12591 = vmatpush3.bf16.msra.mxu1 %v13153_v12  ;;  %v12188_v38 = vpop.f32.mrb[16].mxu0  ;;  %v20060_v27 = vld [vmem:[#allocation78_spill] sm:$0xff] }
 0x63a   :  { %12592 = vmatprep.subr.bf16.mxu1 %v13157_v57  ;;  %v12189_v21 = vpop.f32.mrb[17].mxu0 }
 0x63b   :  { %v12216_v62 = vpop.f32.mrb[16].mxu1  ;;  %v17795_v30 = vadd.f32 %v12189_v21, %v12188_v38  ;;  %v12191_v46 = vpop.f32.mrb[18].mxu0  ;;  %12649 = vmatpush3.bf16.msra.mxu0 %v13162_v20  ;;  %v20061_v38 = vld [vmem:[#allocation97_spill] sm:$0xff]  ;;  %v20063_v21 = vld [vmem:[#allocation84_spill] sm:$0xff] }
 0x63c   :  { %v12217_v45 = vpop.f32.mrb[17].mxu1  ;;  %v12192_v54 = vpop.f32.mrb[19].mxu0  ;;  %12650 = vmatprep.subr.bf16.mxu0 %v13163_v41 }
 0x63d   :  { %v12218_v55 = vadd.f32 %v12217_v45, %v12216_v62  ;;  %v12219_v59 = vpop.f32.mrb[18].mxu1  ;;  %12593 = vmatpush3.bf16.msra.mxu1 %v13159_v13  ;;  %v17797_v19 = vadd.f32 %v12192_v54, %v12191_v46  ;;  %v20062_v62 = vld [vmem:[#allocation79_spill] sm:$0xff]  ;;  %v13167_v45 = vld [vmem:[#allocation7 + $0xc68] sm:$0xff]  }
 0x63e   :  { %v12220_v12 = vpop.f32.mrb[19].mxu1  ;;  %9694 = vmatprep.subr.bf16.mxu1 %v19521_v36  ;;  %9452 = vmatmul.mubr.bf16.gmra.mrb[124].mxu0 %v20060_v27 }
 0x63f   :  { %v7691_v57 = vadd.f32 %v12218_v55, %v17711_v22  ;;  %v12221_v48 = vadd.f32 %v12220_v12, %v12219_v59  ;;  %9459 = vmatprep.mubr.bf16.mxu0 %v20062_v62  ;;  %12651 = vmatpush3.bf16.msra.mxu0 %v13164_v56  ;;  %v13169_v22 = vld [vmem:[#allocation7 + $0xcb0] sm:$0xff]  }
 0x640   :  { %8833 = vmatmul.mubr.bf16.gmra.mrb[124].mxu1 %v20061_v38  ;;  %12652 = vmatprep.subr.bf16.mxu0 %v13166_v0  ;;  %v13171_v0 = vld [vmem:[#allocation7 + $0xcb8] sm:$0xff]  }
 0x641   :  { %v7694_v13 = vadd.f32 %v12221_v48, %v17714_v18  ;;  %11239 = vmatprep.mubr.msk.bf16.mxu1 %vm3911_vm1, %v20063_v21  ;;  %v12274_v20 = vpop.f32.mrb[20].mxu0  ;;  %v13170_v18 = vld [vmem:[#allocation7 + $0xc70] sm:$0xff]  }
 0x642   :  { %v12275_v54 = vpop.f32.mrb[21].mxu0 }
 0x643   :  { %v12222_v46 = vpop.f32.mrb[20].mxu1  ;;  %v12276_v59 = vadd.f32 %v12275_v54, %v12274_v20  ;;  %v12277_v41 = vpop.f32.mrb[22].mxu0  ;;  %12653 = vmatpush3.bf16.msra.mxu0 %v13167_v45 }
 0x644   :  { %v12223_v55 = vpop.f32.mrb[21].mxu1  ;;  %v12278_v38 = vpop.f32.mrb[23].mxu0  ;;  %12654 = vmatprep.subr.bf16.mxu0 %v13169_v22 }
 0x645   :  { %v12224_v12 = vadd.f32 %v12223_v55, %v12222_v46  ;;  %v12225_v27 = vpop.f32.mrb[22].mxu1  ;;  %v12279_v62 = vadd.f32 %v12278_v38, %v12277_v41  ;;  %v17807_v48 = vadd.f32 %v12276_v59, %v7683_v3  ;;  %v13173_v38 = vld [vmem:[#allocation7 + $0xc78] sm:$0xff]  }
 0x646   :  { %v12226_v32 = vpop.f32.mrb[23].mxu1  ;;  %9460 = vmatmul.mubr.bf16.gmra.mrb[128].mxu0 %v19856_v16 }
 0x647   :  { %v7699_v21 = vadd.f32 %v12224_v12, %v17725_v49  ;;  %v12227_v56 = vadd.f32 %v12226_v32, %v12225_v27  ;;  %9467 = vmatprep.mubr.bf16.mxu0 %v19857_v24  ;;  %v17813_v20 = vadd.f32 %v12279_v62, %v7686_v17  ;;  %12655 = vmatpush3.bf16.msra.mxu0 %v13170_v18 }
 0x648   :  { %8841 = vmatmul.mubr.bf16.gmra.mrb[128].mxu1 %v16833_v26  ;;  %12656 = vmatprep.subr.bf16.mxu0 %v13171_v0 }
 0x649   :  { %v7702_v46 = vadd.f32 %v12227_v56, %v17728_v43  ;;  %11240 = vmatprep.mubr.msk.bf16.mxu1 %vm3911_vm1, %v16860_v53  ;;  %v12280_v3 = vpop.f32.mrb[24].mxu0 }
 0x64a   :  { %v12281_v32 = vpop.f32.mrb[25].mxu0 }
 0x64b   :  { %v12228_v49 = vpop.f32.mrb[24].mxu1  ;;  %v12282_v45 = vadd.f32 %v12281_v32, %v12280_v3  ;;  %v12283_v54 = vpop.f32.mrb[26].mxu0  ;;  %12657 = vmatpush3.bf16.msra.mxu0 %v13173_v38 }
 0x64c   :  { %v12229_v16 = vpop.f32.mrb[25].mxu1  ;;  %v12284_v59 = vpop.f32.mrb[27].mxu0 }
 0x64d   :  { %v12230_v22 = vadd.f32 %v12229_v16, %v12228_v49  ;;  %v12231_v55 = vpop.f32.mrb[26].mxu1  ;;  %v12285_v17 = vadd.f32 %v12284_v59, %v12283_v54  ;;  %v17818_v41 = vadd.f32 %v12282_v45, %v7691_v57 }
 0x64e   :  { %v12232_v24 = vpop.f32.mrb[27].mxu1  ;;  %9468 = vmatmul.mubr.bf16.gmra.mrb[132].mxu0 %v19858_v40 }
 0x64f   :  { %v7707_v43 = vadd.f32 %v12230_v22, %v17740_v2  ;;  %v12233_v12 = vadd.f32 %v12232_v24, %v12231_v55  ;;  %9475 = vmatprep.mubr.bf16.mxu0 %v19859_v33  ;;  %v17824_v27 = vadd.f32 %v12285_v17, %v7694_v13 }
 0x650   :  { %8849 = vmatmul.mubr.bf16.gmra.mrb[132].mxu1 %v16857_v4 }
 0x651   :  { %v7710_v62 = vadd.f32 %v12233_v12, %v17743_v25  ;;  %11241 = vmatprep.mubr.msk.bf16.mxu1 %vm3911_vm1, %v16869_v6  ;;  %v12286_v18 = vpop.f32.mrb[28].mxu0 }
 0x652   :  { %v12287_v57 = vpop.f32.mrb[29].mxu0 }
 0x653   :  { %v12234_v56 = vpop.f32.mrb[28].mxu1  ;;  %v12288_v3 = vadd.f32 %v12287_v57, %v12286_v18  ;;  %v12289_v2 = vpop.f32.mrb[30].mxu0 }
 0x654   :  { %v12235_v0 = vpop.f32.mrb[29].mxu1  ;;  %v12290_v40 = vpop.f32.mrb[31].mxu0 }
 0x655   :  { %v12236_v38 = vadd.f32 %v12235_v0, %v12234_v56  ;;  %v12237_v49 = vpop.f32.mrb[30].mxu1  ;;  %v12291_v16 = vadd.f32 %v12290_v40, %v12289_v2  ;;  %v17829_v45 = vadd.f32 %v12288_v3, %v7699_v21 }
 0x656   :  { %v12238_v32 = vpop.f32.mrb[31].mxu1  ;;  %9476 = vmatmul.mubr.bf16.gmra.mrb[136].mxu0 %v19860_v58  ;;  %v13165_v58 = vld [vmem:[#allocation7 + $0xcc0] sm:$0xff]  }
 0x657   :  { %v7715_v33 = vadd.f32 %v12236_v38, %v17755_v61  ;;  %v12239_v13 = vadd.f32 %v12238_v32, %v12237_v49  ;;  %9483 = vmatprep.mubr.bf16.mxu0 %v19861_v60  ;;  %v17835_v25 = vadd.f32 %v12291_v16, %v7702_v46  ;;  %v20066_v38 = vld [vmem:[#allocation91_spill] sm:$0xff]  ;;  %v13168_v49 = vld [vmem:[#allocation7 + $0xcc8] sm:$0xff]  }
 0x658   :  { %8857 = vmatmul.mubr.bf16.gmra.mrb[136].mxu1 %v16866_v63 }
 0x659   :  { %v7718_v54 = vadd.f32 %v12239_v13, %v17758_v8  ;;  %9532 = vmatprep.mubr.bf16.mxu1 %v19862_v1  ;;  %v12292_v22 = vpop.f32.mrb[32].mxu0  ;;  %v20064_v1 = vld [vmem:[#allocation85_spill] sm:$0xff]  ;;  %v20065_v8 = vld [vmem:[#allocation171_spill] sm:$0xff] }
 0x65a   :  { %v12293_v59 = vpop.f32.mrb[33].mxu0 }
 0x65b   :  { %v12240_v55 = vpop.f32.mrb[32].mxu1  ;;  %v12294_v24 = vadd.f32 %v12293_v59, %v12292_v22  ;;  %v12295_v17 = vpop.f32.mrb[34].mxu0 }
 0x65c   :  { %v12241_v21 = vpop.f32.mrb[33].mxu1  ;;  %v12296_v18 = vpop.f32.mrb[35].mxu0 }
 0x65d   :  { %v12242_v61 = vadd.f32 %v12241_v21, %v12240_v55  ;;  %v12243_v12 = vpop.f32.mrb[34].mxu1  ;;  %v12297_v57 = vadd.f32 %v12296_v18, %v12295_v17  ;;  %v17839_v0 = vadd.f32 %v12294_v24, %v7707_v43  ;;  %v20069_v18 = vld [vmem:[#allocation94_spill] sm:$0xff] }
 0x65e   :  { %v12244_v56 = vpop.f32.mrb[35].mxu1  ;;  %9484 = vmatmul.mubr.bf16.gmra.mrb[140].mxu0 %v19863_v51 }
 0x65f   :  { %v7723_v60 = vadd.f32 %v12242_v61, %v17770_v10  ;;  %v12245_v46 = vadd.f32 %v12244_v56, %v12243_v12  ;;  %9491 = vmatprep.mubr.bf16.mxu0 %v20065_v8  ;;  %v17845_v3 = vadd.f32 %v12297_v57, %v7710_v62  ;;  %v13172_v62 = vld [vmem:[#allocation7 + $0xcd0] sm:$0xff]   ;;  %v20070_v57 = vld [vmem:[#allocation175_spill] sm:$0xff] }
 0x660   :  { %9533 = vmatmul.mubr.bf16.vlgmr.msra.gmra.mrb[140].mxu1 %v20064_v1  ;;  %v20067_v61 = vld [vmem:[#allocation169_spill] sm:$0xff] }
 0x661   :  { %v7726_v2 = vadd.f32 %v12245_v46, %v17773_v37  ;;  %9540 = vmatprep.mubr.bf16.mxu1 %v20066_v38  ;;  %9695 = vmatpush1.bf16.msra.mxu1 %v13165_v58  ;;  %v12298_v40 = vpop.f32.mrb[36].mxu0  ;;  %v20068_v12 = vld [vmem:[#allocation89_spill] sm:$0xff]  ;;  %v13174_v46 = vld [vmem:[#allocation7 + $0xcd8] sm:$0xff]  }
 0x662   :  { %9696 = vmatprep.subr.bf16.mxu1 %v19521_v36  ;;  %v12299_v10 = vpop.f32.mrb[37].mxu0 }
 0x663   :  { %v12246_v43 = vpop.f32.mrb[36].mxu1  ;;  %v12300_v16 = vadd.f32 %v12299_v10, %v12298_v40  ;;  %v12301_v51 = vpop.f32.mrb[38].mxu0 }
 0x664   :  { %v12247_v32 = vpop.f32.mrb[37].mxu1  ;;  %v12302_v55 = vpop.f32.mrb[39].mxu0 }
 0x665   :  { %v12248_v13 = vadd.f32 %v12247_v32, %v12246_v43  ;;  %v12249_v22 = vpop.f32.mrb[38].mxu1  ;;  %9697 = vmatpush1.bf16.msra.mxu1 %v13168_v49  ;;  %v12303_v21 = vadd.f32 %v12302_v55, %v12301_v51  ;;  %v17851_v37 = vadd.f32 %v12300_v16, %v7715_v33  ;;  %v20072_v55 = vld [vmem:[#allocation173_spill] sm:$0xff] }
 0x666   :  { %v12250_v59 = vpop.f32.mrb[39].mxu1  ;;  %9698 = vmatprep.subr.bf16.mxu1 %v19521_v36  ;;  %9492 = vmatmul.mubr.bf16.gmra.mrb[144].mxu0 %v20067_v61  ;;  %v13176_v61 = vld [vmem:[#allocation7 + $0xce8] sm:$0xff]  }
 0x667   :  { %v7731_v24 = vadd.f32 %v12248_v13, %v17784_v14  ;;  %v12251_v17 = vadd.f32 %v12250_v59, %v12249_v22  ;;  %9629 = vmatprep.mubr.bf16.mxu0 %v20069_v18  ;;  %v17857_v58 = vadd.f32 %v12303_v21, %v7718_v54  ;;  %v13175_v54 = vld [vmem:[#allocation7 + $0xce0] sm:$0xff]   ;;  %v20071_v22 = vld [vmem:[#allocation93_spill] sm:$0xff] }
 0x668   :  { %9541 = vmatmul.mubr.bf16.gmra.mrb[144].mxu1 %v20068_v12 }
 0x669   :  { %v7734_v56 = vadd.f32 %v12251_v17, %v17786_v7  ;;  %9548 = vmatprep.mubr.bf16.mxu1 %v20070_v57  ;;  %9699 = vmatpush1.bf16.msra.mxu1 %v13172_v62  ;;  %v12304_v1 = vpop.f32.mrb[40].mxu0  ;;  %v20073_v62 = vld [vmem:[#allocation98_spill] sm:$0xff]  ;;  %v20074_v17 = vld [vmem:[#allocation179_spill] sm:$0xff] }
 0x66a   :  { %9700 = vmatprep.subr.bf16.mxu1 %v19521_v36  ;;  %v12305_v14 = vpop.f32.mrb[41].mxu0 }
 0x66b   :  { %v12252_v33 = vpop.f32.mrb[40].mxu1  ;;  %v12306_v38 = vadd.f32 %v12305_v14, %v12304_v1  ;;  %v12307_v49 = vpop.f32.mrb[42].mxu0 }
 0x66c   :  { %v12253_v8 = vpop.f32.mrb[41].mxu1  ;;  %v12308_v10 = vpop.f32.mrb[43].mxu0 }
 0x66d   :  { %v12254_v40 = vadd.f32 %v12253_v8, %v12252_v33  ;;  %v12255_v43 = vpop.f32.mrb[42].mxu1  ;;  %9701 = vmatpush1.bf16.msra.mxu1 %v13174_v46  ;;  %v12309_v16 = vadd.f32 %v12308_v10, %v12307_v49  ;;  %v17863_v7 = vadd.f32 %v12306_v38, %v7723_v60 }
 0x66e   :  { %v12256_v32 = vpop.f32.mrb[43].mxu1  ;;  %9702 = vmatprep.subr.bf16.mxu1 %v19521_v36  ;;  %9630 = vmatmul.mubr.bf16.vlgmr.msra.gmra.mrb[148].mxu0 %v20071_v22 }
 0x66f   :  { %v7739_v51 = vadd.f32 %v12254_v40, %v17795_v30  ;;  %v12257_v13 = vadd.f32 %v12256_v32, %v12255_v43  ;;  %9637 = vmatprep.mubr.bf16.mxu0 %v20073_v62  ;;  %v17869_v59 = vadd.f32 %v12309_v16, %v7726_v2  ;;  %v13177_v2 = vld [vmem:[#allocation7 + $0xcf0] sm:$0xff]  }
 0x670   :  { %9549 = vmatmul.mubr.bf16.gmra.mrb[148].mxu1 %v20072_v55 }
 0x671   :  { %v7742_v21 = vadd.f32 %v12257_v13, %v17797_v19  ;;  %9556 = vmatprep.mubr.bf16.mxu1 %v20074_v17  ;;  %9703 = vmatpush1.bf16.msra.mxu1 %v13175_v54  ;;  %v12310_v12 = vpop.f32.mrb[44].mxu0 }
 0x672   :  { %9704 = vmatprep.subr.bf16.mxu1 %v19521_v36  ;;  %v12311_v30 = vpop.f32.mrb[45].mxu0 }
 0x673   :  { %v7876_v60 = vpop.f32.mrb[44].mxu1  ;;  %v12312_v57 = vadd.f32 %v12311_v30, %v12310_v12  ;;  %v12313_v1 = vpop.f32.mrb[46].mxu0 }
 0x674   :  { %v7877_v18 = vadd.f32 %v7876_v60, %v17807_v48  ;;  %v7878_v46 = vpop.f32.mrb[45].mxu1  ;;  %v12314_v14 = vpop.f32.mrb[47].mxu0 }
 0x675   :  { %v7879_v33 = vpop.f32.mrb[46].mxu1  ;;  %9705 = vmatpush1.bf16.msra.mxu1 %v13176_v61  ;;  %v12315_v8 = vadd.f32 %v12314_v14, %v12313_v1  ;;  %v17877_v49 = vadd.f32 %v12312_v57, %v7731_v24  ;;  %v13181_v1 = vld [vmem:[#allocation7 + $0xd10] sm:$0xff]  }
 0x676   :  { %v7880_v19 = vadd.f32 %v7879_v33, %v17813_v20  ;;  %v7881_v38 = vpop.f32.mrb[47].mxu1  ;;  %9706 = vmatprep.subr.bf16.mxu1 %v19521_v36  ;;  %9638 = vmatmul.mubr.bf16.gmra.mrb[152].mxu0 %v19894_v28  ;;  %v7956_v40 = vrot.slane %v7877_v18, 4  ;;  %v13178_v20 = vld [vmem:[#allocation7 + $0xcf8] sm:$0xff]  }
 0x677   :  { %9645 = vmatprep.mubr.bf16.mxu0 %v19928_v29  ;;  %v17882_v43 = vadd.f32 %v12315_v8, %v7734_v56  ;;  %v20075_v38 = vld [vmem:[#allocation105_spill] sm:$0xff] }
 0x678   :  { %v7957_v48 = vrot.slane %v7880_v19, 4  ;;  %9557 = vmatmul.mubr.bf16.gmra.mrb[152].mxu1 %v19895_v5 }
 0x679   :  { %9564 = vmatprep.mubr.bf16.mxu1 %v19977_v52  ;;  %9707 = vmatpush1.bf16.msra.mxu1 %v13177_v2  ;;  %v12316_v54 = vpop.f32.mrb[48].mxu0  ;;  %v13179_v52 = vld [vmem:[#allocation7 + $0xd00] sm:$0xff]  }
 0x67a   :  { %v7958_v10 = vsel %vm7955_vm5, %v7956_v40, %v7957_v48  ;;  %9708 = vmatprep.subr.bf16.mxu1 %v19521_v36  ;;  %v12317_v32 = vpop.f32.mrb[49].mxu0 }
 0x67b   :  { %v17888_v24 = vadd.f32 %v7958_v10, %v17674_v47  ;;  %v7884_v28 = vpop.f32.mrb[48].mxu1  ;;  %v12318_v16 = vadd.f32 %v12317_v32, %v12316_v54  ;;  %v12319_v56 = vpop.f32.mrb[50].mxu0 }
 0x67c   :  { %v7885_v5 = vadd.f32 %v7884_v28, %v17818_v41  ;;  %v7886_v29 = vpop.f32.mrb[49].mxu1  ;;  %v12320_v22 = vpop.f32.mrb[51].mxu0 }
 0x67d   :  { %v7887_v13 = vpop.f32.mrb[50].mxu1  ;;  %9709 = vmatpush1.bf16.msra.mxu1 %v13178_v20  ;;  %v12321_v62 = vadd.f32 %v12320_v22, %v12319_v56  ;;  %v17893_v61 = vadd.f32 %v12318_v16, %v7739_v51  ;;  %v20076_v16 = vld [vmem:[#allocation75_spill] sm:$0xff] }
 0x67e   :  { %v7888_v55 = vadd.f32 %v7887_v13, %v17824_v27  ;;  %v7889_v17 = vpop.f32.mrb[51].mxu1  ;;  %9710 = vmatprep.subr.bf16.mxu1 %v19521_v36  ;;  %9646 = vmatmul.mubr.bf16.gmra.mrb[156].mxu0 %v19899_v42  ;;  %v7959_v47 = vrot.slane %v7885_v5, 4  ;;  %v13180_v27 = vld [vmem:[#allocation7 + $0xd08] sm:$0xff]   ;;  %v20077_v13 = vld [vmem:[#allocation187_spill] sm:$0xff] }
 0x67f   :  { %9653 = vmatprep.mubr.bf16.mxu0 %v19931_v31  ;;  %v17898_v41 = vadd.f32 %v12321_v62, %v7742_v21  ;;  %v20079_v22 = vld [vmem:[#allocation47_spill] sm:$0xff]  ;;  %v20080_v62 = vld [vmem:[#allocation56_spill] sm:$0xff] }
 0x680   :  { %v7960_v12 = vrot.slane %v7888_v55, 4  ;;  %9565 = vmatmul.mubr.bf16.gmra.mrb[156].mxu1 %v19880_v39 }
 0x681   :  { %9572 = vmatprep.mubr.bf16.mxu1 %v19978_v9  ;;  %9711 = vmatpush1.bf16.msra.mxu1 %v13179_v52  ;;  %v12338_v30 = vpop.f32.mrb[52].mxu0 }
 0x682   :  { %v7961_v60 = vsel %vm7955_vm5, %v7959_v47, %v7960_v12  ;;  %9712 = vmatprep.subr.bf16.mxu1 %v19521_v36  ;;  %v12339_v18 = vpop.f32.mrb[53].mxu0 }
 0x683   :  { %v17904_v51 = vadd.f32 %v7961_v60, %v17692_v35  ;;  %v7892_v42 = vpop.f32.mrb[52].mxu1  ;;  %v17907_v31 = vadd.f32 %v12339_v18, %v12338_v30  ;;  %v12341_v21 = vpop.f32.mrb[54].mxu0 }
 0x684   :  { %v7893_v39 = vadd.f32 %v7892_v42, %v17829_v45  ;;  %v7894_v57 = vpop.f32.mrb[53].mxu1  ;;  %v12342_v9 = vpop.f32.mrb[55].mxu0  ;;  %v13182_v45 = vld [vmem:[#allocation7 + $0xd18] sm:$0xff]  }
 0x685   :  { %v7895_v46 = vpop.f32.mrb[54].mxu1  ;;  %9713 = vmatpush1.bf16.msra.mxu1 %v13180_v27  ;;  %v17910_v2 = vadd.f32 %v12342_v9, %v12341_v21 }
 0x686   :  { %v7896_v33 = vadd.f32 %v7895_v46, %v17835_v25  ;;  %v7897_v14 = vpop.f32.mrb[55].mxu1  ;;  %9714 = vmatprep.subr.bf16.mxu1 %v19521_v36  ;;  %9654 = vmatmul.mubr.bf16.gmra.mrb[160].mxu0 %v19903_v44  ;;  %v7962_v35 = vrot.slane %v7893_v39, 4  ;;  %v20081_v46 = vld [vmem:[#allocation92_spill] sm:$0xff] }
 0x687   :  { %9661 = vmatprep.mubr.bf16.mxu0 %v20027_v34  ;;  %v20083_v14 = vld [vmem:[#allocation265_spill] sm:$0xff] }
 0x688   :  { %v7963_v19 = vrot.slane %v7896_v33, 4  ;;  %9573 = vmatmul.mubr.bf16.gmra.mrb[160].mxu1 %v20026_v15  ;;  %v20082_v33 = vld [vmem:[#allocation46_spill] sm:$0xff] }
 0x689   :  { %9580 = vmatprep.mubr.bf16.mxu1 %v20028_v23  ;;  %9715 = vmatpush1.bf16.msra.mxu1 %v13181_v1  ;;  %v12344_v25 = vpop.f32.mrb[56].mxu0 }
 0x68a   :  { %v7964_v8 = vsel %vm7955_vm5, %v7962_v35, %v7963_v19  ;;  %9716 = vmatprep.subr.bf16.mxu1 %v19521_v36  ;;  %v12345_v44 = vpop.f32.mrb[57].mxu0 }
 0x68b   :  { %v17920_v40 = vadd.f32 %v7964_v8, %v20075_v38  ;;  %v7900_v48 = vpop.f32.mrb[56].mxu1  ;;  %v17923_v15 = vadd.f32 %v12345_v44, %v12344_v25  ;;  %v12347_v34 = vpop.f32.mrb[58].mxu0 }
 0x68c   :  { %v7901_v20 = vadd.f32 %v7900_v48, %v17839_v0  ;;  %v7902_v10 = vpop.f32.mrb[57].mxu1  ;;  %v12348_v23 = vpop.f32.mrb[59].mxu0  ;;  %v20078_v0 = vld [vmem:[#allocation48_spill] sm:$0xff] }
 0x68d   :  { %v7903_v54 = vpop.f32.mrb[58].mxu1  ;;  %9717 = vmatpush1.bf16.msra.mxu1 %v13182_v45  ;;  %v17926_v5 = vadd.f32 %v12348_v23, %v12347_v34  ;;  %v20085_v45 = vld [vmem:[#allocation106_spill] sm:$0xff] }
 0x68e   :  { %v7904_v28 = vadd.f32 %v7903_v54, %v17845_v3  ;;  %v7905_v32 = vpop.f32.mrb[59].mxu1  ;;  %10543 = vmatprep.subr.bf16.mxu1 %v19521_v36  ;;  %9662 = vmatmul.mubr.bf16.gmra.mrb[164].mxu0 %v20076_v16  ;;  %v7965_v29 = vrot.slane %v7901_v20, 4 }
 0x68f   :  { %9669 = vmatprep.mubr.bf16.mxu0 %v20078_v0  ;;  %v20086_v32 = vld [vmem:[#allocation80_spill] sm:$0xff] }
 0x690   :  { %v7966_v56 = vrot.slane %v7904_v28, 4  ;;  %9581 = vmatmul.mubr.bf16.gmra.mrb[164].mxu1 %v20077_v13  ;;  %v20088_v13 = vld [vmem:[#allocation266_spill] sm:$0xff] }
 0x691   :  { %9588 = vmatprep.mubr.bf16.mxu1 %v20079_v22  ;;  %v12350_v55 = vpop.f32.mrb[60].mxu0 }
 0x692   :  { %v7967_v52 = vsel %vm7955_vm5, %v7965_v29, %v7966_v56  ;;  %v12351_v47 = vpop.f32.mrb[61].mxu0  ;;  %v20087_v56 = vld [vmem:[#allocation49_spill] sm:$0xff] }
 0x693   :  { %v17935_v3 = vadd.f32 %v7967_v52, %v20080_v62  ;;  %v7908_v17 = vpop.f32.mrb[60].mxu1  ;;  %v17938_v60 = vadd.f32 %v12351_v47, %v12350_v55  ;;  %v12353_v30 = vpop.f32.mrb[62].mxu0  ;;  %v20090_v52 = vld [vmem:[#allocation57_spill] sm:$0xff] }
 0x694   :  { %v7909_v12 = vadd.f32 %v7908_v17, %v17851_v37  ;;  %v7910_v27 = vpop.f32.mrb[61].mxu1  ;;  %v12354_v18 = vpop.f32.mrb[63].mxu0  ;;  %v20084_v37 = vld [vmem:[#allocation95_spill] sm:$0xff] }
 0x695   :  { %v7911_v42 = vpop.f32.mrb[62].mxu1  ;;  %v17941_v21 = vadd.f32 %v12354_v18, %v12353_v30 }
 0x696   :  { %v7912_v39 = vadd.f32 %v7911_v42, %v17857_v58  ;;  %v7913_v57 = vpop.f32.mrb[63].mxu1  ;;  %9670 = vmatmul.mubr.bf16.gmra.mrb[168].mxu0 %v20081_v46  ;;  %v7968_v9 = vrot.slane %v7909_v12, 4  ;;  %v20091_v46 = vld [vmem:[#allocation190_spill] sm:$0xff] }
 0x697   :  { %9677 = vmatprep.mubr.bf16.mxu0 %v20083_v14 }
 0x698   :  { %v7969_v1 = vrot.slane %v7912_v39, 4  ;;  %9589 = vmatmul.mubr.bf16.gmra.mrb[168].mxu1 %v20082_v33  ;;  %v20092_v33 = vld [vmem:[#allocation267_spill] sm:$0xff] }
 0x699   :  { %11302 = vmatprep.mubr.msk.bf16.mxu1 %vm3911_vm1, %v20084_v37  ;;  %v12356_v19 = vpop.f32.mrb[64].mxu0 }
 0x69a   :  { %v7970_v35 = vsel %vm7955_vm5, %v7968_v9, %v7969_v1  ;;  %v12357_v25 = vpop.f32.mrb[65].mxu0 }
 0x69b   :  { %v17950_v8 = vadd.f32 %v7970_v35, %v20085_v45  ;;  %v7916_v58 = vpop.f32.mrb[64].mxu1  ;;  %v17953_v44 = vadd.f32 %v12357_v25, %v12356_v19  ;;  %v12359_v20 = vpop.f32.mrb[66].mxu0  ;;  %v20094_v35 = vld [vmem:[#allocation277_spill] sm:$0xff] }
 0x69c   :  { %v7917_v38 = vadd.f32 %v7916_v58, %v17863_v7  ;;  %v7918_v48 = vpop.f32.mrb[65].mxu1  ;;  %v12360_v34 = vpop.f32.mrb[67].mxu0  ;;  %v20089_v7 = vld [vmem:[#allocation269_spill] sm:$0xff] }
 0x69d   :  { %v7919_v10 = vpop.f32.mrb[66].mxu1  ;;  %v17956_v28 = vadd.f32 %v12360_v34, %v12359_v20 }
 0x69e   :  { %v7920_v54 = vadd.f32 %v7919_v10, %v17869_v59  ;;  %v7921_v23 = vpop.f32.mrb[67].mxu1  ;;  %9678 = vmatmul.mubr.bf16.gmra.mrb[172].mxu0 %v20086_v32  ;;  %v7971_v16 = vrot.slane %v7917_v38, 4 }
 0x69f   :  { %9685 = vmatprep.mubr.bf16.mxu0 %v20088_v13 }
 0x6a0   :  { %v7972_v29 = vrot.slane %v7920_v54, 4  ;;  %9727 = vmatmul.mubr.bf16.vlgmr.msra.gmra.mrb[172].mxu1 %v20087_v56  ;;  %v20096_v56 = vld [vmem:[#allocation50_spill] sm:$0xff] }
 0x6a1   :  { %11303 = vmatprep.mubr.msk.bf16.mxu1 %vm3911_vm1, %v20089_v7  ;;  %v12362_v22 = vpop.f32.mrb[68].mxu0 }
 0x6a2   :  { %v7973_v0 = vsel %vm7955_vm5, %v7971_v16, %v7972_v29  ;;  %v12363_v62 = vpop.f32.mrb[69].mxu0  ;;  %v20095_v29 = vld [vmem:[#allocation268_spill] sm:$0xff] }
 0x6a3   :  { %v17965_v55 = vadd.f32 %v7973_v0, %v20090_v52  ;;  %v7924_v59 = vpop.f32.mrb[68].mxu1  ;;  %v17968_v12 = vadd.f32 %v12363_v62, %v12362_v22  ;;  %v12365_v27 = vpop.f32.mrb[70].mxu0 }
 0x6a4   :  { %v7925_v17 = vadd.f32 %v7924_v59, %v17877_v49  ;;  %v7926_v47 = vpop.f32.mrb[69].mxu1  ;;  %v12366_v42 = vpop.f32.mrb[71].mxu0  ;;  %v20093_v49 = vld [vmem:[#allocation82_spill] sm:$0xff] }
 0x6a5   :  { %v7927_v30 = vpop.f32.mrb[70].mxu1  ;;  %v17971_v57 = vadd.f32 %v12366_v42, %v12365_v27 }
 0x6a6   :  { %v7928_v18 = vadd.f32 %v7927_v30, %v17882_v43  ;;  %v7929_v39 = vpop.f32.mrb[71].mxu1  ;;  %9686 = vmatmul.mubr.bf16.gmra.mrb[176].mxu0 %v20091_v46  ;;  %v7974_v9 = vrot.slane %v7925_v17, 4 }
 0x6a7   :  { %10084 = vmatprep.mubr.bf16.mxu0 %v19521_v36  ;;  %v20097_v39 = vld [vmem:[#allocation51_spill] sm:$0xff] }
 0x6a8   :  { %v7975_v1 = vrot.slane %v7928_v18, 4  ;;  %9735 = vmatmul.mubr.bf16.gmra.mrb[176].mxu1 %v20092_v33 }
 0x6a9   :  { %11304 = vmatprep.mubr.msk.bf16.mxu1 %vm3911_vm1, %v20093_v49  ;;  %v12368_v37 = vpop.f32.mrb[72].mxu0 }
 0x6aa   :  { %v7976_v14 = vsel %vm7955_vm5, %v7974_v9, %v7975_v1  ;;  %v12369_v45 = vpop.f32.mrb[73].mxu0 }
 0x6ab   :  { %v17980_v19 = vadd.f32 %v7976_v14, %v20094_v35  ;;  %v7932_v43 = vpop.f32.mrb[72].mxu1  ;;  %v17983_v38 = vadd.f32 %v12369_v45, %v12368_v37  ;;  %v12371_v48 = vpop.f32.mrb[74].mxu0 }
 0x6ac   :  { %v7933_v58 = vadd.f32 %v7932_v43, %v17893_v61  ;;  %v7934_v25 = vpop.f32.mrb[73].mxu1  ;;  %v12372_v10 = vpop.f32.mrb[75].mxu0 }
 0x6ad   :  { %v7935_v20 = vpop.f32.mrb[74].mxu1  ;;  %v17986_v23 = vadd.f32 %v12372_v10, %v12371_v48  ;;  %v20099_v48 = vld [vmem:[#allocation84_spill] sm:$0xff] }
 0x6ae   :  { %v7936_v34 = vadd.f32 %v7935_v20, %v17898_v41  ;;  %v7937_v54 = vpop.f32.mrb[75].mxu1  ;;  %v7977_v32 = vrot.slane %v7933_v58, 4 }
 0x6b0   :  { %v7978_v16 = vrot.slane %v7936_v34, 4  ;;  %9743 = vmatmul.mubr.bf16.gmra.mrb[180].mxu1 %v20095_v29 }
 0x6b1   :  { %11305 = vmatprep.mubr.msk.bf16.mxu1 %vm3911_vm1, %v20096_v56  ;;  %v12374_v13 = vpop.f32.mrb[76].mxu0 }
 0x6b2   :  { %v7979_v61 = vsel %vm7955_vm5, %v7977_v32, %v7978_v16  ;;  %v12375_v22 = vpop.f32.mrb[77].mxu0 }
 0x6b3   :  { %v17993_v7 = vadd.f32 %v7979_v61, %v17782_v50  ;;  %v12402_v0 = vpop.f32.mrb[76].mxu1  ;;  %v17995_v52 = vadd.f32 %v12375_v22, %v12374_v13  ;;  %v12377_v59 = vpop.f32.mrb[78].mxu0 }
 0x6b4   :  { %v12403_v41 = vpop.f32.mrb[77].mxu1  ;;  %v12378_v47 = vpop.f32.mrb[79].mxu0 }
 0x6b5   :  { %v12404_v62 = vadd.f32 %v12403_v41, %v12402_v0  ;;  %v12405_v17 = vpop.f32.mrb[78].mxu1  ;;  %v17997_v27 = vadd.f32 %v12378_v47, %v12377_v59 }
 0x6b6   :  { %v12406_v30 = vpop.f32.mrb[79].mxu1 }
 0x6b7   :  { %v8609_v42 = vadd.f32 %v12404_v62, %v17907_v31  ;;  %v12407_v18 = vadd.f32 %v12406_v30, %v12405_v17 }
 0x6b8   :  { %9751 = vmatmul.mubr.bf16.gmra.mrb[184].mxu1 %v16796_v11 }
 0x6b9   :  { %v8612_v50 = vadd.f32 %v12407_v18, %v17910_v2  ;;  %11306 = vmatprep.mubr.msk.bf16.mxu1 %vm3911_vm1, %v20097_v39  ;;  %v12380_v46 = vpop.f32.mrb[80].mxu0  ;;  %v20098_v2 = vld [vmem:[#allocation97_spill] sm:$0xff] }
 0x6ba   :  { %v12381_v1 = vpop.f32.mrb[81].mxu0 }
 0x6bb   :  { %v12408_v9 = vpop.f32.mrb[80].mxu1  ;;  %v18004_v33 = vadd.f32 %v12381_v1, %v12380_v46  ;;  %v12383_v14 = vpop.f32.mrb[82].mxu0 }
 0x6bc   :  { %v12409_v49 = vpop.f32.mrb[81].mxu1  ;;  %v12384_v43 = vpop.f32.mrb[83].mxu0 }
 0x6bd   :  { %v12410_v37 = vadd.f32 %v12409_v49, %v12408_v9  ;;  %v12411_v35 = vpop.f32.mrb[82].mxu1  ;;  %v18006_v45 = vadd.f32 %v12384_v43, %v12383_v14 }
 0x6be   :  { %v12412_v31 = vpop.f32.mrb[83].mxu1 }
 0x6bf   :  { %v8617_v11 = vadd.f32 %v12410_v37, %v17923_v15  ;;  %v12413_v58 = vadd.f32 %v12412_v31, %v12411_v35 }
 0x6c0   :  { %9759 = vmatmul.mubr.bf16.gmra.mrb[188].mxu1 %v20098_v2 }
 0x6c1   :  { %v8620_v25 = vadd.f32 %v12413_v58, %v17926_v5  ;;  %11307 = vmatprep.mubr.msk.bf16.mxu1 %vm3911_vm1, %v20099_v48  ;;  %v12466_v20 = vpop.f32.mrb[84].mxu0 }
 0x6c2   :  { %v12467_v34 = vpop.f32.mrb[85].mxu0 }
 0x6c3   :  { %v12414_v10 = vpop.f32.mrb[84].mxu1  ;;  %v12468_v32 = vadd.f32 %v12467_v34, %v12466_v20  ;;  %v12469_v16 = vpop.f32.mrb[86].mxu0 }
 0x6c4   :  { %v12415_v54 = vpop.f32.mrb[85].mxu1  ;;  %v12470_v61 = vpop.f32.mrb[87].mxu0 }
 0x6c5   :  { %v12416_v29 = vadd.f32 %v12415_v54, %v12414_v10  ;;  %v12417_v56 = vpop.f32.mrb[86].mxu1  ;;  %v12471_v0 = vadd.f32 %v12470_v61, %v12469_v16  ;;  %v18013_v15 = vadd.f32 %v12468_v32, %v8609_v42 }
 0x6c6   :  { %v12418_v13 = vpop.f32.mrb[87].mxu1 }
 0x6c7   :  { %v8625_v22 = vadd.f32 %v12416_v29, %v17938_v60  ;;  %v12419_v41 = vadd.f32 %v12418_v13, %v12417_v56  ;;  %v18017_v5 = vadd.f32 %v12471_v0, %v8612_v50 }
 0x6c8   :  { %9767 = vmatmul.mubr.bf16.gmra.mrb[192].mxu1 %v16833_v26 }
 0x6c9   :  { %v8628_v59 = vadd.f32 %v12419_v41, %v17941_v21  ;;  %11308 = vmatprep.mubr.msk.bf16.mxu1 %vm3911_vm1, %v16860_v53  ;;  %v12472_v62 = vpop.f32.mrb[88].mxu0 }
 0x6ca   :  { %v12473_v47 = vpop.f32.mrb[89].mxu0 }
 0x6cb   :  { %v12420_v17 = vpop.f32.mrb[88].mxu1  ;;  %v12474_v18 = vadd.f32 %v12473_v47, %v12472_v62  ;;  %v12475_v39 = vpop.f32.mrb[90].mxu0 }
 0x6cc   :  { %v12421_v30 = vpop.f32.mrb[89].mxu1  ;;  %v12476_v9 = vpop.f32.mrb[91].mxu0 }
 0x6cd   :  { %v12422_v42 = vadd.f32 %v12421_v30, %v12420_v17  ;;  %v12423_v46 = vpop.f32.mrb[90].mxu1  ;;  %v12477_v1 = vadd.f32 %v12476_v9, %v12475_v39  ;;  %v18022_v49 = vadd.f32 %v12474_v18, %v8617_v11 }
 0x6ce   :  { %v12424_v60 = vpop.f32.mrb[91].mxu1 }
 0x6cf   :  { %v8633_v26 = vadd.f32 %v12422_v42, %v17953_v44  ;;  %v12425_v50 = vadd.f32 %v12424_v60, %v12423_v46  ;;  %v18026_v21 = vadd.f32 %v12477_v1, %v8620_v25 }
 0x6d0   :  { %9775 = vmatmul.mubr.bf16.gmra.mrb[196].mxu1 %v16857_v4 }
 0x6d1   :  { %v8636_v53 = vadd.f32 %v12425_v50, %v17956_v28  ;;  %11309 = vmatprep.mubr.msk.bf16.mxu1 %vm3911_vm1, %v16869_v6  ;;  %v12478_v14 = vpop.f32.mrb[92].mxu0 }
 0x6d2   :  { %v12479_v35 = vpop.f32.mrb[93].mxu0 }
 0x6d3   :  { %v12426_v37 = vpop.f32.mrb[92].mxu1  ;;  %v12480_v31 = vadd.f32 %v12479_v35, %v12478_v14  ;;  %v12481_v58 = vpop.f32.mrb[94].mxu0 }
 0x6d4   :  { %v12427_v43 = vpop.f32.mrb[93].mxu1  ;;  %v12482_v48 = vpop.f32.mrb[95].mxu0 }
 0x6d5   :  { %v12428_v11 = vadd.f32 %v12427_v43, %v12426_v37  ;;  %v12429_v2 = vpop.f32.mrb[94].mxu1  ;;  %v12483_v20 = vadd.f32 %v12482_v48, %v12481_v58  ;;  %v18031_v10 = vadd.f32 %v12480_v31, %v8625_v22 }
 0x6d6   :  { %v12430_v44 = vpop.f32.mrb[95].mxu1 }
 0x6d7   :  { %v8641_v4 = vadd.f32 %v12428_v11, %v17968_v12  ;;  %v12431_v25 = vadd.f32 %v12430_v44, %v12429_v2  ;;  %v18035_v28 = vadd.f32 %v12483_v20, %v8628_v59 }
 0x6d8   :  { %9783 = vmatmul.mubr.bf16.gmra.mrb[200].mxu1 %v16866_v63 }
 0x6d9   :  { %v8644_v6 = vadd.f32 %v12431_v25, %v17971_v57  ;;  %v12484_v34 = vpop.f32.mrb[96].mxu0 }
 0x6da   :  { %v12485_v32 = vpop.f32.mrb[97].mxu0 }
 0x6db   :  { %v12432_v54 = vpop.f32.mrb[96].mxu1  ;;  %v12486_v29 = vadd.f32 %v12485_v32, %v12484_v34  ;;  %v12487_v56 = vpop.f32.mrb[98].mxu0 }
 0x6dc   :  { %v12433_v16 = vpop.f32.mrb[97].mxu1  ;;  %v12488_v0 = vpop.f32.mrb[99].mxu0 }
 0x6dd   :  { %v12434_v61 = vadd.f32 %v12433_v16, %v12432_v54  ;;  %v12435_v13 = vpop.f32.mrb[98].mxu1  ;;  %v12489_v41 = vadd.f32 %v12488_v0, %v12487_v56  ;;  %v18038_v62 = vadd.f32 %v12486_v29, %v8633_v26 }
 0x6de   :  { %v12436_v22 = vpop.f32.mrb[99].mxu1 }
 0x6df   :  { %v8649_v12 = vadd.f32 %v12434_v61, %v17983_v38  ;;  %v12437_v63 = vadd.f32 %v12436_v22, %v12435_v13  ;;  %v18041_v59 = vadd.f32 %v12489_v41, %v8636_v53 }
 0x6e1   :  { %v8652_v57 = vadd.f32 %v12437_v63, %v17986_v23  ;;  %v12490_v17 = vpop.f32.mrb[100].mxu0 }
 0x6e2   :  { %v12491_v30 = vpop.f32.mrb[101].mxu0 }
 0x6e3   :  { %v12438_v47 = vpop.f32.mrb[100].mxu1  ;;  %v12492_v39 = vadd.f32 %v12491_v30, %v12490_v17  ;;  %v12493_v42 = vpop.f32.mrb[102].mxu0 }
 0x6e4   :  { %v12439_v18 = vpop.f32.mrb[101].mxu1  ;;  %v12494_v60 = vpop.f32.mrb[103].mxu0 }
 0x6e5   :  { %v12440_v46 = vadd.f32 %v12439_v18, %v12438_v47  ;;  %v12441_v9 = vpop.f32.mrb[102].mxu1  ;;  %v12495_v50 = vadd.f32 %v12494_v60, %v12493_v42  ;;  %v18044_v26 = vadd.f32 %v12492_v39, %v8641_v4 }
 0x6e6   :  { %v12442_v1 = vpop.f32.mrb[103].mxu1 }
 0x6e7   :  { %v8657_v38 = vadd.f32 %v12440_v46, %v17995_v52  ;;  %v12443_v14 = vadd.f32 %v12442_v1, %v12441_v9  ;;  %v18047_v53 = vadd.f32 %v12495_v50, %v8644_v6 }
 0x6e9   :  { %v8660_v23 = vadd.f32 %v12443_v14, %v17997_v27  ;;  %v12496_v37 = vpop.f32.mrb[104].mxu0 }
 0x6ea   :  { %v12497_v43 = vpop.f32.mrb[105].mxu0 }
 0x6eb   :  { %v12444_v35 = vpop.f32.mrb[104].mxu1  ;;  %v12498_v58 = vadd.f32 %v12497_v43, %v12496_v37  ;;  %v12499_v11 = vpop.f32.mrb[106].mxu0 }
 0x6ec   :  { %v12445_v31 = vpop.f32.mrb[105].mxu1  ;;  %v12500_v44 = vpop.f32.mrb[107].mxu0 }
 0x6ed   :  { %v12446_v2 = vadd.f32 %v12445_v31, %v12444_v35  ;;  %v12447_v48 = vpop.f32.mrb[106].mxu1  ;;  %v12501_v25 = vadd.f32 %v12500_v44, %v12499_v11  ;;  %v18050_v4 = vadd.f32 %v12498_v58, %v8649_v12 }
 0x6ee   :  { %v12448_v20 = vpop.f32.mrb[107].mxu1 }
 0x6ef   :  { %v8665_v52 = vadd.f32 %v12446_v2, %v18004_v33  ;;  %v12449_v34 = vadd.f32 %v12448_v20, %v12447_v48  ;;  %v18053_v6 = vadd.f32 %v12501_v25, %v8652_v57 }
 0x6f1   :  { %v8668_v27 = vadd.f32 %v12449_v34, %v18006_v45  ;;  %v12502_v54 = vpop.f32.mrb[108].mxu0 }
 0x6f2   :  { %v12503_v16 = vpop.f32.mrb[109].mxu0 }
 0x6f3   :  { %v8802_v32 = vpop.f32.mrb[108].mxu1  ;;  %v12504_v56 = vadd.f32 %v12503_v16, %v12502_v54  ;;  %v12505_v13 = vpop.f32.mrb[110].mxu0 }
 0x6f4   :  { %v8803_v29 = vadd.f32 %v8802_v32, %v18013_v15  ;;  %v8804_v61 = vpop.f32.mrb[109].mxu1  ;;  %v12506_v22 = vpop.f32.mrb[111].mxu0 }
 0x6f5   :  { %v8805_v0 = vpop.f32.mrb[110].mxu1  ;;  %v12507_v12 = vadd.f32 %v12506_v22, %v12505_v13  ;;  %v18058_v33 = vadd.f32 %v12504_v56, %v8657_v38 }
 0x6f6   :  { %v8806_v41 = vadd.f32 %v8805_v0, %v18017_v5  ;;  %v8807_v63 = vpop.f32.mrb[111].mxu1  ;;  %v8882_v57 = vrot.slane %v8803_v29, 5 }
 0x6f7   :  { %v18060_v45 = vadd.f32 %v12507_v12, %v8660_v23 }
 0x6f8   :  { %v8883_v17 = vrot.slane %v8806_v41, 5 }
 0x6f9   :  { %v12508_v30 = vpop.f32.mrb[112].mxu0 }
 0x6fa   :  { %v8884_v47 = vsel %vm8881_vm6, %v8882_v57, %v8883_v17  ;;  %v12509_v18 = vpop.f32.mrb[113].mxu0 }
 0x6fb   :  { %v8810_v15 = vpop.f32.mrb[112].mxu1  ;;  %v18064_v39 = vadd.f32 %v8884_v47, %v17888_v24  ;;  %v12510_v5 = vadd.f32 %v12509_v18, %v12508_v30  ;;  %v12511_v9 = vpop.f32.mrb[114].mxu0 }
 0x6fc   :  { %v8811_v42 = vadd.f32 %v8810_v15, %v18022_v49  ;;  %v8812_v46 = vpop.f32.mrb[113].mxu1  ;;  %v12512_v1 = vpop.f32.mrb[115].mxu0 }
 0x6fd   :  { %v8813_v60 = vpop.f32.mrb[114].mxu1  ;;  %v12513_v38 = vadd.f32 %v12512_v1, %v12511_v9  ;;  %v18068_v23 = vadd.f32 %v12510_v5, %v8665_v52 }
 0x6fe   :  { %v8814_v50 = vadd.f32 %v8813_v60, %v18026_v21  ;;  %v8815_v14 = vpop.f32.mrb[115].mxu1  ;;  %v8885_v37 = vrot.slane %v8811_v42, 5 }
 0x6ff   :  { %v18070_v43 = vadd.f32 %v12513_v38, %v8668_v27 }
 0x700   :  { %v8886_v35 = vrot.slane %v8814_v50, 5 }
 0x701   :  { %v12530_v31 = vpop.f32.mrb[116].mxu0 }
 0x702   :  { %v8887_v24 = vsel %vm8881_vm6, %v8885_v37, %v8886_v35  ;;  %v12531_v49 = vpop.f32.mrb[117].mxu0 }
 0x703   :  { %v8818_v58 = vpop.f32.mrb[116].mxu1  ;;  %v18074_v11 = vadd.f32 %v8887_v24, %v17904_v51  ;;  %v18077_v21 = vadd.f32 %v12531_v49, %v12530_v31  ;;  %v12533_v44 = vpop.f32.mrb[118].mxu0 }
 0x704   :  { %v8819_v2 = vadd.f32 %v8818_v58, %v18031_v10  ;;  %v8820_v48 = vpop.f32.mrb[117].mxu1  ;;  %v12534_v25 = vpop.f32.mrb[119].mxu0 }
 0x705   :  { %v8821_v20 = vpop.f32.mrb[118].mxu1  ;;  %v18080_v27 = vadd.f32 %v12534_v25, %v12533_v44 }
 0x706   :  { %v8822_v52 = vadd.f32 %v8821_v20, %v18035_v28  ;;  %v8823_v34 = vpop.f32.mrb[119].mxu1  ;;  %v8888_v54 = vrot.slane %v8819_v2, 5 }
 0x708   :  { %v8889_v32 = vrot.slane %v8822_v52, 5 }
 0x709   :  { %v12536_v29 = vpop.f32.mrb[120].mxu0 }
 0x70a   :  { %v8890_v16 = vsel %vm8881_vm6, %v8888_v54, %v8889_v32  ;;  %v12537_v56 = vpop.f32.mrb[121].mxu0 }
 0x70b   :  { %v8826_v51 = vpop.f32.mrb[120].mxu1  ;;  %v18084_v10 = vadd.f32 %v8890_v16, %v17920_v40  ;;  %v18087_v0 = vadd.f32 %v12537_v56, %v12536_v29  ;;  %v12539_v22 = vpop.f32.mrb[122].mxu0 }
 0x70c   :  { %v8827_v61 = vadd.f32 %v8826_v51, %v18038_v62  ;;  %v8828_v13 = vpop.f32.mrb[121].mxu1  ;;  %v12540_v41 = vpop.f32.mrb[123].mxu0 }
 0x70d   :  { %v8829_v28 = vpop.f32.mrb[122].mxu1  ;;  %v18090_v57 = vadd.f32 %v12540_v41, %v12539_v22 }
 0x70e   :  { %v8830_v12 = vadd.f32 %v8829_v28, %v18041_v59  ;;  %v8831_v63 = vpop.f32.mrb[123].mxu1  ;;  %v8891_v17 = vrot.slane %v8827_v61, 5 }
 0x710   :  { %v8892_v47 = vrot.slane %v8830_v12, 5 }
 0x711   :  { %v12542_v15 = vpop.f32.mrb[124].mxu0 }
 0x712   :  { %v8893_v30 = vsel %vm8881_vm6, %v8891_v17, %v8892_v47  ;;  %v12543_v18 = vpop.f32.mrb[125].mxu0 }
 0x713   :  { %v8834_v40 = vpop.f32.mrb[124].mxu1  ;;  %v18094_v62 = vadd.f32 %v8893_v30, %v17935_v3  ;;  %v18097_v46 = vadd.f32 %v12543_v18, %v12542_v15  ;;  %v12545_v9 = vpop.f32.mrb[126].mxu0 }
 0x714   :  { %v8835_v42 = vadd.f32 %v8834_v40, %v18044_v26  ;;  %v8836_v5 = vpop.f32.mrb[125].mxu1  ;;  %v12546_v60 = vpop.f32.mrb[127].mxu0 }
 0x715   :  { %v8837_v59 = vpop.f32.mrb[126].mxu1  ;;  %v18100_v38 = vadd.f32 %v12546_v60, %v12545_v9 }
 0x716   :  { %v8838_v1 = vadd.f32 %v8837_v59, %v18047_v53  ;;  %v8839_v50 = vpop.f32.mrb[127].mxu1  ;;  %v8894_v14 = vrot.slane %v8835_v42, 5 }
 0x718   :  { %v8895_v37 = vrot.slane %v8838_v1, 5 }
 0x719   :  { %v12548_v24 = vpop.f32.mrb[128].mxu0 }
 0x71a   :  { %v8896_v35 = vsel %vm8881_vm6, %v8894_v14, %v8895_v37  ;;  %v12549_v31 = vpop.f32.mrb[129].mxu0 }
 0x71b   :  { %v8842_v3 = vpop.f32.mrb[128].mxu1  ;;  %v18104_v26 = vadd.f32 %v8896_v35, %v17950_v8  ;;  %v18107_v2 = vadd.f32 %v12549_v31, %v12548_v24  ;;  %v12551_v48 = vpop.f32.mrb[130].mxu0 }
 0x71c   :  { %v8843_v58 = vadd.f32 %v8842_v3, %v18050_v4  ;;  %v8844_v49 = vpop.f32.mrb[129].mxu1  ;;  %v12552_v44 = vpop.f32.mrb[131].mxu0 }
 0x71d   :  { %v8845_v53 = vpop.f32.mrb[130].mxu1  ;;  %v18110_v52 = vadd.f32 %v12552_v44, %v12551_v48 }
 0x71e   :  { %v8846_v20 = vadd.f32 %v8845_v53, %v18053_v6  ;;  %v8847_v25 = vpop.f32.mrb[131].mxu1  ;;  %v8897_v34 = vrot.slane %v8843_v58, 5 }
 0x720   :  { %v8898_v54 = vrot.slane %v8846_v20, 5 }
 0x721   :  { %v12554_v16 = vpop.f32.mrb[132].mxu0 }
 0x722   :  { %v8899_v32 = vsel %vm8881_vm6, %v8897_v34, %v8898_v54  ;;  %v12555_v29 = vpop.f32.mrb[133].mxu0 }
 0x723   :  { %v8850_v8 = vpop.f32.mrb[132].mxu1  ;;  %v18114_v4 = vadd.f32 %v8899_v32, %v17965_v55  ;;  %v18117_v61 = vadd.f32 %v12555_v29, %v12554_v16  ;;  %v12557_v13 = vpop.f32.mrb[134].mxu0 }
 0x724   :  { %v8851_v51 = vadd.f32 %v8850_v8, %v18058_v33  ;;  %v8852_v56 = vpop.f32.mrb[133].mxu1  ;;  %v12558_v22 = vpop.f32.mrb[135].mxu0 }
 0x725   :  { %v8853_v6 = vpop.f32.mrb[134].mxu1  ;;  %v18120_v12 = vadd.f32 %v12558_v22, %v12557_v13 }
 0x726   :  { %v8854_v28 = vadd.f32 %v8853_v6, %v18060_v45  ;;  %v8855_v41 = vpop.f32.mrb[135].mxu1  ;;  %v8900_v63 = vrot.slane %v8851_v51, 5 }
 0x728   :  { %v8901_v17 = vrot.slane %v8854_v28, 5 }
 0x729   :  { %v12560_v30 = vpop.f32.mrb[136].mxu0 }
 0x72a   :  { %v8902_v47 = vsel %vm8881_vm6, %v8900_v63, %v8901_v17  ;;  %v12561_v15 = vpop.f32.mrb[137].mxu0 }
 0x72b   :  { %v8858_v55 = vpop.f32.mrb[136].mxu1  ;;  %v18124_v33 = vadd.f32 %v8902_v47, %v17980_v19  ;;  %v18127_v42 = vadd.f32 %v12561_v15, %v12560_v30  ;;  %v12563_v5 = vpop.f32.mrb[138].mxu0 }
 0x72c   :  { %v8859_v40 = vadd.f32 %v8858_v55, %v18068_v23  ;;  %v8860_v18 = vpop.f32.mrb[137].mxu1  ;;  %v12564_v9 = vpop.f32.mrb[139].mxu0 }
 0x72d   :  { %v8861_v45 = vpop.f32.mrb[138].mxu1  ;;  %v18130_v1 = vadd.f32 %v12564_v9, %v12563_v5 }
 0x72e   :  { %v8862_v59 = vadd.f32 %v8861_v45, %v18070_v43  ;;  %v8863_v60 = vpop.f32.mrb[139].mxu1  ;;  %v8903_v50 = vrot.slane %v8859_v40, 5 }
 0x730   :  { %v8904_v14 = vrot.slane %v8862_v59, 5 }
 0x731   :  { %v12566_v35 = vpop.f32.mrb[140].mxu0 }
 0x732   :  { %v8905_v37 = vsel %vm8881_vm6, %v8903_v50, %v8904_v14  ;;  %v12567_v24 = vpop.f32.mrb[141].mxu0 }
 0x733   :  { %v12594_v19 = vpop.f32.mrb[140].mxu1  ;;  %v18134_v23 = vadd.f32 %v8905_v37, %v17993_v7  ;;  %v18136_v3 = vadd.f32 %v12567_v24, %v12566_v35  ;;  %v12569_v58 = vpop.f32.mrb[142].mxu0 }
 0x734   :  { %v12595_v31 = vpop.f32.mrb[141].mxu1  ;;  %v12570_v43 = vpop.f32.mrb[143].mxu0 }
 0x735   :  { %v12596_v49 = vadd.f32 %v12595_v31, %v12594_v19  ;;  %v12597_v48 = vpop.f32.mrb[142].mxu1  ;;  %v18138_v53 = vadd.f32 %v12570_v43, %v12569_v58 }
 0x736   :  { %v12598_v44 = vpop.f32.mrb[143].mxu1 }
 0x737   :  { %v9535_v20 = vadd.f32 %v12596_v49, %v18077_v21  ;;  %v12599_v25 = vadd.f32 %v12598_v44, %v12597_v48 }
 0x739   :  { %v9538_v34 = vadd.f32 %v12599_v25, %v18080_v27  ;;  %v12572_v54 = vpop.f32.mrb[144].mxu0 }
 0x73a   :  { %v12573_v16 = vpop.f32.mrb[145].mxu0 }
 0x73b   :  { %v12600_v32 = vpop.f32.mrb[144].mxu1  ;;  %v18142_v7 = vadd.f32 %v12573_v16, %v12572_v54  ;;  %v12575_v29 = vpop.f32.mrb[146].mxu0 }
 0x73c   :  { %v12601_v8 = vpop.f32.mrb[145].mxu1  ;;  %v12576_v13 = vpop.f32.mrb[147].mxu0 }
 0x73d   :  { %v12602_v51 = vadd.f32 %v12601_v8, %v12600_v32  ;;  %v12603_v56 = vpop.f32.mrb[146].mxu1  ;;  %v18144_v6 = vadd.f32 %v12576_v13, %v12575_v29 }
 0x73e   :  { %v12604_v22 = vpop.f32.mrb[147].mxu1 }
 0x73f   :  { %v9543_v28 = vadd.f32 %v12602_v51, %v18087_v0  ;;  %v12605_v41 = vadd.f32 %v12604_v22, %v12603_v56 }
 0x741   :  { %v9546_v21 = vadd.f32 %v12605_v41, %v18090_v57  ;;  %v12658_v63 = vpop.f32.mrb[148].mxu0 }
 0x742   :  { %v12659_v17 = vpop.f32.mrb[149].mxu0 }
 0x743   :  { %v12606_v27 = vpop.f32.mrb[148].mxu1  ;;  %v12660_v30 = vadd.f32 %v12659_v17, %v12658_v63  ;;  %v12661_v55 = vpop.f32.mrb[150].mxu0 }
 0x744   :  { %v12607_v47 = vpop.f32.mrb[149].mxu1  ;;  %v12662_v18 = vpop.f32.mrb[151].mxu0 }
 0x745   :  { %v12608_v15 = vadd.f32 %v12607_v47, %v12606_v27  ;;  %v12609_v40 = vpop.f32.mrb[150].mxu1  ;;  %v12663_v45 = vadd.f32 %v12662_v18, %v12661_v55  ;;  %v18148_v9 = vadd.f32 %v12660_v30, %v9535_v20 }
 0x746   :  { %v12610_v5 = vpop.f32.mrb[151].mxu1 }
 0x747   :  { %v9551_v59 = vadd.f32 %v12608_v15, %v18097_v46  ;;  %v12611_v60 = vadd.f32 %v12610_v5, %v12609_v40  ;;  %v18151_v0 = vadd.f32 %v12663_v45, %v9538_v34 }
 0x749   :  { %v9554_v57 = vadd.f32 %v12611_v60, %v18100_v38  ;;  %v12664_v50 = vpop.f32.mrb[152].mxu0 }
 0x74a   :  { %v12665_v37 = vpop.f32.mrb[153].mxu0 }
 0x74b   :  { %v12612_v14 = vpop.f32.mrb[152].mxu1  ;;  %v12666_v19 = vadd.f32 %v12665_v37, %v12664_v50  ;;  %v12667_v24 = vpop.f32.mrb[154].mxu0 }
 0x74c   :  { %v12613_v35 = vpop.f32.mrb[153].mxu1  ;;  %v12668_v49 = vpop.f32.mrb[155].mxu0 }
 0x74d   :  { %v12614_v31 = vadd.f32 %v12613_v35, %v12612_v14  ;;  %v12615_v58 = vpop.f32.mrb[154].mxu1  ;;  %v12669_v43 = vadd.f32 %v12668_v49, %v12667_v24  ;;  %v18154_v44 = vadd.f32 %v12666_v19, %v9543_v28 }
 0x74e   :  { %v12616_v48 = vpop.f32.mrb[155].mxu1 }
 0x74f   :  { %v9559_v46 = vadd.f32 %v12614_v31, %v18107_v2  ;;  %v12617_v20 = vadd.f32 %v12616_v48, %v12615_v58  ;;  %v18157_v25 = vadd.f32 %v12669_v43, %v9546_v21 }
 0x751   :  { %v9562_v38 = vadd.f32 %v12617_v20, %v18110_v52  ;;  %v12670_v34 = vpop.f32.mrb[156].mxu0 }
 0x752   :  { %v12671_v32 = vpop.f32.mrb[157].mxu0 }
 0x753   :  { %v12618_v54 = vpop.f32.mrb[156].mxu1  ;;  %v12672_v8 = vadd.f32 %v12671_v32, %v12670_v34  ;;  %v12673_v29 = vpop.f32.mrb[158].mxu0 }
 0x754   :  { %v12619_v16 = vpop.f32.mrb[157].mxu1  ;;  %v12674_v13 = vpop.f32.mrb[159].mxu0 }
 0x755   :  { %v12620_v51 = vadd.f32 %v12619_v16, %v12618_v54  ;;  %v12621_v56 = vpop.f32.mrb[158].mxu1  ;;  %v12675_v41 = vadd.f32 %v12674_v13, %v12673_v29  ;;  %v18160_v28 = vadd.f32 %v12672_v8, %v9551_v59 }
 0x756   :  { %v12622_v22 = vpop.f32.mrb[159].mxu1 }
 0x757   :  { %v9567_v2 = vadd.f32 %v12620_v51, %v18117_v61  ;;  %v12623_v63 = vadd.f32 %v12622_v22, %v12621_v56  ;;  %v18163_v21 = vadd.f32 %v12675_v41, %v9554_v57 }
 0x759   :  { %v9570_v52 = vadd.f32 %v12623_v63, %v18120_v12  ;;  %v12676_v27 = vpop.f32.mrb[160].mxu0 }
 0x75a   :  { %v12677_v47 = vpop.f32.mrb[161].mxu0 }
 0x75b   :  { %v12624_v17 = vpop.f32.mrb[160].mxu1  ;;  %v12678_v55 = vadd.f32 %v12677_v47, %v12676_v27  ;;  %v12679_v15 = vpop.f32.mrb[162].mxu0 }
 0x75c   :  { %v12625_v30 = vpop.f32.mrb[161].mxu1  ;;  %v12680_v5 = vpop.f32.mrb[163].mxu0 }
 0x75d   :  { %v12626_v40 = vadd.f32 %v12625_v30, %v12624_v17  ;;  %v12627_v18 = vpop.f32.mrb[162].mxu1  ;;  %v12681_v60 = vadd.f32 %v12680_v5, %v12679_v15  ;;  %v18166_v59 = vadd.f32 %v12678_v55, %v9559_v46 }
 0x75e   :  { %v12628_v45 = vpop.f32.mrb[163].mxu1 }
 0x75f   :  { %v9575_v61 = vadd.f32 %v12626_v40, %v18127_v42  ;;  %v12629_v50 = vadd.f32 %v12628_v45, %v12627_v18  ;;  %v18169_v57 = vadd.f32 %v12681_v60, %v9562_v38 }
 0x761   :  { %v9578_v12 = vadd.f32 %v12629_v50, %v18130_v1  ;;  %v12682_v14 = vpop.f32.mrb[164].mxu0 }
 0x762   :  { %v12683_v35 = vpop.f32.mrb[165].mxu0 }
 0x763   :  { %v12630_v37 = vpop.f32.mrb[164].mxu1  ;;  %v12684_v24 = vadd.f32 %v12683_v35, %v12682_v14  ;;  %v12685_v31 = vpop.f32.mrb[166].mxu0 }
 0x764   :  { %v12631_v19 = vpop.f32.mrb[165].mxu1  ;;  %v12686_v48 = vpop.f32.mrb[167].mxu0 }
 0x765   :  { %v12632_v58 = vadd.f32 %v12631_v19, %v12630_v37  ;;  %v12633_v49 = vpop.f32.mrb[166].mxu1  ;;  %v12687_v20 = vadd.f32 %v12686_v48, %v12685_v31  ;;  %v18172_v46 = vadd.f32 %v12684_v24, %v9567_v2 }
 0x766   :  { %v12634_v43 = vpop.f32.mrb[167].mxu1 }
 0x767   :  { %v9583_v42 = vadd.f32 %v12632_v58, %v18136_v3  ;;  %v12635_v34 = vadd.f32 %v12634_v43, %v12633_v49  ;;  %v18175_v38 = vadd.f32 %v12687_v20, %v9570_v52 }
 0x769   :  { %v9586_v1 = vadd.f32 %v12635_v34, %v18138_v53  ;;  %v12688_v54 = vpop.f32.mrb[168].mxu0 }
 0x76a   :  { %v12689_v16 = vpop.f32.mrb[169].mxu0 }
 0x76b   :  { %v12636_v32 = vpop.f32.mrb[168].mxu1  ;;  %v12690_v29 = vadd.f32 %v12689_v16, %v12688_v54  ;;  %v12691_v51 = vpop.f32.mrb[170].mxu0  ;;  %v13185_v16 = vld [vmem:[#allocation10 + $0x4] ss:$8 sps:$4 sm:$0xff]  }
 0x76c   :  { %v12637_v8 = vpop.f32.mrb[169].mxu1  ;;  %v12692_v22 = vpop.f32.mrb[171].mxu0  ;;  %10052 = vmatprep.subr.bf16.mxu0 %v13185_v16 }
 0x76d   :  { %v12638_v56 = vadd.f32 %v12637_v8, %v12636_v32  ;;  %v12639_v13 = vpop.f32.mrb[170].mxu1  ;;  %v12693_v63 = vadd.f32 %v12692_v22, %v12691_v51  ;;  %v18178_v2 = vadd.f32 %v12690_v29, %v9575_v61  ;;  %v13183_v32 = vld [vmem:[#allocation10] ss:$8 sps:$4 sm:$0xff]  }
 0x76e   :  { %v12640_v41 = vpop.f32.mrb[171].mxu1  ;;  %10053 = vmatpush1.bf16.msra.mxu0 %v13183_v32 }
 0x76f   :  { %v9591_v3 = vadd.f32 %v12638_v56, %v18142_v7  ;;  %v12641_v27 = vadd.f32 %v12640_v41, %v12639_v13  ;;  %v18181_v52 = vadd.f32 %v12693_v63, %v9578_v12 }
 0x771   :  { %v9594_v53 = vadd.f32 %v12641_v27, %v18144_v6  ;;  %v12694_v17 = vpop.f32.mrb[172].mxu0 }
 0x772   :  { %v12695_v30 = vpop.f32.mrb[173].mxu0 }
 0x773   :  { %v9728_v47 = vpop.f32.mrb[172].mxu1  ;;  %v12696_v15 = vadd.f32 %v12695_v30, %v12694_v17  ;;  %v12697_v18 = vpop.f32.mrb[174].mxu0 }
 0x774   :  { %v9729_v55 = vadd.f32 %v9728_v47, %v18148_v9  ;;  %v9730_v40 = vpop.f32.mrb[173].mxu1  ;;  %v12698_v45 = vpop.f32.mrb[175].mxu0 }
 0x775   :  { %v9731_v5 = vpop.f32.mrb[174].mxu1  ;;  %v12699_v61 = vadd.f32 %v12698_v45, %v12697_v18  ;;  %v18186_v7 = vadd.f32 %v12696_v15, %v9583_v42 }
 0x776   :  { %v9732_v60 = vadd.f32 %v9731_v5, %v18151_v0  ;;  %v9733_v50 = vpop.f32.mrb[175].mxu1  ;;  %v9808_v12 = vrot.slane %v9729_v55, 6 }
 0x777   :  { %v18188_v6 = vadd.f32 %v12699_v61, %v9586_v1  ;;  %v13186_v50 = vld [vmem:[#allocation10 + $0x10] ss:$8 sps:$4 sm:$0xff]  }
 0x778   :  { %v9809_v14 = vrot.slane %v9732_v60, 6 }
 0x779   :  { %v12700_v37 = vpop.f32.mrb[176].mxu0 }
 0x77a   :  { %v9810_v35 = vsel %vm9807_vm7, %v9808_v12, %v9809_v14  ;;  %v12701_v19 = vpop.f32.mrb[177].mxu0  ;;  %v13188_v12 = vld [vmem:[#allocation10 + $0x14] ss:$8 sps:$4 sm:$0xff]  }
 0x77b   :  { %v9736_v9 = vpop.f32.mrb[176].mxu1  ;;  %v9840_v24 = vadd.f32 %v9810_v35, %v18064_v39  ;;  %v12702_v58 = vadd.f32 %v12701_v19, %v12700_v37  ;;  %v12703_v49 = vpop.f32.mrb[178].mxu0  ;;  %10054 = vmatprep.subr.bf16.mxu0 %v13188_v12  ;;  %v13232_v12 = vld [vmem:[%s18415_s9 + $0x8] sm:$0xff]  }
 0x77c   :  { %v9737_v31 = vadd.f32 %v9736_v9, %v18154_v44  ;;  %v9738_v0 = vpop.f32.mrb[177].mxu1  ;;  %v12704_v43 = vpop.f32.mrb[179].mxu0  ;;  %10055 = vmatpush1.bf16.msra.mxu0 %v13186_v50  ;;  %v13231_v50 = vld [vmem:[%s18415_s9] sm:$0xff]  }
 0x77d   :  { %v9739_v48 = vpop.f32.mrb[178].mxu1  ;;  %v9856_v20 = vrot.slane %v9840_v24, 1  ;;  %v12705_v34 = vadd.f32 %v12704_v43, %v12703_v49  ;;  %v18194_v54 = vadd.f32 %v12702_v58, %v9591_v3  ;;  %10544 = vmatpush1.bf16.msra.mxu1 %v13231_v50 }
 0x77e   :  { %v9740_v42 = vadd.f32 %v9739_v48, %v18157_v25  ;;  %v9741_v1 = vpop.f32.mrb[179].mxu1  ;;  %v9811_v29 = vrot.slane %v9737_v31, 6  ;;  %10545 = vmatprep.subr.bf16.mxu1 %v19521_v36 }
 0x77f   :  { %v18196_v8 = vmax.f32 %v9840_v24, %v9856_v20  ;;  %v18198_v51 = vadd.f32 %v12705_v34, %v9594_v53 }
 0x780   :  { %v9812_v39 = vrot.slane %v9740_v42, 6 }
 0x781   :  { %9900 = vrot.lane.b32.xlu1 %v18196_v8, %s13709_s3  ;;  %10546 = vmatpush1.bf16.msra.mxu1 %v13232_v12 }
 0x782   :  { %v9813_v44 = vsel %vm9807_vm7, %v9811_v29, %v9812_v39  ;;  %v13189_v29 = vld [vmem:[#allocation10 + $0x20] ss:$8 sps:$4 sm:$0xff]   ;;  %v13191_v39 = vld [vmem:[#allocation10 + $0x24] ss:$8 sps:$4 sm:$0xff]   ;;  %10547 = vmatprep.subr.bf16.mxu1 %v19521_v36 }
 0x783   :  { %v9744_v25 = vpop.f32.mrb[180].mxu1  ;;  %v9841_v56 = vadd.f32 %v9813_v44, %v18074_v11  ;;  %10056 = vmatprep.subr.bf16.mxu0 %v13191_v39 }
 0x784   :  { %v9745_v13 = vadd.f32 %v9744_v25, %v18160_v28  ;;  %v9746_v22 = vpop.f32.mrb[181].mxu1  ;;  %10057 = vmatpush1.bf16.msra.mxu0 %v13189_v29 }
 0x785   :  { %v9747_v41 = vpop.f32.mrb[182].mxu1  ;;  %v9857_v63 = vrot.slane %v9841_v56, 1 }
 0x786   :  { %v9748_v3 = vadd.f32 %v9747_v41, %v18163_v21  ;;  %v9749_v27 = vpop.f32.mrb[183].mxu1  ;;  %v9814_v17 = vrot.slane %v9745_v13, 6 }
 0x787   :  { %v18206_v53 = vmax.f32 %v9841_v56, %v9857_v63 }
 0x788   :  { %v9815_v47 = vrot.slane %v9748_v3, 6 }
 0x789   :  { %9902 = vrot.lane.b32.xlu0 %v18206_v53, %s13709_s3 }
 0x78a   :  { %v9816_v30 = vsel %vm9807_vm7, %v9814_v17, %v9815_v47 }
 0x78b   :  { %v9752_v55 = vpop.f32.mrb[184].mxu1  ;;  %v9842_v11 = vadd.f32 %v9816_v30, %v18084_v10 }
 0x78c   :  { %v9753_v28 = vadd.f32 %v9752_v55, %v18166_v59  ;;  %v9754_v15 = vpop.f32.mrb[185].mxu1 }
 0x78d   :  { %v9755_v40 = vpop.f32.mrb[186].mxu1  ;;  %v9858_v18 = vrot.slane %v9842_v11, 1 }
 0x78e   :  { %v9756_v21 = vadd.f32 %v9755_v40, %v18169_v57  ;;  %v9757_v5 = vpop.f32.mrb[187].mxu1  ;;  %v9817_v60 = vrot.slane %v9753_v28, 6 }
 0x78f   :  { %v18214_v45 = vmax.f32 %v9842_v11, %v9858_v18  ;;  %v13194_v5 = vld [vmem:[#allocation10 + $0x34] ss:$8 sps:$4 sm:$0xff]  }
 0x790   :  { %v9818_v61 = vrot.slane %v9756_v21, 6  ;;  %v13192_v21 = vld [vmem:[#allocation10 + $0x30] ss:$8 sps:$4 sm:$0xff]   ;;  %10058 = vmatprep.subr.bf16.mxu0 %v13194_v5 }
 0x791   :  { %9904 = vrot.lane.b32.xlu0 %v18214_v45, %s13709_s3  ;;  %10059 = vmatpush1.bf16.msra.mxu0 %v13192_v21 }
 0x792   :  { %v9819_v14 = vsel %vm9807_vm7, %v9817_v60, %v9818_v61 }
 0x793   :  { %v9760_v10 = vpop.f32.mrb[188].mxu1  ;;  %v9843_v59 = vadd.f32 %v9819_v14, %v18094_v62  ;;  %v13234_v14 = vld [vmem:[%s18415_s9 + $0x18] sm:$0xff]  }
 0x794   :  { %v9761_v37 = vadd.f32 %v9760_v10, %v18172_v46  ;;  %v9762_v35 = vpop.f32.mrb[189].mxu1  ;;  %v13235_v10 = vld [vmem:[%s18415_s9 + $0x20] sm:$0xff]  }
 0x795   :  { %v9763_v57 = vpop.f32.mrb[190].mxu1  ;;  %v9859_v9 = vrot.slane %v9843_v59, 1  ;;  %v13238_v35 = vld [vmem:[%s18415_s9 + $0x38] sm:$0xff]  }
 0x796   :  { %v9764_v19 = vadd.f32 %v9763_v57, %v18175_v38  ;;  %v9765_v24 = vpop.f32.mrb[191].mxu1  ;;  %v9820_v58 = vrot.slane %v9761_v37, 6  ;;  %v13237_v37 = vld [vmem:[%s18415_s9 + $0x30] sm:$0xff]   ;;  %v13239_v57 = vld [vmem:[%s18415_s9 + $0x40] sm:$0xff]  }
 0x797   :  { %v18222_v31 = vmax.f32 %v9843_v59, %v9859_v9  ;;  %v13236_v59 = vld [vmem:[%s18415_s9 + $0x28] sm:$0xff]  }
 0x798   :  { %v9821_v0 = vrot.slane %v9764_v19, 6  ;;  %v13240_v9 = vld [vmem:[%s18415_s9 + $0x48] sm:$0xff]   ;;  %v13241_v19 = vld [vmem:[%s18415_s9 + $0x50] sm:$0xff]  }
 0x799   :  { %9906 = vrot.lane.b32.xlu1 %v18222_v31, %s13709_s3 }
 0x79a   :  { %v9822_v49 = vsel %vm9807_vm7, %v9820_v58, %v9821_v0 }
 0x79b   :  { %v9768_v62 = vpop.f32.mrb[192].mxu1  ;;  %v9844_v48 = vadd.f32 %v9822_v49, %v18104_v26 }
 0x79c   :  { %v9769_v46 = vadd.f32 %v9768_v62, %v18178_v2  ;;  %v9770_v43 = vpop.f32.mrb[193].mxu1 }
 0x79d   :  { %v9771_v20 = vpop.f32.mrb[194].mxu1  ;;  %v9860_v42 = vrot.slane %v9844_v48, 1 }
 0x79e   :  { %v9772_v38 = vadd.f32 %v9771_v20, %v18181_v52  ;;  %v9773_v34 = vpop.f32.mrb[195].mxu1  ;;  %v9823_v32 = vrot.slane %v9769_v46, 6 }
 0x79f   :  { %v18230_v1 = vmax.f32 %v9844_v48, %v9860_v42  ;;  %v11310_v42 = vld [vmem:[#allocation9] ss:$0 sm:$0xff] }
 0x7a0   :  { %v9824_v16 = vrot.slane %v9772_v38, 6 }
 0x7a1   :  { %9908 = vrot.lane.b32.xlu0 %v18230_v1, %s13709_s3 }
 0x7a2   :  { %v9825_v44 = vsel %vm9807_vm7, %v9823_v32, %v9824_v16 }
 0x7a3   :  { %v9776_v26 = vpop.f32.mrb[196].mxu1  ;;  %v9845_v2 = vadd.f32 %v9825_v44, %v18114_v4 }
 0x7a4   :  { %v9777_v25 = vadd.f32 %v9776_v26, %v18186_v7  ;;  %v9778_v56 = vpop.f32.mrb[197].mxu1 }
 0x7a5   :  { %v9779_v52 = vpop.f32.mrb[198].mxu1  ;;  %v9861_v13 = vrot.slane %v9845_v2, 1 }
 0x7a6   :  { %v9780_v22 = vadd.f32 %v9779_v52, %v18188_v6  ;;  %v9781_v41 = vpop.f32.mrb[199].mxu1  ;;  %v9826_v3 = vrot.slane %v9777_v25, 6 }
 0x7a7   :  { %v18238_v63 = vmax.f32 %v9845_v2, %v9861_v13 }
 0x7a8   :  { %v9827_v27 = vrot.slane %v9780_v22, 6 }
 0x7a9   :  { %9910 = vrot.lane.b32.xlu1 %v18238_v63, %s13709_s3 }
 0x7aa   :  { %v9828_v17 = vsel %vm9807_vm7, %v9826_v3, %v9827_v27 }
 0x7ab   :  { %v9784_v4 = vpop.f32.mrb[200].mxu1  ;;  %v9846_v47 = vadd.f32 %v9828_v17, %v18124_v33 }
 0x7ac   :  { %v9785_v7 = vadd.f32 %v9784_v4, %v18194_v54  ;;  %v9786_v30 = vpop.f32.mrb[201].mxu1 }
 0x7ad   :  { %v9787_v55 = vpop.f32.mrb[202].mxu1  ;;  %v9862_v11 = vrot.slane %v9846_v47, 1 }
 0x7ae   :  { %v9788_v6 = vadd.f32 %v9787_v55, %v18198_v51  ;;  %v9789_v28 = vpop.f32.mrb[203].mxu1  ;;  %v9829_v40 = vrot.slane %v9785_v7, 6  ;;  %v13197_v51 = vld [vmem:[#allocation10 + $0x44] ss:$8 sps:$4 sm:$0xff]  }
 0x7af   :  { %v18246_v15 = vmax.f32 %v9846_v47, %v9862_v11  ;;  %10162 = vmatprep.subr.bf16.mxu0 %v13197_v51 }
 0x7b0   :  { %v9830_v18 = vrot.slane %v9788_v6, 6 }
 0x7b1   :  { %9912 = vrot.lane.b32.xlu0 %v18246_v15, %s13709_s3 }
 0x7b2   :  { %v9831_v60 = vsel %vm9807_vm7, %v9829_v40, %v9830_v18 }
 0x7b3   :  { %v9847_v33 = vadd.f32 %v9831_v60, %v18134_v23  ;;  %v13233_v23 = vld [vmem:[%s18415_s9 + $0x10] sm:$0xff]  }
 0x7b4   :  { %10548 = vmatpush1.bf16.msra.mxu1 %v13233_v23 }
 0x7b5   :  { %v9863_v54 = vrot.slane %v9847_v33, 1  ;;  %10549 = vmatprep.subr.bf16.mxu1 %v19521_v36 }
 0x7b7   :  { %v18252_v61 = vmax.f32 %v9847_v33, %v9863_v54 }
 0x7b8   :  { %10550 = vmatpush1.bf16.msra.mxu1 %v13234_v14 }
 0x7b9   :  { %9914 = vrot.lane.b32.xlu1 %v18252_v61, %s13709_s3  ;;  %10551 = vmatprep.subr.bf16.mxu1 %v19521_v36 }
 0x7bc   :  { %10552 = vmatpush1.bf16.msra.mxu1 %v13235_v10 }
 0x7bd   :  { %10553 = vmatprep.subr.bf16.mxu1 %v19521_v36 }
 0x7c0   :  { %10554 = vmatpush1.bf16.msra.mxu1 %v13236_v59 }
 0x7c1   :  { %10555 = vmatprep.subr.bf16.mxu1 %v19521_v36 }
 0x7c4   :  { %10556 = vmatpush1.bf16.msra.mxu1 %v13237_v37 }
 0x7c5   :  { %10557 = vmatprep.subr.bf16.mxu1 %v19521_v36 }
 0x7c8   :  { %10558 = vmatpush1.bf16.msra.mxu1 %v13238_v35 }
 0x7c9   :  { %10559 = vmatprep.subr.bf16.mxu1 %v19521_v36 }
 0x7cc   :  { %10560 = vmatpush1.bf16.msra.mxu1 %v13239_v57 }
 0x7cd   :  { %10561 = vmatprep.subr.bf16.mxu1 %v19521_v36 }
 0x7d0   :  { %10562 = vmatpush1.bf16.msra.mxu1 %v13240_v9 }
 0x7d1   :  { %10563 = vmatprep.subr.bf16.mxu1 %v19521_v36 }
 0x7d4   :  { %10564 = vmatpush1.bf16.msra.mxu1 %v13241_v19 }
 0x7d5   :  { %10565 = vmatprep.subr.bf16.mxu1 %v19521_v36 }
 0x7f3   :  { %v9901_v58 = vpop.permute.xlu1 %9900 }
 0x7f4   :  { %v9924_v29 = vmax.f32 %v18196_v8, %v9901_v58 }
 0x7f6   :  { %v9939_v56 = vadd.f32 %v11310_v42, %v9924_v29  ;;  %v13206_v29 = vld [vmem:[#allocation10 + $0x74] ss:$8 sps:$4 sm:$0xff]  }
 0x7f8   :  { %v9947_v3 = vmax.f32 %v9939_v56, 0.0  ;;  %v13209_v56 = vld [vmem:[#allocation10 + $0x84] ss:$8 sps:$4 sm:$0xff]  }
 0x7fa   :  { %v9955_v55 = vpack.c.bf16 %v9947_v3, %v9947_v3  ;;  %v13215_v3 = vld [vmem:[#allocation10 + $0xa4] ss:$8 sps:$4 sm:$0xff]  }
 0x7fb   :  { %v9903_v24 = vpop.permute.xlu0 %9902 }
 0x7fc   :  { %v9925_v62 = vmax.f32 %v18206_v53, %v9903_v24  ;;  %v18322_v60 = vunpack.c.l.b16 %v9955_v55  ;;  %v13195_v24 = vld [vmem:[#allocation10 + $0x40] ss:$8 sps:$4 sm:$0xff]  }
 0x7fe   :  { %v9940_v34 = vadd.f32 %v11310_v42, %v9925_v62  ;;  %v13198_v62 = vld [vmem:[#allocation10 + $0x50] ss:$8 sps:$4 sm:$0xff]  }
 0x800   :  { %v9948_v26 = vmax.f32 %v9940_v34, 0.0  ;;  %v13201_v34 = vld [vmem:[#allocation10 + $0x60] ss:$8 sps:$4 sm:$0xff]  }
 0x802   :  { %v9956_v13 = vpack.c.bf16 %v9948_v26, %v9948_v26 }
 0x803   :  { %v9905_v0 = vpop.permute.xlu0 %9904 }
 0x804   :  { %v9926_v46 = vmax.f32 %v18214_v45, %v9905_v0  ;;  %v18307_v8 = vunpack.c.l.b16 %v9956_v13  ;;  %v13200_v0 = vld [vmem:[#allocation10 + $0x54] ss:$8 sps:$4 sm:$0xff]  }
 0x805   :  { %v13212_v13 = vld [vmem:[#allocation10 + $0x94] ss:$8 sps:$4 sm:$0xff]  }
 0x806   :  { %v9941_v16 = vadd.f32 %v11310_v42, %v9926_v46  ;;  %v10104_v46 = vrot.slane %v18322_v60, 2 }
 0x808   :  { %v9949_v53 = vmax.f32 %v9941_v16, 0.0 }
 0x80b   :  { %v9907_v49 = vpop.permute.xlu1 %9906 }
 0x80c   :  { %v9927_v20 = vmax.f32 %v18222_v31, %v9907_v49  ;;  %v10105_v49 = vrot.slane %v18307_v8, 1 }
 0x80e   :  { %v9942_v39 = vadd.f32 %v11310_v42, %v9927_v20 }
 0x810   :  { %v9950_v45 = vmax.f32 %v9942_v39, 0.0 }
 0x813   :  { %v9909_v48 = vpop.permute.xlu0 %9908 }
 0x814   :  { %v9928_v38 = vmax.f32 %v18230_v1, %v9909_v48  ;;  %v9957_v1 = vpack.c.bf16 %v9949_v53, %v9949_v53  ;;  %v13203_v48 = vld [vmem:[#allocation10 + $0x64] ss:$8 sps:$4 sm:$0xff]   ;;  %v13204_v53 = vld [vmem:[#allocation10 + $0x70] ss:$8 sps:$4 sm:$0xff]  }
 0x816   :  { %v9943_v44 = vadd.f32 %v11310_v42, %v9928_v38  ;;  %v18309_v47 = vunpack.c.l.b16 %v9957_v1  ;;  %v13210_v1 = vld [vmem:[#allocation10 + $0x90] ss:$8 sps:$4 sm:$0xff]  }
 0x818   :  { %v9951_v31 = vmax.f32 %v9943_v44, 0.0  ;;  %v9990_v21 = vrot.slane %v18309_v47, 6 }
 0x81a   :  { %v9959_v27 = vpack.c.bf16 %v9951_v31, %v9951_v31 }
 0x81b   :  { %v9911_v43 = vpop.permute.xlu1 %9910 }
 0x81c   :  { %v9929_v32 = vmax.f32 %v18238_v63, %v9911_v43  ;;  %v9958_v63 = vpack.c.bf16 %v9950_v45, %v9950_v45  ;;  %v18314_v28 = vunpack.c.l.b16 %v9959_v27 }
 0x81e   :  { %v9944_v2 = vadd.f32 %v11310_v42, %v9929_v32  ;;  %v18311_v11 = vunpack.c.l.b16 %v9958_v63  ;;  %v10110_v20 = vrot.slane %v18314_v28, 6  ;;  %v10214_v63 = vrot.slane %v18322_v60, 4 }
 0x820   :  { %v9952_v22 = vmax.f32 %v9944_v2, 0.0  ;;  %v9993_v33 = vrot.slane %v18311_v11, 5  ;;  %v10108_v43 = vrot.slane %v18311_v11, 7  ;;  %v10219_v27 = vrot.slane %v18311_v11, 1 }
 0x822   :  { %v9960_v4 = vpack.c.bf16 %v9952_v22, %v9952_v22  ;;  %v10215_v22 = vrot.slane %v18307_v8, 3 }
 0x823   :  { %v9913_v25 = vpop.permute.xlu0 %9912 }
 0x824   :  { %v9930_v52 = vmax.f32 %v18246_v15, %v9913_v25  ;;  %v9987_v15 = vrot.slane %v18307_v8, 7  ;;  %v18317_v40 = vunpack.c.l.b16 %v9960_v4 }
 0x826   :  { %v9945_v41 = vadd.f32 %v11310_v42, %v9930_v52  ;;  %v9989_v51 = vsel %vm9988_vm8, %v9987_v15, %v18322_v60  ;;  %v9999_v50 = vrot.slane %v18317_v40, 3  ;;  %v10112_v38 = vrot.slane %v18317_v40, 5  ;;  %v13207_v52 = vld [vmem:[#allocation10 + $0x80] ss:$8 sps:$4 sm:$0xff]  }
 0x827   :  { %v9992_v23 = vsel %vm9991_vm10, %v9990_v21, %v9989_v51  ;;  %v10222_v4 = vrot.slane %v18317_v40, 7  ;;  %v13221_v51 = vld [vmem:[#allocation10 + $0xc4] ss:$8 sps:$4 sm:$0xff]  }
 0x828   :  { %v9953_v17 = vmax.f32 %v9945_v41, 0.0  ;;  %v9995_v10 = vsel %vm9994_vm9, %v9993_v33, %v9992_v23  ;;  %v10217_v41 = vrot.slane %v18309_v47, 2 }
 0x82a   :  { %v9961_v7 = vpack.c.bf16 %v9953_v17, %v9953_v17  ;;  %v10216_v17 = vsel %vm9988_vm8, %v10215_v22, %v10214_v63 }
 0x82b   :  { %v9915_v30 = vpop.permute.xlu1 %9914 }
 0x82c   :  { %v9931_v6 = vmax.f32 %v18252_v61, %v9915_v30  ;;  %v18320_v5 = vunpack.c.l.b16 %v9961_v7  ;;  %v9996_v61 = vrot.slane %v18314_v28, 4  ;;  %v13213_v7 = vld [vmem:[#allocation10 + $0xa0] ss:$8 sps:$4 sm:$0xff]   ;;  %v10218_v30 = vsel %vm9991_vm10, %v10217_v41, %v10216_v17 }
 0x82d   :  { %v10220_v15 = vsel %vm9994_vm9, %v10219_v27, %v10218_v30 }
 0x82e   :  { %v9946_v18 = vadd.f32 %v11310_v42, %v9931_v6  ;;  %v10002_v14 = vrot.slane %v18320_v5, 2  ;;  %v9998_v37 = vsel %vm9997_vm12, %v9996_v61, %v9995_v10  ;;  %v10106_v42 = vsel %vm9988_vm8, %v10105_v49, %v10104_v46  ;;  %v13218_v6 = vld [vmem:[#allocation10 + $0xb4] ss:$8 sps:$4 sm:$0xff]  }
 0x82f   :  { %v10001_v35 = vsel %vm10000_vm11, %v9999_v50, %v9998_v37  ;;  %v10107_v32 = vsel %vm9991_vm10, %v18309_v47, %v10106_v42  ;;  %v10114_v16 = vrot.slane %v18320_v5, 4  ;;  %v10224_v55 = vrot.slane %v18320_v5, 6  ;;  %v13222_v37 = vld [vmem:[#allocation10 + $0xd0] ss:$8 sps:$4 sm:$0xff]   ;;  %v9880_v42 = vld [vmem:[#allocation12] sm:$0x3] }
 0x830   :  { %v9954_v54 = vmax.f32 %v9946_v18, 0.0  ;;  %v10004_v9 = vsel %vm10003_vm14, %v10002_v14, %v10001_v35  ;;  %v10109_v39 = vsel %vm9994_vm9, %v10108_v43, %v10107_v32  ;;  %v10221_v21 = vsel %vm9997_vm12, %v18314_v28, %v10220_v15  ;;  %v13224_v14 = vld [vmem:[#allocation10 + $0xd4] ss:$8 sps:$4 sm:$0xff]  }
 0x831   :  { %v10111_v26 = vsel %vm9997_vm12, %v10110_v20, %v10109_v39  ;;  %v10223_v33 = vsel %vm10000_vm11, %v10222_v4, %v10221_v21  ;;  %v10325_v10 = vrot.slane %v18307_v8, 5  ;;  %v10327_v35 = vrot.slane %v18309_v47, 4  ;;  %v13225_v8 = vld [vmem:[#allocation10 + $0xe0] ss:$8 sps:$4 sm:$0xff]   ;;  %v13243_v20 = vld [vmem:[%s18415_s9 + $0x60] ss:$0 sps:$4 sm:$0xff]  }
 0x832   :  { %v9962_v12 = vpack.c.bf16 %v9954_v54, %v9954_v54  ;;  %v10113_v2 = vsel %vm10000_vm11, %v10112_v38, %v10111_v26  ;;  %v13216_v54 = vld [vmem:[#allocation10 + $0xb0] ss:$8 sps:$4 sm:$0xff]   ;;  %v10225_v61 = vsel %vm10003_vm14, %v10224_v55, %v10223_v33 }
 0x833   :  { %v10115_v25 = vsel %vm10003_vm14, %v10114_v16, %v10113_v2  ;;  %v20100_v38 = vld [vmem:[#allocation334_spill] sm:$0xff] }
 0x834   :  { %v18332_v59 = vunpack.c.l.b16 %v9962_v12  ;;  %v13219_v12 = vld [vmem:[#allocation10 + $0xc0] ss:$8 sps:$4 sm:$0xff]   ;;  %v20102_v16 = vsub.s32 1, %v20100_v38 }
 0x836   :  { %v10005_v57 = vrot.slane %v18332_v59, 1  ;;  %v10116_v44 = vrot.slane %v18332_v59, 3  ;;  %v10226_v18 = vrot.slane %v18332_v59, 5 }
 0x838   :  { %v10007_v19 = vsel %vm10006_vm13, %v10005_v57, %v10004_v9  ;;  %v10117_v45 = vsel %vm10006_vm13, %v10116_v44, %v10115_v25  ;;  %v10227_v50 = vsel %vm10006_vm13, %v10226_v18, %v10225_v61  ;;  %v13227_v57 = vld [vmem:[#allocation10 + $0xe4] ss:$8 sps:$4 sm:$0xff]   ;;  %v10324_v9 = vrot.slane %v18322_v60, 6 }
 0x839   :  { %v10008_v58 = vpack.c.b16 %v10007_v19, %v10007_v19  ;;  %v10118_v31 = vpack.c.b16 %v10117_v45, %v10117_v45  ;;  %v10228_v23 = vpack.c.b16 %v10227_v50, %v10227_v50  ;;  %v10329_v19 = vrot.slane %v18311_v11, 3 }
 0x83b   :  { %11319 = vmatmul.mubr.msk.bf16.vlgmr.msra.gmra.mrb[180].mxu0 %vm3911_vm1, %v10008_v58  ;;  %v10326_v58 = vsel %vm9988_vm8, %v10325_v10, %v10324_v9 }
 0x83c   :  { %10163 = vmatpush1.bf16.msra.mxu0 %v13195_v24  ;;  %10194 = vmatprep.mubr.bf16.mxu0 %v19521_v36  ;;  %v10331_v24 = vrot.slane %v18314_v28, 2  ;;  %v10328_v49 = vsel %vm9991_vm10, %v10327_v35, %v10326_v58  ;;  %v13228_v28 = vld [vmem:[#allocation10 + $0xf0] ss:$8 sps:$4 sm:$0xff]  }
 0x83d   :  { %10164 = vmatprep.subr.bf16.mxu0 %v13200_v0  ;;  %v10333_v0 = vrot.slane %v18317_v40, 1  ;;  %v10330_v47 = vsel %vm9994_vm9, %v10329_v19, %v10328_v49 }
 0x83e   :  { %v10332_v60 = vsel %vm9997_vm12, %v10331_v24, %v10330_v47 }
 0x83f   :  { %v10334_v11 = vsel %vm10000_vm11, %v10333_v0, %v10332_v60 }
 0x840   :  { %10165 = vmatpush1.bf16.msra.mxu0 %v13198_v62  ;;  %v13230_v62 = vld [vmem:[#allocation10 + $0xf4] ss:$8 sps:$4 sm:$0xff]   ;;  %v10335_v46 = vsel %vm10003_vm14, %v18320_v5, %v10334_v11  ;;  %v10541_v5 = vsel %vm7955_vm5, %v13243_v20, 0 }
 0x841   :  { %10166 = vmatprep.subr.bf16.mxu0 %v13203_v48  ;;  %v10336_v48 = vrot.slane %v18332_v59, 7  ;;  %v13242_v59 = vld [vmem:[%s18415_s9 + $0x58] sm:$0xff]  }
 0x842   :  { %10566 = vmatpush1.bf16.msra.mxu1 %v13242_v59 }
 0x843   :  { %v10337_v40 = vsel %vm10006_vm13, %v10336_v48, %v10335_v46  ;;  %10567 = vmatprep.subr.bf16.mxu1 %v19521_v36 }
 0x844   :  { %10167 = vmatpush1.bf16.msra.mxu0 %v13201_v34  ;;  %v10338_v43 = vpack.c.b16 %v10337_v40, %v10337_v40  ;;  %v20101_v34 = vsub.s32 0, %v20100_v38 }
 0x845   :  { %10168 = vmatprep.subr.bf16.mxu0 %v13206_v29  ;;  %v9889_v29 = vrot.slane %v9880_v42, %v20102_v16 }
 0x846   :  { %10568 = vmatpush1.bf16.msra.mxu1 %v10541_v5  ;;  %v9885_v32 = vrot.slane %v9880_v42, %v20101_v34 }
 0x848   :  { %10169 = vmatpush1.bf16.msra.mxu0 %v13204_v53 }
 0x849   :  { %10272 = vmatprep.subr.bf16.mxu0 %v13209_v56 }
 0x84b   :  { %11328 = vmatmul.mubr.msk.bf16.vlgmr.msra.gmra.mrb[180].mxu0 %vm3911_vm1, %v10118_v31  ;;  %v11347_v31 = vld [vmem:[#allocation13] ss:$0 sm:$0xff] }
 0x84c   :  { %10273 = vmatpush1.bf16.msra.mxu0 %v13207_v52  ;;  %10304 = vmatprep.mubr.bf16.mxu0 %v19521_v36 }
 0x84d   :  { %10274 = vmatprep.subr.bf16.mxu0 %v13212_v13 }
 0x850   :  { %10275 = vmatpush1.bf16.msra.mxu0 %v13210_v1 }
 0x851   :  { %10276 = vmatprep.subr.bf16.mxu0 %v13215_v3 }
 0x854   :  { %10277 = vmatpush1.bf16.msra.mxu0 %v13213_v7 }
 0x855   :  { %10278 = vmatprep.subr.bf16.mxu0 %v13218_v6 }
 0x858   :  { %10279 = vmatpush1.bf16.msra.mxu0 %v13216_v54 }
 0x859   :  { %10382 = vmatprep.subr.bf16.mxu0 %v13221_v51 }
 0x85b   :  { %11337 = vmatmul.mubr.msk.bf16.vlgmr.msra.gmra.mrb[180].mxu0 %vm3911_vm1, %v10228_v23 }
 0x85c   :  { %10383 = vmatpush1.bf16.msra.mxu0 %v13219_v12  ;;  %10414 = vmatprep.mubr.bf16.mxu0 %v19521_v36 }
 0x85d   :  { %10384 = vmatprep.subr.bf16.mxu0 %v13224_v14 }
 0x860   :  { %10385 = vmatpush1.bf16.msra.mxu0 %v13222_v37 }
 0x861   :  { %10386 = vmatprep.subr.bf16.mxu0 %v13227_v57 }
 0x864   :  { %10387 = vmatpush1.bf16.msra.mxu0 %v13225_v8 }
 0x865   :  { %10388 = vmatprep.subr.bf16.mxu0 %v13230_v62 }
 0x868   :  { %10389 = vmatpush1.bf16.msra.mxu0 %v13228_v28 }
 0x86b   :  { %11346 = vmatmul.mubr.msk.bf16.vlgmr.msra.gmra.mrb[180].mxu0 %vm3911_vm1, %v10338_v43 }
 0x93e   :  { %v10416_v39 = vpop.f32.mrb[180].mxu0 }
 0x93f   :  { %v12718_v44 = vadd.f32 %v10416_v39, %v9885_v32  ;;  %v10418_v26 = vpop.f32.mrb[181].mxu0 }
 0x940   :  { %v12719_v2 = vadd.f32 %v10418_v26, %v9889_v29  ;;  %v10420_v53 = vpop.f32.mrb[182].mxu0 }
 0x941   :  { %v10425_v36 = vmax.f32 %v12718_v44, 0.0  ;;  %v10421_v25 = vpop.f32.mrb[183].mxu0 }
 0x942   :  { %v10426_v56 = vmax.f32 %v12719_v2, 0.0 }
 0x943   :  { %v10427_v52 = vpack.c.bf16 %v10425_v36, %v10425_v36 }
 0x944   :  { %v10428_v45 = vpack.c.bf16 %v10426_v56, %v10426_v56 }
 0x946   :  { %11361 = vmatprep.mubr.msk.bf16.mxu1 %vm10536_vm15, %v10428_v45 }
 0x947   :  { %10576 = vmatmul.mubr.bf16.vlgmr.msra.gmra.mrb[204].mxu1 %v10427_v52 }
 0xa1a   :  { %v10577_v13 = vpop.f32.mrb[204].mxu1 }
 0xa1b   :  { %v10578_v22 = vadd.f32 %v11347_v31, %v10577_v13  ;;  %v10579_v1 = vpop.f32.mrb[205].mxu1 }
 0xa1c   :  { %v10580_v41 = vpop.f32.mrb[206].mxu1 }
 0xa1d   :  { %10584 = vst.msk [vmem:[%s18417_s11] sm:$0xff] %vm10583_vm0, %v10578_v22  ;;  %v10581_v3 = vpop.f32.mrb[207].mxu1 }
 0xa1e   :  { %10589 = vsyncpa [#allocation3], 1 }
 0xa1f   :  { %10590 = vsyncpa [#allocation5], 1 }
 0xa20   :  { %10591 = vsyncpa [#allocation8], 1 }
 0xa21   :  { %10592 = vsyncpa [#allocation11], 1 }
 0xa22   :  { %10593 = vsyncpa [#allocation14], 1 }

</bundles_post_ra>
